<compile_context>
chip_gen: v6e
topology: v6e:2x2x1
jax: 0.10.0
libtpu: 0.0.40
codegen_flags: <defaults>
</compile_context>

<pallas_src>
import functools

import numpy as np
import jax
import jax.numpy as jnp
from jax.experimental import pallas as pl
from jax.experimental.pallas import tpu as pltpu


def _round_up(x, m):
    return ((x + m - 1) // m) * m


def _make_tree_triplet_kernel(num_classes, upper_ids, lower_ids, max_triplet,
                              tile_n, margin=0.6):
    upper = list(upper_ids)
    lower = list(lower_ids)
    valid_classes = list(range(1, num_classes))        # anchors; 0 and ignore excluded
    all_ids = sorted(set(valid_classes) | set(upper) | set(lower))
    id_row = {cid: i for i, cid in enumerate(all_ids)}
    K = len(valid_classes)
    n_ids = len(all_ids)
    n_ids_pad = _round_up(max(n_ids, 1), 8)
    T = _round_up(max_triplet, 8)                      # padded triplet-slot count
    R = 2 * K + 2                                      # K anchors, K positives, 2 group unions

    def kernel(labels_ref, feats_ref, loss_ref, count_ref, g_ref, cnt_ref):
        t = pl.program_id(0)
        n_tiles = pl.num_programs(0)

        @pl.when(t == 0)
        def _init():
            g_ref[...] = jnp.zeros_like(g_ref)
            cnt_ref[...] = jnp.zeros_like(cnt_ref)

        labels = labels_ref[...]                       # (1, TILE_N) int32
        feats = feats_ref[...]                         # (TILE_N, C) float32

        # ---- per-class masks: computed once per tile (K compares total) -------------
        masks = {cid: labels == cid for cid in all_ids}          # (1, TILE_N) bool

        rows = [masks[cid].astype(jnp.float32) for cid in all_ids]
        if n_ids_pad > n_ids:
            rows.append(jnp.zeros((n_ids_pad - n_ids, tile_n), jnp.float32))
        m_stack = jnp.concatenate(rows, axis=0)                  # (n_ids_pad, TILE_N)

        # ---- batched inclusive prefix sum along lanes (Hillis-Steele roll ladder) ----
        # f32 accumulation is exact (counts <= TILE_N), cast to int32 for rank math.
        lane = jax.lax.broadcasted_iota(jnp.int32, (n_ids_pad, tile_n), 1)
        scan = m_stack
        shift = 1
        while shift < tile_n:
            rolled = pltpu.roll(scan, shift, axis=1)
            scan = scan + jnp.where(lane >= shift, rolled, 0.0)
            shift *= 2
        local_rank = scan.astype(jnp.int32)                      # (n_ids_pad, TILE_N)

        prev = cnt_ref[...]                                      # (n_ids_pad, 1) int32
        tile_cnt = jnp.sum(m_stack, axis=1, keepdims=True).astype(jnp.int32)
        new_cnt = prev + tile_cnt                                # totals incl. this tile
        cnt_ref[...] = new_cnt

        def rank_of(cid):
            r = id_row[cid]
            return local_rank[r:r + 1, :]                        # (1, TILE_N) int32

        def prev_of(cid):
            r = id_row[cid]
            return prev[r:r + 1, :]                              # (1, 1) int32

        def mask_union(ids):
            if not ids:
                return jnp.zeros_like(labels, dtype=jnp.bool_)
            return functools.reduce(jnp.logical_or, [masks[i] for i in ids])

        def rank_union(ids):
            if not ids:
                return jnp.zeros((1, tile_n), jnp.int32)
            return functools.reduce(lambda a, b: a + b, [rank_of(i) for i in ids])

        def prev_union(ids):
            if not ids:
                return jnp.zeros((1, 1), jnp.int32)
            return functools.reduce(lambda a, b: a + b, [prev_of(i) for i in ids])

        grp = {
            "upper": (mask_union(upper), rank_union(upper), prev_union(upper)),
            "lower": (mask_union(lower), rank_union(lower), prev_union(lower)),
        }

        jidx = jax.lax.broadcasted_iota(jnp.int32, (T, 1), 0)    # triplet-slot index

        def selection(mask, rank, prev_cnt):
            # sel[j, i] = 1 iff mask[i] and this lane is the j-th masked element globally
            grank = prev_cnt + rank - 1                          # (1, TILE_N) 0-based
            sel = jnp.logical_and(grank == jidx, mask)           # (T, TILE_N)
            return sel.astype(jnp.float32)

        pieces = []
        # anchors -> rows [0, K)
        for c in valid_classes:
            pieces.append(selection(masks[c], rank_of(c), prev_of(c)))
        # positives (group union minus anchor class) -> rows [K, 2K)
        for c in valid_classes:
            gname = "upper" if c in upper else "lower"
            gmask, grank, gprev = grp[gname]
            in_grp = (c in upper) or (c in lower)
            pmask = jnp.logical_and(gmask, jnp.logical_not(masks[c]))
            prank = grank - rank_of(c) if in_grp else grank
            pprev = gprev - prev_of(c) if in_grp else gprev
            pieces.append(selection(pmask, prank, pprev))
        # group unions (shared negatives) -> rows 2K (upper) and 2K+1 (lower)
        for gname in ("upper", "lower"):
            gmask, grank, gprev = grp[gname]
            pieces.append(selection(gmask, grank, gprev))

        sel_all = jnp.concatenate(pieces, axis=0)                # (R*T, TILE_N)
        # one tall matmul per tile; one-hot f32 @ f32 with f32 accumulation keeps the
        # gathered rows numerically exact (bf16 inputs would round the features).
        g_ref[...] = g_ref[...] + jnp.dot(sel_all, feats,
                                          preferred_element_type=jnp.float32)

        # ---------------------------- finalize --------------------------------------
        @pl.when(t == n_tiles - 1)
        def _finalize():
            g = g_ref[...]                                       # (R*T, C)

            def cnt_total(ids):
                if not ids:
                    return jnp.zeros((1, 1), jnp.int32)
                return functools.reduce(
                    lambda a, b: a + b,
                    [new_cnt[id_row[i]:id_row[i] + 1, :] for i in ids])

            loss_acc = jnp.zeros((1, 1), jnp.float32)
            cls_acc = jnp.zeros((1, 1), jnp.float32)

            for k, c in enumerate(valid_classes):
                if c in upper:
                    pos_ids = [p for p in upper if p != c]
                    neg_ids = lower
                    neg_row = 2 * K + 1                          # lower union
                else:
                    pos_ids = [p for p in lower if p != c]
                    neg_ids = upper
                    neg_row = 2 * K                              # upper union

                cnt_a = cnt_total([c])
                cnt_p = cnt_total(pos_ids)
                cnt_n = cnt_total(neg_ids)
                min_size = jnp.minimum(jnp.minimum(cnt_a, cnt_p),
                                       jnp.minimum(cnt_n, jnp.int32(max_triplet)))

                g_a = g[k * T:(k + 1) * T, :]
                g_p = g[(K + k) * T:(K + k + 1) * T, :]
                g_n = g[neg_row * T:(neg_row + 1) * T, :]

                # fused: dot_an - dot_ap
                diff = jnp.sum(g_a * (g_n - g_p), axis=1, keepdims=True)   # (T, 1)
                tl = jnp.maximum(diff + jnp.float32(margin), 0.0)
                valid = (jidx < min_size).astype(jnp.float32)              # (T, 1)
                msf = min_size.astype(jnp.float32)
                class_loss = (jnp.sum(tl * valid, axis=0, keepdims=True)
                              / jnp.maximum(msf, 1.0))                     # (1, 1)
                has = (min_size > 0).astype(jnp.float32)

                loss_acc = loss_acc + has * class_loss
                cls_acc = cls_acc + has

            # TODO(synk): PyTorch returns (None, 0) when class_count == 0; we return (0.0, 0).
            loss = jnp.where(cls_acc > 0.0,
                             loss_acc / jnp.maximum(cls_acc, 1.0), 0.0)
            loss_ref[...] = loss
            count_ref[...] = cls_acc.astype(jnp.int32)

    return kernel


class TreeTripletLossPallas:
    """Pallas TPU implementation of TreeTripletLoss.forward."""

    def __init__(self, num_classes, upper_ids, lower_ids, ignore_index=255):
        self.num_classes = num_classes
        self.upper_ids = list(upper_ids)
        self.lower_ids = list(lower_ids)
        self.ignore_label = ignore_index

    def __call__(self, feats, labels, max_triplet=200, tile_n=256):
        # feats: (B, C, H, W) float; labels: (B, Hl, Wl) int
        B, C, H, W = feats.shape
        _, Hl, Wl = labels.shape

        # F.interpolate(mode='nearest') on labels -> (B, H, W)  (glue, plain JAX)
        rows = (jnp.arange(H) * Hl) // H
        cols = (jnp.arange(W) * Wl) // W
        labels_r = labels[:, rows][:, :, cols]

        labels_flat = labels_r.reshape(1, -1).astype(jnp.int32)            # (1, N)
        feats_flat = jnp.transpose(feats, (0, 2, 3, 1)).reshape(-1, C)     # (N, C)
        feats_flat = feats_flat.astype(jnp.float32)

        N = labels_flat.shape[1]
        tile_n = max(128, (int(tile_n) // 128) * 128)
        tile_n = min(tile_n, _round_up(N, 128))
        n_pad = _round_up(N, tile_n)
        if n_pad != N:
            labels_flat = jnp.pad(labels_flat, ((0, 0), (0, n_pad - N)),
                                  constant_values=self.ignore_label)
            feats_flat = jnp.pad(feats_flat, ((0, n_pad - N), (0, 0)))
        n_tiles = n_pad // tile_n

        valid_classes = list(range(1, self.num_classes))
        K = len(valid_classes)
        R = 2 * K + 2
        T = _round_up(max_triplet, 8)
        all_ids = sorted(set(valid_classes) | set(self.upper_ids) | set(self.lower_ids))
        n_ids_pad = _round_up(max(len(all_ids), 1), 8)

        kernel = _make_tree_triplet_kernel(self.num_classes, self.upper_ids,
                                           self.lower_ids, max_triplet, tile_n)

        loss, count = pl.pallas_call(
            kernel,
            out_shape=(jax.ShapeDtypeStruct((1, 1), jnp.float32),
                       jax.ShapeDtypeStruct((1, 1), jnp.int32)),
            grid_spec=pltpu.PrefetchScalarGridSpec(
                num_scalar_prefetch=0,
                grid=(n_tiles,),
                in_specs=[
                    pl.BlockSpec((1, tile_n), lambda t: (0, t)),      # labels tile
                    pl.BlockSpec((tile_n, C), lambda t: (t, 0)),      # feats tile
                ],
                out_specs=(
                    pl.BlockSpec((1, 1), lambda t: (0, 0)),
                    pl.BlockSpec((1, 1), lambda t: (0, 0)),
                ),
                scratch_shapes=[
                    pltpu.VMEM((R * T, C), jnp.float32),              # gathered rows
                    pltpu.VMEM((n_ids_pad, 1), jnp.int32),            # running class counts
                ],
            ),
            compiler_params=pltpu.CompilerParams(
                dimension_semantics=("arbitrary",)),
        )(labels_flat, feats_flat)
        return loss[0, 0], count[0, 0]


def _reference(labels_flat, feats_flat, num_classes, upper_ids, lower_ids,
               max_triplet=200, margin=0.6):
    """Pure numpy port of the PyTorch forward (boolean indexing semantics)."""
    labels = np.asarray(labels_flat)[0]
    feats = np.asarray(feats_flat)
    triplet_loss = 0.0
    class_count = 0
    exist_classes = [int(x) for x in np.unique(labels) if x != 255 and x != 0]
    for ii in exist_classes:
        if ii in upper_ids:
            label_pos = [p for p in upper_ids if p != ii]
            label_neg = list(lower_ids)
        else:
            label_pos = [p for p in lower_ids if p != ii]
            label_neg = list(upper_ids)
        index_anchor = labels == ii
        index_pos = np.zeros_like(index_anchor)
        index_neg = np.zeros_like(index_anchor)
        for pos_l in label_pos:
            index_pos |= labels == pos_l
        for neg_l in label_neg:
            index_neg |= labels == neg_l
        min_size = min(int(index_anchor.sum()), int(index_pos.sum()),
                       int(index_neg.sum()), max_triplet)
        if min_size == 0:
            continue
        fa = feats[index_anchor][:min_size]
        fp = feats[index_pos][:min_size]
        fn = feats[index_neg][:min_size]
        d0 = 1.0 - (fa * fp).sum(1)
        d1 = 1.0 - (fa * fn).sum(1)
        tl = np.maximum(d0 - d1 + margin, 0.0)
        triplet_loss += float(tl.mean())
        class_count += 1
    if class_count == 0:
        return 0.0, 0
    return triplet_loss / class_count, class_count


if __name__ == "__main__":
    key = jax.random.PRNGKey(0)
    B, C, H, W = 2, 16, 16, 16
    Hl, Wl = 32, 32
    num_classes = 6
    upper_ids = [1, 2, 3]
    lower_ids = [4, 5]

    k1, k2, k3 = jax.random.split(key, 3)
    feats = jax.random.normal(k1, (B, C, H, W), jnp.float32)
    feats = feats / (jnp.linalg.norm(feats, axis=1, keepdims=True) + 1e-6)
    labels = jax.random.randint(k2, (B, Hl, Wl), 0, num_classes)
    ignore = jax.random.uniform(k3, (B, Hl, Wl)) < 0.05
    labels = jnp.where(ignore, 255, labels).astype(jnp.int32)

    loss_mod = TreeTripletLossPallas(num_classes, upper_ids, lower_ids)
    # tile_n=128 -> 4 grid steps over N=512, exercising the cross-tile rank/gather carry.
    loss, count = loss_mod(feats, labels, max_triplet=200, tile_n=128)
    jax.block_until_ready((loss, count))

    # independent numpy reference using the same flattening / resizing glue
    rows = (jnp.arange(H) * Hl) // H
    cols = (jnp.arange(W) * Wl) // W
    labels_r = labels[:, rows][:, :, cols]
    labels_flat = labels_r.reshape(1, -1).astype(jnp.int32)
    feats_flat = jnp.transpose(feats, (0, 2, 3, 1)).reshape(-1, C).astype(jnp.float32)
    ref_loss, ref_count = _reference(labels_flat, feats_flat, num_classes,
                                     upper_ids, lower_ids, max_triplet=200)

    assert int(count) == int(ref_count), (int(count), int(ref_count))
    assert abs(float(loss) - float(ref_loss)) < 1e-4, (float(loss), float(ref_loss))
    print("KERNEL_OK")
</pallas_src>

<mosaic_0001>
module attributes {stable_mosaic.version = 11 : i64} {
  func.func @kernel(%arg0: i32, %arg1: memref<1x128xi32, #tpu.memory_space<vmem>>, %arg2: memref<128x16xf32, #tpu.memory_space<vmem>>, %arg3: memref<1x1xf32, #tpu.memory_space<vmem>>, %arg4: memref<1x1xi32, #tpu.memory_space<vmem>>, %arg5: memref<2400x16xf32, #tpu.memory_space<vmem>>, %arg6: memref<8x1xi32, #tpu.memory_space<vmem>>) attributes {dimension_semantics = [#tpu.dimension_semantics<arbitrary>], iteration_bounds = array<i64: 4>, scalar_prefetch = 0 : i64, scratch_operands = 2 : i64, tpu.core_type = #tpu.core_type<tc>, window_params = [{transform_indices = @transform_0, window_bounds = array<i64: 1, 128>}, {transform_indices = @transform_1, window_bounds = array<i64: 128, 16>}, {pipeline_mode = #tpu.pipeline_mode<synchronous>, transform_indices = @transform_2, window_bounds = array<i64: 1, 1>}, {pipeline_mode = #tpu.pipeline_mode<synchronous>, transform_indices = @transform_3, window_bounds = array<i64: 1, 1>}]} {
    %c0_i32 = arith.constant 0 : i32
    %0 = arith.cmpi eq, %arg0, %c0_i32 : i32
    %1 = arith.extui %0 : i1 to i32
    %c0_i32_0 = arith.constant 0 : i32
    %2 = arith.cmpi ne, %1, %c0_i32_0 : i32
    scf.if %2 {
      %cst_50 = arith.constant 0.000000e+00 : f32
      %277 = vector.broadcast %cst_50 : f32 to vector<2400x16xf32>
      %c0_51 = arith.constant 0 : index
      %c0_52 = arith.constant 0 : index
      %278 = vector.load %arg5[%c0_51, %c0_52] : memref<2400x16xf32, #tpu.memory_space<vmem>>, vector<2400x16xf32>
      tpu.vector_store %arg5[%c0_51, %c0_52], %277 {strides = array<i32>} : memref<2400x16xf32, #tpu.memory_space<vmem>>, vector<2400x16xf32>,
      %c0_i32_53 = arith.constant 0 : i32
      %279 = vector.broadcast %c0_i32_53 : i32 to vector<8x1xi32>
      %c0_54 = arith.constant 0 : index
      %c0_55 = arith.constant 0 : index
      %280 = vector.load %arg6[%c0_54, %c0_55] : memref<8x1xi32, #tpu.memory_space<vmem>>, vector<8x1xi32>
      tpu.vector_store %arg6[%c0_54, %c0_55], %279 {strides = array<i32>} : memref<8x1xi32, #tpu.memory_space<vmem>>, vector<8x1xi32>,
    } else {
    }
    %c0 = arith.constant 0 : index
    %c0_1 = arith.constant 0 : index
    %3 = vector.load %arg1[%c0, %c0_1] : memref<1x128xi32, #tpu.memory_space<vmem>>, vector<1x128xi32>
    %c0_2 = arith.constant 0 : index
    %c0_3 = arith.constant 0 : index
    %4 = vector.load %arg2[%c0_2, %c0_3] : memref<128x16xf32, #tpu.memory_space<vmem>>, vector<128x16xf32>
    %c1_i32 = arith.constant 1 : i32
    %5 = vector.broadcast %c1_i32 : i32 to vector<1x128xi32>
    %6 = arith.cmpi eq, %3, %5 : vector<1x128xi32>
    %c2_i32 = arith.constant 2 : i32
    %7 = vector.broadcast %c2_i32 : i32 to vector<1x128xi32>
    %8 = arith.cmpi eq, %3, %7 : vector<1x128xi32>
    %c3_i32 = arith.constant 3 : i32
    %9 = vector.broadcast %c3_i32 : i32 to vector<1x128xi32>
    %10 = arith.cmpi eq, %3, %9 : vector<1x128xi32>
    %c4_i32 = arith.constant 4 : i32
    %11 = vector.broadcast %c4_i32 : i32 to vector<1x128xi32>
    %12 = arith.cmpi eq, %3, %11 : vector<1x128xi32>
    %c5_i32 = arith.constant 5 : i32
    %13 = vector.broadcast %c5_i32 : i32 to vector<1x128xi32>
    %14 = arith.cmpi eq, %3, %13 : vector<1x128xi32>
    %15 = arith.extui %6 : vector<1x128xi1> to vector<1x128xi32>
    %16 = arith.sitofp %15 : vector<1x128xi32> to vector<1x128xf32>
    %17 = arith.extui %8 : vector<1x128xi1> to vector<1x128xi32>
    %18 = arith.sitofp %17 : vector<1x128xi32> to vector<1x128xf32>
    %19 = arith.extui %10 : vector<1x128xi1> to vector<1x128xi32>
    %20 = arith.sitofp %19 : vector<1x128xi32> to vector<1x128xf32>
    %21 = arith.extui %12 : vector<1x128xi1> to vector<1x128xi32>
    %22 = arith.sitofp %21 : vector<1x128xi32> to vector<1x128xf32>
    %23 = arith.extui %14 : vector<1x128xi1> to vector<1x128xi32>
    %24 = arith.sitofp %23 : vector<1x128xi32> to vector<1x128xf32>
    %cst = arith.constant 0.000000e+00 : f32
    %25 = vector.broadcast %cst : f32 to vector<3x128xf32>
    %26 = tpu.concatenate %16, %18, %20, %22, %24, %25 in 0 : vector<1x128xf32>, vector<1x128xf32>, vector<1x128xf32>, vector<1x128xf32>, vector<1x128xf32>, vector<3x128xf32> -> vector<8x128xf32>
    %27 = tpu.iota {dimensions = array<i32: 1>} : vector<8x128xi32>
    %c1_i32_4 = arith.constant 1 : i32
    %28 = tpu.dynamic_rotate %26 by %c1_i32_4 dim 1 : vector<8x128xf32>, i32 -> vector<8x128xf32>
    %c1_i32_5 = arith.constant 1 : i32
    %29 = vector.broadcast %c1_i32_5 : i32 to vector<8x128xi32>
    %30 = arith.cmpi sge, %27, %29 : vector<8x128xi32>
    %cst_6 = arith.constant 0.000000e+00 : f32
    %31 = vector.broadcast %cst_6 : f32 to vector<8x128xf32>
    %32 = arith.select %30, %28, %31 : vector<8x128xi1>, vector<8x128xf32>
    %33 = arith.addf %26, %32 : vector<8x128xf32>
    %c2_i32_7 = arith.constant 2 : i32
    %34 = tpu.dynamic_rotate %33 by %c2_i32_7 dim 1 : vector<8x128xf32>, i32 -> vector<8x128xf32>
    %c2_i32_8 = arith.constant 2 : i32
    %35 = vector.broadcast %c2_i32_8 : i32 to vector<8x128xi32>
    %36 = arith.cmpi sge, %27, %35 : vector<8x128xi32>
    %cst_9 = arith.constant 0.000000e+00 : f32
    %37 = vector.broadcast %cst_9 : f32 to vector<8x128xf32>
    %38 = arith.select %36, %34, %37 : vector<8x128xi1>, vector<8x128xf32>
    %39 = arith.addf %33, %38 : vector<8x128xf32>
    %c4_i32_10 = arith.constant 4 : i32
    %40 = tpu.dynamic_rotate %39 by %c4_i32_10 dim 1 : vector<8x128xf32>, i32 -> vector<8x128xf32>
    %c4_i32_11 = arith.constant 4 : i32
    %41 = vector.broadcast %c4_i32_11 : i32 to vector<8x128xi32>
    %42 = arith.cmpi sge, %27, %41 : vector<8x128xi32>
    %cst_12 = arith.constant 0.000000e+00 : f32
    %43 = vector.broadcast %cst_12 : f32 to vector<8x128xf32>
    %44 = arith.select %42, %40, %43 : vector<8x128xi1>, vector<8x128xf32>
    %45 = arith.addf %39, %44 : vector<8x128xf32>
    %c8_i32 = arith.constant 8 : i32
    %46 = tpu.dynamic_rotate %45 by %c8_i32 dim 1 : vector<8x128xf32>, i32 -> vector<8x128xf32>
    %c8_i32_13 = arith.constant 8 : i32
    %47 = vector.broadcast %c8_i32_13 : i32 to vector<8x128xi32>
    %48 = arith.cmpi sge, %27, %47 : vector<8x128xi32>
    %cst_14 = arith.constant 0.000000e+00 : f32
    %49 = vector.broadcast %cst_14 : f32 to vector<8x128xf32>
    %50 = arith.select %48, %46, %49 : vector<8x128xi1>, vector<8x128xf32>
    %51 = arith.addf %45, %50 : vector<8x128xf32>
    %c16_i32 = arith.constant 16 : i32
    %52 = tpu.dynamic_rotate %51 by %c16_i32 dim 1 : vector<8x128xf32>, i32 -> vector<8x128xf32>
    %c16_i32_15 = arith.constant 16 : i32
    %53 = vector.broadcast %c16_i32_15 : i32 to vector<8x128xi32>
    %54 = arith.cmpi sge, %27, %53 : vector<8x128xi32>
    %cst_16 = arith.constant 0.000000e+00 : f32
    %55 = vector.broadcast %cst_16 : f32 to vector<8x128xf32>
    %56 = arith.select %54, %52, %55 : vector<8x128xi1>, vector<8x128xf32>
    %57 = arith.addf %51, %56 : vector<8x128xf32>
    %c32_i32 = arith.constant 32 : i32
    %58 = tpu.dynamic_rotate %57 by %c32_i32 dim 1 : vector<8x128xf32>, i32 -> vector<8x128xf32>
    %c32_i32_17 = arith.constant 32 : i32
    %59 = vector.broadcast %c32_i32_17 : i32 to vector<8x128xi32>
    %60 = arith.cmpi sge, %27, %59 : vector<8x128xi32>
    %cst_18 = arith.constant 0.000000e+00 : f32
    %61 = vector.broadcast %cst_18 : f32 to vector<8x128xf32>
    %62 = arith.select %60, %58, %61 : vector<8x128xi1>, vector<8x128xf32>
    %63 = arith.addf %57, %62 : vector<8x128xf32>
    %c64_i32 = arith.constant 64 : i32
    %64 = tpu.dynamic_rotate %63 by %c64_i32 dim 1 : vector<8x128xf32>, i32 -> vector<8x128xf32>
    %c64_i32_19 = arith.constant 64 : i32
    %65 = vector.broadcast %c64_i32_19 : i32 to vector<8x128xi32>
    %66 = arith.cmpi sge, %27, %65 : vector<8x128xi32>
    %cst_20 = arith.constant 0.000000e+00 : f32
    %67 = vector.broadcast %cst_20 : f32 to vector<8x128xf32>
    %68 = arith.select %66, %64, %67 : vector<8x128xi1>, vector<8x128xf32>
    %69 = arith.addf %63, %68 : vector<8x128xf32>
    %70 = arith.fptosi %69 : vector<8x128xf32> to vector<8x128xi32>
    %c0_21 = arith.constant 0 : index
    %c0_22 = arith.constant 0 : index
    %71 = vector.load %arg6[%c0_21, %c0_22] : memref<8x1xi32, #tpu.memory_space<vmem>>, vector<8x1xi32>
    %cst_23 = arith.constant dense<0.000000e+00> : vector<8xf32>
    %72 = vector.multi_reduction <add>, %26, %cst_23 [1] : vector<8x128xf32> to vector<8xf32>
    %73 = vector.shape_cast %72 : vector<8xf32> to vector<8x1xf32>
    %74 = arith.fptosi %73 : vector<8x1xf32> to vector<8x1xi32>
    %75 = arith.addi %71, %74 : vector<8x1xi32>
    %c0_24 = arith.constant 0 : index
    %c0_25 = arith.constant 0 : index
    %76 = vector.load %arg6[%c0_24, %c0_25] : memref<8x1xi32, #tpu.memory_space<vmem>>, vector<8x1xi32>
    tpu.vector_store %arg6[%c0_24, %c0_25], %75 {strides = array<i32>} : memref<8x1xi32, #tpu.memory_space<vmem>>, vector<8x1xi32>,
    %77 = arith.ori %6, %8 : vector<1x128xi1>
    %78 = arith.ori %77, %10 : vector<1x128xi1>
    %79 = vector.extract_strided_slice %70 {offsets = [0, 0], sizes = [1, 128], strides = [1, 1]} : vector<8x128xi32> to vector<1x128xi32>
    %80 = vector.extract_strided_slice %70 {offsets = [1, 0], sizes = [1, 128], strides = [1, 1]} : vector<8x128xi32> to vector<1x128xi32>
    %81 = vector.extract_strided_slice %70 {offsets = [2, 0], sizes = [1, 128], strides = [1, 1]} : vector<8x128xi32> to vector<1x128xi32>
    %82 = arith.addi %79, %80 : vector<1x128xi32>
    %83 = arith.addi %82, %81 : vector<1x128xi32>
    %84 = vector.extract_strided_slice %71 {offsets = [0, 0], sizes = [1, 1], strides = [1, 1]} : vector<8x1xi32> to vector<1x1xi32>
    %85 = vector.extract_strided_slice %71 {offsets = [1, 0], sizes = [1, 1], strides = [1, 1]} : vector<8x1xi32> to vector<1x1xi32>
    %86 = vector.extract_strided_slice %71 {offsets = [2, 0], sizes = [1, 1], strides = [1, 1]} : vector<8x1xi32> to vector<1x1xi32>
    %87 = arith.addi %84, %85 : vector<1x1xi32>
    %88 = arith.addi %87, %86 : vector<1x1xi32>
    %89 = arith.ori %12, %14 : vector<1x128xi1>
    %90 = vector.extract_strided_slice %70 {offsets = [3, 0], sizes = [1, 128], strides = [1, 1]} : vector<8x128xi32> to vector<1x128xi32>
    %91 = vector.extract_strided_slice %70 {offsets = [4, 0], sizes = [1, 128], strides = [1, 1]} : vector<8x128xi32> to vector<1x128xi32>
    %92 = arith.addi %90, %91 : vector<1x128xi32>
    %93 = vector.extract_strided_slice %71 {offsets = [3, 0], sizes = [1, 1], strides = [1, 1]} : vector<8x1xi32> to vector<1x1xi32>
    %94 = vector.extract_strided_slice %71 {offsets = [4, 0], sizes = [1, 1], strides = [1, 1]} : vector<8x1xi32> to vector<1x1xi32>
    %95 = arith.addi %93, %94 : vector<1x1xi32>
    %96 = tpu.iota {dimensions = array<i32: 0>} : vector<200x1xi32>
    %97 = vector.extract_strided_slice %70 {offsets = [0, 0], sizes = [1, 128], strides = [1, 1]} : vector<8x128xi32> to vector<1x128xi32>
    %98 = vector.extract_strided_slice %71 {offsets = [0, 0], sizes = [1, 1], strides = [1, 1]} : vector<8x1xi32> to vector<1x1xi32>
    %99 = vector.broadcast %98 : vector<1x1xi32> to vector<1x128xi32>
    %100 = arith.addi %99, %97 : vector<1x128xi32>
    %c1_i32_26 = arith.constant 1 : i32
    %101 = vector.broadcast %c1_i32_26 : i32 to vector<1x128xi32>
    %102 = arith.subi %100, %101 : vector<1x128xi32>
    %103 = vector.broadcast %102 : vector<1x128xi32> to vector<200x128xi32>
    %104 = vector.broadcast %96 : vector<200x1xi32> to vector<200x128xi32>
    %105 = arith.cmpi eq, %103, %104 : vector<200x128xi32>
    %106 = vector.broadcast %6 : vector<1x128xi1> to vector<200x128xi1>
    %107 = arith.andi %105, %106 : vector<200x128xi1>
    %108 = arith.extui %107 : vector<200x128xi1> to vector<200x128xi32>
    %109 = arith.sitofp %108 : vector<200x128xi32> to vector<200x128xf32>
    %110 = vector.extract_strided_slice %70 {offsets = [1, 0], sizes = [1, 128], strides = [1, 1]} : vector<8x128xi32> to vector<1x128xi32>
    %111 = vector.extract_strided_slice %71 {offsets = [1, 0], sizes = [1, 1], strides = [1, 1]} : vector<8x1xi32> to vector<1x1xi32>
    %112 = vector.broadcast %111 : vector<1x1xi32> to vector<1x128xi32>
    %113 = arith.addi %112, %110 : vector<1x128xi32>
    %c1_i32_27 = arith.constant 1 : i32
    %114 = vector.broadcast %c1_i32_27 : i32 to vector<1x128xi32>
    %115 = arith.subi %113, %114 : vector<1x128xi32>
    %116 = vector.broadcast %115 : vector<1x128xi32> to vector<200x128xi32>
    %117 = vector.broadcast %96 : vector<200x1xi32> to vector<200x128xi32>
    %118 = arith.cmpi eq, %116, %117 : vector<200x128xi32>
    %119 = vector.broadcast %8 : vector<1x128xi1> to vector<200x128xi1>
    %120 = arith.andi %118, %119 : vector<200x128xi1>
    %121 = arith.extui %120 : vector<200x128xi1> to vector<200x128xi32>
    %122 = arith.sitofp %121 : vector<200x128xi32> to vector<200x128xf32>
    %123 = vector.extract_strided_slice %70 {offsets = [2, 0], sizes = [1, 128], strides = [1, 1]} : vector<8x128xi32> to vector<1x128xi32>
    %124 = vector.extract_strided_slice %71 {offsets = [2, 0], sizes = [1, 1], strides = [1, 1]} : vector<8x1xi32> to vector<1x1xi32>
    %125 = vector.broadcast %124 : vector<1x1xi32> to vector<1x128xi32>
    %126 = arith.addi %125, %123 : vector<1x128xi32>
    %c1_i32_28 = arith.constant 1 : i32
    %127 = vector.broadcast %c1_i32_28 : i32 to vector<1x128xi32>
    %128 = arith.subi %126, %127 : vector<1x128xi32>
    %129 = vector.broadcast %128 : vector<1x128xi32> to vector<200x128xi32>
    %130 = vector.broadcast %96 : vector<200x1xi32> to vector<200x128xi32>
    %131 = arith.cmpi eq, %129, %130 : vector<200x128xi32>
    %132 = vector.broadcast %10 : vector<1x128xi1> to vector<200x128xi1>
    %133 = arith.andi %131, %132 : vector<200x128xi1>
    %134 = arith.extui %133 : vector<200x128xi1> to vector<200x128xi32>
    %135 = arith.sitofp %134 : vector<200x128xi32> to vector<200x128xf32>
    %136 = vector.extract_strided_slice %70 {offsets = [3, 0], sizes = [1, 128], strides = [1, 1]} : vector<8x128xi32> to vector<1x128xi32>
    %137 = vector.extract_strided_slice %71 {offsets = [3, 0], sizes = [1, 1], strides = [1, 1]} : vector<8x1xi32> to vector<1x1xi32>
    %138 = vector.broadcast %137 : vector<1x1xi32> to vector<1x128xi32>
    %139 = arith.addi %138, %136 : vector<1x128xi32>
    %c1_i32_29 = arith.constant 1 : i32
    %140 = vector.broadcast %c1_i32_29 : i32 to vector<1x128xi32>
    %141 = arith.subi %139, %140 : vector<1x128xi32>
    %142 = vector.broadcast %141 : vector<1x128xi32> to vector<200x128xi32>
    %143 = vector.broadcast %96 : vector<200x1xi32> to vector<200x128xi32>
    %144 = arith.cmpi eq, %142, %143 : vector<200x128xi32>
    %145 = vector.broadcast %12 : vector<1x128xi1> to vector<200x128xi1>
    %146 = arith.andi %144, %145 : vector<200x128xi1>
    %147 = arith.extui %146 : vector<200x128xi1> to vector<200x128xi32>
    %148 = arith.sitofp %147 : vector<200x128xi32> to vector<200x128xf32>
    %149 = vector.extract_strided_slice %70 {offsets = [4, 0], sizes = [1, 128], strides = [1, 1]} : vector<8x128xi32> to vector<1x128xi32>
    %150 = vector.extract_strided_slice %71 {offsets = [4, 0], sizes = [1, 1], strides = [1, 1]} : vector<8x1xi32> to vector<1x1xi32>
    %151 = vector.broadcast %150 : vector<1x1xi32> to vector<1x128xi32>
    %152 = arith.addi %151, %149 : vector<1x128xi32>
    %c1_i32_30 = arith.constant 1 : i32
    %153 = vector.broadcast %c1_i32_30 : i32 to vector<1x128xi32>
    %154 = arith.subi %152, %153 : vector<1x128xi32>
    %155 = vector.broadcast %154 : vector<1x128xi32> to vector<200x128xi32>
    %156 = vector.broadcast %96 : vector<200x1xi32> to vector<200x128xi32>
    %157 = arith.cmpi eq, %155, %156 : vector<200x128xi32>
    %158 = vector.broadcast %14 : vector<1x128xi1> to vector<200x128xi1>
    %159 = arith.andi %157, %158 : vector<200x128xi1>
    %160 = arith.extui %159 : vector<200x128xi1> to vector<200x128xi32>
    %161 = arith.sitofp %160 : vector<200x128xi32> to vector<200x128xf32>
    %cst_31 = arith.constant dense<true> : vector<1x128xi1>
    %162 = arith.xori %6, %cst_31 : vector<1x128xi1>
    %163 = arith.andi %78, %162 : vector<1x128xi1>
    %164 = vector.extract_strided_slice %70 {offsets = [0, 0], sizes = [1, 128], strides = [1, 1]} : vector<8x128xi32> to vector<1x128xi32>
    %165 = arith.subi %83, %164 : vector<1x128xi32>
    %166 = vector.extract_strided_slice %71 {offsets = [0, 0], sizes = [1, 1], strides = [1, 1]} : vector<8x1xi32> to vector<1x1xi32>
    %167 = arith.subi %88, %166 : vector<1x1xi32>
    %168 = vector.broadcast %167 : vector<1x1xi32> to vector<1x128xi32>
    %169 = arith.addi %168, %165 : vector<1x128xi32>
    %c1_i32_32 = arith.constant 1 : i32
    %170 = vector.broadcast %c1_i32_32 : i32 to vector<1x128xi32>
    %171 = arith.subi %169, %170 : vector<1x128xi32>
    %172 = vector.broadcast %171 : vector<1x128xi32> to vector<200x128xi32>
    %173 = vector.broadcast %96 : vector<200x1xi32> to vector<200x128xi32>
    %174 = arith.cmpi eq, %172, %173 : vector<200x128xi32>
    %175 = vector.broadcast %163 : vector<1x128xi1> to vector<200x128xi1>
    %176 = arith.andi %174, %175 : vector<200x128xi1>
    %177 = arith.extui %176 : vector<200x128xi1> to vector<200x128xi32>
    %178 = arith.sitofp %177 : vector<200x128xi32> to vector<200x128xf32>
    %cst_33 = arith.constant dense<true> : vector<1x128xi1>
    %179 = arith.xori %8, %cst_33 : vector<1x128xi1>
    %180 = arith.andi %78, %179 : vector<1x128xi1>
    %181 = vector.extract_strided_slice %70 {offsets = [1, 0], sizes = [1, 128], strides = [1, 1]} : vector<8x128xi32> to vector<1x128xi32>
    %182 = arith.subi %83, %181 : vector<1x128xi32>
    %183 = vector.extract_strided_slice %71 {offsets = [1, 0], sizes = [1, 1], strides = [1, 1]} : vector<8x1xi32> to vector<1x1xi32>
    %184 = arith.subi %88, %183 : vector<1x1xi32>
    %185 = vector.broadcast %184 : vector<1x1xi32> to vector<1x128xi32>
    %186 = arith.addi %185, %182 : vector<1x128xi32>
    %c1_i32_34 = arith.constant 1 : i32
    %187 = vector.broadcast %c1_i32_34 : i32 to vector<1x128xi32>
    %188 = arith.subi %186, %187 : vector<1x128xi32>
    %189 = vector.broadcast %188 : vector<1x128xi32> to vector<200x128xi32>
    %190 = vector.broadcast %96 : vector<200x1xi32> to vector<200x128xi32>
    %191 = arith.cmpi eq, %189, %190 : vector<200x128xi32>
    %192 = vector.broadcast %180 : vector<1x128xi1> to vector<200x128xi1>
    %193 = arith.andi %191, %192 : vector<200x128xi1>
    %194 = arith.extui %193 : vector<200x128xi1> to vector<200x128xi32>
    %195 = arith.sitofp %194 : vector<200x128xi32> to vector<200x128xf32>
    %cst_35 = arith.constant dense<true> : vector<1x128xi1>
    %196 = arith.xori %10, %cst_35 : vector<1x128xi1>
    %197 = arith.andi %78, %196 : vector<1x128xi1>
    %198 = vector.extract_strided_slice %70 {offsets = [2, 0], sizes = [1, 128], strides = [1, 1]} : vector<8x128xi32> to vector<1x128xi32>
    %199 = arith.subi %83, %198 : vector<1x128xi32>
    %200 = vector.extract_strided_slice %71 {offsets = [2, 0], sizes = [1, 1], strides = [1, 1]} : vector<8x1xi32> to vector<1x1xi32>
    %201 = arith.subi %88, %200 : vector<1x1xi32>
    %202 = vector.broadcast %201 : vector<1x1xi32> to vector<1x128xi32>
    %203 = arith.addi %202, %199 : vector<1x128xi32>
    %c1_i32_36 = arith.constant 1 : i32
    %204 = vector.broadcast %c1_i32_36 : i32 to vector<1x128xi32>
    %205 = arith.subi %203, %204 : vector<1x128xi32>
    %206 = vector.broadcast %205 : vector<1x128xi32> to vector<200x128xi32>
    %207 = vector.broadcast %96 : vector<200x1xi32> to vector<200x128xi32>
    %208 = arith.cmpi eq, %206, %207 : vector<200x128xi32>
    %209 = vector.broadcast %197 : vector<1x128xi1> to vector<200x128xi1>
    %210 = arith.andi %208, %209 : vector<200x128xi1>
    %211 = arith.extui %210 : vector<200x128xi1> to vector<200x128xi32>
    %212 = arith.sitofp %211 : vector<200x128xi32> to vector<200x128xf32>
    %cst_37 = arith.constant dense<true> : vector<1x128xi1>
    %213 = arith.xori %12, %cst_37 : vector<1x128xi1>
    %214 = arith.andi %89, %213 : vector<1x128xi1>
    %215 = vector.extract_strided_slice %70 {offsets = [3, 0], sizes = [1, 128], strides = [1, 1]} : vector<8x128xi32> to vector<1x128xi32>
    %216 = arith.subi %92, %215 : vector<1x128xi32>
    %217 = vector.extract_strided_slice %71 {offsets = [3, 0], sizes = [1, 1], strides = [1, 1]} : vector<8x1xi32> to vector<1x1xi32>
    %218 = arith.subi %95, %217 : vector<1x1xi32>
    %219 = vector.broadcast %218 : vector<1x1xi32> to vector<1x128xi32>
    %220 = arith.addi %219, %216 : vector<1x128xi32>
    %c1_i32_38 = arith.constant 1 : i32
    %221 = vector.broadcast %c1_i32_38 : i32 to vector<1x128xi32>
    %222 = arith.subi %220, %221 : vector<1x128xi32>
    %223 = vector.broadcast %222 : vector<1x128xi32> to vector<200x128xi32>
    %224 = vector.broadcast %96 : vector<200x1xi32> to vector<200x128xi32>
    %225 = arith.cmpi eq, %223, %224 : vector<200x128xi32>
    %226 = vector.broadcast %214 : vector<1x128xi1> to vector<200x128xi1>
    %227 = arith.andi %225, %226 : vector<200x128xi1>
    %228 = arith.extui %227 : vector<200x128xi1> to vector<200x128xi32>
    %229 = arith.sitofp %228 : vector<200x128xi32> to vector<200x128xf32>
    %cst_39 = arith.constant dense<true> : vector<1x128xi1>
    %230 = arith.xori %14, %cst_39 : vector<1x128xi1>
    %231 = arith.andi %89, %230 : vector<1x128xi1>
    %232 = vector.extract_strided_slice %70 {offsets = [4, 0], sizes = [1, 128], strides = [1, 1]} : vector<8x128xi32> to vector<1x128xi32>
    %233 = arith.subi %92, %232 : vector<1x128xi32>
    %234 = vector.extract_strided_slice %71 {offsets = [4, 0], sizes = [1, 1], strides = [1, 1]} : vector<8x1xi32> to vector<1x1xi32>
    %235 = arith.subi %95, %234 : vector<1x1xi32>
    %236 = vector.broadcast %235 : vector<1x1xi32> to vector<1x128xi32>
    %237 = arith.addi %236, %233 : vector<1x128xi32>
    %c1_i32_40 = arith.constant 1 : i32
    %238 = vector.broadcast %c1_i32_40 : i32 to vector<1x128xi32>
    %239 = arith.subi %237, %238 : vector<1x128xi32>
    %240 = vector.broadcast %239 : vector<1x128xi32> to vector<200x128xi32>
    %241 = vector.broadcast %96 : vector<200x1xi32> to vector<200x128xi32>
    %242 = arith.cmpi eq, %240, %241 : vector<200x128xi32>
    %243 = vector.broadcast %231 : vector<1x128xi1> to vector<200x128xi1>
    %244 = arith.andi %242, %243 : vector<200x128xi1>
    %245 = arith.extui %244 : vector<200x128xi1> to vector<200x128xi32>
    %246 = arith.sitofp %245 : vector<200x128xi32> to vector<200x128xf32>
    %247 = vector.broadcast %88 : vector<1x1xi32> to vector<1x128xi32>
    %248 = arith.addi %247, %83 : vector<1x128xi32>
    %c1_i32_41 = arith.constant 1 : i32
    %249 = vector.broadcast %c1_i32_41 : i32 to vector<1x128xi32>
    %250 = arith.subi %248, %249 : vector<1x128xi32>
    %251 = vector.broadcast %250 : vector<1x128xi32> to vector<200x128xi32>
    %252 = vector.broadcast %96 : vector<200x1xi32> to vector<200x128xi32>
    %253 = arith.cmpi eq, %251, %252 : vector<200x128xi32>
    %254 = vector.broadcast %78 : vector<1x128xi1> to vector<200x128xi1>
    %255 = arith.andi %253, %254 : vector<200x128xi1>
    %256 = arith.extui %255 : vector<200x128xi1> to vector<200x128xi32>
    %257 = arith.sitofp %256 : vector<200x128xi32> to vector<200x128xf32>
    %258 = vector.broadcast %95 : vector<1x1xi32> to vector<1x128xi32>
    %259 = arith.addi %258, %92 : vector<1x128xi32>
    %c1_i32_42 = arith.constant 1 : i32
    %260 = vector.broadcast %c1_i32_42 : i32 to vector<1x128xi32>
    %261 = arith.subi %259, %260 : vector<1x128xi32>
    %262 = vector.broadcast %261 : vector<1x128xi32> to vector<200x128xi32>
    %263 = vector.broadcast %96 : vector<200x1xi32> to vector<200x128xi32>
    %264 = arith.cmpi eq, %262, %263 : vector<200x128xi32>
    %265 = vector.broadcast %89 : vector<1x128xi1> to vector<200x128xi1>
    %266 = arith.andi %264, %265 : vector<200x128xi1>
    %267 = arith.extui %266 : vector<200x128xi1> to vector<200x128xi32>
    %268 = arith.sitofp %267 : vector<200x128xi32> to vector<200x128xf32>
    %269 = tpu.concatenate %109, %122, %135, %148, %161, %178, %195, %212, %229, %246, %257, %268 in 0 : vector<200x128xf32>, vector<200x128xf32>, vector<200x128xf32>, vector<200x128xf32>, vector<200x128xf32>, vector<200x128xf32>, vector<200x128xf32>, vector<200x128xf32>, vector<200x128xf32>, vector<200x128xf32>, vector<200x128xf32>, vector<200x128xf32> -> vector<2400x128xf32>
    %c0_43 = arith.constant 0 : index
    %c0_44 = arith.constant 0 : index
    %270 = vector.load %arg5[%c0_43, %c0_44] : memref<2400x16xf32, #tpu.memory_space<vmem>>, vector<2400x16xf32>
    %cst_45 = arith.constant dense<0.000000e+00> : vector<2400x16xf32>
    %271 = tpu.matmul %269, %4, %cst_45 {dimension_numbers = #tpu.dot_dimension_numbers<[1], [0], [0], [1], [0, 0, 1, 1], [], []>} : vector<2400x128xf32>, vector<128x16xf32>, vector<2400x16xf32> -> vector<2400x16xf32>
    %272 = arith.addf %270, %271 : vector<2400x16xf32>
    %c0_46 = arith.constant 0 : index
    %c0_47 = arith.constant 0 : index
    %273 = vector.load %arg5[%c0_46, %c0_47] : memref<2400x16xf32, #tpu.memory_space<vmem>>, vector<2400x16xf32>
    tpu.vector_store %arg5[%c0_46, %c0_47], %272 {strides = array<i32>} : memref<2400x16xf32, #tpu.memory_space<vmem>>, vector<2400x16xf32>,
    %c3_i32_48 = arith.constant 3 : i32
    %274 = arith.cmpi eq, %arg0, %c3_i32_48 : i32
    %275 = arith.extui %274 : i1 to i32
    %c0_i32_49 = arith.constant 0 : i32
    %276 = arith.cmpi ne, %275, %c0_i32_49 : i32
    scf.if %276 {
      %c0_50 = arith.constant 0 : index
      %c0_51 = arith.constant 0 : index
      %277 = vector.load %arg5[%c0_50, %c0_51] : memref<2400x16xf32, #tpu.memory_space<vmem>>, vector<2400x16xf32>
      %cst_52 = arith.constant 0.000000e+00 : f32
      %278 = vector.broadcast %cst_52 : f32 to vector<1x1xf32>
      %cst_53 = arith.constant 0.000000e+00 : f32
      %279 = vector.broadcast %cst_53 : f32 to vector<1x1xf32>
      %280 = vector.extract_strided_slice %75 {offsets = [0, 0], sizes = [1, 1], strides = [1, 1]} : vector<8x1xi32> to vector<1x1xi32>
      %281 = vector.extract_strided_slice %75 {offsets = [1, 0], sizes = [1, 1], strides = [1, 1]} : vector<8x1xi32> to vector<1x1xi32>
      %282 = vector.extract_strided_slice %75 {offsets = [2, 0], sizes = [1, 1], strides = [1, 1]} : vector<8x1xi32> to vector<1x1xi32>
      %283 = arith.addi %281, %282 : vector<1x1xi32>
      %284 = vector.extract_strided_slice %75 {offsets = [3, 0], sizes = [1, 1], strides = [1, 1]} : vector<8x1xi32> to vector<1x1xi32>
      %285 = vector.extract_strided_slice %75 {offsets = [4, 0], sizes = [1, 1], strides = [1, 1]} : vector<8x1xi32> to vector<1x1xi32>
      %286 = arith.addi %284, %285 : vector<1x1xi32>
      %287 = arith.minsi %280, %283 : vector<1x1xi32>
      %c200_i32 = arith.constant 200 : i32
      %288 = vector.broadcast %c200_i32 : i32 to vector<1x1xi32>
      %289 = arith.minsi %286, %288 : vector<1x1xi32>
      %290 = arith.minsi %287, %289 : vector<1x1xi32>
      %291 = vector.extract_strided_slice %277 {offsets = [0, 0], sizes = [200, 16], strides = [1, 1]} : vector<2400x16xf32> to vector<200x16xf32>
      %292 = vector.extract_strided_slice %277 {offsets = [1000, 0], sizes = [200, 16], strides = [1, 1]} : vector<2400x16xf32> to vector<200x16xf32>
      %293 = vector.extract_strided_slice %277 {offsets = [2200, 0], sizes = [200, 16], strides = [1, 1]} : vector<2400x16xf32> to vector<200x16xf32>
      %294 = arith.subf %293, %292 : vector<200x16xf32>
      %295 = arith.mulf %291, %294 : vector<200x16xf32>
      %cst_54 = arith.constant dense<0.000000e+00> : vector<200xf32>
      %296 = vector.multi_reduction <add>, %295, %cst_54 [1] : vector<200x16xf32> to vector<200xf32>
      %297 = vector.shape_cast %296 : vector<200xf32> to vector<200x1xf32>
      %cst_55 = arith.constant 6.000000e-01 : f32
      %298 = vector.broadcast %cst_55 : f32 to vector<200x1xf32>
      %299 = arith.addf %297, %298 : vector<200x1xf32>
      %cst_56 = arith.constant 0.000000e+00 : f32
      %300 = vector.broadcast %cst_56 : f32 to vector<200x1xf32>
      %301 = arith.maximumf %299, %300 : vector<200x1xf32>
      %302 = vector.broadcast %290 : vector<1x1xi32> to vector<200x1xi32>
      %303 = arith.cmpi slt, %96, %302 : vector<200x1xi32>
      %304 = arith.extui %303 : vector<200x1xi1> to vector<200x1xi32>
      %305 = arith.sitofp %304 : vector<200x1xi32> to vector<200x1xf32>
      %306 = arith.sitofp %290 : vector<1x1xi32> to vector<1x1xf32>
      %307 = arith.mulf %301, %305 : vector<200x1xf32>
      %cst_57 = arith.constant dense<0.000000e+00> : vector<1xf32>
      %308 = vector.multi_reduction <add>, %307, %cst_57 [0] : vector<200x1xf32> to vector<1xf32>
      %309 = vector.shape_cast %308 : vector<1xf32> to vector<1x1xf32>
      %cst_58 = arith.constant 1.000000e+00 : f32
      %310 = vector.broadcast %cst_58 : f32 to vector<1x1xf32>
      %311 = arith.maximumf %306, %310 : vector<1x1xf32>
      %312 = arith.divf %309, %311 : vector<1x1xf32>
      %c0_i32_59 = arith.constant 0 : i32
      %313 = vector.broadcast %c0_i32_59 : i32 to vector<1x1xi32>
      %314 = arith.cmpi sgt, %290, %313 : vector<1x1xi32>
      %315 = arith.extui %314 : vector<1x1xi1> to vector<1x1xi32>
      %316 = arith.sitofp %315 : vector<1x1xi32> to vector<1x1xf32>
      %317 = arith.mulf %316, %312 : vector<1x1xf32>
      %318 = arith.addf %278, %317 : vector<1x1xf32>
      %319 = arith.addf %279, %316 : vector<1x1xf32>
      %320 = vector.extract_strided_slice %75 {offsets = [1, 0], sizes = [1, 1], strides = [1, 1]} : vector<8x1xi32> to vector<1x1xi32>
      %321 = vector.extract_strided_slice %75 {offsets = [0, 0], sizes = [1, 1], strides = [1, 1]} : vector<8x1xi32> to vector<1x1xi32>
      %322 = vector.extract_strided_slice %75 {offsets = [2, 0], sizes = [1, 1], strides = [1, 1]} : vector<8x1xi32> to vector<1x1xi32>
      %323 = arith.addi %321, %322 : vector<1x1xi32>
      %324 = vector.extract_strided_slice %75 {offsets = [3, 0], sizes = [1, 1], strides = [1, 1]} : vector<8x1xi32> to vector<1x1xi32>
      %325 = vector.extract_strided_slice %75 {offsets = [4, 0], sizes = [1, 1], strides = [1, 1]} : vector<8x1xi32> to vector<1x1xi32>
      %326 = arith.addi %324, %325 : vector<1x1xi32>
      %327 = arith.minsi %320, %323 : vector<1x1xi32>
      %c200_i32_60 = arith.constant 200 : i32
      %328 = vector.broadcast %c200_i32_60 : i32 to vector<1x1xi32>
      %329 = arith.minsi %326, %328 : vector<1x1xi32>
      %330 = arith.minsi %327, %329 : vector<1x1xi32>
      %331 = vector.extract_strided_slice %277 {offsets = [200, 0], sizes = [200, 16], strides = [1, 1]} : vector<2400x16xf32> to vector<200x16xf32>
      %332 = vector.extract_strided_slice %277 {offsets = [1200, 0], sizes = [200, 16], strides = [1, 1]} : vector<2400x16xf32> to vector<200x16xf32>
      %333 = vector.extract_strided_slice %277 {offsets = [2200, 0], sizes = [200, 16], strides = [1, 1]} : vector<2400x16xf32> to vector<200x16xf32>
      %334 = arith.subf %333, %332 : vector<200x16xf32>
      %335 = arith.mulf %331, %334 : vector<200x16xf32>
      %cst_61 = arith.constant dense<0.000000e+00> : vector<200xf32>
      %336 = vector.multi_reduction <add>, %335, %cst_61 [1] : vector<200x16xf32> to vector<200xf32>
      %337 = vector.shape_cast %336 : vector<200xf32> to vector<200x1xf32>
      %cst_62 = arith.constant 6.000000e-01 : f32
      %338 = vector.broadcast %cst_62 : f32 to vector<200x1xf32>
      %339 = arith.addf %337, %338 : vector<200x1xf32>
      %cst_63 = arith.constant 0.000000e+00 : f32
      %340 = vector.broadcast %cst_63 : f32 to vector<200x1xf32>
      %341 = arith.maximumf %339, %340 : vector<200x1xf32>
      %342 = vector.broadcast %330 : vector<1x1xi32> to vector<200x1xi32>
      %343 = arith.cmpi slt, %96, %342 : vector<200x1xi32>
      %344 = arith.extui %343 : vector<200x1xi1> to vector<200x1xi32>
      %345 = arith.sitofp %344 : vector<200x1xi32> to vector<200x1xf32>
      %346 = arith.sitofp %330 : vector<1x1xi32> to vector<1x1xf32>
      %347 = arith.mulf %341, %345 : vector<200x1xf32>
      %cst_64 = arith.constant dense<0.000000e+00> : vector<1xf32>
      %348 = vector.multi_reduction <add>, %347, %cst_64 [0] : vector<200x1xf32> to vector<1xf32>
      %349 = vector.shape_cast %348 : vector<1xf32> to vector<1x1xf32>
      %cst_65 = arith.constant 1.000000e+00 : f32
      %350 = vector.broadcast %cst_65 : f32 to vector<1x1xf32>
      %351 = arith.maximumf %346, %350 : vector<1x1xf32>
      %352 = arith.divf %349, %351 : vector<1x1xf32>
      %c0_i32_66 = arith.constant 0 : i32
      %353 = vector.broadcast %c0_i32_66 : i32 to vector<1x1xi32>
      %354 = arith.cmpi sgt, %330, %353 : vector<1x1xi32>
      %355 = arith.extui %354 : vector<1x1xi1> to vector<1x1xi32>
      %356 = arith.sitofp %355 : vector<1x1xi32> to vector<1x1xf32>
      %357 = arith.mulf %356, %352 : vector<1x1xf32>
      %358 = arith.addf %318, %357 : vector<1x1xf32>
      %359 = arith.addf %319, %356 : vector<1x1xf32>
      %360 = vector.extract_strided_slice %75 {offsets = [2, 0], sizes = [1, 1], strides = [1, 1]} : vector<8x1xi32> to vector<1x1xi32>
      %361 = vector.extract_strided_slice %75 {offsets = [0, 0], sizes = [1, 1], strides = [1, 1]} : vector<8x1xi32> to vector<1x1xi32>
      %362 = vector.extract_strided_slice %75 {offsets = [1, 0], sizes = [1, 1], strides = [1, 1]} : vector<8x1xi32> to vector<1x1xi32>
      %363 = arith.addi %361, %362 : vector<1x1xi32>
      %364 = vector.extract_strided_slice %75 {offsets = [3, 0], sizes = [1, 1], strides = [1, 1]} : vector<8x1xi32> to vector<1x1xi32>
      %365 = vector.extract_strided_slice %75 {offsets = [4, 0], sizes = [1, 1], strides = [1, 1]} : vector<8x1xi32> to vector<1x1xi32>
      %366 = arith.addi %364, %365 : vector<1x1xi32>
      %367 = arith.minsi %360, %363 : vector<1x1xi32>
      %c200_i32_67 = arith.constant 200 : i32
      %368 = vector.broadcast %c200_i32_67 : i32 to vector<1x1xi32>
      %369 = arith.minsi %366, %368 : vector<1x1xi32>
      %370 = arith.minsi %367, %369 : vector<1x1xi32>
      %371 = vector.extract_strided_slice %277 {offsets = [400, 0], sizes = [200, 16], strides = [1, 1]} : vector<2400x16xf32> to vector<200x16xf32>
      %372 = vector.extract_strided_slice %277 {offsets = [1400, 0], sizes = [200, 16], strides = [1, 1]} : vector<2400x16xf32> to vector<200x16xf32>
      %373 = vector.extract_strided_slice %277 {offsets = [2200, 0], sizes = [200, 16], strides = [1, 1]} : vector<2400x16xf32> to vector<200x16xf32>
      %374 = arith.subf %373, %372 : vector<200x16xf32>
      %375 = arith.mulf %371, %374 : vector<200x16xf32>
      %cst_68 = arith.constant dense<0.000000e+00> : vector<200xf32>
      %376 = vector.multi_reduction <add>, %375, %cst_68 [1] : vector<200x16xf32> to vector<200xf32>
      %377 = vector.shape_cast %376 : vector<200xf32> to vector<200x1xf32>
      %cst_69 = arith.constant 6.000000e-01 : f32
      %378 = vector.broadcast %cst_69 : f32 to vector<200x1xf32>
      %379 = arith.addf %377, %378 : vector<200x1xf32>
      %cst_70 = arith.constant 0.000000e+00 : f32
      %380 = vector.broadcast %cst_70 : f32 to vector<200x1xf32>
      %381 = arith.maximumf %379, %380 : vector<200x1xf32>
      %382 = vector.broadcast %370 : vector<1x1xi32> to vector<200x1xi32>
      %383 = arith.cmpi slt, %96, %382 : vector<200x1xi32>
      %384 = arith.extui %383 : vector<200x1xi1> to vector<200x1xi32>
      %385 = arith.sitofp %384 : vector<200x1xi32> to vector<200x1xf32>
      %386 = arith.sitofp %370 : vector<1x1xi32> to vector<1x1xf32>
      %387 = arith.mulf %381, %385 : vector<200x1xf32>
      %cst_71 = arith.constant dense<0.000000e+00> : vector<1xf32>
      %388 = vector.multi_reduction <add>, %387, %cst_71 [0] : vector<200x1xf32> to vector<1xf32>
      %389 = vector.shape_cast %388 : vector<1xf32> to vector<1x1xf32>
      %cst_72 = arith.constant 1.000000e+00 : f32
      %390 = vector.broadcast %cst_72 : f32 to vector<1x1xf32>
      %391 = arith.maximumf %386, %390 : vector<1x1xf32>
      %392 = arith.divf %389, %391 : vector<1x1xf32>
      %c0_i32_73 = arith.constant 0 : i32
      %393 = vector.broadcast %c0_i32_73 : i32 to vector<1x1xi32>
      %394 = arith.cmpi sgt, %370, %393 : vector<1x1xi32>
      %395 = arith.extui %394 : vector<1x1xi1> to vector<1x1xi32>
      %396 = arith.sitofp %395 : vector<1x1xi32> to vector<1x1xf32>
      %397 = arith.mulf %396, %392 : vector<1x1xf32>
      %398 = arith.addf %358, %397 : vector<1x1xf32>
      %399 = arith.addf %359, %396 : vector<1x1xf32>
      %400 = vector.extract_strided_slice %75 {offsets = [3, 0], sizes = [1, 1], strides = [1, 1]} : vector<8x1xi32> to vector<1x1xi32>
      %401 = vector.extract_strided_slice %75 {offsets = [4, 0], sizes = [1, 1], strides = [1, 1]} : vector<8x1xi32> to vector<1x1xi32>
      %402 = vector.extract_strided_slice %75 {offsets = [0, 0], sizes = [1, 1], strides = [1, 1]} : vector<8x1xi32> to vector<1x1xi32>
      %403 = vector.extract_strided_slice %75 {offsets = [1, 0], sizes = [1, 1], strides = [1, 1]} : vector<8x1xi32> to vector<1x1xi32>
      %404 = vector.extract_strided_slice %75 {offsets = [2, 0], sizes = [1, 1], strides = [1, 1]} : vector<8x1xi32> to vector<1x1xi32>
      %405 = arith.addi %402, %403 : vector<1x1xi32>
      %406 = arith.addi %405, %404 : vector<1x1xi32>
      %407 = arith.minsi %400, %401 : vector<1x1xi32>
      %c200_i32_74 = arith.constant 200 : i32
      %408 = vector.broadcast %c200_i32_74 : i32 to vector<1x1xi32>
      %409 = arith.minsi %406, %408 : vector<1x1xi32>
      %410 = arith.minsi %407, %409 : vector<1x1xi32>
      %411 = vector.extract_strided_slice %277 {offsets = [600, 0], sizes = [200, 16], strides = [1, 1]} : vector<2400x16xf32> to vector<200x16xf32>
      %412 = vector.extract_strided_slice %277 {offsets = [1600, 0], sizes = [200, 16], strides = [1, 1]} : vector<2400x16xf32> to vector<200x16xf32>
      %413 = vector.extract_strided_slice %277 {offsets = [2000, 0], sizes = [200, 16], strides = [1, 1]} : vector<2400x16xf32> to vector<200x16xf32>
      %414 = arith.subf %413, %412 : vector<200x16xf32>
      %415 = arith.mulf %411, %414 : vector<200x16xf32>
      %cst_75 = arith.constant dense<0.000000e+00> : vector<200xf32>
      %416 = vector.multi_reduction <add>, %415, %cst_75 [1] : vector<200x16xf32> to vector<200xf32>
      %417 = vector.shape_cast %416 : vector<200xf32> to vector<200x1xf32>
      %cst_76 = arith.constant 6.000000e-01 : f32
      %418 = vector.broadcast %cst_76 : f32 to vector<200x1xf32>
      %419 = arith.addf %417, %418 : vector<200x1xf32>
      %cst_77 = arith.constant 0.000000e+00 : f32
      %420 = vector.broadcast %cst_77 : f32 to vector<200x1xf32>
      %421 = arith.maximumf %419, %420 : vector<200x1xf32>
      %422 = vector.broadcast %410 : vector<1x1xi32> to vector<200x1xi32>
      %423 = arith.cmpi slt, %96, %422 : vector<200x1xi32>
      %424 = arith.extui %423 : vector<200x1xi1> to vector<200x1xi32>
      %425 = arith.sitofp %424 : vector<200x1xi32> to vector<200x1xf32>
      %426 = arith.sitofp %410 : vector<1x1xi32> to vector<1x1xf32>
      %427 = arith.mulf %421, %425 : vector<200x1xf32>
      %cst_78 = arith.constant dense<0.000000e+00> : vector<1xf32>
      %428 = vector.multi_reduction <add>, %427, %cst_78 [0] : vector<200x1xf32> to vector<1xf32>
      %429 = vector.shape_cast %428 : vector<1xf32> to vector<1x1xf32>
      %cst_79 = arith.constant 1.000000e+00 : f32
      %430 = vector.broadcast %cst_79 : f32 to vector<1x1xf32>
      %431 = arith.maximumf %426, %430 : vector<1x1xf32>
      %432 = arith.divf %429, %431 : vector<1x1xf32>
      %c0_i32_80 = arith.constant 0 : i32
      %433 = vector.broadcast %c0_i32_80 : i32 to vector<1x1xi32>
      %434 = arith.cmpi sgt, %410, %433 : vector<1x1xi32>
      %435 = arith.extui %434 : vector<1x1xi1> to vector<1x1xi32>
      %436 = arith.sitofp %435 : vector<1x1xi32> to vector<1x1xf32>
      %437 = arith.mulf %436, %432 : vector<1x1xf32>
      %438 = arith.addf %398, %437 : vector<1x1xf32>
      %439 = arith.addf %399, %436 : vector<1x1xf32>
      %440 = vector.extract_strided_slice %75 {offsets = [4, 0], sizes = [1, 1], strides = [1, 1]} : vector<8x1xi32> to vector<1x1xi32>
      %441 = vector.extract_strided_slice %75 {offsets = [3, 0], sizes = [1, 1], strides = [1, 1]} : vector<8x1xi32> to vector<1x1xi32>
      %442 = vector.extract_strided_slice %75 {offsets = [0, 0], sizes = [1, 1], strides = [1, 1]} : vector<8x1xi32> to vector<1x1xi32>
      %443 = vector.extract_strided_slice %75 {offsets = [1, 0], sizes = [1, 1], strides = [1, 1]} : vector<8x1xi32> to vector<1x1xi32>
      %444 = vector.extract_strided_slice %75 {offsets = [2, 0], sizes = [1, 1], strides = [1, 1]} : vector<8x1xi32> to vector<1x1xi32>
      %445 = arith.addi %442, %443 : vector<1x1xi32>
      %446 = arith.addi %445, %444 : vector<1x1xi32>
      %447 = arith.minsi %440, %441 : vector<1x1xi32>
      %c200_i32_81 = arith.constant 200 : i32
      %448 = vector.broadcast %c200_i32_81 : i32 to vector<1x1xi32>
      %449 = arith.minsi %446, %448 : vector<1x1xi32>
      %450 = arith.minsi %447, %449 : vector<1x1xi32>
      %451 = vector.extract_strided_slice %277 {offsets = [800, 0], sizes = [200, 16], strides = [1, 1]} : vector<2400x16xf32> to vector<200x16xf32>
      %452 = vector.extract_strided_slice %277 {offsets = [1800, 0], sizes = [200, 16], strides = [1, 1]} : vector<2400x16xf32> to vector<200x16xf32>
      %453 = vector.extract_strided_slice %277 {offsets = [2000, 0], sizes = [200, 16], strides = [1, 1]} : vector<2400x16xf32> to vector<200x16xf32>
      %454 = arith.subf %453, %452 : vector<200x16xf32>
      %455 = arith.mulf %451, %454 : vector<200x16xf32>
      %cst_82 = arith.constant dense<0.000000e+00> : vector<200xf32>
      %456 = vector.multi_reduction <add>, %455, %cst_82 [1] : vector<200x16xf32> to vector<200xf32>
      %457 = vector.shape_cast %456 : vector<200xf32> to vector<200x1xf32>
      %cst_83 = arith.constant 6.000000e-01 : f32
      %458 = vector.broadcast %cst_83 : f32 to vector<200x1xf32>
      %459 = arith.addf %457, %458 : vector<200x1xf32>
      %cst_84 = arith.constant 0.000000e+00 : f32
      %460 = vector.broadcast %cst_84 : f32 to vector<200x1xf32>
      %461 = arith.maximumf %459, %460 : vector<200x1xf32>
      %462 = vector.broadcast %450 : vector<1x1xi32> to vector<200x1xi32>
      %463 = arith.cmpi slt, %96, %462 : vector<200x1xi32>
      %464 = arith.extui %463 : vector<200x1xi1> to vector<200x1xi32>
      %465 = arith.sitofp %464 : vector<200x1xi32> to vector<200x1xf32>
      %466 = arith.sitofp %450 : vector<1x1xi32> to vector<1x1xf32>
      %467 = arith.mulf %461, %465 : vector<200x1xf32>
      %cst_85 = arith.constant dense<0.000000e+00> : vector<1xf32>
      %468 = vector.multi_reduction <add>, %467, %cst_85 [0] : vector<200x1xf32> to vector<1xf32>
      %469 = vector.shape_cast %468 : vector<1xf32> to vector<1x1xf32>
      %cst_86 = arith.constant 1.000000e+00 : f32
      %470 = vector.broadcast %cst_86 : f32 to vector<1x1xf32>
      %471 = arith.maximumf %466, %470 : vector<1x1xf32>
      %472 = arith.divf %469, %471 : vector<1x1xf32>
      %c0_i32_87 = arith.constant 0 : i32
      %473 = vector.broadcast %c0_i32_87 : i32 to vector<1x1xi32>
      %474 = arith.cmpi sgt, %450, %473 : vector<1x1xi32>
      %475 = arith.extui %474 : vector<1x1xi1> to vector<1x1xi32>
      %476 = arith.sitofp %475 : vector<1x1xi32> to vector<1x1xf32>
      %477 = arith.mulf %476, %472 : vector<1x1xf32>
      %478 = arith.addf %438, %477 : vector<1x1xf32>
      %479 = arith.addf %439, %476 : vector<1x1xf32>
      %cst_88 = arith.constant 0.000000e+00 : f32
      %480 = vector.broadcast %cst_88 : f32 to vector<1x1xf32>
      %481 = arith.cmpf ogt, %479, %480 : vector<1x1xf32>
      %cst_89 = arith.constant 1.000000e+00 : f32
      %482 = vector.broadcast %cst_89 : f32 to vector<1x1xf32>
      %483 = arith.maximumf %479, %482 : vector<1x1xf32>
      %484 = arith.divf %478, %483 : vector<1x1xf32>
      %cst_90 = arith.constant 0.000000e+00 : f32
      %485 = vector.broadcast %cst_90 : f32 to vector<1x1xf32>
      %486 = arith.select %481, %484, %485 : vector<1x1xi1>, vector<1x1xf32>
      %c0_91 = arith.constant 0 : index
      %c0_92 = arith.constant 0 : index
      %487 = vector.load %arg3[%c0_91, %c0_92] : memref<1x1xf32, #tpu.memory_space<vmem>>, vector<1x1xf32>
      tpu.vector_store %arg3[%c0_91, %c0_92], %486 {strides = array<i32>} : memref<1x1xf32, #tpu.memory_space<vmem>>, vector<1x1xf32>,
      %488 = arith.fptosi %479 : vector<1x1xf32> to vector<1x1xi32>
      %c0_93 = arith.constant 0 : index
      %c0_94 = arith.constant 0 : index
      %489 = vector.load %arg4[%c0_93, %c0_94] : memref<1x1xi32, #tpu.memory_space<vmem>>, vector<1x1xi32>
      tpu.vector_store %arg4[%c0_93, %c0_94], %488 {strides = array<i32>} : memref<1x1xi32, #tpu.memory_space<vmem>>, vector<1x1xi32>,
    } else {
    }
    return
  }
  func.func @transform_0(%arg0: i32) -> (i32, i32) {
    %c0_i32 = arith.constant 0 : i32
    %c0_i32_0 = arith.constant 0 : i32
    return %c0_i32, %arg0 : i32, i32
  }
  func.func @transform_1(%arg0: i32) -> (i32, i32) {
    %c0_i32 = arith.constant 0 : i32
    %c0_i32_0 = arith.constant 0 : i32
    return %arg0, %c0_i32 : i32, i32
  }
  func.func @transform_2(%arg0: i32) -> (i32, i32) {
    %c0_i32 = arith.constant 0 : i32
    %c0_i32_0 = arith.constant 0 : i32
    %c0_i32_1 = arith.constant 0 : i32
    return %c0_i32, %c0_i32_0 : i32, i32
  }
  func.func @transform_3(%arg0: i32) -> (i32, i32) {
    %c0_i32 = arith.constant 0 : i32
    %c0_i32_0 = arith.constant 0 : i32
    %c0_i32_1 = arith.constant 0 : i32
    return %c0_i32, %c0_i32_0 : i32, i32
  }
}

</mosaic_0001>

<bundles_post_ra>
// kernel: tpu_custom_call.1
= control target key start
LH: loop header
LB: loop body
LE: loop exit
PB: predicated region body
PF: predicated region fallthrough
CT: control target
= control target key end

     0   :  { %9 = vsyncpa [#allocation5], 0  ;;  %s13477_s0 = inlined_call_operand.vmem [shape: s32[1,512], index: 0, kind: input, shape index: {}]   ;;  %s13478_s1 = inlined_call_operand.vmem [shape: f32[512,16], index: 1, kind: input, shape index: {}]   ;;  %s13479_s2 = inlined_call_operand.hbm [shape: f32[1,1], index: 2, kind: output, shape index: {0}]   ;;  %s13480_s3 = inlined_call_operand.hbm [shape: s32[1,1], index: 3, kind: output, shape index: {1}]  }
   0x1   :  { %10 = vsyncpa [#allocation7], 0  ;;  %s8190_s12 = smov 0  }
   0x2 LB: > { %s8196_s13 = sadd.s32 4294967295, %s8152_s12   ;;  %p6470_p0 = scmp.ge.s32.totalorder %s8152_s12, 1  ;;  %s8152_s12 = sphi %s8190_s12, %s16_s12  }
   0x3   : > { %p141_p1 = scmp.lt.s32.totalorder %s8152_s12, 5 }
   0x5   : > { %p142_p2 = pnand %p6470_p0, %p141_p1 }
   0x7   : > { %145 = sbr.rel (%p142_p2) target bundleno = 1985 (0x7c1), region = 28 }
   0xc   : > { %p163_p3 = scmp.lt.s32.totalorder %s8196_s13, 3  ;;  %s6471_s14 = sshll.u32 %s8196_s13, 4 }
   0xd   : > { %p167_p4 = scmp.lt.s32.totalorder %s6471_s14, 63  ;;  %p6473_p5 = scmp.ne.s32.totalorder %s8196_s13, 0 }
   0xe   : > { %s8203_s15 = scalar_select %p163_p3, %s8196_s13, 3 }
   0xf   : > { %s14026_s14 = smov (!%p167_p4, %s6471_s14), 63  ;;  %175 = sbr.rel (%p6473_p5) target bundleno = 172 (0xac), region = 32 }
  0x10   : > { %s165_s18 = scalar_lea.vmem %s13477_s0, %s8203_s15  ;;  %s6472_s19 = sshll.u32 %s14026_s14, 3 }
  0x11   : > { %s8212_s22 = scalar_lea.vmem %s13478_s1, %s6472_s19 }
  0x14   : > { %vm176_vm0 = vcmask 130048   ;;  %vm477_vm1 = vcmask 7168   ;;  %v8154_v0 = vmov 0.0   ;;  %v8155_v1 = vmov 0  }
  0x15   : > { %177 = vst.msk [vmem:[#allocation2] sm:$0xff] %vm176_vm0, %v8154_v0  ;;  %178 = vst.msk [vmem:[#allocation2 + $0x8] sm:$0xff] %vm176_vm0, %v8154_v0 }
  0x16   : > { %179 = vst.msk [vmem:[#allocation2 + $0x10] sm:$0xff] %vm176_vm0, %v8154_v0  ;;  %180 = vst.msk [vmem:[#allocation2 + $0x18] sm:$0xff] %vm176_vm0, %v8154_v0 }
  0x17   : > { %181 = vst.msk [vmem:[#allocation2 + $0x20] sm:$0xff] %vm176_vm0, %v8154_v0  ;;  %182 = vst.msk [vmem:[#allocation2 + $0x28] sm:$0xff] %vm176_vm0, %v8154_v0 }
  0x18   : > { %183 = vst.msk [vmem:[#allocation2 + $0x30] sm:$0xff] %vm176_vm0, %v8154_v0  ;;  %184 = vst.msk [vmem:[#allocation2 + $0x38] sm:$0xff] %vm176_vm0, %v8154_v0 }
  0x19   : > { %185 = vst.msk [vmem:[#allocation2 + $0x40] sm:$0xff] %vm176_vm0, %v8154_v0  ;;  %186 = vst.msk [vmem:[#allocation2 + $0x48] sm:$0xff] %vm176_vm0, %v8154_v0 }
  0x1a   : > { %187 = vst.msk [vmem:[#allocation2 + $0x50] sm:$0xff] %vm176_vm0, %v8154_v0  ;;  %188 = vst.msk [vmem:[#allocation2 + $0x58] sm:$0xff] %vm176_vm0, %v8154_v0 }
  0x1b   : > { %189 = vst.msk [vmem:[#allocation2 + $0x60] sm:$0xff] %vm176_vm0, %v8154_v0  ;;  %190 = vst.msk [vmem:[#allocation2 + $0x68] sm:$0xff] %vm176_vm0, %v8154_v0 }
  0x1c   : > { %191 = vst.msk [vmem:[#allocation2 + $0x70] sm:$0xff] %vm176_vm0, %v8154_v0  ;;  %192 = vst.msk [vmem:[#allocation2 + $0x78] sm:$0xff] %vm176_vm0, %v8154_v0 }
  0x1d   : > { %193 = vst.msk [vmem:[#allocation2 + $0x80] sm:$0xff] %vm176_vm0, %v8154_v0  ;;  %194 = vst.msk [vmem:[#allocation2 + $0x88] sm:$0xff] %vm176_vm0, %v8154_v0 }
  0x1e   : > { %195 = vst.msk [vmem:[#allocation2 + $0x90] sm:$0xff] %vm176_vm0, %v8154_v0  ;;  %196 = vst.msk [vmem:[#allocation2 + $0x98] sm:$0xff] %vm176_vm0, %v8154_v0 }
  0x1f   : > { %197 = vst.msk [vmem:[#allocation2 + $0xa0] sm:$0xff] %vm176_vm0, %v8154_v0  ;;  %198 = vst.msk [vmem:[#allocation2 + $0xa8] sm:$0xff] %vm176_vm0, %v8154_v0 }
  0x20   : > { %199 = vst.msk [vmem:[#allocation2 + $0xb0] sm:$0xff] %vm176_vm0, %v8154_v0  ;;  %200 = vst.msk [vmem:[#allocation2 + $0xb8] sm:$0xff] %vm176_vm0, %v8154_v0 }
  0x21   : > { %201 = vst.msk [vmem:[#allocation2 + $0xc0] sm:$0xff] %vm176_vm0, %v8154_v0  ;;  %202 = vst.msk [vmem:[#allocation2 + $0xc8] sm:$0xff] %vm176_vm0, %v8154_v0 }
  0x22   : > { %203 = vst.msk [vmem:[#allocation2 + $0xd0] sm:$0xff] %vm176_vm0, %v8154_v0  ;;  %204 = vst.msk [vmem:[#allocation2 + $0xd8] sm:$0xff] %vm176_vm0, %v8154_v0 }
  0x23   : > { %205 = vst.msk [vmem:[#allocation2 + $0xe0] sm:$0xff] %vm176_vm0, %v8154_v0  ;;  %206 = vst.msk [vmem:[#allocation2 + $0xe8] sm:$0xff] %vm176_vm0, %v8154_v0 }
  0x24   : > { %207 = vst.msk [vmem:[#allocation2 + $0xf0] sm:$0xff] %vm176_vm0, %v8154_v0  ;;  %208 = vst.msk [vmem:[#allocation2 + $0xf8] sm:$0xff] %vm176_vm0, %v8154_v0 }
  0x25   : > { %209 = vst.msk [vmem:[#allocation2 + $0x100] sm:$0xff] %vm176_vm0, %v8154_v0  ;;  %210 = vst.msk [vmem:[#allocation2 + $0x108] sm:$0xff] %vm176_vm0, %v8154_v0 }
  0x26   : > { %211 = vst.msk [vmem:[#allocation2 + $0x110] sm:$0xff] %vm176_vm0, %v8154_v0  ;;  %212 = vst.msk [vmem:[#allocation2 + $0x118] sm:$0xff] %vm176_vm0, %v8154_v0 }
  0x27   : > { %213 = vst.msk [vmem:[#allocation2 + $0x120] sm:$0xff] %vm176_vm0, %v8154_v0  ;;  %214 = vst.msk [vmem:[#allocation2 + $0x128] sm:$0xff] %vm176_vm0, %v8154_v0 }
  0x28   : > { %215 = vst.msk [vmem:[#allocation2 + $0x130] sm:$0xff] %vm176_vm0, %v8154_v0  ;;  %216 = vst.msk [vmem:[#allocation2 + $0x138] sm:$0xff] %vm176_vm0, %v8154_v0 }
  0x29   : > { %217 = vst.msk [vmem:[#allocation2 + $0x140] sm:$0xff] %vm176_vm0, %v8154_v0  ;;  %218 = vst.msk [vmem:[#allocation2 + $0x148] sm:$0xff] %vm176_vm0, %v8154_v0 }
  0x2a   : > { %219 = vst.msk [vmem:[#allocation2 + $0x150] sm:$0xff] %vm176_vm0, %v8154_v0  ;;  %220 = vst.msk [vmem:[#allocation2 + $0x158] sm:$0xff] %vm176_vm0, %v8154_v0 }
  0x2b   : > { %221 = vst.msk [vmem:[#allocation2 + $0x160] sm:$0xff] %vm176_vm0, %v8154_v0  ;;  %222 = vst.msk [vmem:[#allocation2 + $0x168] sm:$0xff] %vm176_vm0, %v8154_v0 }
  0x2c   : > { %223 = vst.msk [vmem:[#allocation2 + $0x170] sm:$0xff] %vm176_vm0, %v8154_v0  ;;  %224 = vst.msk [vmem:[#allocation2 + $0x178] sm:$0xff] %vm176_vm0, %v8154_v0 }
  0x2d   : > { %225 = vst.msk [vmem:[#allocation2 + $0x180] sm:$0xff] %vm176_vm0, %v8154_v0  ;;  %226 = vst.msk [vmem:[#allocation2 + $0x188] sm:$0xff] %vm176_vm0, %v8154_v0 }
  0x2e   : > { %227 = vst.msk [vmem:[#allocation2 + $0x190] sm:$0xff] %vm176_vm0, %v8154_v0  ;;  %228 = vst.msk [vmem:[#allocation2 + $0x198] sm:$0xff] %vm176_vm0, %v8154_v0 }
  0x2f   : > { %229 = vst.msk [vmem:[#allocation2 + $0x1a0] sm:$0xff] %vm176_vm0, %v8154_v0  ;;  %230 = vst.msk [vmem:[#allocation2 + $0x1a8] sm:$0xff] %vm176_vm0, %v8154_v0 }
  0x30   : > { %231 = vst.msk [vmem:[#allocation2 + $0x1b0] sm:$0xff] %vm176_vm0, %v8154_v0  ;;  %232 = vst.msk [vmem:[#allocation2 + $0x1b8] sm:$0xff] %vm176_vm0, %v8154_v0 }
  0x31   : > { %233 = vst.msk [vmem:[#allocation2 + $0x1c0] sm:$0xff] %vm176_vm0, %v8154_v0  ;;  %234 = vst.msk [vmem:[#allocation2 + $0x1c8] sm:$0xff] %vm176_vm0, %v8154_v0 }
  0x32   : > { %235 = vst.msk [vmem:[#allocation2 + $0x1d0] sm:$0xff] %vm176_vm0, %v8154_v0  ;;  %236 = vst.msk [vmem:[#allocation2 + $0x1d8] sm:$0xff] %vm176_vm0, %v8154_v0 }
  0x33   : > { %237 = vst.msk [vmem:[#allocation2 + $0x1e0] sm:$0xff] %vm176_vm0, %v8154_v0  ;;  %238 = vst.msk [vmem:[#allocation2 + $0x1e8] sm:$0xff] %vm176_vm0, %v8154_v0 }
  0x34   : > { %239 = vst.msk [vmem:[#allocation2 + $0x1f0] sm:$0xff] %vm176_vm0, %v8154_v0  ;;  %240 = vst.msk [vmem:[#allocation2 + $0x1f8] sm:$0xff] %vm176_vm0, %v8154_v0 }
  0x35   : > { %241 = vst.msk [vmem:[#allocation2 + $0x200] sm:$0xff] %vm176_vm0, %v8154_v0  ;;  %242 = vst.msk [vmem:[#allocation2 + $0x208] sm:$0xff] %vm176_vm0, %v8154_v0 }
  0x36   : > { %243 = vst.msk [vmem:[#allocation2 + $0x210] sm:$0xff] %vm176_vm0, %v8154_v0  ;;  %244 = vst.msk [vmem:[#allocation2 + $0x218] sm:$0xff] %vm176_vm0, %v8154_v0 }
  0x37   : > { %245 = vst.msk [vmem:[#allocation2 + $0x220] sm:$0xff] %vm176_vm0, %v8154_v0  ;;  %246 = vst.msk [vmem:[#allocation2 + $0x228] sm:$0xff] %vm176_vm0, %v8154_v0 }
  0x38   : > { %247 = vst.msk [vmem:[#allocation2 + $0x230] sm:$0xff] %vm176_vm0, %v8154_v0  ;;  %248 = vst.msk [vmem:[#allocation2 + $0x238] sm:$0xff] %vm176_vm0, %v8154_v0 }
  0x39   : > { %249 = vst.msk [vmem:[#allocation2 + $0x240] sm:$0xff] %vm176_vm0, %v8154_v0  ;;  %250 = vst.msk [vmem:[#allocation2 + $0x248] sm:$0xff] %vm176_vm0, %v8154_v0 }
  0x3a   : > { %251 = vst.msk [vmem:[#allocation2 + $0x250] sm:$0xff] %vm176_vm0, %v8154_v0  ;;  %252 = vst.msk [vmem:[#allocation2 + $0x258] sm:$0xff] %vm176_vm0, %v8154_v0 }
  0x3b   : > { %253 = vst.msk [vmem:[#allocation2 + $0x260] sm:$0xff] %vm176_vm0, %v8154_v0  ;;  %254 = vst.msk [vmem:[#allocation2 + $0x268] sm:$0xff] %vm176_vm0, %v8154_v0 }
  0x3c   : > { %255 = vst.msk [vmem:[#allocation2 + $0x270] sm:$0xff] %vm176_vm0, %v8154_v0  ;;  %256 = vst.msk [vmem:[#allocation2 + $0x278] sm:$0xff] %vm176_vm0, %v8154_v0 }
  0x3d   : > { %257 = vst.msk [vmem:[#allocation2 + $0x280] sm:$0xff] %vm176_vm0, %v8154_v0  ;;  %258 = vst.msk [vmem:[#allocation2 + $0x288] sm:$0xff] %vm176_vm0, %v8154_v0 }
  0x3e   : > { %259 = vst.msk [vmem:[#allocation2 + $0x290] sm:$0xff] %vm176_vm0, %v8154_v0  ;;  %260 = vst.msk [vmem:[#allocation2 + $0x298] sm:$0xff] %vm176_vm0, %v8154_v0 }
  0x3f   : > { %261 = vst.msk [vmem:[#allocation2 + $0x2a0] sm:$0xff] %vm176_vm0, %v8154_v0  ;;  %262 = vst.msk [vmem:[#allocation2 + $0x2a8] sm:$0xff] %vm176_vm0, %v8154_v0 }
  0x40   : > { %263 = vst.msk [vmem:[#allocation2 + $0x2b0] sm:$0xff] %vm176_vm0, %v8154_v0  ;;  %264 = vst.msk [vmem:[#allocation2 + $0x2b8] sm:$0xff] %vm176_vm0, %v8154_v0 }
  0x41   : > { %265 = vst.msk [vmem:[#allocation2 + $0x2c0] sm:$0xff] %vm176_vm0, %v8154_v0  ;;  %266 = vst.msk [vmem:[#allocation2 + $0x2c8] sm:$0xff] %vm176_vm0, %v8154_v0 }
  0x42   : > { %267 = vst.msk [vmem:[#allocation2 + $0x2d0] sm:$0xff] %vm176_vm0, %v8154_v0  ;;  %268 = vst.msk [vmem:[#allocation2 + $0x2d8] sm:$0xff] %vm176_vm0, %v8154_v0 }
  0x43   : > { %269 = vst.msk [vmem:[#allocation2 + $0x2e0] sm:$0xff] %vm176_vm0, %v8154_v0  ;;  %270 = vst.msk [vmem:[#allocation2 + $0x2e8] sm:$0xff] %vm176_vm0, %v8154_v0 }
  0x44   : > { %271 = vst.msk [vmem:[#allocation2 + $0x2f0] sm:$0xff] %vm176_vm0, %v8154_v0  ;;  %272 = vst.msk [vmem:[#allocation2 + $0x2f8] sm:$0xff] %vm176_vm0, %v8154_v0 }
  0x45   : > { %273 = vst.msk [vmem:[#allocation2 + $0x300] sm:$0xff] %vm176_vm0, %v8154_v0  ;;  %274 = vst.msk [vmem:[#allocation2 + $0x308] sm:$0xff] %vm176_vm0, %v8154_v0 }
  0x46   : > { %275 = vst.msk [vmem:[#allocation2 + $0x310] sm:$0xff] %vm176_vm0, %v8154_v0  ;;  %276 = vst.msk [vmem:[#allocation2 + $0x318] sm:$0xff] %vm176_vm0, %v8154_v0 }
  0x47   : > { %277 = vst.msk [vmem:[#allocation2 + $0x320] sm:$0xff] %vm176_vm0, %v8154_v0  ;;  %278 = vst.msk [vmem:[#allocation2 + $0x328] sm:$0xff] %vm176_vm0, %v8154_v0 }
  0x48   : > { %279 = vst.msk [vmem:[#allocation2 + $0x330] sm:$0xff] %vm176_vm0, %v8154_v0  ;;  %280 = vst.msk [vmem:[#allocation2 + $0x338] sm:$0xff] %vm176_vm0, %v8154_v0 }
  0x49   : > { %281 = vst.msk [vmem:[#allocation2 + $0x340] sm:$0xff] %vm176_vm0, %v8154_v0  ;;  %282 = vst.msk [vmem:[#allocation2 + $0x348] sm:$0xff] %vm176_vm0, %v8154_v0 }
  0x4a   : > { %283 = vst.msk [vmem:[#allocation2 + $0x350] sm:$0xff] %vm176_vm0, %v8154_v0  ;;  %284 = vst.msk [vmem:[#allocation2 + $0x358] sm:$0xff] %vm176_vm0, %v8154_v0 }
  0x4b   : > { %285 = vst.msk [vmem:[#allocation2 + $0x360] sm:$0xff] %vm176_vm0, %v8154_v0  ;;  %286 = vst.msk [vmem:[#allocation2 + $0x368] sm:$0xff] %vm176_vm0, %v8154_v0 }
  0x4c   : > { %287 = vst.msk [vmem:[#allocation2 + $0x370] sm:$0xff] %vm176_vm0, %v8154_v0  ;;  %288 = vst.msk [vmem:[#allocation2 + $0x378] sm:$0xff] %vm176_vm0, %v8154_v0 }
  0x4d   : > { %289 = vst.msk [vmem:[#allocation2 + $0x380] sm:$0xff] %vm176_vm0, %v8154_v0  ;;  %290 = vst.msk [vmem:[#allocation2 + $0x388] sm:$0xff] %vm176_vm0, %v8154_v0 }
  0x4e   : > { %291 = vst.msk [vmem:[#allocation2 + $0x390] sm:$0xff] %vm176_vm0, %v8154_v0  ;;  %292 = vst.msk [vmem:[#allocation2 + $0x398] sm:$0xff] %vm176_vm0, %v8154_v0 }
  0x4f   : > { %293 = vst.msk [vmem:[#allocation2 + $0x3a0] sm:$0xff] %vm176_vm0, %v8154_v0  ;;  %294 = vst.msk [vmem:[#allocation2 + $0x3a8] sm:$0xff] %vm176_vm0, %v8154_v0 }
  0x50   : > { %295 = vst.msk [vmem:[#allocation2 + $0x3b0] sm:$0xff] %vm176_vm0, %v8154_v0  ;;  %296 = vst.msk [vmem:[#allocation2 + $0x3b8] sm:$0xff] %vm176_vm0, %v8154_v0 }
  0x51   : > { %297 = vst.msk [vmem:[#allocation2 + $0x3c0] sm:$0xff] %vm176_vm0, %v8154_v0  ;;  %298 = vst.msk [vmem:[#allocation2 + $0x3c8] sm:$0xff] %vm176_vm0, %v8154_v0 }
  0x52   : > { %299 = vst.msk [vmem:[#allocation2 + $0x3d0] sm:$0xff] %vm176_vm0, %v8154_v0  ;;  %300 = vst.msk [vmem:[#allocation2 + $0x3d8] sm:$0xff] %vm176_vm0, %v8154_v0 }
  0x53   : > { %301 = vst.msk [vmem:[#allocation2 + $0x3e0] sm:$0xff] %vm176_vm0, %v8154_v0  ;;  %302 = vst.msk [vmem:[#allocation2 + $0x3e8] sm:$0xff] %vm176_vm0, %v8154_v0 }
  0x54   : > { %303 = vst.msk [vmem:[#allocation2 + $0x3f0] sm:$0xff] %vm176_vm0, %v8154_v0  ;;  %304 = vst.msk [vmem:[#allocation2 + $0x3f8] sm:$0xff] %vm176_vm0, %v8154_v0 }
  0x55   : > { %305 = vst.msk [vmem:[#allocation2 + $0x400] sm:$0xff] %vm176_vm0, %v8154_v0  ;;  %306 = vst.msk [vmem:[#allocation2 + $0x408] sm:$0xff] %vm176_vm0, %v8154_v0 }
  0x56   : > { %307 = vst.msk [vmem:[#allocation2 + $0x410] sm:$0xff] %vm176_vm0, %v8154_v0  ;;  %308 = vst.msk [vmem:[#allocation2 + $0x418] sm:$0xff] %vm176_vm0, %v8154_v0 }
  0x57   : > { %309 = vst.msk [vmem:[#allocation2 + $0x420] sm:$0xff] %vm176_vm0, %v8154_v0  ;;  %310 = vst.msk [vmem:[#allocation2 + $0x428] sm:$0xff] %vm176_vm0, %v8154_v0 }
  0x58   : > { %311 = vst.msk [vmem:[#allocation2 + $0x430] sm:$0xff] %vm176_vm0, %v8154_v0  ;;  %312 = vst.msk [vmem:[#allocation2 + $0x438] sm:$0xff] %vm176_vm0, %v8154_v0 }
  0x59   : > { %313 = vst.msk [vmem:[#allocation2 + $0x440] sm:$0xff] %vm176_vm0, %v8154_v0  ;;  %314 = vst.msk [vmem:[#allocation2 + $0x448] sm:$0xff] %vm176_vm0, %v8154_v0 }
  0x5a   : > { %315 = vst.msk [vmem:[#allocation2 + $0x450] sm:$0xff] %vm176_vm0, %v8154_v0  ;;  %316 = vst.msk [vmem:[#allocation2 + $0x458] sm:$0xff] %vm176_vm0, %v8154_v0 }
  0x5b   : > { %317 = vst.msk [vmem:[#allocation2 + $0x460] sm:$0xff] %vm176_vm0, %v8154_v0  ;;  %318 = vst.msk [vmem:[#allocation2 + $0x468] sm:$0xff] %vm176_vm0, %v8154_v0 }
  0x5c   : > { %319 = vst.msk [vmem:[#allocation2 + $0x470] sm:$0xff] %vm176_vm0, %v8154_v0  ;;  %320 = vst.msk [vmem:[#allocation2 + $0x478] sm:$0xff] %vm176_vm0, %v8154_v0 }
  0x5d   : > { %321 = vst.msk [vmem:[#allocation2 + $0x480] sm:$0xff] %vm176_vm0, %v8154_v0  ;;  %322 = vst.msk [vmem:[#allocation2 + $0x488] sm:$0xff] %vm176_vm0, %v8154_v0 }
  0x5e   : > { %323 = vst.msk [vmem:[#allocation2 + $0x490] sm:$0xff] %vm176_vm0, %v8154_v0  ;;  %324 = vst.msk [vmem:[#allocation2 + $0x498] sm:$0xff] %vm176_vm0, %v8154_v0 }
  0x5f   : > { %325 = vst.msk [vmem:[#allocation2 + $0x4a0] sm:$0xff] %vm176_vm0, %v8154_v0  ;;  %326 = vst.msk [vmem:[#allocation2 + $0x4a8] sm:$0xff] %vm176_vm0, %v8154_v0 }
  0x60   : > { %327 = vst.msk [vmem:[#allocation2 + $0x4b0] sm:$0xff] %vm176_vm0, %v8154_v0  ;;  %328 = vst.msk [vmem:[#allocation2 + $0x4b8] sm:$0xff] %vm176_vm0, %v8154_v0 }
  0x61   : > { %329 = vst.msk [vmem:[#allocation2 + $0x4c0] sm:$0xff] %vm176_vm0, %v8154_v0  ;;  %330 = vst.msk [vmem:[#allocation2 + $0x4c8] sm:$0xff] %vm176_vm0, %v8154_v0 }
  0x62   : > { %331 = vst.msk [vmem:[#allocation2 + $0x4d0] sm:$0xff] %vm176_vm0, %v8154_v0  ;;  %332 = vst.msk [vmem:[#allocation2 + $0x4d8] sm:$0xff] %vm176_vm0, %v8154_v0 }
  0x63   : > { %333 = vst.msk [vmem:[#allocation2 + $0x4e0] sm:$0xff] %vm176_vm0, %v8154_v0  ;;  %334 = vst.msk [vmem:[#allocation2 + $0x4e8] sm:$0xff] %vm176_vm0, %v8154_v0 }
  0x64   : > { %335 = vst.msk [vmem:[#allocation2 + $0x4f0] sm:$0xff] %vm176_vm0, %v8154_v0  ;;  %336 = vst.msk [vmem:[#allocation2 + $0x4f8] sm:$0xff] %vm176_vm0, %v8154_v0 }
  0x65   : > { %337 = vst.msk [vmem:[#allocation2 + $0x500] sm:$0xff] %vm176_vm0, %v8154_v0  ;;  %338 = vst.msk [vmem:[#allocation2 + $0x508] sm:$0xff] %vm176_vm0, %v8154_v0 }
  0x66   : > { %339 = vst.msk [vmem:[#allocation2 + $0x510] sm:$0xff] %vm176_vm0, %v8154_v0  ;;  %340 = vst.msk [vmem:[#allocation2 + $0x518] sm:$0xff] %vm176_vm0, %v8154_v0 }
  0x67   : > { %341 = vst.msk [vmem:[#allocation2 + $0x520] sm:$0xff] %vm176_vm0, %v8154_v0  ;;  %342 = vst.msk [vmem:[#allocation2 + $0x528] sm:$0xff] %vm176_vm0, %v8154_v0 }
  0x68   : > { %343 = vst.msk [vmem:[#allocation2 + $0x530] sm:$0xff] %vm176_vm0, %v8154_v0  ;;  %344 = vst.msk [vmem:[#allocation2 + $0x538] sm:$0xff] %vm176_vm0, %v8154_v0 }
  0x69   : > { %345 = vst.msk [vmem:[#allocation2 + $0x540] sm:$0xff] %vm176_vm0, %v8154_v0  ;;  %346 = vst.msk [vmem:[#allocation2 + $0x548] sm:$0xff] %vm176_vm0, %v8154_v0 }
  0x6a   : > { %347 = vst.msk [vmem:[#allocation2 + $0x550] sm:$0xff] %vm176_vm0, %v8154_v0  ;;  %348 = vst.msk [vmem:[#allocation2 + $0x558] sm:$0xff] %vm176_vm0, %v8154_v0 }
  0x6b   : > { %349 = vst.msk [vmem:[#allocation2 + $0x560] sm:$0xff] %vm176_vm0, %v8154_v0  ;;  %350 = vst.msk [vmem:[#allocation2 + $0x568] sm:$0xff] %vm176_vm0, %v8154_v0 }
  0x6c   : > { %351 = vst.msk [vmem:[#allocation2 + $0x570] sm:$0xff] %vm176_vm0, %v8154_v0  ;;  %352 = vst.msk [vmem:[#allocation2 + $0x578] sm:$0xff] %vm176_vm0, %v8154_v0 }
  0x6d   : > { %353 = vst.msk [vmem:[#allocation2 + $0x580] sm:$0xff] %vm176_vm0, %v8154_v0  ;;  %354 = vst.msk [vmem:[#allocation2 + $0x588] sm:$0xff] %vm176_vm0, %v8154_v0 }
  0x6e   : > { %355 = vst.msk [vmem:[#allocation2 + $0x590] sm:$0xff] %vm176_vm0, %v8154_v0  ;;  %356 = vst.msk [vmem:[#allocation2 + $0x598] sm:$0xff] %vm176_vm0, %v8154_v0 }
  0x6f   : > { %357 = vst.msk [vmem:[#allocation2 + $0x5a0] sm:$0xff] %vm176_vm0, %v8154_v0  ;;  %358 = vst.msk [vmem:[#allocation2 + $0x5a8] sm:$0xff] %vm176_vm0, %v8154_v0 }
  0x70   : > { %359 = vst.msk [vmem:[#allocation2 + $0x5b0] sm:$0xff] %vm176_vm0, %v8154_v0  ;;  %360 = vst.msk [vmem:[#allocation2 + $0x5b8] sm:$0xff] %vm176_vm0, %v8154_v0 }
  0x71   : > { %361 = vst.msk [vmem:[#allocation2 + $0x5c0] sm:$0xff] %vm176_vm0, %v8154_v0  ;;  %362 = vst.msk [vmem:[#allocation2 + $0x5c8] sm:$0xff] %vm176_vm0, %v8154_v0 }
  0x72   : > { %363 = vst.msk [vmem:[#allocation2 + $0x5d0] sm:$0xff] %vm176_vm0, %v8154_v0  ;;  %364 = vst.msk [vmem:[#allocation2 + $0x5d8] sm:$0xff] %vm176_vm0, %v8154_v0 }
  0x73   : > { %365 = vst.msk [vmem:[#allocation2 + $0x5e0] sm:$0xff] %vm176_vm0, %v8154_v0  ;;  %366 = vst.msk [vmem:[#allocation2 + $0x5e8] sm:$0xff] %vm176_vm0, %v8154_v0 }
  0x74   : > { %367 = vst.msk [vmem:[#allocation2 + $0x5f0] sm:$0xff] %vm176_vm0, %v8154_v0  ;;  %368 = vst.msk [vmem:[#allocation2 + $0x5f8] sm:$0xff] %vm176_vm0, %v8154_v0 }
  0x75   : > { %369 = vst.msk [vmem:[#allocation2 + $0x600] sm:$0xff] %vm176_vm0, %v8154_v0  ;;  %370 = vst.msk [vmem:[#allocation2 + $0x608] sm:$0xff] %vm176_vm0, %v8154_v0 }
  0x76   : > { %371 = vst.msk [vmem:[#allocation2 + $0x610] sm:$0xff] %vm176_vm0, %v8154_v0  ;;  %372 = vst.msk [vmem:[#allocation2 + $0x618] sm:$0xff] %vm176_vm0, %v8154_v0 }
  0x77   : > { %373 = vst.msk [vmem:[#allocation2 + $0x620] sm:$0xff] %vm176_vm0, %v8154_v0  ;;  %374 = vst.msk [vmem:[#allocation2 + $0x628] sm:$0xff] %vm176_vm0, %v8154_v0 }
  0x78   : > { %375 = vst.msk [vmem:[#allocation2 + $0x630] sm:$0xff] %vm176_vm0, %v8154_v0  ;;  %376 = vst.msk [vmem:[#allocation2 + $0x638] sm:$0xff] %vm176_vm0, %v8154_v0 }
  0x79   : > { %377 = vst.msk [vmem:[#allocation2 + $0x640] sm:$0xff] %vm176_vm0, %v8154_v0  ;;  %378 = vst.msk [vmem:[#allocation2 + $0x648] sm:$0xff] %vm176_vm0, %v8154_v0 }
  0x7a   : > { %379 = vst.msk [vmem:[#allocation2 + $0x650] sm:$0xff] %vm176_vm0, %v8154_v0  ;;  %380 = vst.msk [vmem:[#allocation2 + $0x658] sm:$0xff] %vm176_vm0, %v8154_v0 }
  0x7b   : > { %381 = vst.msk [vmem:[#allocation2 + $0x660] sm:$0xff] %vm176_vm0, %v8154_v0  ;;  %382 = vst.msk [vmem:[#allocation2 + $0x668] sm:$0xff] %vm176_vm0, %v8154_v0 }
  0x7c   : > { %383 = vst.msk [vmem:[#allocation2 + $0x670] sm:$0xff] %vm176_vm0, %v8154_v0  ;;  %384 = vst.msk [vmem:[#allocation2 + $0x678] sm:$0xff] %vm176_vm0, %v8154_v0 }
  0x7d   : > { %385 = vst.msk [vmem:[#allocation2 + $0x680] sm:$0xff] %vm176_vm0, %v8154_v0  ;;  %386 = vst.msk [vmem:[#allocation2 + $0x688] sm:$0xff] %vm176_vm0, %v8154_v0 }
  0x7e   : > { %387 = vst.msk [vmem:[#allocation2 + $0x690] sm:$0xff] %vm176_vm0, %v8154_v0  ;;  %388 = vst.msk [vmem:[#allocation2 + $0x698] sm:$0xff] %vm176_vm0, %v8154_v0 }
  0x7f   : > { %389 = vst.msk [vmem:[#allocation2 + $0x6a0] sm:$0xff] %vm176_vm0, %v8154_v0  ;;  %390 = vst.msk [vmem:[#allocation2 + $0x6a8] sm:$0xff] %vm176_vm0, %v8154_v0 }
  0x80   : > { %391 = vst.msk [vmem:[#allocation2 + $0x6b0] sm:$0xff] %vm176_vm0, %v8154_v0  ;;  %392 = vst.msk [vmem:[#allocation2 + $0x6b8] sm:$0xff] %vm176_vm0, %v8154_v0 }
  0x81   : > { %393 = vst.msk [vmem:[#allocation2 + $0x6c0] sm:$0xff] %vm176_vm0, %v8154_v0  ;;  %394 = vst.msk [vmem:[#allocation2 + $0x6c8] sm:$0xff] %vm176_vm0, %v8154_v0 }
  0x82   : > { %395 = vst.msk [vmem:[#allocation2 + $0x6d0] sm:$0xff] %vm176_vm0, %v8154_v0  ;;  %396 = vst.msk [vmem:[#allocation2 + $0x6d8] sm:$0xff] %vm176_vm0, %v8154_v0 }
  0x83   : > { %397 = vst.msk [vmem:[#allocation2 + $0x6e0] sm:$0xff] %vm176_vm0, %v8154_v0  ;;  %398 = vst.msk [vmem:[#allocation2 + $0x6e8] sm:$0xff] %vm176_vm0, %v8154_v0 }
  0x84   : > { %399 = vst.msk [vmem:[#allocation2 + $0x6f0] sm:$0xff] %vm176_vm0, %v8154_v0  ;;  %400 = vst.msk [vmem:[#allocation2 + $0x6f8] sm:$0xff] %vm176_vm0, %v8154_v0 }
  0x85   : > { %401 = vst.msk [vmem:[#allocation2 + $0x700] sm:$0xff] %vm176_vm0, %v8154_v0  ;;  %402 = vst.msk [vmem:[#allocation2 + $0x708] sm:$0xff] %vm176_vm0, %v8154_v0 }
  0x86   : > { %403 = vst.msk [vmem:[#allocation2 + $0x710] sm:$0xff] %vm176_vm0, %v8154_v0  ;;  %404 = vst.msk [vmem:[#allocation2 + $0x718] sm:$0xff] %vm176_vm0, %v8154_v0 }
  0x87   : > { %405 = vst.msk [vmem:[#allocation2 + $0x720] sm:$0xff] %vm176_vm0, %v8154_v0  ;;  %406 = vst.msk [vmem:[#allocation2 + $0x728] sm:$0xff] %vm176_vm0, %v8154_v0 }
  0x88   : > { %407 = vst.msk [vmem:[#allocation2 + $0x730] sm:$0xff] %vm176_vm0, %v8154_v0  ;;  %408 = vst.msk [vmem:[#allocation2 + $0x738] sm:$0xff] %vm176_vm0, %v8154_v0 }
  0x89   : > { %409 = vst.msk [vmem:[#allocation2 + $0x740] sm:$0xff] %vm176_vm0, %v8154_v0  ;;  %410 = vst.msk [vmem:[#allocation2 + $0x748] sm:$0xff] %vm176_vm0, %v8154_v0 }
  0x8a   : > { %411 = vst.msk [vmem:[#allocation2 + $0x750] sm:$0xff] %vm176_vm0, %v8154_v0  ;;  %412 = vst.msk [vmem:[#allocation2 + $0x758] sm:$0xff] %vm176_vm0, %v8154_v0 }
  0x8b   : > { %413 = vst.msk [vmem:[#allocation2 + $0x760] sm:$0xff] %vm176_vm0, %v8154_v0  ;;  %414 = vst.msk [vmem:[#allocation2 + $0x768] sm:$0xff] %vm176_vm0, %v8154_v0 }
  0x8c   : > { %415 = vst.msk [vmem:[#allocation2 + $0x770] sm:$0xff] %vm176_vm0, %v8154_v0  ;;  %416 = vst.msk [vmem:[#allocation2 + $0x778] sm:$0xff] %vm176_vm0, %v8154_v0 }
  0x8d   : > { %417 = vst.msk [vmem:[#allocation2 + $0x780] sm:$0xff] %vm176_vm0, %v8154_v0  ;;  %418 = vst.msk [vmem:[#allocation2 + $0x788] sm:$0xff] %vm176_vm0, %v8154_v0 }
  0x8e   : > { %419 = vst.msk [vmem:[#allocation2 + $0x790] sm:$0xff] %vm176_vm0, %v8154_v0  ;;  %420 = vst.msk [vmem:[#allocation2 + $0x798] sm:$0xff] %vm176_vm0, %v8154_v0 }
  0x8f   : > { %421 = vst.msk [vmem:[#allocation2 + $0x7a0] sm:$0xff] %vm176_vm0, %v8154_v0  ;;  %422 = vst.msk [vmem:[#allocation2 + $0x7a8] sm:$0xff] %vm176_vm0, %v8154_v0 }
  0x90   : > { %423 = vst.msk [vmem:[#allocation2 + $0x7b0] sm:$0xff] %vm176_vm0, %v8154_v0  ;;  %424 = vst.msk [vmem:[#allocation2 + $0x7b8] sm:$0xff] %vm176_vm0, %v8154_v0 }
  0x91   : > { %425 = vst.msk [vmem:[#allocation2 + $0x7c0] sm:$0xff] %vm176_vm0, %v8154_v0  ;;  %426 = vst.msk [vmem:[#allocation2 + $0x7c8] sm:$0xff] %vm176_vm0, %v8154_v0 }
  0x92   : > { %427 = vst.msk [vmem:[#allocation2 + $0x7d0] sm:$0xff] %vm176_vm0, %v8154_v0  ;;  %428 = vst.msk [vmem:[#allocation2 + $0x7d8] sm:$0xff] %vm176_vm0, %v8154_v0 }
  0x93   : > { %429 = vst.msk [vmem:[#allocation2 + $0x7e0] sm:$0xff] %vm176_vm0, %v8154_v0  ;;  %430 = vst.msk [vmem:[#allocation2 + $0x7e8] sm:$0xff] %vm176_vm0, %v8154_v0 }
  0x94   : > { %431 = vst.msk [vmem:[#allocation2 + $0x7f0] sm:$0xff] %vm176_vm0, %v8154_v0  ;;  %432 = vst.msk [vmem:[#allocation2 + $0x7f8] sm:$0xff] %vm176_vm0, %v8154_v0 }
  0x95   : > { %433 = vst.msk [vmem:[#allocation2 + $0x800] sm:$0xff] %vm176_vm0, %v8154_v0  ;;  %434 = vst.msk [vmem:[#allocation2 + $0x808] sm:$0xff] %vm176_vm0, %v8154_v0 }
  0x96   : > { %435 = vst.msk [vmem:[#allocation2 + $0x810] sm:$0xff] %vm176_vm0, %v8154_v0  ;;  %436 = vst.msk [vmem:[#allocation2 + $0x818] sm:$0xff] %vm176_vm0, %v8154_v0 }
  0x97   : > { %437 = vst.msk [vmem:[#allocation2 + $0x820] sm:$0xff] %vm176_vm0, %v8154_v0  ;;  %438 = vst.msk [vmem:[#allocation2 + $0x828] sm:$0xff] %vm176_vm0, %v8154_v0 }
  0x98   : > { %439 = vst.msk [vmem:[#allocation2 + $0x830] sm:$0xff] %vm176_vm0, %v8154_v0  ;;  %440 = vst.msk [vmem:[#allocation2 + $0x838] sm:$0xff] %vm176_vm0, %v8154_v0 }
  0x99   : > { %441 = vst.msk [vmem:[#allocation2 + $0x840] sm:$0xff] %vm176_vm0, %v8154_v0  ;;  %442 = vst.msk [vmem:[#allocation2 + $0x848] sm:$0xff] %vm176_vm0, %v8154_v0 }
  0x9a   : > { %443 = vst.msk [vmem:[#allocation2 + $0x850] sm:$0xff] %vm176_vm0, %v8154_v0  ;;  %444 = vst.msk [vmem:[#allocation2 + $0x858] sm:$0xff] %vm176_vm0, %v8154_v0 }
  0x9b   : > { %445 = vst.msk [vmem:[#allocation2 + $0x860] sm:$0xff] %vm176_vm0, %v8154_v0  ;;  %446 = vst.msk [vmem:[#allocation2 + $0x868] sm:$0xff] %vm176_vm0, %v8154_v0 }
  0x9c   : > { %447 = vst.msk [vmem:[#allocation2 + $0x870] sm:$0xff] %vm176_vm0, %v8154_v0  ;;  %448 = vst.msk [vmem:[#allocation2 + $0x878] sm:$0xff] %vm176_vm0, %v8154_v0 }
  0x9d   : > { %449 = vst.msk [vmem:[#allocation2 + $0x880] sm:$0xff] %vm176_vm0, %v8154_v0  ;;  %450 = vst.msk [vmem:[#allocation2 + $0x888] sm:$0xff] %vm176_vm0, %v8154_v0 }
  0x9e   : > { %451 = vst.msk [vmem:[#allocation2 + $0x890] sm:$0xff] %vm176_vm0, %v8154_v0  ;;  %452 = vst.msk [vmem:[#allocation2 + $0x898] sm:$0xff] %vm176_vm0, %v8154_v0 }
  0x9f   : > { %453 = vst.msk [vmem:[#allocation2 + $0x8a0] sm:$0xff] %vm176_vm0, %v8154_v0  ;;  %454 = vst.msk [vmem:[#allocation2 + $0x8a8] sm:$0xff] %vm176_vm0, %v8154_v0 }
  0xa0   : > { %455 = vst.msk [vmem:[#allocation2 + $0x8b0] sm:$0xff] %vm176_vm0, %v8154_v0  ;;  %456 = vst.msk [vmem:[#allocation2 + $0x8b8] sm:$0xff] %vm176_vm0, %v8154_v0 }
  0xa1   : > { %457 = vst.msk [vmem:[#allocation2 + $0x8c0] sm:$0xff] %vm176_vm0, %v8154_v0  ;;  %458 = vst.msk [vmem:[#allocation2 + $0x8c8] sm:$0xff] %vm176_vm0, %v8154_v0 }
  0xa2   : > { %459 = vst.msk [vmem:[#allocation2 + $0x8d0] sm:$0xff] %vm176_vm0, %v8154_v0  ;;  %460 = vst.msk [vmem:[#allocation2 + $0x8d8] sm:$0xff] %vm176_vm0, %v8154_v0 }
  0xa3   : > { %461 = vst.msk [vmem:[#allocation2 + $0x8e0] sm:$0xff] %vm176_vm0, %v8154_v0  ;;  %462 = vst.msk [vmem:[#allocation2 + $0x8e8] sm:$0xff] %vm176_vm0, %v8154_v0 }
  0xa4   : > { %463 = vst.msk [vmem:[#allocation2 + $0x8f0] sm:$0xff] %vm176_vm0, %v8154_v0  ;;  %464 = vst.msk [vmem:[#allocation2 + $0x8f8] sm:$0xff] %vm176_vm0, %v8154_v0 }
  0xa5   : > { %465 = vst.msk [vmem:[#allocation2 + $0x900] sm:$0xff] %vm176_vm0, %v8154_v0  ;;  %466 = vst.msk [vmem:[#allocation2 + $0x908] sm:$0xff] %vm176_vm0, %v8154_v0 }
  0xa6   : > { %467 = vst.msk [vmem:[#allocation2 + $0x910] sm:$0xff] %vm176_vm0, %v8154_v0  ;;  %468 = vst.msk [vmem:[#allocation2 + $0x918] sm:$0xff] %vm176_vm0, %v8154_v0 }
  0xa7   : > { %469 = vst.msk [vmem:[#allocation2 + $0x920] sm:$0xff] %vm176_vm0, %v8154_v0  ;;  %470 = vst.msk [vmem:[#allocation2 + $0x928] sm:$0xff] %vm176_vm0, %v8154_v0 }
  0xa8   : > { %471 = vst.msk [vmem:[#allocation2 + $0x930] sm:$0xff] %vm176_vm0, %v8154_v0  ;;  %472 = vst.msk [vmem:[#allocation2 + $0x938] sm:$0xff] %vm176_vm0, %v8154_v0 }
  0xa9   : > { %473 = vst.msk [vmem:[#allocation2 + $0x940] sm:$0xff] %vm176_vm0, %v8154_v0  ;;  %474 = vst.msk [vmem:[#allocation2 + $0x948] sm:$0xff] %vm176_vm0, %v8154_v0 }
  0xaa   : > { %475 = vst.msk [vmem:[#allocation2 + $0x950] sm:$0xff] %vm176_vm0, %v8154_v0  ;;  %476 = vst.msk [vmem:[#allocation2 + $0x958] sm:$0xff] %vm176_vm0, %v8154_v0 }
  0xab   : > { %478 = vst.msk [vmem:[#allocation3] sm:$0xff] %vm477_vm1, %v8155_v1 }
  0xac PF: > { %v479_v2 = vld [vmem:[%s165_s18] sm:$0x1]  ;;  %v512_v3 = vlaneseq  ;;  %v8156_v4 = vmov 0   ;;  %v8157_v9 = vmov 0.0   ;;  %vm8158_vm10 = vmmov 1   ;;  %s8159_s25 = smov 1  }
  0xad   : > { %vm496_vm2 = vcmp.eq.s32.totalorder %v479_v2, 1  ;;  %vm497_vm3 = vcmp.eq.s32.totalorder %v479_v2, 2  ;;  %8067 = vset.pattern.permute.xlu1 %v8156_v4  ;;  %8068 = vset.pattern.permute.xlu0 %v8156_v4  ;;  %vm498_vm4 = vcmp.eq.s32.totalorder %v479_v2, 3  ;;  %vm499_vm5 = vcmp.eq.s32.totalorder %v479_v2, 4  ;;  %s8160_s26 = smov 2   ;;  %s8161_s27 = smov 4  }
  0xae   : > { %vm13481_vm6 = vcmp.eq.s32.totalorder %v479_v2, 5  ;;  %v8822_v5 = vsel %vm497_vm3, 1, %v8156_v4  ;;  %vm590_vm7 = vmor %vm496_vm2, %vm497_vm3  ;;  %v8827_v6 = vsel %vm498_vm4, 1, %v8156_v4  ;;  %v8830_v7 = vsel %vm499_vm5, 1, %v8156_v4  ;;  %s8162_s28 = smov 8   ;;  %s8163_s29 = smov 16  }
  0xaf   : > { %vm8833_vm8 = vmor %vm590_vm7, %vm498_vm4  ;;  %v6475_v10 = vsel %vm497_vm3, 1.0, %v8157_v9  ;;  %v8839_v11 = vsel %vm13481_vm6, 1, %v8156_v4  ;;  %v8841_v12 = vshrl.u32 %v512_v3, 7  ;;  %v6476_v14 = vsel %vm498_vm4, 1.0, %v8157_v9  ;;  %v495_v59 = vld [vmem:[%s8212_s22 + $0x78] sm:$0xff]  ;;  %v494_v60 = vld [vmem:[%s8212_s22 + $0x70] sm:$0xff] }
  0xb0   : > { %vm8845_vm9 = vmor %vm499_vm5, %vm13481_vm6  ;;  %v6477_v15 = vsel %vm499_vm5, 1.0, %v8157_v9  ;;  %v6478_v16 = vsel %vm13481_vm6, 1.0, %v8157_v9  ;;  %v8863_v19 = vsel %vm8833_vm8, 1, %v8156_v4  ;;  %v8870_v21 = vsel %vm496_vm2, 1, %v8156_v4  ;;  %7511 = vmatprep.subr.mxu0 %v495_v59  ;;  %7993 = vmatprep.subr.mxu1 %v495_v59  ;;  %s8164_s30 = smov 32   ;;  %v493_v61 = vld [vmem:[%s8212_s22 + $0x68] sm:$0xff] }
  0xb1   : > { %13615 = vst [vmem:[#allocation10_spill] sm:$0xff] %v8841_v12  ;;  %v8853_v17 = vsub.s32 0, %v8841_v12  ;;  %vm8857_vm11 = vmxor %vm496_vm2, %vm8158_vm10  ;;  %v8867_v20 = vsel %vm8845_vm9, 1, %v8156_v4  ;;  %v6474_v22 = vsel %vm496_vm2, 1.0, %v8157_v9  ;;  %vm535_vm12 = vcmask 1040384   ;;  %7512 = vmatpush3.msra.mxu0 %v495_v59  ;;  %8009 = vmatpush3.msra.mxu1 %v495_v59  ;;  %v492_v62 = vld [vmem:[%s8212_s22 + $0x60] sm:$0xff] }
  0xb2   : > { %vm1178_vm13 = vmand %vm8833_vm8, %vm8857_vm11  ;;  %vm537_vm14 = vcmask 1041408   ;;  %vm539_vm0 = vcmask 1042432   ;;  %vm541_vm2 = vcmask 1043456   ;;  %vm543_vm11 = vcmask 1044480   ;;  %v8917_v50 = vld [vmem:[#allocation3] sm:$0xff]  ;;  %7513 = vmatprep.subr.mxu0 %v494_v60  ;;  %7994 = vmatprep.subr.mxu1 %v494_v60  ;;  %v491_v63 = vld [vmem:[%s8212_s22 + $0x58] sm:$0xff] }
  0xb3   : > { %v515_v23 = vrot.slane %v6475_v10, %v8853_v17  ;;  %v521_v24 = vrot.slane %v6476_v14, %v8853_v17  ;;  %v527_v25 = vrot.slane %v6477_v15, %v8853_v17  ;;  %vm1296_vm15 = vmxor %vm497_vm3, %vm8158_vm10  ;;  %v533_v26 = vrot.slane %v6478_v16, %v8853_v17  ;;  %7514 = vmatpush3.msra.mxu0 %v494_v60  ;;  %v490_v0 = vld [vmem:[%s8212_s22 + $0x50] sm:$0xff]  ;;  %v489_v1 = vld [vmem:[%s8212_s22 + $0x48] sm:$0xff]  ;;  %s8165_s4 = smov 64   ;;  %p7084_p6 = scmp.ne.s32.totalorder %s8196_s13, 3 }
  0xb4   : > { %vm1297_vm1 = vmand %vm8833_vm8, %vm1296_vm15  ;;  %v8885_v28 = vsel %vm1178_vm13, 1, %v8156_v4  ;;  %vm13620_vm13 = vcmp.eq.s32.totalorder %v479_v2, 5  ;;  %v8910_v37 = vand.u32 127, %v512_v3  ;;  %v596_v51 = vrot.slane %v8917_v50, 1  ;;  %7515 = vmatprep.subr.mxu0 %v493_v61  ;;  %8010 = vmatpush3.msra.mxu1 %v494_v60  ;;  %v488_v2 = vld [vmem:[%s8212_s22 + $0x40] sm:$0xff]  ;;  %v487_v3 = vld [vmem:[%s8212_s22 + $0x38] sm:$0xff] }
  0xb5   : > { %v536_v27 = vsel %vm535_vm12, %v6474_v22, %v515_v23  ;;  %v8887_v29 = vsel %vm1297_vm1, 1, %v8156_v4  ;;  %vm1415_vm7 = vmxor %vm498_vm4, %vm8158_vm10  ;;  %v598_v53 = vrot.slane %v8917_v50, 2  ;;  %7516 = vmatpush3.msra.mxu0 %v493_v61  ;;  %7995 = vmatprep.subr.mxu1 %v493_v61  ;;  %v485_v8 = vld [vmem:[%s8212_s22 + $0x28] sm:$0xff]  ;;  %v484_v9 = vld [vmem:[%s8212_s22 + $0x20] sm:$0xff] }
  0xb6   : > { %v538_v30 = vsel %vm537_vm14, %v536_v27, %v521_v24  ;;  %vm1416_vm3 = vmand %vm8833_vm8, %vm1415_vm7  ;;  %v597_v52 = vadd.s32 %v596_v51, %v8917_v50  ;;  %vm569_vm14 = vcmp.ge.s32.totalorder %v8910_v37, 16  ;;  %7517 = vmatprep.subr.mxu0 %v492_v62  ;;  %8011 = vmatpush3.msra.mxu1 %v493_v61  ;;  %vm574_vm15 = vcmp.ge.s32.totalorder %v8910_v37, 32  ;;  %v483_v10 = vld [vmem:[%s8212_s22 + $0x18] sm:$0xff]  ;;  %v482_v15 = vld [vmem:[%s8212_s22 + $0x10] sm:$0xff] }
  0xb7   : > { %v540_v31 = vsel %vm539_vm0, %v538_v30, %v527_v25  ;;  %vm1532_vm6 = vmxor %vm499_vm5, %vm8158_vm10  ;;  %v8895_v33 = vsel %vm1416_vm3, 1, %v8156_v4  ;;  %vm549_vm5 = vcmp.ge.s32.totalorder %v8910_v37, 1  ;;  %7518 = vmatpush3.msra.mxu0 %v492_v62  ;;  %7996 = vmatprep.subr.mxu1 %v492_v62  ;;  %v481_v18 = vld [vmem:[%s8212_s22 + $0x8] sm:$0xff]  ;;  %v480_v22 = vld [vmem:[%s8212_s22] sm:$0xff]  ;;  %vm579_vm0 = vcmp.ge.s32.totalorder %v8910_v37, 64 }
  0xb8   : > { %v542_v32 = vsel %vm541_vm2, %v540_v31, %v533_v26  ;;  %vm1533_vm12 = vmand %vm8845_vm9, %vm1532_vm6  ;;  %vm554_vm6 = vcmp.ge.s32.totalorder %v8910_v37, 2  ;;  %v8922_v54 = vadd.s32 %v598_v53, %v597_v52  ;;  %7519 = vmatprep.subr.mxu0 %v491_v63  ;;  %8012 = vmatpush3.msra.mxu1 %v492_v62  ;;  %v1338_v59 = vrot.slane %v8887_v29, %v8853_v17 }
  0xb9   : > { %v8899_v34 = vsel %vm543_vm11, %v542_v32, 0.0  ;;  %vm1615_vm4 = vmxor %vm13620_vm13, %vm8158_vm10  ;;  %v8903_v35 = vsel %vm1533_vm12, 1, %v8156_v4  ;;  %vm564_vm10 = vcmp.ge.s32.totalorder %v8910_v37, 8  ;;  %7520 = vmatpush3.msra.mxu0 %v491_v63  ;;  %7997 = vmatprep.subr.mxu1 %v491_v63  ;;  %v664_v32 = vrot.slane %v8870_v21, %v8853_v17 }
  0xba   : > { %vm1616_vm8 = vmand %vm8845_vm9, %vm1615_vm4  ;;  %547 = vrot.lane.b32.xlu0 %v8899_v34, %s8159_s25  ;;  %vm559_vm9 = vcmp.ge.s32.totalorder %v8910_v37, 4  ;;  %v8925_v55 = vsub.s32 %v8922_v54, %v596_v51  ;;  %7521 = vmatprep.subr.mxu0 %v490_v0  ;;  %v1180_v23 = vsub.s32 %v8922_v54, %v8917_v50  ;;  %v8966_v37 = vadd.s32 8, %v8841_v12 }
  0xbb   : > { %v8908_v36 = vsel %vm1616_vm8, 1, %v8156_v4  ;;  %7522 = vmatpush3.msra.mxu0 %v490_v0  ;;  %8013 = vmatpush3.msra.mxu1 %v491_v63  ;;  %v486_v4 = vld [vmem:[%s8212_s22 + $0x30] sm:$0xff]  ;;  %vm8971_vm1 = vcmp.eq.s32.totalorder %v664_v32, 1  ;;  %v8995_v51 = vadd.s32 48, %v8841_v12  ;;  %v9287_v32 = vadd.s32 192, %v8841_v12 }
  0xbc   : > { %7523 = vmatprep.subr.mxu0 %v489_v1  ;;  %7998 = vmatprep.subr.mxu1 %v490_v0  ;;  %13621 = vst [vmem:[#allocation11_spill] sm:$0xff] %v8966_v37  ;;  %v991_v62 = vrot.slane %v8830_v7, %v8853_v17 }
  0xbd   : > { %7524 = vmatpush3.msra.mxu0 %v489_v1  ;;  %8014 = vmatpush3.msra.mxu1 %v490_v0  ;;  %13629 = vst [vmem:[#allocation17_spill] sm:$0xff] %v8995_v51  ;;  %13657 = vst [vmem:[#allocation35_spill] sm:$0xff] %v9287_v32 }
  0xbe   : > { %7525 = vmatprep.subr.mxu0 %v488_v2  ;;  %7999 = vmatprep.subr.mxu1 %v489_v1 }
  0xbf   : > { %7526 = vmatpush3.msra.mxu0 %v488_v2  ;;  %8015 = vmatpush3.msra.mxu1 %v489_v1  ;;  %v1621_v1 = vrot.slane %v8908_v36, %v8853_v17  ;;  %v13680_v36 = vmov 0 }
  0xc0   : > { %8000 = vmatprep.subr.mxu1 %v488_v2  ;;  %7527 = vmatprep.subr.mxu0 %v487_v3 }
  0xc1   : > { %8016 = vmatpush3.msra.mxu1 %v488_v2  ;;  %7528 = vmatpush3.msra.mxu0 %v487_v3 }
  0xc2   : > { %8001 = vmatprep.subr.mxu1 %v487_v3  ;;  %7529 = vmatprep.subr.mxu0 %v486_v4 }
  0xc3   : > { %8017 = vmatpush3.msra.mxu1 %v487_v3  ;;  %7530 = vmatpush3.msra.mxu0 %v486_v4  ;;  %v9076_v3 = vadd.s32 72, %v8841_v12 }
  0xc4   : > { %8002 = vmatprep.subr.mxu1 %v486_v4  ;;  %7531 = vmatprep.subr.mxu0 %v485_v8 }
  0xc5   : > { %8018 = vmatpush3.msra.mxu1 %v486_v4  ;;  %7532 = vmatpush3.msra.mxu0 %v485_v8  ;;  %13640 = vst [vmem:[#allocation20_spill] sm:$0xff] %v9076_v3  ;;  %v1924_v4 = vld [vmem:[#allocation2 + $0x8] sm:$0xff] }
  0xc6   : > { %8003 = vmatprep.subr.mxu1 %v485_v8  ;;  %7533 = vmatprep.subr.mxu0 %v484_v9 }
  0xc7   : > { %8019 = vmatpush3.msra.mxu1 %v485_v8  ;;  %7534 = vmatpush3.msra.mxu0 %v484_v9  ;;  %v9095_v8 = vadd.s32 80, %v8841_v12 }
  0xc8   : > { %8004 = vmatprep.subr.mxu1 %v484_v9  ;;  %7535 = vmatprep.subr.mxu0 %v483_v10 }
  0xc9   : > { %8020 = vmatpush3.msra.mxu1 %v484_v9  ;;  %7536 = vmatpush3.msra.mxu0 %v483_v10  ;;  %13643 = vst [vmem:[#allocation21_spill] sm:$0xff] %v9095_v8  ;;  %v9114_v9 = vadd.s32 88, %v8841_v12 }
  0xca   : > { %8005 = vmatprep.subr.mxu1 %v483_v10  ;;  %7537 = vmatprep.subr.mxu0 %v482_v15 }
  0xcb   : > { %8021 = vmatpush3.msra.mxu1 %v483_v10  ;;  %7538 = vmatpush3.msra.mxu0 %v482_v15  ;;  %13644 = vst [vmem:[#allocation22_spill] sm:$0xff] %v9114_v9  ;;  %v9126_v10 = vadd.s32 96, %v8841_v12 }
  0xcc   : > { %8006 = vmatprep.subr.mxu1 %v482_v15  ;;  %7539 = vmatprep.subr.mxu0 %v481_v18 }
  0xcd   : > { %8022 = vmatpush3.msra.mxu1 %v482_v15  ;;  %7540 = vmatpush3.msra.mxu0 %v481_v18  ;;  %13645 = vst [vmem:[#allocation23_spill] sm:$0xff] %v9126_v10  ;;  %v9170_v15 = vadd.s32 120, %v8841_v12 }
  0xce   : > { %8007 = vmatprep.subr.mxu1 %v481_v18  ;;  %7541 = vmatprep.subr.mxu0 %v480_v22 }
  0xcf   : > { %8023 = vmatpush3.msra.mxu1 %v481_v18  ;;  %7542 = vmatpush3.msra.mxu0 %v480_v22  ;;  %13648 = vst [vmem:[#allocation26_spill] sm:$0xff] %v9170_v15  ;;  %v9196_v18 = vadd.s32 136, %v8841_v12 }
  0xd0   : > { %8008 = vmatprep.subr.mxu1 %v480_v22 }
  0xd1   : > { %8024 = vmatpush3.msra.mxu1 %v480_v22  ;;  %13650 = vst [vmem:[#allocation28_spill] sm:$0xff] %v9196_v18  ;;  %v9208_v22 = vadd.s32 144, %v8841_v12 }
  0xd3   : > { %13651 = vst [vmem:[#allocation29_spill] sm:$0xff] %v9208_v22 }
 0x12c   : > { %v548_v38 = vpop.permute.xlu0 %547 }
 0x12d   : > { %v550_v39 = vsel %vm549_vm5, %v548_v38, 0.0 }
 0x12e   : > { %v551_v40 = vadd.f32 %v550_v39, %v8899_v34 }
 0x130   : > { %552 = vrot.lane.b32.xlu0 %v551_v40, %s8160_s26 }
 0x1a2   : > { %v553_v41 = vpop.permute.xlu0 %552 }
 0x1a3   : > { %v555_v42 = vsel %vm554_vm6, %v553_v41, 0.0  ;;  %v8969_v41 = vadd.s32 16, %v8841_v12 }
 0x1a4   : > { %v556_v43 = vadd.f32 %v555_v42, %v551_v40 }
 0x1a5   : > { %13622 = vst [vmem:[#allocation12_spill] sm:$0xff] %v8969_v41 }
 0x1a6   : > { %557 = vrot.lane.b32.xlu1 %v556_v43, %s8161_s27 }
 0x218   : > { %v558_v44 = vpop.permute.xlu1 %557 }
 0x219   : > { %v560_v45 = vsel %vm559_vm9, %v558_v44, 0.0 }
 0x21a   : > { %v561_v46 = vadd.f32 %v560_v45, %v556_v43  ;;  %v8977_v43 = vadd.s32 24, %v8841_v12  ;;  %v8984_v45 = vsub.s32 3, %v8841_v12 }
 0x21c   : > { %562 = vrot.lane.b32.xlu1 %v561_v46, %s8162_s28  ;;  %13625 = vst [vmem:[#allocation13_spill] sm:$0xff] %v8977_v43  ;;  %13626 = vst [vmem:[#allocation14_spill] sm:$0xff] %v8984_v45 }
 0x28e   : > { %v563_v47 = vpop.permute.xlu1 %562 }
 0x28f   : > { %v565_v48 = vsel %vm564_vm10, %v563_v47, 0.0  ;;  %v8987_v47 = vadd.s32 32, %v8841_v12 }
 0x290   : > { %v566_v49 = vadd.f32 %v565_v48, %v561_v46 }
 0x291   : > { %13627 = vst [vmem:[#allocation15_spill] sm:$0xff] %v8987_v47 }
 0x292   : > { %567 = vrot.lane.b32.xlu0 %v566_v49, %s8163_s29 }
 0x304   : > { %v568_v56 = vpop.permute.xlu0 %567 }
 0x305   : > { %v570_v57 = vsel %vm569_vm14, %v568_v56, 0.0 }
 0x306   : > { %v8928_v58 = vadd.f32 %v570_v57, %v566_v49  ;;  %v8166_v57 = vmov 1.0  }
 0x308   : > { %572 = vrot.lane.b32.xlu1 %v8928_v58, %s8164_s30 }
 0x30c   : > { %628 = vperm.xlu1 %8067, %v8917_v50   ;;  %v8992_v50 = vadd.s32 40, %v8841_v12 }
 0x30e   : > { %13628 = vst [vmem:[#allocation16_spill] sm:$0xff] %v8992_v50 }
 0x310   : > { %1418 = vperm.xlu1 %8067, %v597_v52   ;;  %v9004_v52 = vadd.s32 56, %v8841_v12 }
 0x312   : > { %13630 = vst [vmem:[#allocation18_spill] sm:$0xff] %v9004_v52 }
 0x314   : > { %1699 = vperm.xlu1 %8067, %v8922_v54  }
 0x338   : > { %584 = vadd.xlane.f32.xlu1 %v8899_v34 }
 0x37a   : > { %v573_v13 = vpop.permute.xlu1 %572 }
 0x37b   : > { %v575_v14 = vsel %vm574_vm15, %v573_v13, 0.0  ;;  %v9144_v13 = vadd.s32 104, %v8841_v12 }
 0x37c   : > { %v576_v16 = vadd.f32 %v575_v14, %v8928_v58  ;;  %v9021_v58 = vadd.s32 64, %v8841_v12  ;;  %v9156_v14 = vadd.s32 112, %v8841_v12 }
 0x37d   : > { %13646 = vst [vmem:[#allocation24_spill] sm:$0xff] %v9144_v13 }
 0x37e   : > { %577 = vrot.lane.b32.xlu0 %v576_v16, %s8165_s4  ;;  %13631 = vst [vmem:[#allocation19_spill] sm:$0xff] %v9021_v58  ;;  %13647 = vst [vmem:[#allocation25_spill] sm:$0xff] %v9156_v14 }
 0x382   : > { %1301 = vperm.xlu0 %8068, %v8925_v55  }
 0x386   : > { %1182 = vperm.xlu0 %8068, %v1180_v23   ;;  %v9222_v23 = vadd.s32 152, %v8841_v12 }
 0x387   : > { %v629_v31 = vpop.permute.xlu1 %628 }
 0x388   : > { %13652 = vst [vmem:[#allocation30_spill] sm:$0xff] %v9222_v23 }
 0x38b   : > { %v1419_v46 = vpop.permute.xlu1 %1418 }
 0x3f0   : > { %v578_v24 = vpop.permute.xlu0 %577 }
 0x3f1   : > { %v580_v25 = vsel %vm579_vm0, %v578_v24, 0.0  ;;  %v9234_v24 = vadd.s32 160, %v8841_v12 }
 0x3f2   : > { %v581_v26 = vadd.f32 %v580_v25, %v576_v16  ;;  %v9182_v16 = vadd.s32 128, %v8841_v12  ;;  %v9248_v25 = vadd.s32 168, %v8841_v12 }
 0x3f3   : > { %13653 = vst [vmem:[#allocation31_spill] sm:$0xff] %v9234_v24 }
 0x3f4   : > { %v8025_v27 = vtrunc.f32 %v581_v26  ;;  %13649 = vst [vmem:[#allocation27_spill] sm:$0xff] %v9182_v16  ;;  %13654 = vst [vmem:[#allocation32_spill] sm:$0xff] %v9248_v25  ;;  %v9260_v26 = vadd.s32 176, %v8841_v12 }
 0x3f6   : > { %v8956_v30 = vcvt.f32.s32 %v8025_v27  ;;  %13655 = vst [vmem:[#allocation33_spill] sm:$0xff] %v9260_v26  ;;  %v13518_v27 = vsub.s32 1, %v8841_v12 }
 0x3f8   : > { %v630_v34 = vadd.s32 %v8956_v30, %v629_v31  ;;  %v592_v38 = vrot.slane %v8956_v30, 1  ;;  %v594_v21 = vrot.slane %v8956_v30, 2  ;;  %v9275_v31 = vadd.s32 184, %v8841_v12 }
 0x3fa   : > { %v8962_v39 = vadd.s32 4294967295, %v630_v34  ;;  %v593_v40 = vadd.s32 %v8956_v30, %v592_v38  ;;  %13656 = vst [vmem:[#allocation34_spill] sm:$0xff] %v9275_v31  ;;  %v773_v34 = vrot.slane %v8822_v5, %v8853_v17  ;;  %v1923_v5 = vld [vmem:[#allocation2] sm:$0xff] }
 0x3fc   : > { %v8981_v44 = vrot.slane %v8962_v39, %v8853_v17  ;;  %v8989_v48 = vadd.s32 %v594_v21, %v593_v40  ;;  %v1420_v49 = vadd.s32 %v1419_v46, %v593_v40  ;;  %v1455_v40 = vrot.slane %v8895_v33, %v8853_v17 }
 0x3fd   : > { %v1302_v56 = vpop.permute.xlu0 %1301  ;;  %v13517_v21 = vsub.s32 2, %v8841_v12  ;;  %v9918_v63 = vrot.slane %v8962_v39, %v8984_v45 }
 0x3fe   : > { %vm636_vm2 = vcmp.eq.s32.totalorder %v8981_v44, %v8841_v12  ;;  %vm637_vm7 = vcmp.eq.s32.totalorder %v8981_v44, %v8966_v37  ;;  %vm638_vm11 = vcmp.eq.s32.totalorder %v8981_v44, %v8969_v41  ;;  %v9006_v53 = vadd.s32 4294967295, %v1420_v49 }
 0x3ff   : > { %v1298_v54 = vsub.s32 %v8989_v48, %v592_v38  ;;  %vm666_vm3 = vmand %vm636_vm2, %vm8971_vm1  ;;  %v1179_v55 = vsub.s32 %v8989_v48, %v8956_v30  ;;  %vm639_vm12 = vcmp.eq.s32.totalorder %v8981_v44, %v8977_v43  ;;  %vm640_vm4 = vcmp.eq.s32.totalorder %v8981_v44, %v8987_v47 }
 0x400   : > { %7543 = vmatprep.mubr.msk.f32.mxu0 %vm666_vm3, %v8166_v57  ;;  %vm667_vm13 = vmand %vm637_vm7, %vm8971_vm1  ;;  %v9027_v60 = vrot.slane %v9006_v53, %v8984_v45  ;;  %vm641_vm5 = vcmp.eq.s32.totalorder %v8981_v44, %v8992_v50  ;;  %vm642_vm9 = vcmp.eq.s32.totalorder %v8981_v44, %v8995_v51  ;;  %vm643_vm14 = vcmp.eq.s32.totalorder %v8981_v44, %v9004_v52 }
 0x401   : > { %v1303_v61 = vadd.s32 %v1302_v56, %v1298_v54  ;;  %7544 = vmatmul.mubr.msk.f32.vlgmr.msra.gmra.mxu0 %vm667_vm13, %v8166_v57  ;;  %vm668_vm8 = vmand %vm638_vm11, %vm8971_vm1  ;;  %vm644_vm0 = vcmp.eq.s32.totalorder %v8981_v44, %v9021_v58  ;;  %vm9054_vm2 = vcmp.eq.s32.totalorder %v1338_v59, 1  ;;  %v9299_v38 = vrot.slane %v8962_v39, %v13518_v27 }
 0x402   : > { %7546 = vmatprep.mubr.msk.f32.mxu0 %vm668_vm8, %v8166_v57  ;;  %vm669_vm6 = vmand %vm639_vm12, %vm8971_vm1  ;;  %v9355_v42 = vrot.slane %v9006_v53, %v8853_v17  ;;  %v9572_v46 = vrot.slane %v8962_v39, %v13517_v21  ;;  %v1070_v49 = vsub.s32 4, %v8841_v12  ;;  %v1538_v53 = vrot.slane %v8903_v35, %v8853_v17 }
 0x403   : > { %v6631_v29 = vadd.s32 4294967295, %v1303_v61  ;;  %vm670_vm10 = vmand %vm640_vm4, %vm8971_vm1  ;;  %v1100_v56 = vrot.slane %v8839_v11, %v8853_v17 }
 0x404   : > { %vm9048_vm15 = vmand %vm641_vm5, %vm8971_vm1  ;;  %v9626_v54 = vrot.slane %v8962_v39, %v1070_v49  ;;  %v1925_v49 = vld [vmem:[#allocation2 + $0x10] sm:$0xff] }
 0x405   : > { %v9059_v0 = vrot.slane %v6631_v29, %v8853_v17  ;;  %7547 = vmatmul.mubr.msk.f32.gmra.mxu0 %vm669_vm6, %v8166_v57  ;;  %vm9064_vm7 = vmand %vm642_vm9, %vm8971_vm1 }
 0x406   : > { %7549 = vmatprep.mubr.msk.f32.mxu0 %vm670_vm10, %v8166_v57  ;;  %vm9071_vm11 = vmand %vm643_vm14, %vm8971_vm1  ;;  %vm645_vm14 = vcmp.eq.s32.totalorder %v8981_v44, %v9076_v3 }
 0x407   : > { %vm1309_vm3 = vcmp.eq.s32.totalorder %v9059_v0, %v8841_v12  ;;  %vm1310_vm12 = vcmp.eq.s32.totalorder %v9059_v0, %v8966_v37  ;;  %vm1311_vm13 = vcmp.eq.s32.totalorder %v9059_v0, %v8969_v41  ;;  %vm9086_vm4 = vmand %vm644_vm0, %vm8971_vm1  ;;  %vm1312_vm5 = vcmp.eq.s32.totalorder %v9059_v0, %v8977_v43 }
 0x408   : > { %vm1340_vm8 = vmand %vm1309_vm3, %vm9054_vm2  ;;  %vm1313_vm9 = vcmp.eq.s32.totalorder %v9059_v0, %v8987_v47  ;;  %vm1314_vm0 = vcmp.eq.s32.totalorder %v9059_v0, %v8992_v50  ;;  %vm646_vm3 = vcmp.eq.s32.totalorder %v8981_v44, %v9095_v8 }
 0x409   : > { %7768 = vmatprep.mubr.msk.f32.mxu1 %vm1340_vm8, %v8166_v57  ;;  %7550 = vmatmul.mubr.msk.f32.gmra.mxu0 %vm9048_vm15, %v8166_v57  ;;  %vm1341_vm6 = vmand %vm1310_vm12, %vm9054_vm2 }
 0x40a   : > { %7769 = vmatmul.mubr.msk.f32.vlgmr.msra.gmra.mxu1 %vm1341_vm6, %v8166_v57  ;;  %7552 = vmatprep.mubr.msk.f32.mxu0 %vm9064_vm7, %v8166_v57  ;;  %vm1342_vm10 = vmand %vm1311_vm13, %vm9054_vm2  ;;  %vm1315_vm13 = vcmp.eq.s32.totalorder %v9059_v0, %v8995_v51  ;;  %vm1316_vm6 = vcmp.eq.s32.totalorder %v9059_v0, %v9004_v52 }
 0x40b   : > { %7771 = vmatprep.mubr.msk.f32.mxu1 %vm1342_vm10, %v8166_v57  ;;  %vm1343_vm15 = vmand %vm1312_vm5, %vm9054_vm2  ;;  %vm647_vm5 = vcmp.eq.s32.totalorder %v8981_v44, %v9114_v9 }
 0x40c   : > { %vm1344_vm7 = vmand %vm1313_vm9, %vm9054_vm2  ;;  %vm648_vm9 = vcmp.eq.s32.totalorder %v8981_v44, %v9126_v10 }
 0x40d   : > { %7553 = vmatmul.mubr.msk.f32.gmra.mxu0 %vm9071_vm11, %v8166_v57  ;;  %vm675_vm12 = vmand %vm645_vm14, %vm8971_vm1  ;;  %vm1317_vm14 = vcmp.eq.s32.totalorder %v9059_v0, %v9021_v58 }
 0x40e   : > { %7772 = vmatmul.mubr.msk.f32.gmra.mxu1 %vm1343_vm15, %v8166_v57  ;;  %7555 = vmatprep.mubr.msk.f32.mxu0 %vm9086_vm4, %v8166_v57  ;;  %vm1345_vm8 = vmand %vm1314_vm0, %vm9054_vm2  ;;  %vm649_vm0 = vcmp.eq.s32.totalorder %v8981_v44, %v9144_v13 }
 0x40f   : > { %7774 = vmatprep.mubr.msk.f32.mxu1 %vm1344_vm7, %v8166_v57  ;;  %vm676_vm11 = vmand %vm646_vm3, %vm8971_vm1  ;;  %vm1318_vm3 = vcmp.eq.s32.totalorder %v9059_v0, %v9076_v3 }
 0x410   : > { %vm1346_vm4 = vmand %vm1315_vm13, %vm9054_vm2  ;;  %vm650_vm13 = vcmp.eq.s32.totalorder %v8981_v44, %v9156_v14 }
 0x411   : > { %7556 = vmatmul.mubr.msk.f32.gmra.mxu0 %vm675_vm12, %v8166_v57  ;;  %vm677_vm10 = vmand %vm647_vm5, %vm8971_vm1  ;;  %vm1319_vm5 = vcmp.eq.s32.totalorder %v9059_v0, %v9095_v8 }
 0x412   : > { %7775 = vmatmul.mubr.msk.f32.gmra.mxu1 %vm1345_vm8, %v8166_v57  ;;  %7558 = vmatprep.mubr.msk.f32.mxu0 %vm676_vm11, %v8166_v57  ;;  %vm1347_vm15 = vmand %vm1316_vm6, %vm9054_vm2  ;;  %vm651_vm6 = vcmp.eq.s32.totalorder %v8981_v44, %v9170_v15 }
 0x413   : > { %7777 = vmatprep.mubr.msk.f32.mxu1 %vm1346_vm4, %v8166_v57  ;;  %vm678_vm7 = vmand %vm648_vm9, %vm8971_vm1  ;;  %vm1320_vm9 = vcmp.eq.s32.totalorder %v9059_v0, %v9114_v9 }
 0x414   : > { %vm1348_vm12 = vmand %vm1317_vm14, %vm9054_vm2  ;;  %vm652_vm14 = vcmp.eq.s32.totalorder %v8981_v44, %v9182_v16 }
 0x415   : > { %7559 = vmatmul.mubr.msk.f32.gmra.mxu0 %vm677_vm10, %v8166_v57  ;;  %vm679_vm8 = vmand %vm649_vm0, %vm8971_vm1  ;;  %vm1321_vm0 = vcmp.eq.s32.totalorder %v9059_v0, %v9126_v10 }
 0x416   : > { %7778 = vmatmul.mubr.msk.f32.gmra.mxu1 %vm1347_vm15, %v8166_v57  ;;  %7561 = vmatprep.mubr.msk.f32.mxu0 %vm678_vm7, %v8166_v57  ;;  %vm1349_vm11 = vmand %vm1318_vm3, %vm9054_vm2  ;;  %vm653_vm3 = vcmp.eq.s32.totalorder %v8981_v44, %v9196_v18 }
 0x417   : > { %7780 = vmatprep.mubr.msk.f32.mxu1 %vm1348_vm12, %v8166_v57  ;;  %vm680_vm4 = vmand %vm650_vm13, %vm8971_vm1  ;;  %vm1322_vm13 = vcmp.eq.s32.totalorder %v9059_v0, %v9144_v13 }
 0x418   : > { %vm1350_vm10 = vmand %vm1319_vm5, %vm9054_vm2  ;;  %vm654_vm5 = vcmp.eq.s32.totalorder %v8981_v44, %v9208_v22 }
 0x419   : > { %7562 = vmatmul.mubr.msk.f32.gmra.mxu0 %vm679_vm8, %v8166_v57  ;;  %vm681_vm15 = vmand %vm651_vm6, %vm8971_vm1  ;;  %vm1323_vm6 = vcmp.eq.s32.totalorder %v9059_v0, %v9156_v14 }
 0x41a   : > { %7781 = vmatmul.mubr.msk.f32.gmra.mxu1 %vm1349_vm11, %v8166_v57  ;;  %7564 = vmatprep.mubr.msk.f32.mxu0 %vm680_vm4, %v8166_v57  ;;  %vm1351_vm7 = vmand %vm1320_vm9, %vm9054_vm2  ;;  %vm655_vm9 = vcmp.eq.s32.totalorder %v8981_v44, %v9222_v23 }
 0x41b   : > { %7783 = vmatprep.mubr.msk.f32.mxu1 %vm1350_vm10, %v8166_v57  ;;  %vm682_vm12 = vmand %vm652_vm14, %vm8971_vm1  ;;  %vm1324_vm14 = vcmp.eq.s32.totalorder %v9059_v0, %v9170_v15 }
 0x41c   : > { %vm1352_vm8 = vmand %vm1321_vm0, %vm9054_vm2  ;;  %vm656_vm0 = vcmp.eq.s32.totalorder %v8981_v44, %v9234_v24 }
 0x41d   : > { %7565 = vmatmul.mubr.msk.f32.gmra.mxu0 %vm681_vm15, %v8166_v57  ;;  %vm683_vm11 = vmand %vm653_vm3, %vm8971_vm1  ;;  %vm1325_vm3 = vcmp.eq.s32.totalorder %v9059_v0, %v9182_v16 }
 0x41e   : > { %7784 = vmatmul.mubr.msk.f32.gmra.mxu1 %vm1351_vm7, %v8166_v57  ;;  %7567 = vmatprep.mubr.msk.f32.mxu0 %vm682_vm12, %v8166_v57  ;;  %vm1353_vm4 = vmand %vm1322_vm13, %vm9054_vm2  ;;  %vm657_vm13 = vcmp.eq.s32.totalorder %v8981_v44, %v9248_v25 }
 0x41f   : > { %7786 = vmatprep.mubr.msk.f32.mxu1 %vm1352_vm8, %v8166_v57  ;;  %vm684_vm10 = vmand %vm654_vm5, %vm8971_vm1  ;;  %vm1326_vm5 = vcmp.eq.s32.totalorder %v9059_v0, %v9196_v18 }
 0x420   : > { %vm1354_vm15 = vmand %vm1323_vm6, %vm9054_vm2  ;;  %vm658_vm6 = vcmp.eq.s32.totalorder %v8981_v44, %v9260_v26 }
 0x421   : > { %7568 = vmatmul.mubr.msk.f32.gmra.mxu0 %vm683_vm11, %v8166_v57  ;;  %vm685_vm7 = vmand %vm655_vm9, %vm8971_vm1  ;;  %vm1327_vm9 = vcmp.eq.s32.totalorder %v9059_v0, %v9208_v22 }
 0x422   : > { %7787 = vmatmul.mubr.msk.f32.gmra.mxu1 %vm1353_vm4, %v8166_v57  ;;  %7570 = vmatprep.mubr.msk.f32.mxu0 %vm684_vm10, %v8166_v57  ;;  %vm1355_vm12 = vmand %vm1324_vm14, %vm9054_vm2  ;;  %vm659_vm14 = vcmp.eq.s32.totalorder %v8981_v44, %v9275_v31 }
 0x423   : > { %7789 = vmatprep.mubr.msk.f32.mxu1 %vm1354_vm15, %v8166_v57  ;;  %vm686_vm8 = vmand %vm656_vm0, %vm8971_vm1  ;;  %vm1328_vm0 = vcmp.eq.s32.totalorder %v9059_v0, %v9222_v23 }
 0x424   : > { %vm1356_vm11 = vmand %vm1325_vm3, %vm9054_vm2  ;;  %vm660_vm3 = vcmp.eq.s32.totalorder %v8981_v44, %v9287_v32  ;;  %v882_v44 = vrot.slane %v8827_v6, %v8853_v17 }
 0x425   : > { %7571 = vmatmul.mubr.msk.f32.gmra.mxu0 %vm685_vm7, %v8166_v57  ;;  %vm687_vm4 = vmand %vm657_vm13, %vm8971_vm1  ;;  %vm1329_vm13 = vcmp.eq.s32.totalorder %v9059_v0, %v9234_v24 }
 0x426   : > { %7790 = vmatmul.mubr.msk.f32.gmra.mxu1 %vm1355_vm12, %v8166_v57  ;;  %7573 = vmatprep.mubr.msk.f32.mxu0 %vm686_vm8, %v8166_v57  ;;  %vm1357_vm10 = vmand %vm1326_vm5, %vm9054_vm2  ;;  %vm9321_vm8 = vcmp.eq.s32.totalorder %v773_v34, 1  ;;  %v1700_v34 = vpop.permute.xlu1 %1699 }
 0x427   : > { %7792 = vmatprep.mubr.msk.f32.mxu1 %vm1356_vm11, %v8166_v57  ;;  %vm688_vm15 = vmand %vm658_vm6, %vm8971_vm1  ;;  %vm745_vm11 = vcmp.eq.s32.totalorder %v9299_v38, %v8841_v12 }
 0x428   : > { %vm1358_vm7 = vmand %vm1327_vm9, %vm9054_vm2 }
 0x429   : > { %7574 = vmatmul.mubr.msk.f32.gmra.mxu0 %vm687_vm4, %v8166_v57  ;;  %vm689_vm12 = vmand %vm659_vm14, %vm8971_vm1  ;;  %vm1330_vm4 = vcmp.eq.s32.totalorder %v9059_v0, %v9248_v25 }
 0x42a   : > { %7793 = vmatmul.mubr.msk.f32.gmra.mxu1 %vm1357_vm10, %v8166_v57  ;;  %7576 = vmatprep.mubr.msk.f32.mxu0 %vm688_vm15, %v8166_v57  ;;  %vm1359_vm5 = vmand %vm1328_vm0, %vm9054_vm2  ;;  %vm746_vm10 = vcmp.eq.s32.totalorder %v9299_v38, %v8966_v37  ;;  %vm1331_vm15 = vcmp.eq.s32.totalorder %v9059_v0, %v9260_v26  ;;  %vm747_vm0 = vcmp.eq.s32.totalorder %v9299_v38, %v8969_v41 }
 0x42b   : > { %7795 = vmatprep.mubr.msk.f32.mxu1 %vm1358_vm7, %v8166_v57  ;;  %vm690_vm6 = vmand %vm660_vm3, %vm8971_vm1  ;;  %vm1332_vm3 = vcmp.eq.s32.totalorder %v9059_v0, %v9275_v31 }
 0x42c   : > { %vm1360_vm9 = vmand %vm1329_vm13, %vm9054_vm2  ;;  %vm748_vm13 = vcmp.eq.s32.totalorder %v9299_v38, %v8977_v43 }
 0x42d   : > { %7577 = vmatmul.mubr.msk.f32.gmra.mxu0 %vm689_vm12, %v8166_v57  ;;  %vm775_vm14 = vmand %vm745_vm11, %vm9321_vm8  ;;  %vm1333_vm11 = vcmp.eq.s32.totalorder %v9059_v0, %v9287_v32 }
 0x42e   : > { %7796 = vmatmul.mubr.msk.f32.gmra.mxu1 %vm1359_vm5, %v8166_v57  ;;  %7579 = vmatprep.mubr.msk.f32.mxu0 %vm690_vm6, %v8166_v57  ;;  %vm1361_vm1 = vmand %vm1330_vm4, %vm9054_vm2  ;;  %vm749_vm4 = vcmp.eq.s32.totalorder %v9299_v38, %v8987_v47 }
 0x42f   : > { %7798 = vmatprep.mubr.msk.f32.mxu1 %vm1360_vm9, %v8166_v57  ;;  %vm776_vm7 = vmand %vm746_vm10, %vm9321_vm8  ;;  %vm9377_vm9 = vcmp.eq.s32.totalorder %v1455_v40, 1 }
 0x430   : > { %vm1362_vm12 = vmand %vm1331_vm15, %vm9054_vm2 }
 0x431   : > { %7580 = vmatmul.mubr.msk.f32.gmra.mxu0 %vm775_vm14, %v8166_v57  ;;  %vm777_vm5 = vmand %vm747_vm0, %vm9321_vm8  ;;  %vm1426_vm14 = vcmp.eq.s32.totalorder %v9355_v42, %v8841_v12 }
 0x432   : > { %7799 = vmatmul.mubr.msk.f32.gmra.mxu1 %vm1361_vm1, %v8166_v57  ;;  %7582 = vmatprep.mubr.msk.f32.mxu0 %vm776_vm7, %v8166_v57  ;;  %vm1363_vm6 = vmand %vm1332_vm3, %vm9054_vm2  ;;  %vm750_vm1 = vcmp.eq.s32.totalorder %v9299_v38, %v8992_v50  ;;  %vm1427_vm7 = vcmp.eq.s32.totalorder %v9355_v42, %v8966_v37 }
 0x433   : > { %7801 = vmatprep.mubr.msk.f32.mxu1 %vm1362_vm12, %v8166_v57  ;;  %vm778_vm10 = vmand %vm748_vm13, %vm9321_vm8  ;;  %vm1428_vm13 = vcmp.eq.s32.totalorder %v9355_v42, %v8969_v41 }
 0x434   : > { %vm1364_vm15 = vmand %vm1333_vm11, %vm9054_vm2  ;;  %vm751_vm2 = vcmp.eq.s32.totalorder %v9299_v38, %v8995_v51  ;;  %vm752_vm11 = vcmp.eq.s32.totalorder %v9299_v38, %v9004_v52 }
 0x435   : > { %7583 = vmatmul.mubr.msk.f32.gmra.mxu0 %vm777_vm5, %v8166_v57  ;;  %vm779_vm0 = vmand %vm749_vm4, %vm9321_vm8  ;;  %vm1429_vm4 = vcmp.eq.s32.totalorder %v9355_v42, %v8977_v43 }
 0x436   : > { %7802 = vmatmul.mubr.msk.f32.gmra.mxu1 %vm1363_vm6, %v8166_v57  ;;  %7585 = vmatprep.mubr.msk.f32.mxu0 %vm778_vm10, %v8166_v57  ;;  %vm1457_vm3 = vmand %vm1426_vm14, %vm9377_vm9  ;;  %vm753_vm14 = vcmp.eq.s32.totalorder %v9299_v38, %v9021_v58 }
 0x437   : > { %7804 = vmatprep.mubr.msk.f32.mxu1 %vm1364_vm15, %v8166_v57  ;;  %vm780_vm12 = vmand %vm750_vm1, %vm9321_vm8  ;;  %vm1430_vm1 = vcmp.eq.s32.totalorder %v9355_v42, %v8987_v47 }
 0x438   : > { %vm1458_vm5 = vmand %vm1427_vm7, %vm9377_vm9  ;;  %vm754_vm7 = vcmp.eq.s32.totalorder %v9299_v38, %v9076_v3 }
 0x439   : > { %7586 = vmatmul.mubr.msk.f32.gmra.mxu0 %vm779_vm0, %v8166_v57  ;;  %vm781_vm6 = vmand %vm751_vm2, %vm9321_vm8  ;;  %vm1431_vm2 = vcmp.eq.s32.totalorder %v9355_v42, %v8992_v50 }
 0x43a   : > { %7805 = vmatmul.mubr.msk.f32.gmra.mxu1 %vm1457_vm3, %v8166_v57  ;;  %7588 = vmatprep.mubr.msk.f32.mxu0 %vm780_vm12, %v8166_v57  ;;  %vm1459_vm10 = vmand %vm1428_vm13, %vm9377_vm9  ;;  %vm755_vm13 = vcmp.eq.s32.totalorder %v9299_v38, %v9095_v8 }
 0x43b   : > { %7807 = vmatprep.mubr.msk.f32.mxu1 %vm1458_vm5, %v8166_v57  ;;  %vm782_vm15 = vmand %vm752_vm11, %vm9321_vm8  ;;  %vm1432_vm11 = vcmp.eq.s32.totalorder %v9355_v42, %v8995_v51 }
 0x43c   : > { %vm1460_vm0 = vmand %vm1429_vm4, %vm9377_vm9  ;;  %vm756_vm4 = vcmp.eq.s32.totalorder %v9299_v38, %v9114_v9 }
 0x43d   : > { %7589 = vmatmul.mubr.msk.f32.gmra.mxu0 %vm781_vm6, %v8166_v57  ;;  %vm783_vm3 = vmand %vm753_vm14, %vm9321_vm8  ;;  %vm1433_vm14 = vcmp.eq.s32.totalorder %v9355_v42, %v9004_v52 }
 0x43e   : > { %7808 = vmatmul.mubr.msk.f32.gmra.mxu1 %vm1459_vm10, %v8166_v57  ;;  %7591 = vmatprep.mubr.msk.f32.mxu0 %vm782_vm15, %v8166_v57  ;;  %vm1461_vm12 = vmand %vm1430_vm1, %vm9377_vm9  ;;  %vm757_vm1 = vcmp.eq.s32.totalorder %v9299_v38, %v9126_v10 }
 0x43f   : > { %7810 = vmatprep.mubr.msk.f32.mxu1 %vm1460_vm0, %v8166_v57  ;;  %vm784_vm5 = vmand %vm754_vm7, %vm9321_vm8  ;;  %vm1434_vm7 = vcmp.eq.s32.totalorder %v9355_v42, %v9021_v58 }
 0x440   : > { %vm1462_vm6 = vmand %vm1431_vm2, %vm9377_vm9  ;;  %vm758_vm2 = vcmp.eq.s32.totalorder %v9299_v38, %v9144_v13 }
 0x441   : > { %7592 = vmatmul.mubr.msk.f32.gmra.mxu0 %vm783_vm3, %v8166_v57  ;;  %vm785_vm10 = vmand %vm755_vm13, %vm9321_vm8  ;;  %vm1435_vm13 = vcmp.eq.s32.totalorder %v9355_v42, %v9076_v3 }
 0x442   : > { %7811 = vmatmul.mubr.msk.f32.gmra.mxu1 %vm1461_vm12, %v8166_v57  ;;  %7594 = vmatprep.mubr.msk.f32.mxu0 %vm784_vm5, %v8166_v57  ;;  %vm1463_vm15 = vmand %vm1432_vm11, %vm9377_vm9  ;;  %vm759_vm11 = vcmp.eq.s32.totalorder %v9299_v38, %v9156_v14 }
 0x443   : > { %7813 = vmatprep.mubr.msk.f32.mxu1 %vm1462_vm6, %v8166_v57  ;;  %vm786_vm0 = vmand %vm756_vm4, %vm9321_vm8  ;;  %vm1436_vm4 = vcmp.eq.s32.totalorder %v9355_v42, %v9095_v8 }
 0x444   : > { %vm1464_vm3 = vmand %vm1433_vm14, %vm9377_vm9  ;;  %vm760_vm14 = vcmp.eq.s32.totalorder %v9299_v38, %v9170_v15 }
 0x445   : > { %7595 = vmatmul.mubr.msk.f32.gmra.mxu0 %vm785_vm10, %v8166_v57  ;;  %vm787_vm12 = vmand %vm757_vm1, %vm9321_vm8  ;;  %vm1437_vm1 = vcmp.eq.s32.totalorder %v9355_v42, %v9114_v9 }
 0x446   : > { %7814 = vmatmul.mubr.msk.f32.gmra.mxu1 %vm1463_vm15, %v8166_v57  ;;  %7597 = vmatprep.mubr.msk.f32.mxu0 %vm786_vm0, %v8166_v57  ;;  %vm1465_vm5 = vmand %vm1434_vm7, %vm9377_vm9  ;;  %vm761_vm7 = vcmp.eq.s32.totalorder %v9299_v38, %v9182_v16 }
 0x447   : > { %7816 = vmatprep.mubr.msk.f32.mxu1 %vm1464_vm3, %v8166_v57  ;;  %vm788_vm6 = vmand %vm758_vm2, %vm9321_vm8  ;;  %vm1438_vm2 = vcmp.eq.s32.totalorder %v9355_v42, %v9126_v10 }
 0x448   : > { %vm1466_vm10 = vmand %vm1435_vm13, %vm9377_vm9  ;;  %vm762_vm13 = vcmp.eq.s32.totalorder %v9299_v38, %v9196_v18 }
 0x449   : > { %7598 = vmatmul.mubr.msk.f32.gmra.mxu0 %vm787_vm12, %v8166_v57  ;;  %vm789_vm15 = vmand %vm759_vm11, %vm9321_vm8  ;;  %vm1439_vm11 = vcmp.eq.s32.totalorder %v9355_v42, %v9144_v13 }
 0x44a   : > { %7817 = vmatmul.mubr.msk.f32.gmra.mxu1 %vm1465_vm5, %v8166_v57  ;;  %7600 = vmatprep.mubr.msk.f32.mxu0 %vm788_vm6, %v8166_v57  ;;  %vm1467_vm0 = vmand %vm1436_vm4, %vm9377_vm9  ;;  %vm763_vm4 = vcmp.eq.s32.totalorder %v9299_v38, %v9208_v22 }
 0x44b   : > { %7819 = vmatprep.mubr.msk.f32.mxu1 %vm1466_vm10, %v8166_v57  ;;  %vm790_vm3 = vmand %vm760_vm14, %vm9321_vm8  ;;  %vm1440_vm14 = vcmp.eq.s32.totalorder %v9355_v42, %v9156_v14 }
 0x44c   : > { %vm1468_vm12 = vmand %vm1437_vm1, %vm9377_vm9  ;;  %vm764_vm1 = vcmp.eq.s32.totalorder %v9299_v38, %v9222_v23 }
 0x44d   : > { %7601 = vmatmul.mubr.msk.f32.gmra.mxu0 %vm789_vm15, %v8166_v57  ;;  %vm791_vm5 = vmand %vm761_vm7, %vm9321_vm8  ;;  %vm1441_vm7 = vcmp.eq.s32.totalorder %v9355_v42, %v9170_v15 }
 0x44e   : > { %7820 = vmatmul.mubr.msk.f32.gmra.mxu1 %vm1467_vm0, %v8166_v57  ;;  %7603 = vmatprep.mubr.msk.f32.mxu0 %vm790_vm3, %v8166_v57  ;;  %vm1469_vm6 = vmand %vm1438_vm2, %vm9377_vm9  ;;  %vm765_vm2 = vcmp.eq.s32.totalorder %v9299_v38, %v9234_v24 }
 0x44f   : > { %7822 = vmatprep.mubr.msk.f32.mxu1 %vm1468_vm12, %v8166_v57  ;;  %vm792_vm10 = vmand %vm762_vm13, %vm9321_vm8  ;;  %vm1442_vm13 = vcmp.eq.s32.totalorder %v9355_v42, %v9182_v16 }
 0x450   : > { %vm1470_vm15 = vmand %vm1439_vm11, %vm9377_vm9  ;;  %vm766_vm11 = vcmp.eq.s32.totalorder %v9299_v38, %v9248_v25 }
 0x451   : > { %7604 = vmatmul.mubr.msk.f32.gmra.mxu0 %vm791_vm5, %v8166_v57  ;;  %vm793_vm0 = vmand %vm763_vm4, %vm9321_vm8  ;;  %vm1443_vm4 = vcmp.eq.s32.totalorder %v9355_v42, %v9196_v18 }
 0x452   : > { %7823 = vmatmul.mubr.msk.f32.gmra.mxu1 %vm1469_vm6, %v8166_v57  ;;  %7606 = vmatprep.mubr.msk.f32.mxu0 %vm792_vm10, %v8166_v57  ;;  %vm1471_vm3 = vmand %vm1440_vm14, %vm9377_vm9  ;;  %vm767_vm14 = vcmp.eq.s32.totalorder %v9299_v38, %v9260_v26 }
 0x453   : > { %7825 = vmatprep.mubr.msk.f32.mxu1 %vm1470_vm15, %v8166_v57  ;;  %vm794_vm12 = vmand %vm764_vm1, %vm9321_vm8  ;;  %vm1444_vm1 = vcmp.eq.s32.totalorder %v9355_v42, %v9208_v22 }
 0x454   : > { %vm1472_vm5 = vmand %vm1441_vm7, %vm9377_vm9  ;;  %vm768_vm7 = vcmp.eq.s32.totalorder %v9299_v38, %v9275_v31 }
 0x455   : > { %7607 = vmatmul.mubr.msk.f32.gmra.mxu0 %vm793_vm0, %v8166_v57  ;;  %vm795_vm6 = vmand %vm765_vm2, %vm9321_vm8  ;;  %vm1445_vm2 = vcmp.eq.s32.totalorder %v9355_v42, %v9222_v23 }
 0x456   : > { %7826 = vmatmul.mubr.msk.f32.gmra.mxu1 %vm1471_vm3, %v8166_v57  ;;  %7609 = vmatprep.mubr.msk.f32.mxu0 %vm794_vm12, %v8166_v57  ;;  %vm1473_vm10 = vmand %vm1442_vm13, %vm9377_vm9  ;;  %vm769_vm13 = vcmp.eq.s32.totalorder %v9299_v38, %v9287_v32 }
 0x457   : > { %7828 = vmatprep.mubr.msk.f32.mxu1 %vm1472_vm5, %v8166_v57  ;;  %vm796_vm15 = vmand %vm766_vm11, %vm9321_vm8  ;;  %vm1446_vm11 = vcmp.eq.s32.totalorder %v9355_v42, %v9234_v24 }
 0x458   : > { %vm1474_vm0 = vmand %vm1443_vm4, %vm9377_vm9 }
 0x459   : > { %7610 = vmatmul.mubr.msk.f32.gmra.mxu0 %vm795_vm6, %v8166_v57  ;;  %vm797_vm3 = vmand %vm767_vm14, %vm9321_vm8  ;;  %vm9594_vm6 = vcmp.eq.s32.totalorder %v882_v44, 1  ;;  %v1926_v44 = vld [vmem:[#allocation2 + $0x18] sm:$0xff] }
 0x45a   : > { %7829 = vmatmul.mubr.msk.f32.gmra.mxu1 %vm1473_vm10, %v8166_v57  ;;  %7612 = vmatprep.mubr.msk.f32.mxu0 %vm796_vm15, %v8166_v57  ;;  %vm1475_vm12 = vmand %vm1444_vm1, %vm9377_vm9  ;;  %vm854_vm10 = vcmp.eq.s32.totalorder %v9572_v46, %v8841_v12  ;;  %vm1447_vm15 = vcmp.eq.s32.totalorder %v9355_v42, %v9248_v25 }
 0x45b   : > { %7831 = vmatprep.mubr.msk.f32.mxu1 %vm1474_vm0, %v8166_v57  ;;  %vm798_vm5 = vmand %vm768_vm7, %vm9321_vm8  ;;  %vm855_vm0 = vcmp.eq.s32.totalorder %v9572_v46, %v8966_v37 }
 0x45c   : > { %vm1476_vm4 = vmand %vm1445_vm2, %vm9377_vm9  ;;  %vm856_vm2 = vcmp.eq.s32.totalorder %v9572_v46, %v8969_v41 }
 0x45d   : > { %7613 = vmatmul.mubr.msk.f32.gmra.mxu0 %vm797_vm3, %v8166_v57  ;;  %vm799_vm14 = vmand %vm769_vm13, %vm9321_vm8  ;;  %vm1448_vm8 = vcmp.eq.s32.totalorder %v9355_v42, %v9260_v26  ;;  %vm1449_vm13 = vcmp.eq.s32.totalorder %v9355_v42, %v9275_v31 }
 0x45e   : > { %7832 = vmatmul.mubr.msk.f32.gmra.mxu1 %vm1475_vm12, %v8166_v57  ;;  %7615 = vmatprep.mubr.msk.f32.mxu0 %vm798_vm5, %v8166_v57  ;;  %vm1477_vm1 = vmand %vm1446_vm11, %vm9377_vm9  ;;  %vm857_vm11 = vcmp.eq.s32.totalorder %v9572_v46, %v8977_v43 }
 0x45f   : > { %7834 = vmatprep.mubr.msk.f32.mxu1 %vm1476_vm4, %v8166_v57  ;;  %vm884_vm7 = vmand %vm854_vm10, %vm9594_vm6  ;;  %vm1450_vm10 = vcmp.eq.s32.totalorder %v9355_v42, %v9287_v32  ;;  %v1701_v42 = vadd.s32 %v1700_v34, %v8989_v48  ;;  %v1927_v34 = vld [vmem:[#allocation2 + $0x20] sm:$0xff] }
 0x460   : > { %vm1478_vm3 = vmand %vm1447_vm15, %vm9377_vm9  ;;  %vm858_vm15 = vcmp.eq.s32.totalorder %v9572_v46, %v8987_v47 }
 0x461   : > { %7616 = vmatmul.mubr.msk.f32.gmra.mxu0 %vm799_vm14, %v8166_v57  ;;  %vm885_vm12 = vmand %vm855_vm0, %vm9594_vm6  ;;  %v6733_v35 = vadd.s32 4294967295, %v1701_v42  ;;  %v1736_v42 = vrot.slane %v8863_v19, %v8853_v17 }
 0x462   : > { %7835 = vmatmul.mubr.msk.f32.gmra.mxu1 %vm1477_vm1, %v8166_v57  ;;  %7618 = vmatprep.mubr.msk.f32.mxu0 %vm884_vm7, %v8166_v57  ;;  %vm1479_vm5 = vmand %vm1448_vm8, %vm9377_vm9  ;;  %vm9648_vm1 = vcmp.eq.s32.totalorder %v1538_v53, 1  ;;  %vm13497_vm7 = vcmp.eq.s32.totalorder %v9626_v54, %v8841_v12 }
 0x463   : > { %7837 = vmatprep.mubr.msk.f32.mxu1 %vm1478_vm3, %v8166_v57  ;;  %vm886_vm4 = vmand %vm856_vm2, %vm9594_vm6  ;;  %vm859_vm3 = vcmp.eq.s32.totalorder %v9572_v46, %v8992_v50 }
 0x464   : > { %vm1480_vm14 = vmand %vm1449_vm13, %vm9377_vm9 }
 0x465   : > { %7619 = vmatmul.mubr.msk.f32.gmra.mxu0 %vm885_vm12, %v8166_v57  ;;  %vm887_vm0 = vmand %vm857_vm11, %vm9594_vm6  ;;  %vm13496_vm12 = vcmp.eq.s32.totalorder %v9626_v54, %v8966_v37  ;;  %vm13493_vm11 = vcmp.eq.s32.totalorder %v9626_v54, %v8969_v41 }
 0x466   : > { %7838 = vmatmul.mubr.msk.f32.gmra.mxu1 %vm1479_vm5, %v8166_v57  ;;  %7621 = vmatprep.mubr.msk.f32.mxu0 %vm886_vm4, %v8166_v57  ;;  %vm1481_vm8 = vmand %vm1450_vm10, %vm9377_vm9  ;;  %vm860_vm9 = vcmp.eq.s32.totalorder %v9572_v46, %v8995_v51  ;;  %vm861_vm10 = vcmp.eq.s32.totalorder %v9572_v46, %v9004_v52 }
 0x467   : > { %7840 = vmatprep.mubr.msk.f32.mxu1 %vm1480_vm14, %v8166_v57  ;;  %vm888_vm2 = vmand %vm858_vm15, %vm9594_vm6  ;;  %vm13483_vm15 = vcmp.eq.s32.totalorder %v9626_v54, %v8977_v43 }
 0x468   : > { %vm1540_vm13 = vmand %vm13497_vm7, %vm9648_vm1 }
 0x469   : > { %7622 = vmatmul.mubr.msk.f32.gmra.mxu0 %vm887_vm0, %v8166_v57  ;;  %vm889_vm5 = vmand %vm859_vm3, %vm9594_vm6 }
 0x46a   : > { %7841 = vmatmul.mubr.msk.f32.gmra.mxu1 %vm1481_vm8, %v8166_v57  ;;  %7624 = vmatprep.mubr.msk.f32.mxu0 %vm888_vm2, %v8166_v57  ;;  %vm1541_vm4 = vmand %vm13496_vm12, %vm9648_vm1  ;;  %vm862_vm8 = vcmp.eq.s32.totalorder %v9572_v46, %v9021_v58  ;;  %vm13482_vm2 = vcmp.eq.s32.totalorder %v9626_v54, %v8987_v47  ;;  %vm1093_vm12 = vcmp.eq.s32.totalorder %v9626_v54, %v9248_v25 }
 0x46b   : > { %7843 = vmatprep.mubr.msk.f32.mxu1 %vm1540_vm13, %v8166_v57  ;;  %vm890_vm14 = vmand %vm860_vm9, %vm9594_vm6  ;;  %vm863_vm9 = vcmp.eq.s32.totalorder %v9572_v46, %v9076_v3 }
 0x46c   : > { %vm1542_vm0 = vmand %vm13493_vm11, %vm9648_vm1 }
 0x46d   : > { %7625 = vmatmul.mubr.msk.f32.gmra.mxu0 %vm889_vm5, %v8166_v57  ;;  %vm891_vm3 = vmand %vm861_vm10, %vm9594_vm6  ;;  %vm13485_vm10 = vcmp.eq.s32.totalorder %v9626_v54, %v8992_v50 }
 0x46e   : > { %7844 = vmatmul.mubr.msk.f32.gmra.mxu1 %vm1541_vm4, %v8166_v57  ;;  %7627 = vmatprep.mubr.msk.f32.mxu0 %vm890_vm14, %v8166_v57  ;;  %vm1543_vm13 = vmand %vm13483_vm15, %vm9648_vm1  ;;  %vm864_vm14 = vcmp.eq.s32.totalorder %v9572_v46, %v9095_v8  ;;  %vm865_vm15 = vcmp.eq.s32.totalorder %v9572_v46, %v9114_v9 }
 0x46f   : > { %7846 = vmatprep.mubr.msk.f32.mxu1 %vm1542_vm0, %v8166_v57  ;;  %vm892_vm5 = vmand %vm862_vm8, %vm9594_vm6  ;;  %vm13484_vm8 = vcmp.eq.s32.totalorder %v9626_v54, %v8995_v51 }
 0x470   : > { %vm1544_vm4 = vmand %vm13482_vm2, %vm9648_vm1 }
 0x471   : > { %7628 = vmatmul.mubr.msk.f32.gmra.mxu0 %vm891_vm3, %v8166_v57  ;;  %vm893_vm0 = vmand %vm863_vm9, %vm9594_vm6  ;;  %vm13487_vm9 = vcmp.eq.s32.totalorder %v9626_v54, %v9004_v52 }
 0x472   : > { %7847 = vmatmul.mubr.msk.f32.gmra.mxu1 %vm1543_vm13, %v8166_v57  ;;  %7630 = vmatprep.mubr.msk.f32.mxu0 %vm892_vm5, %v8166_v57  ;;  %vm1545_vm2 = vmand %vm13485_vm10, %vm9648_vm1  ;;  %vm866_vm5 = vcmp.eq.s32.totalorder %v9572_v46, %v9126_v10  ;;  %vm867_vm10 = vcmp.eq.s32.totalorder %v9572_v46, %v9144_v13 }
 0x473   : > { %7849 = vmatprep.mubr.msk.f32.mxu1 %vm1544_vm4, %v8166_v57  ;;  %vm894_vm3 = vmand %vm864_vm14, %vm9594_vm6  ;;  %vm13486_vm14 = vcmp.eq.s32.totalorder %v9626_v54, %v9021_v58 }
 0x474   : > { %vm1546_vm13 = vmand %vm13484_vm8, %vm9648_vm1 }
 0x475   : > { %7631 = vmatmul.mubr.msk.f32.gmra.mxu0 %vm893_vm0, %v8166_v57  ;;  %vm895_vm4 = vmand %vm865_vm15, %vm9594_vm6  ;;  %vm13489_vm0 = vcmp.eq.s32.totalorder %v9626_v54, %v9076_v3 }
 0x476   : > { %7850 = vmatmul.mubr.msk.f32.gmra.mxu1 %vm1545_vm2, %v8166_v57  ;;  %7633 = vmatprep.mubr.msk.f32.mxu0 %vm894_vm3, %v8166_v57  ;;  %vm1547_vm8 = vmand %vm13487_vm9, %vm9648_vm1  ;;  %vm868_vm3 = vcmp.eq.s32.totalorder %v9572_v46, %v9156_v14  ;;  %vm869_vm9 = vcmp.eq.s32.totalorder %v9572_v46, %v9170_v15 }
 0x477   : > { %7852 = vmatprep.mubr.msk.f32.mxu1 %vm1546_vm13, %v8166_v57  ;;  %vm896_vm15 = vmand %vm866_vm5, %vm9594_vm6  ;;  %vm13488_vm5 = vcmp.eq.s32.totalorder %v9626_v54, %v9095_v8 }
 0x478   : > { %vm1548_vm2 = vmand %vm13486_vm14, %vm9648_vm1 }
 0x479   : > { %7634 = vmatmul.mubr.msk.f32.gmra.mxu0 %vm895_vm4, %v8166_v57  ;;  %vm897_vm13 = vmand %vm867_vm10, %vm9594_vm6 }
 0x47a   : > { %7853 = vmatmul.mubr.msk.f32.gmra.mxu1 %vm1547_vm8, %v8166_v57  ;;  %7636 = vmatprep.mubr.msk.f32.mxu0 %vm896_vm15, %v8166_v57  ;;  %vm1549_vm14 = vmand %vm13489_vm0, %vm9648_vm1  ;;  %vm13490_vm8 = vcmp.eq.s32.totalorder %v9626_v54, %v9114_v9  ;;  %vm870_vm15 = vcmp.eq.s32.totalorder %v9572_v46, %v9182_v16  ;;  %vm871_vm0 = vcmp.eq.s32.totalorder %v9572_v46, %v9196_v18 }
 0x47b   : > { %7855 = vmatprep.mubr.msk.f32.mxu1 %vm1548_vm2, %v8166_v57  ;;  %vm898_vm10 = vmand %vm868_vm3, %vm9594_vm6  ;;  %vm13491_vm3 = vcmp.eq.s32.totalorder %v9626_v54, %v9126_v10 }
 0x47c   : > { %vm1550_vm4 = vmand %vm13488_vm5, %vm9648_vm1 }
 0x47d   : > { %7637 = vmatmul.mubr.msk.f32.gmra.mxu0 %vm897_vm13, %v8166_v57  ;;  %vm899_vm2 = vmand %vm869_vm9, %vm9594_vm6  ;;  %vm9821_vm13 = vcmp.eq.s32.totalorder %v1100_v56, 1 }
 0x47e   : > { %7856 = vmatmul.mubr.msk.f32.gmra.mxu1 %vm1549_vm14, %v8166_v57  ;;  %7639 = vmatprep.mubr.msk.f32.mxu0 %vm898_vm10, %v8166_v57  ;;  %vm1551_vm5 = vmand %vm13490_vm8, %vm9648_vm1  ;;  %vm1085_vm14 = vcmp.eq.s32.totalorder %v9626_v54, %v9144_v13 }
 0x47f   : > { %7858 = vmatprep.mubr.msk.f32.mxu1 %vm1550_vm4, %v8166_v57  ;;  %vm900_vm9 = vmand %vm870_vm15, %vm9594_vm6  ;;  %vm872_vm4 = vcmp.eq.s32.totalorder %v9572_v46, %v9208_v22 }
 0x480   : > { %vm1552_vm10 = vmand %vm13491_vm3, %vm9648_vm1  ;;  %vm13492_vm3 = vcmp.eq.s32.totalorder %v9626_v54, %v9156_v14 }
 0x481   : > { %7640 = vmatmul.mubr.msk.f32.gmra.mxu0 %vm899_vm2, %v8166_v57  ;;  %vm901_vm8 = vmand %vm871_vm0, %vm9594_vm6  ;;  %vm873_vm2 = vcmp.eq.s32.totalorder %v9572_v46, %v9222_v23 }
 0x482   : > { %7859 = vmatmul.mubr.msk.f32.gmra.mxu1 %vm1551_vm5, %v8166_v57  ;;  %7642 = vmatprep.mubr.msk.f32.mxu0 %vm900_vm9, %v8166_v57  ;;  %vm9844_vm15 = vmand %vm1085_vm14, %vm9821_vm13  ;;  %vm1087_vm9 = vcmp.eq.s32.totalorder %v9626_v54, %v9170_v15 }
 0x483   : > { %7861 = vmatprep.mubr.msk.f32.mxu1 %vm1552_vm10, %v8166_v57  ;;  %vm1553_vm0 = vmand %vm1085_vm14, %vm9648_vm1 }
 0x484   : > { %vm902_vm5 = vmand %vm872_vm4, %vm9594_vm6  ;;  %vm874_vm4 = vcmp.eq.s32.totalorder %v9572_v46, %v9234_v24 }
 0x485   : > { %7643 = vmatmul.mubr.msk.f32.gmra.mxu0 %vm901_vm8, %v8166_v57  ;;  %vm1554_vm10 = vmand %vm13492_vm3, %vm9648_vm1  ;;  %vm13494_vm3 = vcmp.eq.s32.totalorder %v9626_v54, %v9182_v16 }
 0x486   : > { %7862 = vmatmul.mubr.msk.f32.gmra.mxu1 %vm1553_vm0, %v8166_v57  ;;  %7645 = vmatprep.mubr.msk.f32.mxu0 %vm902_vm5, %v8166_v57  ;;  %vm903_vm14 = vmand %vm873_vm2, %vm9594_vm6  ;;  %vm875_vm2 = vcmp.eq.s32.totalorder %v9572_v46, %v9248_v25 }
 0x487   : > { %7864 = vmatprep.mubr.msk.f32.mxu1 %vm1554_vm10, %v8166_v57  ;;  %vm9874_vm8 = vmand %vm1087_vm9, %vm9821_vm13  ;;  %vm1089_vm10 = vcmp.eq.s32.totalorder %v9626_v54, %v9196_v18 }
 0x488   : > { %vm1555_vm0 = vmand %vm1087_vm9, %vm9648_vm1 }
 0x489   : > { %7646 = vmatmul.mubr.msk.f32.gmra.mxu0 %vm903_vm14, %v8166_v57  ;;  %vm904_vm5 = vmand %vm874_vm4, %vm9594_vm6  ;;  %vm876_vm4 = vcmp.eq.s32.totalorder %v9572_v46, %v9260_v26 }
 0x48a   : > { %7865 = vmatmul.mubr.msk.f32.gmra.mxu1 %vm1555_vm0, %v8166_v57  ;;  %7648 = vmatprep.mubr.msk.f32.mxu0 %vm904_vm5, %v8166_v57  ;;  %vm1556_vm9 = vmand %vm13494_vm3, %vm9648_vm1  ;;  %vm13495_vm0 = vcmp.eq.s32.totalorder %v9626_v54, %v9208_v22 }
 0x48b   : > { %7867 = vmatprep.mubr.msk.f32.mxu1 %vm1556_vm9, %v8166_v57  ;;  %vm905_vm14 = vmand %vm875_vm2, %vm9594_vm6  ;;  %vm877_vm2 = vcmp.eq.s32.totalorder %v9572_v46, %v9275_v31 }
 0x48c   : > { %vm9903_vm11 = vmand %vm1089_vm10, %vm9821_vm13 }
 0x48d   : > { %7649 = vmatmul.mubr.msk.f32.gmra.mxu0 %vm905_vm14, %v8166_v57  ;;  %vm1557_vm5 = vmand %vm1089_vm10, %vm9648_vm1  ;;  %vm1091_vm14 = vcmp.eq.s32.totalorder %v9626_v54, %v9222_v23 }
 0x48e   : > { %7868 = vmatmul.mubr.msk.f32.gmra.mxu1 %vm1557_vm5, %v8166_v57  ;;  %vm906_vm9 = vmand %vm876_vm4, %vm9594_vm6  ;;  %vm878_vm5 = vcmp.eq.s32.totalorder %v9572_v46, %v9287_v32 }
 0x48f   : > { %7651 = vmatprep.mubr.msk.f32.mxu0 %vm906_vm9, %v8166_v57  ;;  %vm1558_vm10 = vmand %vm13495_vm0, %vm9648_vm1  ;;  %vm13498_vm9 = vcmp.eq.s32.totalorder %v9626_v54, %v9234_v24  ;;  %vm9945_vm0 = vcmp.eq.s32.totalorder %v991_v62, 1  ;;  %v1928_v62 = vld [vmem:[#allocation2 + $0x28] sm:$0xff] }
 0x490   : > { %7870 = vmatprep.mubr.msk.f32.mxu1 %vm1558_vm10, %v8166_v57  ;;  %vm907_vm3 = vmand %vm877_vm2, %vm9594_vm6  ;;  %vm13502_vm10 = vcmp.eq.s32.totalorder %v9918_v63, %v8841_v12 }
 0x491   : > { %7652 = vmatmul.mubr.msk.f32.gmra.mxu0 %vm907_vm3, %v8166_v57  ;;  %vm9939_vm4 = vmand %vm1091_vm14, %vm9821_vm13 }
 0x492   : > { %vm1559_vm2 = vmand %vm1091_vm14, %vm9648_vm1 }
 0x493   : > { %7871 = vmatmul.mubr.msk.f32.gmra.mxu1 %vm1559_vm2, %v8166_v57  ;;  %vm908_vm3 = vmand %vm878_vm5, %vm9594_vm6  ;;  %vm13499_vm6 = vcmp.eq.s32.totalorder %v9918_v63, %v8966_v37 }
 0x494   : > { %7654 = vmatprep.mubr.msk.f32.mxu0 %vm908_vm3, %v8166_v57  ;;  %vm1560_vm7 = vmand %vm13498_vm9, %vm9648_vm1  ;;  %vm13501_vm3 = vcmp.eq.s32.totalorder %v9918_v63, %v8969_v41  ;;  %vm1095_vm9 = vcmp.eq.s32.totalorder %v9626_v54, %v9275_v31 }
 0x495   : > { %7873 = vmatprep.mubr.msk.f32.mxu1 %vm1560_vm7, %v8166_v57  ;;  %vm993_vm14 = vmand %vm13502_vm10, %vm9945_vm0  ;;  %vm13500_vm7 = vcmp.eq.s32.totalorder %v9626_v54, %v9260_v26  ;;  %vm10022_vm10 = vcmp.eq.s32.totalorder %v1621_v1, 1 }
 0x496   : > { %7655 = vmatmul.mubr.msk.f32.gmra.mxu0 %vm993_vm14, %v8166_v57  ;;  %vm9975_vm5 = vmand %vm1093_vm12, %vm9821_vm13 }
 0x497   : > { %vm1561_vm2 = vmand %vm1093_vm12, %vm9648_vm1 }
 0x498   : > { %7874 = vmatmul.mubr.msk.f32.gmra.mxu1 %vm1561_vm2, %v8166_v57  ;;  %vm994_vm14 = vmand %vm13499_vm6, %vm9945_vm0  ;;  %vm13503_vm6 = vcmp.eq.s32.totalorder %v9918_v63, %v8977_v43 }
 0x499   : > { %7657 = vmatprep.mubr.msk.f32.mxu0 %vm994_vm14, %v8166_v57  ;;  %vm1562_vm12 = vmand %vm13500_vm7, %vm9648_vm1 }
 0x49a   : > { %7876 = vmatprep.mubr.msk.f32.mxu1 %vm1562_vm12, %v8166_v57  ;;  %vm995_vm2 = vmand %vm13501_vm3, %vm9945_vm0  ;;  %vm13504_vm12 = vcmp.eq.s32.totalorder %v9626_v54, %v9287_v32  ;;  %vm968_vm3 = vcmp.eq.s32.totalorder %v9918_v63, %v8992_v50 }
 0x49b   : > { %7658 = vmatmul.mubr.msk.f32.gmra.mxu0 %vm995_vm2, %v8166_v57  ;;  %vm10012_vm14 = vmand %vm1095_vm9, %vm9821_vm13 }
 0x49c   : > { %v13681_v36 = vsel %vm10012_vm14, 4294967295, %v13680_v36  ;;  %vm1563_vm7 = vmand %vm1095_vm9, %vm9648_vm1 }
 0x49d   : > { %7877 = vmatmul.mubr.msk.f32.gmra.mxu1 %vm1563_vm7, %v8166_v57  ;;  %vm996_vm2 = vmand %vm13503_vm6, %vm9945_vm0  ;;  %vm13684_vm7 = vcmp.eq.s32.totalorder %v9918_v63, %v8987_v47 }
 0x49e   : > { %7660 = vmatprep.mubr.msk.f32.mxu0 %vm996_vm2, %v8166_v57  ;;  %vm1564_vm9 = vmand %vm13504_vm12, %vm9648_vm1  ;;  %vm13685_vm2 = vcmp.eq.s32.totalorder %v9918_v63, %v8841_v12  ;;  %vm13505_vm1 = vcmp.eq.s32.totalorder %v9918_v63, %v8995_v51 }
 0x49f   : > { %7879 = vmatprep.mubr.msk.f32.mxu1 %vm1564_vm9, %v8166_v57  ;;  %vm997_vm14 = vmand %vm13684_vm7, %vm9945_vm0 }
 0x4a0   : > { %7661 = vmatmul.mubr.msk.f32.gmra.mxu0 %vm997_vm14, %v8166_v57  ;;  %vm1623_vm6 = vmand %vm13685_vm2, %vm10022_vm10  ;;  %vm13686_vm14 = vcmp.eq.s32.totalorder %v9918_v63, %v8966_v37  ;;  %vm13506_vm2 = vcmp.eq.s32.totalorder %v9918_v63, %v9004_v52 }
 0x4a1   : > { %7880 = vmatmul.mubr.msk.f32.gmra.mxu1 %vm1623_vm6, %v8166_v57  ;;  %vm998_vm9 = vmand %vm968_vm3, %vm9945_vm0 }
 0x4a2   : > { %7663 = vmatprep.mubr.msk.f32.mxu0 %vm998_vm9, %v8166_v57  ;;  %vm1624_vm7 = vmand %vm13686_vm14, %vm10022_vm10  ;;  %vm13687_vm9 = vcmp.eq.s32.totalorder %v9918_v63, %v8969_v41  ;;  %vm971_vm14 = vcmp.eq.s32.totalorder %v9918_v63, %v9021_v58 }
 0x4a3   : > { %7882 = vmatprep.mubr.msk.f32.mxu1 %vm1624_vm7, %v8166_v57  ;;  %vm999_vm6 = vmand %vm13505_vm1, %vm9945_vm0 }
 0x4a4   : > { %7664 = vmatmul.mubr.msk.f32.gmra.mxu0 %vm999_vm6, %v8166_v57  ;;  %vm1625_vm12 = vmand %vm13687_vm9, %vm10022_vm10  ;;  %vm13688_vm6 = vcmp.eq.s32.totalorder %v9918_v63, %v8977_v43  ;;  %vm13507_vm9 = vcmp.eq.s32.totalorder %v9918_v63, %v9076_v3 }
 0x4a5   : > { %7883 = vmatmul.mubr.msk.f32.gmra.mxu1 %vm1625_vm12, %v8166_v57  ;;  %vm1000_vm7 = vmand %vm13506_vm2, %vm9945_vm0 }
 0x4a6   : > { %7666 = vmatprep.mubr.msk.f32.mxu0 %vm1000_vm7, %v8166_v57  ;;  %vm1626_vm1 = vmand %vm13688_vm6, %vm10022_vm10  ;;  %vm13689_vm7 = vcmp.eq.s32.totalorder %v9918_v63, %v8987_v47  ;;  %vm13508_vm6 = vcmp.eq.s32.totalorder %v9918_v63, %v9095_v8 }
 0x4a7   : > { %7885 = vmatprep.mubr.msk.f32.mxu1 %vm1626_vm1, %v8166_v57  ;;  %vm1001_vm12 = vmand %vm971_vm14, %vm9945_vm0 }
 0x4a8   : > { %7667 = vmatmul.mubr.msk.f32.gmra.mxu0 %vm1001_vm12, %v8166_v57  ;;  %vm1627_vm2 = vmand %vm13689_vm7, %vm10022_vm10  ;;  %vm974_vm7 = vcmp.eq.s32.totalorder %v9918_v63, %v9114_v9 }
 0x4a9   : > { %7886 = vmatmul.mubr.msk.f32.gmra.mxu1 %vm1627_vm2, %v8166_v57  ;;  %vm1002_vm1 = vmand %vm13507_vm9, %vm9945_vm0 }
 0x4aa   : > { %7669 = vmatprep.mubr.msk.f32.mxu0 %vm1002_vm1, %v8166_v57  ;;  %vm1628_vm12 = vmand %vm968_vm3, %vm10022_vm10  ;;  %vm13690_vm1 = vcmp.eq.s32.totalorder %v9918_v63, %v8995_v51  ;;  %vm13509_vm3 = vcmp.eq.s32.totalorder %v9918_v63, %v9126_v10 }
 0x4ab   : > { %7888 = vmatprep.mubr.msk.f32.mxu1 %vm1628_vm12, %v8166_v57  ;;  %vm1003_vm2 = vmand %vm13508_vm6, %vm9945_vm0 }
 0x4ac   : > { %7670 = vmatmul.mubr.msk.f32.gmra.mxu0 %vm1003_vm2, %v8166_v57  ;;  %vm1629_vm9 = vmand %vm13690_vm1, %vm10022_vm10  ;;  %vm13691_vm2 = vcmp.eq.s32.totalorder %v9918_v63, %v9004_v52  ;;  %vm13510_vm1 = vcmp.eq.s32.totalorder %v9918_v63, %v9144_v13 }
 0x4ad   : > { %7889 = vmatmul.mubr.msk.f32.gmra.mxu1 %vm1629_vm9, %v8166_v57  ;;  %vm1004_vm12 = vmand %vm974_vm7, %vm9945_vm0 }
 0x4ae   : > { %7672 = vmatprep.mubr.msk.f32.mxu0 %vm1004_vm12, %v8166_v57  ;;  %vm1630_vm6 = vmand %vm13691_vm2, %vm10022_vm10  ;;  %vm977_vm2 = vcmp.eq.s32.totalorder %v9918_v63, %v9156_v14 }
 0x4af   : > { %7891 = vmatprep.mubr.msk.f32.mxu1 %vm1630_vm6, %v8166_v57  ;;  %vm1005_vm9 = vmand %vm13509_vm3, %vm9945_vm0 }
 0x4b0   : > { %7673 = vmatmul.mubr.msk.f32.gmra.mxu0 %vm1005_vm9, %v8166_v57  ;;  %vm1631_vm12 = vmand %vm971_vm14, %vm10022_vm10  ;;  %vm13692_vm9 = vcmp.eq.s32.totalorder %v9918_v63, %v9076_v3  ;;  %vm13511_vm14 = vcmp.eq.s32.totalorder %v9918_v63, %v9170_v15 }
 0x4b1   : > { %7892 = vmatmul.mubr.msk.f32.gmra.mxu1 %vm1631_vm12, %v8166_v57  ;;  %vm1006_vm6 = vmand %vm13510_vm1, %vm9945_vm0 }
 0x4b2   : > { %7675 = vmatprep.mubr.msk.f32.mxu0 %vm1006_vm6, %v8166_v57  ;;  %vm1632_vm3 = vmand %vm13692_vm9, %vm10022_vm10  ;;  %vm13693_vm6 = vcmp.eq.s32.totalorder %v9918_v63, %v9095_v8  ;;  %vm13512_vm9 = vcmp.eq.s32.totalorder %v9918_v63, %v9182_v16 }
 0x4b3   : > { %7894 = vmatprep.mubr.msk.f32.mxu1 %vm1632_vm3, %v8166_v57  ;;  %vm1007_vm12 = vmand %vm977_vm2, %vm9945_vm0 }
 0x4b4   : > { %7676 = vmatmul.mubr.msk.f32.gmra.mxu0 %vm1007_vm12, %v8166_v57  ;;  %vm1633_vm1 = vmand %vm13693_vm6, %vm10022_vm10  ;;  %vm980_vm6 = vcmp.eq.s32.totalorder %v9918_v63, %v9196_v18 }
 0x4b5   : > { %7895 = vmatmul.mubr.msk.f32.gmra.mxu1 %vm1633_vm1, %v8166_v57  ;;  %vm1008_vm3 = vmand %vm13511_vm14, %vm9945_vm0 }
 0x4b6   : > { %7678 = vmatprep.mubr.msk.f32.mxu0 %vm1008_vm3, %v8166_v57  ;;  %vm1634_vm12 = vmand %vm974_vm7, %vm10022_vm10  ;;  %vm13694_vm3 = vcmp.eq.s32.totalorder %v9918_v63, %v9126_v10  ;;  %vm13513_vm7 = vcmp.eq.s32.totalorder %v9918_v63, %v9208_v22 }
 0x4b7   : > { %7897 = vmatprep.mubr.msk.f32.mxu1 %vm1634_vm12, %v8166_v57  ;;  %vm1009_vm1 = vmand %vm13512_vm9, %vm9945_vm0 }
 0x4b8   : > { %7679 = vmatmul.mubr.msk.f32.gmra.mxu0 %vm1009_vm1, %v8166_v57  ;;  %vm1635_vm14 = vmand %vm13694_vm3, %vm10022_vm10  ;;  %vm13695_vm1 = vcmp.eq.s32.totalorder %v9918_v63, %v9144_v13  ;;  %vm13514_vm3 = vcmp.eq.s32.totalorder %v9918_v63, %v9222_v23 }
 0x4b9   : > { %7898 = vmatmul.mubr.msk.f32.gmra.mxu1 %vm1635_vm14, %v8166_v57  ;;  %vm1010_vm12 = vmand %vm980_vm6, %vm9945_vm0 }
 0x4ba   : > { %7681 = vmatprep.mubr.msk.f32.mxu0 %vm1010_vm12, %v8166_v57  ;;  %vm1636_vm9 = vmand %vm13695_vm1, %vm10022_vm10  ;;  %vm13515_vm1 = vcmp.eq.s32.totalorder %v9918_v63, %v9234_v24 }
 0x4bb   : > { %7900 = vmatprep.mubr.msk.f32.mxu1 %vm1636_vm9, %v8166_v57  ;;  %vm1011_vm14 = vmand %vm13513_vm7, %vm9945_vm0 }
 0x4bc   : > { %7682 = vmatmul.mubr.msk.f32.gmra.mxu0 %vm1011_vm14, %v8166_v57  ;;  %vm1637_vm12 = vmand %vm977_vm2, %vm10022_vm10  ;;  %vm13696_vm14 = vcmp.eq.s32.totalorder %v9918_v63, %v9170_v15  ;;  %vm984_vm2 = vcmp.eq.s32.totalorder %v9918_v63, %v9248_v25 }
 0x4bd   : > { %7901 = vmatmul.mubr.msk.f32.gmra.mxu1 %vm1637_vm12, %v8166_v57  ;;  %vm1012_vm9 = vmand %vm13514_vm3, %vm9945_vm0  ;;  %vm13516_vm3 = vcmp.eq.s32.totalorder %v9918_v63, %v9260_v26 }
 0x4be   : > { %7684 = vmatprep.mubr.msk.f32.mxu0 %vm1012_vm9, %v8166_v57  ;;  %vm1638_vm7 = vmand %vm13696_vm14, %vm10022_vm10  ;;  %vm13697_vm9 = vcmp.eq.s32.totalorder %v9918_v63, %v9182_v16 }
 0x4bf   : > { %7903 = vmatprep.mubr.msk.f32.mxu1 %vm1638_vm7, %v8166_v57  ;;  %vm1013_vm12 = vmand %vm13515_vm1, %vm9945_vm0  ;;  %vm4088_vm1 = vcmask 130048  }
 0x4c0   : > { %7685 = vmatmul.mubr.msk.f32.gmra.mxu0 %vm1013_vm12, %v8166_v57  ;;  %vm1639_vm14 = vmand %vm13697_vm9, %vm10022_vm10  ;;  %vm986_vm9 = vcmp.eq.s32.totalorder %v9918_v63, %v9275_v31 }
 0x4c1   : > { %7904 = vmatmul.mubr.msk.f32.gmra.mxu1 %vm1639_vm14, %v8166_v57  ;;  %vm1014_vm7 = vmand %vm984_vm2, %vm9945_vm0  ;;  %v7545_v38 = vpop.f32.mrf.mxu0 }
 0x4c2   : > { %7687 = vmatprep.mubr.msk.f32.mxu0 %vm1014_vm7, %v8166_v57  ;;  %vm1640_vm12 = vmand %vm980_vm6, %vm10022_vm10  ;;  %v3789_v40 = vadd.f32 %v7545_v38, %v1924_v4  ;;  %vm13698_vm6 = vcmp.eq.s32.totalorder %v9918_v63, %v9208_v22  ;;  %v2074_v4 = vld [vmem:[#allocation2 + $0x4b8] sm:$0xff] }
 0x4c3   : > { %7906 = vmatprep.mubr.msk.f32.mxu1 %vm1640_vm12, %v8166_v57  ;;  %vm1015_vm14 = vmand %vm13516_vm3, %vm9945_vm0  ;;  %v2289_v33 = vpop.f32.mrf.mxu0  ;;  %vm987_vm12 = vcmp.eq.s32.totalorder %v9918_v63, %v9287_v32 }
 0x4c4   : > { %4090 = vst.msk [vmem:[#allocation2 + $0x8] sm:$0xff] %vm4088_vm1, %v3789_v40  ;;  %7688 = vmatmul.mubr.msk.f32.gmra.mxu0 %vm1015_vm14, %v8166_v57  ;;  %vm1641_vm7 = vmand %vm13698_vm6, %vm10022_vm10  ;;  %v3788_v46 = vadd.f32 %v2289_v33, %v1923_v5  ;;  %vm13699_vm14 = vcmp.eq.s32.totalorder %v9918_v63, %v9222_v23  ;;  %v2073_v40 = vld [vmem:[#allocation2 + $0x4b0] sm:$0xff]  ;;  %v10350_v33 = vrot.slane %v6733_v35, %v8853_v17 }
 0x4c5   : > { %7907 = vmatmul.mubr.msk.f32.gmra.mxu1 %vm1641_vm7, %v8166_v57  ;;  %vm1016_vm3 = vmand %vm986_vm9, %vm9945_vm0  ;;  %v7548_v6 = vpop.f32.mrf.mxu0 }
 0x4c6   : > { %7690 = vmatprep.mubr.msk.f32.mxu0 %vm1016_vm3, %v8166_v57  ;;  %vm1642_vm6 = vmand %vm13699_vm14, %vm10022_vm10  ;;  %4089 = vst.msk [vmem:[#allocation2] sm:$0xff] %vm4088_vm1, %v3788_v46  ;;  %v3791_v53 = vadd.f32 %v7548_v6, %v1926_v44  ;;  %vm13700_vm3 = vcmp.eq.s32.totalorder %v9918_v63, %v9234_v24  ;;  %v1930_v6 = vld [vmem:[#allocation2 + $0x38] sm:$0xff] }
 0x4c7   : > { %7909 = vmatprep.mubr.msk.f32.mxu1 %vm1642_vm6, %v8166_v57  ;;  %vm1017_vm7 = vmand %vm987_vm12, %vm9945_vm0  ;;  %v2299_v56 = vpop.f32.mrf.mxu0  ;;  %vm13701_vm0 = vcmp.eq.s32.totalorder %v9626_v54, %v8841_v12 }
 0x4c8   : > { %4092 = vst.msk [vmem:[#allocation2 + $0x18] sm:$0xff] %vm4088_vm1, %v3791_v53  ;;  %7691 = vmatmul.mubr.msk.f32.gmra.mxu0 %vm1017_vm7, %v8166_v57  ;;  %vm1643_vm14 = vmand %vm13700_vm3, %vm10022_vm10  ;;  %v3790_v1 = vadd.f32 %v2299_v56, %v1925_v49  ;;  %vm13702_vm3 = vcmp.eq.s32.totalorder %v9626_v54, %v8966_v37  ;;  %v2076_v53 = vld [vmem:[#allocation2 + $0x4c8] sm:$0xff] }
 0x4c9   : > { %7910 = vmatmul.mubr.msk.f32.gmra.mxu1 %vm1643_vm14, %v8166_v57  ;;  %vm1102_vm6 = vmand %vm13701_vm0, %vm9821_vm13  ;;  %v7551_v39 = vpop.f32.mrf.mxu0 }
 0x4ca   : > { %7693 = vmatprep.mubr.msk.f32.mxu0 %vm1102_vm6, %v8166_v57  ;;  %vm1644_vm7 = vmand %vm984_vm2, %vm10022_vm10  ;;  %4091 = vst.msk [vmem:[#allocation2 + $0x10] sm:$0xff] %vm4088_vm1, %v3790_v1  ;;  %v3793_v38 = vadd.f32 %v7551_v39, %v1928_v62  ;;  %v7770_v5 = vpop.f32.mrf.mxu1  ;;  %vm13703_vm2 = vcmp.eq.s32.totalorder %v9918_v63, %v9260_v26  ;;  %vm13704_vm6 = vcmp.eq.s32.totalorder %v9626_v54, %v8969_v41  ;;  %v1929_v62 = vld [vmem:[#allocation2 + $0x30] sm:$0xff]  ;;  %v2075_v39 = vld [vmem:[#allocation2 + $0x4c0] sm:$0xff] }
 0x4cb   : > { %7912 = vmatprep.mubr.msk.f32.mxu1 %vm1644_vm7, %v8166_v57  ;;  %vm1103_vm14 = vmand %vm13702_vm3, %vm9821_vm13  ;;  %v3939_v44 = vadd.f32 %v7770_v5, %v2074_v4  ;;  %v2309_v46 = vpop.f32.mrf.mxu0  ;;  %v1931_v63 = vld [vmem:[#allocation2 + $0x40] sm:$0xff] }
 0x4cc   : > { %4094 = vst.msk [vmem:[#allocation2 + $0x28] sm:$0xff] %vm4088_vm1, %v3793_v38  ;;  %7694 = vmatmul.mubr.msk.f32.gmra.mxu0 %vm1103_vm14, %v8166_v57  ;;  %vm1645_vm0 = vmand %vm13703_vm2, %vm10022_vm10  ;;  %v3792_v19 = vadd.f32 %v2309_v46, %v1927_v34  ;;  %v3039_v49 = vpop.f32.mrf.mxu1  ;;  %vm10379_vm14 = vcmp.eq.s32.totalorder %v1736_v42, 1  ;;  %vm13707_vm2 = vcmp.eq.s32.totalorder %v9626_v54, %v8977_v43  ;;  %v2078_v46 = vld [vmem:[#allocation2 + $0x4d8] sm:$0xff] }
 0x4cd   : > { %4240 = vst.msk [vmem:[#allocation2 + $0x4b8] sm:$0xff] %vm4088_vm1, %v3939_v44  ;;  %7913 = vmatmul.mubr.msk.f32.gmra.mxu1 %vm1645_vm0, %v8166_v57  ;;  %vm1104_vm7 = vmand %vm13704_vm6, %vm9821_vm13  ;;  %v3938_v35 = vadd.f32 %v3039_v49, %v2073_v40  ;;  %v7554_v56 = vpop.f32.mrf.mxu0  ;;  %v1932_v40 = vld [vmem:[#allocation2 + $0x48] sm:$0xff] }
 0x4ce   : > { %7696 = vmatprep.mubr.msk.f32.mxu0 %vm1104_vm7, %v8166_v57  ;;  %vm1646_vm3 = vmand %vm986_vm9, %vm10022_vm10  ;;  %4093 = vst.msk [vmem:[#allocation2 + $0x20] sm:$0xff] %vm4088_vm1, %v3792_v19  ;;  %v3795_v1 = vadd.f32 %v7554_v56, %v1930_v6  ;;  %v7773_v4 = vpop.f32.mrf.mxu1  ;;  %vm1707_vm9 = vcmp.eq.s32.totalorder %v10350_v33, %v8841_v12  ;;  %vm13708_vm7 = vcmp.eq.s32.totalorder %v9626_v54, %v8987_v47 }
 0x4cf   : > { %7915 = vmatprep.mubr.msk.f32.mxu1 %vm1646_vm3, %v8166_v57  ;;  %4239 = vst.msk [vmem:[#allocation2 + $0x4b0] sm:$0xff] %vm4088_vm1, %v3938_v35  ;;  %vm1105_vm0 = vmand %vm13707_vm2, %vm9821_vm13  ;;  %v3941_v38 = vadd.f32 %v7773_v4, %v2076_v53  ;;  %v2319_v5 = vpop.f32.mrf.mxu0  ;;  %vm1708_vm2 = vcmp.eq.s32.totalorder %v10350_v33, %v8966_v37  ;;  %v2077_v53 = vld [vmem:[#allocation2 + $0x4d0] sm:$0xff] }
 0x4d0   : > { %4096 = vst.msk [vmem:[#allocation2 + $0x38] sm:$0xff] %vm4088_vm1, %v3795_v1  ;;  %7697 = vmatmul.mubr.msk.f32.gmra.mxu0 %vm1105_vm0, %v8166_v57  ;;  %vm1647_vm6 = vmand %vm987_vm12, %vm10022_vm10  ;;  %v3794_v42 = vadd.f32 %v2319_v5, %v1929_v62  ;;  %v3049_v44 = vpop.f32.mrf.mxu1  ;;  %vm13709_vm12 = vcmp.eq.s32.totalorder %v9626_v54, %v8992_v50  ;;  %v1934_v62 = vld [vmem:[#allocation2 + $0x58] sm:$0xff] }
 0x4d1   : > { %4242 = vst.msk [vmem:[#allocation2 + $0x4c8] sm:$0xff] %vm4088_vm1, %v3941_v38  ;;  %7916 = vmatmul.mubr.msk.f32.gmra.mxu1 %vm1647_vm6, %v8166_v57  ;;  %vm1106_vm3 = vmand %vm13708_vm7, %vm9821_vm13  ;;  %v3940_v6 = vadd.f32 %v3049_v44, %v2075_v39  ;;  %v7557_v19 = vpop.f32.mrf.mxu0  ;;  %vm1709_vm6 = vcmp.eq.s32.totalorder %v10350_v33, %v8969_v41  ;;  %v2080_v39 = vld [vmem:[#allocation2 + $0x4e8] sm:$0xff]  ;;  %vm13710_vm7 = vcmp.eq.s32.totalorder %v9626_v54, %v8995_v51 }
 0x4d2   : > { %7699 = vmatprep.mubr.msk.f32.mxu0 %vm1106_vm3, %v8166_v57  ;;  %vm1738_vm10 = vmand %vm1707_vm9, %vm10379_vm14  ;;  %4095 = vst.msk [vmem:[#allocation2 + $0x30] sm:$0xff] %vm4088_vm1, %v3794_v42  ;;  %v3797_v2 = vadd.f32 %v7557_v19, %v1932_v40  ;;  %v7776_v49 = vpop.f32.mrf.mxu1  ;;  %v1933_v40 = vld [vmem:[#allocation2 + $0x50] sm:$0xff] }
 0x4d3   : > { %7918 = vmatprep.mubr.msk.f32.mxu1 %vm1738_vm10, %v8166_v57  ;;  %4241 = vst.msk [vmem:[#allocation2 + $0x4c0] sm:$0xff] %vm4088_vm1, %v3940_v6  ;;  %vm1107_vm0 = vmand %vm13709_vm12, %vm9821_vm13  ;;  %v3943_v35 = vadd.f32 %v7776_v49, %v2078_v46  ;;  %v2329_v56 = vpop.f32.mrf.mxu0  ;;  %vm1710_vm10 = vcmp.eq.s32.totalorder %v10350_v33, %v8977_v43  ;;  %v2079_v46 = vld [vmem:[#allocation2 + $0x4e0] sm:$0xff]  ;;  %vm13711_vm12 = vcmp.eq.s32.totalorder %v9626_v54, %v9004_v52 }
 0x4d4   : > { %4098 = vst.msk [vmem:[#allocation2 + $0x48] sm:$0xff] %vm4088_vm1, %v3797_v2  ;;  %7700 = vmatmul.mubr.msk.f32.gmra.mxu0 %vm1107_vm0, %v8166_v57  ;;  %vm1739_vm9 = vmand %vm1708_vm2, %vm10379_vm14  ;;  %v3796_v1 = vadd.f32 %v2329_v56, %v1931_v63  ;;  %v3059_v4 = vpop.f32.mrf.mxu1  ;;  %v1936_v63 = vld [vmem:[#allocation2 + $0x68] sm:$0xff] }
 0x4d5   : > { %4244 = vst.msk [vmem:[#allocation2 + $0x4d8] sm:$0xff] %vm4088_vm1, %v3943_v35  ;;  %7919 = vmatmul.mubr.msk.f32.gmra.mxu1 %vm1739_vm9, %v8166_v57  ;;  %vm1108_vm3 = vmand %vm13710_vm7, %vm9821_vm13  ;;  %v3942_v38 = vadd.f32 %v3059_v4, %v2077_v53  ;;  %v7560_v5 = vpop.f32.mrf.mxu0  ;;  %vm1711_vm9 = vcmp.eq.s32.totalorder %v10350_v33, %v8987_v47  ;;  %v2082_v53 = vld [vmem:[#allocation2 + $0x4f8] sm:$0xff]  ;;  %vm13712_vm7 = vcmp.eq.s32.totalorder %v9626_v54, %v9021_v58 }
 0x4d6   : > { %7702 = vmatprep.mubr.msk.f32.mxu0 %vm1108_vm3, %v8166_v57  ;;  %vm1740_vm2 = vmand %vm1709_vm6, %vm10379_vm14  ;;  %4097 = vst.msk [vmem:[#allocation2 + $0x40] sm:$0xff] %vm4088_vm1, %v3796_v1  ;;  %v3799_v42 = vadd.f32 %v7560_v5, %v1934_v62  ;;  %v7779_v44 = vpop.f32.mrf.mxu1  ;;  %v1935_v62 = vld [vmem:[#allocation2 + $0x60] sm:$0xff] }
 0x4d7   : > { %7921 = vmatprep.mubr.msk.f32.mxu1 %vm1740_vm2, %v8166_v57  ;;  %4243 = vst.msk [vmem:[#allocation2 + $0x4d0] sm:$0xff] %vm4088_vm1, %v3942_v38  ;;  %vm1109_vm0 = vmand %vm13711_vm12, %vm9821_vm13  ;;  %v3945_v6 = vadd.f32 %v7779_v44, %v2080_v39  ;;  %v2339_v19 = vpop.f32.mrf.mxu0  ;;  %vm1712_vm2 = vcmp.eq.s32.totalorder %v10350_v33, %v8992_v50  ;;  %v2081_v39 = vld [vmem:[#allocation2 + $0x4f0] sm:$0xff]  ;;  %vm13713_vm12 = vcmp.eq.s32.totalorder %v9626_v54, %v9076_v3 }
 0x4d8   : > { %4100 = vst.msk [vmem:[#allocation2 + $0x58] sm:$0xff] %vm4088_vm1, %v3799_v42  ;;  %7703 = vmatmul.mubr.msk.f32.gmra.mxu0 %vm1109_vm0, %v8166_v57  ;;  %vm1741_vm6 = vmand %vm1710_vm10, %vm10379_vm14  ;;  %v3798_v2 = vadd.f32 %v2339_v19, %v1933_v40  ;;  %v3069_v49 = vpop.f32.mrf.mxu1  ;;  %v1938_v40 = vld [vmem:[#allocation2 + $0x78] sm:$0xff] }
 0x4d9   : > { %4246 = vst.msk [vmem:[#allocation2 + $0x4e8] sm:$0xff] %vm4088_vm1, %v3945_v6  ;;  %7922 = vmatmul.mubr.msk.f32.gmra.mxu1 %vm1741_vm6, %v8166_v57  ;;  %vm1110_vm3 = vmand %vm13712_vm7, %vm9821_vm13  ;;  %v3944_v35 = vadd.f32 %v3069_v49, %v2079_v46  ;;  %v7563_v56 = vpop.f32.mrf.mxu0  ;;  %vm1713_vm6 = vcmp.eq.s32.totalorder %v10350_v33, %v8995_v51  ;;  %v2084_v46 = vld [vmem:[#allocation2 + $0x508] sm:$0xff]  ;;  %vm13714_vm7 = vcmp.eq.s32.totalorder %v9626_v54, %v9095_v8 }
 0x4da   : > { %7705 = vmatprep.mubr.msk.f32.mxu0 %vm1110_vm3, %v8166_v57  ;;  %vm1742_vm10 = vmand %vm1711_vm9, %vm10379_vm14  ;;  %4099 = vst.msk [vmem:[#allocation2 + $0x50] sm:$0xff] %vm4088_vm1, %v3798_v2  ;;  %v3801_v1 = vadd.f32 %v7563_v56, %v1936_v63  ;;  %v7782_v4 = vpop.f32.mrf.mxu1  ;;  %v1937_v63 = vld [vmem:[#allocation2 + $0x70] sm:$0xff] }
 0x4db   : > { %7924 = vmatprep.mubr.msk.f32.mxu1 %vm1742_vm10, %v8166_v57  ;;  %4245 = vst.msk [vmem:[#allocation2 + $0x4e0] sm:$0xff] %vm4088_vm1, %v3944_v35  ;;  %vm1111_vm0 = vmand %vm13713_vm12, %vm9821_vm13  ;;  %v3947_v38 = vadd.f32 %v7782_v4, %v2082_v53  ;;  %v2349_v5 = vpop.f32.mrf.mxu0  ;;  %vm1714_vm10 = vcmp.eq.s32.totalorder %v10350_v33, %v9004_v52  ;;  %v2083_v53 = vld [vmem:[#allocation2 + $0x500] sm:$0xff]  ;;  %vm13715_vm12 = vcmp.eq.s32.totalorder %v9626_v54, %v9114_v9 }
 0x4dc   : > { %4102 = vst.msk [vmem:[#allocation2 + $0x68] sm:$0xff] %vm4088_vm1, %v3801_v1  ;;  %7706 = vmatmul.mubr.msk.f32.gmra.mxu0 %vm1111_vm0, %v8166_v57  ;;  %vm1743_vm9 = vmand %vm1712_vm2, %vm10379_vm14  ;;  %v3800_v42 = vadd.f32 %v2349_v5, %v1935_v62  ;;  %v3079_v44 = vpop.f32.mrf.mxu1  ;;  %v1940_v62 = vld [vmem:[#allocation2 + $0x88] sm:$0xff] }
 0x4dd   : > { %4248 = vst.msk [vmem:[#allocation2 + $0x4f8] sm:$0xff] %vm4088_vm1, %v3947_v38  ;;  %7925 = vmatmul.mubr.msk.f32.gmra.mxu1 %vm1743_vm9, %v8166_v57  ;;  %vm1112_vm3 = vmand %vm13714_vm7, %vm9821_vm13  ;;  %v3946_v6 = vadd.f32 %v3079_v44, %v2081_v39  ;;  %v7566_v19 = vpop.f32.mrf.mxu0  ;;  %vm1715_vm9 = vcmp.eq.s32.totalorder %v10350_v33, %v9021_v58  ;;  %v2086_v39 = vld [vmem:[#allocation2 + $0x518] sm:$0xff]  ;;  %vm1716_vm7 = vcmp.eq.s32.totalorder %v10350_v33, %v9076_v3 }
 0x4de   : > { %7708 = vmatprep.mubr.msk.f32.mxu0 %vm1112_vm3, %v8166_v57  ;;  %vm1744_vm2 = vmand %vm1713_vm6, %vm10379_vm14  ;;  %4101 = vst.msk [vmem:[#allocation2 + $0x60] sm:$0xff] %vm4088_vm1, %v3800_v42  ;;  %v3803_v2 = vadd.f32 %v7566_v19, %v1938_v40  ;;  %v7785_v49 = vpop.f32.mrf.mxu1  ;;  %vm13716_vm3 = vcmp.eq.s32.totalorder %v9626_v54, %v9126_v10  ;;  %v1939_v40 = vld [vmem:[#allocation2 + $0x80] sm:$0xff] }
 0x4df   : > { %7927 = vmatprep.mubr.msk.f32.mxu1 %vm1744_vm2, %v8166_v57  ;;  %4247 = vst.msk [vmem:[#allocation2 + $0x4f0] sm:$0xff] %vm4088_vm1, %v3946_v6  ;;  %vm1113_vm0 = vmand %vm13715_vm12, %vm9821_vm13  ;;  %v3949_v35 = vadd.f32 %v7785_v49, %v2084_v46  ;;  %v2359_v56 = vpop.f32.mrf.mxu0  ;;  %vm1717_vm12 = vcmp.eq.s32.totalorder %v10350_v33, %v9095_v8  ;;  %v2085_v46 = vld [vmem:[#allocation2 + $0x510] sm:$0xff]  ;;  %v1183_v6 = vpop.permute.xlu0 %1182 }
 0x4e0   : > { %4104 = vst.msk [vmem:[#allocation2 + $0x78] sm:$0xff] %vm4088_vm1, %v3803_v2  ;;  %7709 = vmatmul.mubr.msk.f32.gmra.mxu0 %vm1113_vm0, %v8166_v57  ;;  %vm1745_vm6 = vmand %vm1714_vm10, %vm10379_vm14  ;;  %v3802_v1 = vadd.f32 %v2359_v56, %v1937_v63  ;;  %v3089_v4 = vpop.f32.mrf.mxu1  ;;  %v1942_v2 = vld [vmem:[#allocation2 + $0x98] sm:$0xff] }
 0x4e1   : > { %4250 = vst.msk [vmem:[#allocation2 + $0x508] sm:$0xff] %vm4088_vm1, %v3949_v35  ;;  %7928 = vmatmul.mubr.msk.f32.gmra.mxu1 %vm1745_vm6, %v8166_v57  ;;  %vm1114_vm2 = vmand %vm13716_vm3, %vm9821_vm13  ;;  %v3948_v38 = vadd.f32 %v3089_v4, %v2083_v53  ;;  %v7569_v5 = vpop.f32.mrf.mxu0  ;;  %vm13717_vm6 = vcmp.eq.s32.totalorder %v9626_v54, %v9156_v14  ;;  %v2088_v35 = vld [vmem:[#allocation2 + $0x528] sm:$0xff] }
 0x4e2   : > { %7711 = vmatprep.mubr.msk.f32.mxu0 %vm1114_vm2, %v8166_v57  ;;  %vm1746_vm10 = vmand %vm1715_vm9, %vm10379_vm14  ;;  %4103 = vst.msk [vmem:[#allocation2 + $0x70] sm:$0xff] %vm4088_vm1, %v3802_v1  ;;  %v3805_v42 = vadd.f32 %v7569_v5, %v1940_v62  ;;  %v7788_v44 = vpop.f32.mrf.mxu1  ;;  %vm1718_vm9 = vcmp.eq.s32.totalorder %v10350_v33, %v9114_v9  ;;  %v1941_v62 = vld [vmem:[#allocation2 + $0x90] sm:$0xff]  ;;  %v1184_v1 = vadd.s32 %v1183_v6, %v1179_v55  ;;  %v2087_v5 = vld [vmem:[#allocation2 + $0x520] sm:$0xff] }
 0x4e3   : > { %7930 = vmatprep.mubr.msk.f32.mxu1 %vm1746_vm10, %v8166_v57  ;;  %4249 = vst.msk [vmem:[#allocation2 + $0x500] sm:$0xff] %vm4088_vm1, %v3948_v38  ;;  %v3951_v19 = vadd.f32 %v7788_v44, %v2086_v39  ;;  %vm1747_vm0 = vmand %vm1716_vm7, %vm10379_vm14  ;;  %v2369_v63 = vpop.f32.mrf.mxu0  ;;  %vm1719_vm7 = vcmp.eq.s32.totalorder %v10350_v33, %v9126_v10  ;;  %vm1720_vm10 = vcmp.eq.s32.totalorder %v10350_v33, %v9144_v13  ;;  %v1944_v55 = vld [vmem:[#allocation2 + $0xa8] sm:$0xff]  ;;  %v2090_v44 = vld [vmem:[#allocation2 + $0x538] sm:$0xff] }
 0x4e4   : > { %4106 = vst.msk [vmem:[#allocation2 + $0x88] sm:$0xff] %vm4088_vm1, %v3805_v42  ;;  %7712 = vmatmul.mubr.msk.f32.gmra.mxu0 %vm9844_vm15, %v8166_v57  ;;  %vm1116_vm3 = vmand %vm13717_vm6, %vm9821_vm13  ;;  %v3804_v49 = vadd.f32 %v2369_v63, %v1939_v40  ;;  %v3099_v53 = vpop.f32.mrf.mxu1  ;;  %vm1721_vm6 = vcmp.eq.s32.totalorder %v10350_v33, %v9156_v14  ;;  %v6605_v63 = vadd.s32 4294967295, %v1184_v1  ;;  %v1946_v1 = vld [vmem:[#allocation2 + $0xb8] sm:$0xff]  ;;  %v2092_v38 = vld [vmem:[#allocation2 + $0x548] sm:$0xff] }
 0x4e5   : > { %4252 = vst.msk [vmem:[#allocation2 + $0x518] sm:$0xff] %vm4088_vm1, %v3951_v19  ;;  %7931 = vmatmul.mubr.msk.f32.gmra.mxu1 %vm1747_vm0, %v8166_v57  ;;  %7714 = vmatprep.mubr.msk.f32.mxu0 %vm1116_vm3, %v8166_v57  ;;  %vm1748_vm15 = vmand %vm1717_vm12, %vm10379_vm14  ;;  %v3950_v59 = vadd.f32 %v3099_v53, %v2085_v46  ;;  %v7572_v56 = vpop.f32.mrf.mxu0  ;;  %vm13720_vm12 = vcmp.eq.s32.totalorder %v9626_v54, %v9182_v16  ;;  %v1943_v19 = vld [vmem:[#allocation2 + $0xa0] sm:$0xff] }
 0x4e6   : > { %7933 = vmatprep.mubr.msk.f32.mxu1 %vm1748_vm15, %v8166_v57  ;;  %4105 = vst.msk [vmem:[#allocation2 + $0x80] sm:$0xff] %vm4088_vm1, %v3804_v49  ;;  %v3807_v4 = vadd.f32 %v7572_v56, %v1942_v2  ;;  %v7791_v39 = vpop.f32.mrf.mxu1  ;;  %vm10583_vm2 = vmand %vm1718_vm9, %vm10379_vm14  ;;  %vm1722_vm3 = vcmp.eq.s32.totalorder %v10350_v33, %v9170_v15  ;;  %vm13723_vm15 = vcmp.eq.s32.totalorder %v9626_v54, %v9208_v22 }
 0x4e7   : > { %4251 = vst.msk [vmem:[#allocation2 + $0x510] sm:$0xff] %vm4088_vm1, %v3950_v59  ;;  %v3953_v30 = vadd.f32 %v7791_v39, %v2088_v35  ;;  %vm1118_vm0 = vmand %vm13720_vm12, %vm9821_vm13  ;;  %v2379_v48 = vpop.f32.mrf.mxu0  ;;  %v2089_v35 = vld [vmem:[#allocation2 + $0x530] sm:$0xff] }
 0x4e8   : > { %4108 = vst.msk [vmem:[#allocation2 + $0x98] sm:$0xff] %vm4088_vm1, %v3807_v4  ;;  %7715 = vmatmul.mubr.msk.f32.gmra.mxu0 %vm9874_vm8, %v8166_v57  ;;  %vm1750_vm9 = vmand %vm1719_vm7, %vm10379_vm14  ;;  %v3806_v40 = vadd.f32 %v2379_v48, %v1941_v62  ;;  %v3109_v42 = vpop.f32.mrf.mxu1 }
 0x4e9   : > { %4254 = vst.msk [vmem:[#allocation2 + $0x528] sm:$0xff] %vm4088_vm1, %v3953_v30  ;;  %7934 = vmatmul.mubr.msk.f32.gmra.mxu1 %vm10583_vm2, %v8166_v57  ;;  %7717 = vmatprep.mubr.msk.f32.mxu0 %vm1118_vm0, %v8166_v57  ;;  %v3952_v61 = vadd.f32 %v3109_v42, %v2087_v5  ;;  %v7575_v46 = vpop.f32.mrf.mxu0  ;;  %vm10616_vm8 = vmand %vm1720_vm10, %vm10379_vm14  ;;  %vm1723_vm10 = vcmp.eq.s32.totalorder %v10350_v33, %v9182_v16  ;;  %v2093_v5 = vld [vmem:[#allocation2 + $0x550] sm:$0xff] }
 0x4ea   : > { %7936 = vmatprep.mubr.msk.f32.mxu1 %vm1750_vm9, %v8166_v57  ;;  %4107 = vst.msk [vmem:[#allocation2 + $0x90] sm:$0xff] %vm4088_vm1, %v3806_v40  ;;  %v3809_v2 = vadd.f32 %v7575_v46, %v1944_v55  ;;  %v7794_v49 = vpop.f32.mrf.mxu1  ;;  %vm10629_vm7 = vmand %vm13723_vm15, %vm9821_vm13  ;;  %vm1724_vm0 = vcmp.eq.s32.totalorder %v10350_v33, %v9196_v18  ;;  %v1945_v55 = vld [vmem:[#allocation2 + $0xb0] sm:$0xff]  ;;  %v1219_v40 = vrot.slane %v8885_v28, %v8853_v17  ;;  %v2091_v28 = vld [vmem:[#allocation2 + $0x540] sm:$0xff] }
 0x4eb   : > { %4253 = vst.msk [vmem:[#allocation2 + $0x520] sm:$0xff] %vm4088_vm1, %v3952_v61  ;;  %v3955_v59 = vadd.f32 %v7794_v49, %v2090_v44  ;;  %vm10639_vm2 = vmand %vm1721_vm6, %vm10379_vm14  ;;  %v2389_v62 = vpop.f32.mrf.mxu0  ;;  %v10679_v42 = vrot.slane %v6605_v63, %v8853_v17  ;;  %v1948_v63 = vld [vmem:[#allocation2 + $0xc8] sm:$0xff]  ;;  %vm1726_vm15 = vcmp.eq.s32.totalorder %v10350_v33, %v9222_v23 }
 0x4ec   : > { %4110 = vst.msk [vmem:[#allocation2 + $0xa8] sm:$0xff] %vm4088_vm1, %v3809_v2  ;;  %7718 = vmatmul.mubr.msk.f32.gmra.mxu0 %vm9903_vm11, %v8166_v57  ;;  %v3808_v4 = vadd.f32 %v2389_v62, %v1943_v19  ;;  %v3119_v39 = vpop.f32.mrf.mxu1  ;;  %vm10654_vm12 = vmand %vm1722_vm3, %vm10379_vm14  ;;  %vm13730_vm11 = vcmp.eq.s32.totalorder %v9626_v54, %v9234_v24  ;;  %v2096_v46 = vld [vmem:[#allocation2 + $0x568] sm:$0xff]  ;;  %v2095_v2 = vld [vmem:[#allocation2 + $0x560] sm:$0xff] }
 0x4ed   : > { %4256 = vst.msk [vmem:[#allocation2 + $0x538] sm:$0xff] %vm4088_vm1, %v3955_v59  ;;  %7937 = vmatmul.mubr.msk.f32.gmra.mxu1 %vm10616_vm8, %v8166_v57  ;;  %7720 = vmatprep.mubr.msk.f32.mxu0 %vm10629_vm7, %v8166_v57  ;;  %v3954_v29 = vadd.f32 %v3119_v39, %v2089_v35  ;;  %v7578_v30 = vpop.f32.mrf.mxu0  ;;  %vm10672_vm9 = vmand %vm13730_vm11, %vm9821_vm13  ;;  %vm1725_vm8 = vcmp.eq.s32.totalorder %v10350_v33, %v9208_v22  ;;  %v2094_v35 = vld [vmem:[#allocation2 + $0x558] sm:$0xff] }
 0x4ee   : > { %7939 = vmatprep.mubr.msk.f32.mxu1 %vm10639_vm2, %v8166_v57  ;;  %4109 = vst.msk [vmem:[#allocation2 + $0xa0] sm:$0xff] %vm4088_vm1, %v3808_v4  ;;  %v3811_v44 = vadd.f32 %v7578_v30, %v1946_v1  ;;  %v7797_v61 = vpop.f32.mrf.mxu1  ;;  %vm10690_vm6 = vmand %vm1723_vm10, %vm10379_vm14  ;;  %vm13737_vm7 = vcmp.eq.s32.totalorder %v9626_v54, %v9260_v26  ;;  %v1947_v1 = vld [vmem:[#allocation2 + $0xc0] sm:$0xff]  ;;  %vm1727_vm10 = vcmp.eq.s32.totalorder %v10350_v33, %v9234_v24 }
 0x4ef   : > { %4255 = vst.msk [vmem:[#allocation2 + $0x530] sm:$0xff] %vm4088_vm1, %v3954_v29  ;;  %v3957_v6 = vadd.f32 %v7797_v61, %v2092_v38  ;;  %v2399_v19 = vpop.f32.mrf.mxu0  ;;  %vm10702_vm3 = vmand %vm1724_vm0, %vm10379_vm14  ;;  %vm1190_vm11 = vcmp.eq.s32.totalorder %v10679_v42, %v8841_v12 }
 0x4f0   : > { %4112 = vst.msk [vmem:[#allocation2 + $0xb8] sm:$0xff] %vm4088_vm1, %v3811_v44  ;;  %7721 = vmatmul.mubr.msk.f32.gmra.mxu0 %vm9939_vm4, %v8166_v57  ;;  %v3810_v49 = vadd.f32 %v2399_v19, %v1945_v55  ;;  %v3129_v53 = vpop.f32.mrf.mxu1  ;;  %vm10717_vm2 = vmand %vm13737_vm7, %vm9821_vm13  ;;  %v1950_v55 = vld [vmem:[#allocation2 + $0xd8] sm:$0xff]  ;;  %vm1729_vm7 = vcmp.eq.s32.totalorder %v10350_v33, %v9260_v26 }
 0x4f1   : > { %4258 = vst.msk [vmem:[#allocation2 + $0x548] sm:$0xff] %vm4088_vm1, %v3957_v6  ;;  %7940 = vmatmul.mubr.msk.f32.gmra.mxu1 %vm10654_vm12, %v8166_v57  ;;  %7723 = vmatprep.mubr.msk.f32.mxu0 %vm10672_vm9, %v8166_v57  ;;  %v3956_v7 = vadd.f32 %v3129_v53, %v2091_v28  ;;  %v7581_v56 = vpop.f32.mrf.mxu0  ;;  %vm10733_vm4 = vmand %vm1725_vm8, %vm10379_vm14  ;;  %vm10739_vm12 = vcmp.eq.s32.totalorder %v1219_v40, 1  ;;  %vm13746_vm9 = vcmp.eq.s32.totalorder %v9626_v54, %v9287_v32  ;;  %v1949_v28 = vld [vmem:[#allocation2 + $0xd0] sm:$0xff]  ;;  %v1954_v54 = vld [vmem:[#allocation2 + $0xf8] sm:$0xff] }
 0x4f2   : > { %7942 = vmatprep.mubr.msk.f32.mxu1 %vm10690_vm6, %v8166_v57  ;;  %4111 = vst.msk [vmem:[#allocation2 + $0xb0] sm:$0xff] %vm4088_vm1, %v3810_v49  ;;  %v3813_v39 = vadd.f32 %v7581_v56, %v1948_v63  ;;  %v7800_v38 = vpop.f32.mrf.mxu1  ;;  %vm10752_vm0 = vmand %vm1726_vm15, %vm10379_vm14  ;;  %vm1728_vm8 = vcmp.eq.s32.totalorder %v10350_v33, %v9248_v25  ;;  %vm1191_vm15 = vcmp.eq.s32.totalorder %v10679_v42, %v8966_v37 }
 0x4f3   : > { %4257 = vst.msk [vmem:[#allocation2 + $0x540] sm:$0xff] %vm4088_vm1, %v3956_v7  ;;  %v3959_v30 = vadd.f32 %v7800_v38, %v2094_v35  ;;  %v2409_v48 = vpop.f32.mrf.mxu0  ;;  %vm10764_vm6 = vmand %vm13746_vm9, %vm9821_vm13  ;;  %v1846_v53 = vrot.slane %v8867_v20, %v8853_v17  ;;  %v1952_v7 = vld [vmem:[#allocation2 + $0xe8] sm:$0xff] }
 0x4f4   : > { %4114 = vst.msk [vmem:[#allocation2 + $0xc8] sm:$0xff] %vm4088_vm1, %v3813_v39  ;;  %7724 = vmatmul.mubr.msk.f32.gmra.mxu0 %vm9975_vm5, %v8166_v57  ;;  %v3812_v44 = vadd.f32 %v2409_v48, %v1947_v1  ;;  %v3139_v61 = vpop.f32.mrf.mxu1  ;;  %vm10779_vm13 = vmand %vm1727_vm10, %vm10379_vm14  ;;  %vm1730_vm10 = vcmp.eq.s32.totalorder %v10350_v33, %v9275_v31  ;;  %v2098_v1 = vld [vmem:[#allocation2 + $0x578] sm:$0xff] }
 0x4f5   : > { %4260 = vst.msk [vmem:[#allocation2 + $0x558] sm:$0xff] %vm4088_vm1, %v3959_v30  ;;  %7943 = vmatmul.mubr.msk.f32.gmra.mxu1 %vm10702_vm3, %v8166_v57  ;;  %7726 = vmatprep.mubr.msk.f32.mxu0 %vm10717_vm2, %v8166_v57  ;;  %v3958_v11 = vadd.f32 %v3139_v61, %v2093_v5  ;;  %v7584_v0 = vpop.f32.mrf.mxu0  ;;  %vm10797_vm5 = vmand %vm1190_vm11, %vm10739_vm12  ;;  %vm1192_vm2 = vcmp.eq.s32.totalorder %v10679_v42, %v8969_v41  ;;  %vm13757_vm11 = vnez %v13681_v36  ;;  %v1951_v5 = vld [vmem:[#allocation2 + $0xe0] sm:$0xff] }
 0x4f6   : > { %7945 = vmatprep.mubr.msk.f32.mxu1 %vm10733_vm4, %v8166_v57  ;;  %4113 = vst.msk [vmem:[#allocation2 + $0xc0] sm:$0xff] %vm4088_vm1, %v3812_v44  ;;  %v3815_v19 = vadd.f32 %v7584_v0, %v1950_v55  ;;  %v7803_v63 = vpop.f32.mrf.mxu1  ;;  %vm10812_vm3 = vmand %vm1728_vm8, %vm10379_vm14  ;;  %vm1193_vm8 = vcmp.eq.s32.totalorder %v10679_v42, %v8977_v43  ;;  %v2097_v55 = vld [vmem:[#allocation2 + $0x570] sm:$0xff] }
 0x4f7   : > { %4259 = vst.msk [vmem:[#allocation2 + $0x550] sm:$0xff] %vm4088_vm1, %v3958_v11  ;;  %v3961_v35 = vadd.f32 %v7803_v63, %v2096_v46  ;;  %v2419_v59 = vpop.f32.mrf.mxu0  ;;  %vm10826_vm4 = vmand %vm1191_vm15, %vm10739_vm12 }
 0x4f8   : > { %4116 = vst.msk [vmem:[#allocation2 + $0xd8] sm:$0xff] %vm4088_vm1, %v3815_v19  ;;  %7727 = vmatmul.mubr.msk.f32.gmra.mxu0 %vm13757_vm11, %v8166_v57  ;;  %v3814_v20 = vadd.f32 %v2419_v59, %v1949_v28  ;;  %v3149_v62 = vpop.f32.mrf.mxu1  ;;  %vm10841_vm9 = vmand %vm1729_vm7, %vm10379_vm14  ;;  %vm1731_vm7 = vcmp.eq.s32.totalorder %v10350_v33, %v9287_v32  ;;  %v2100_v19 = vld [vmem:[#allocation2 + $0x588] sm:$0xff]  ;;  %v1953_v33 = vld [vmem:[#allocation2 + $0xf0] sm:$0xff] }
 0x4f9   : > { %4262 = vst.msk [vmem:[#allocation2 + $0x568] sm:$0xff] %vm4088_vm1, %v3961_v35  ;;  %7946 = vmatmul.mubr.msk.f32.gmra.mxu1 %vm10752_vm0, %v8166_v57  ;;  %7729 = vmatprep.mubr.msk.f32.mxu0 %vm10764_vm6, %v8166_v57  ;;  %v3960_v36 = vadd.f32 %v3149_v62, %v2095_v2  ;;  %v7587_v38 = vpop.f32.mrf.mxu0  ;;  %vm10859_vm15 = vmand %vm1192_vm2, %vm10739_vm12  ;;  %vm1194_vm6 = vcmp.eq.s32.totalorder %v10679_v42, %v8987_v47  ;;  %vm10880_vm2 = vcmp.eq.s32.totalorder %v1846_v53, 1  ;;  %v2099_v35 = vld [vmem:[#allocation2 + $0x580] sm:$0xff] }
 0x4fa   : > { %7948 = vmatprep.mubr.msk.f32.mxu1 %vm10779_vm13, %v8166_v57  ;;  %4115 = vst.msk [vmem:[#allocation2 + $0xd0] sm:$0xff] %vm4088_vm1, %v3814_v20  ;;  %v3817_v29 = vadd.f32 %v7587_v38, %v1952_v7  ;;  %v7806_v48 = vpop.f32.mrf.mxu1  ;;  %vm10874_vm0 = vmand %vm1730_vm10, %vm10379_vm14  ;;  %vm1817_vm10 = vcmp.eq.s32.totalorder %v9027_v60, %v8841_v12  ;;  %v1956_v20 = vld [vmem:[#allocation2 + $0x108] sm:$0xff] }
 0x4fb   : > { %4261 = vst.msk [vmem:[#allocation2 + $0x560] sm:$0xff] %vm4088_vm1, %v3960_v36  ;;  %v3963_v61 = vadd.f32 %v7806_v48, %v2098_v1  ;;  %v2429_v46 = vpop.f32.mrf.mxu0  ;;  %vm10890_vm13 = vmand %vm1193_vm8, %vm10739_vm12  ;;  %vm1195_vm8 = vcmp.eq.s32.totalorder %v10679_v42, %v8992_v50  ;;  %v2102_v36 = vld [vmem:[#allocation2 + $0x598] sm:$0xff] }
 0x4fc   : > { %4118 = vst.msk [vmem:[#allocation2 + $0xe8] sm:$0xff] %vm4088_vm1, %v3817_v29  ;;  %7730 = vmatmul.mubr.msk.f32.gmra.mxu0 %vm10797_vm5, %v8166_v57  ;;  %v3816_v0 = vadd.f32 %v2429_v46, %v1951_v5  ;;  %v3159_v28 = vpop.f32.mrf.mxu1  ;;  %vm10905_vm11 = vmand %vm1731_vm7, %vm10379_vm14  ;;  %vm1818_vm5 = vcmp.eq.s32.totalorder %v9027_v60, %v8966_v37  ;;  %vm1819_vm7 = vcmp.eq.s32.totalorder %v9027_v60, %v8969_v41  ;;  %v1955_v29 = vld [vmem:[#allocation2 + $0x100] sm:$0xff] }
 0x4fd   : > { %4264 = vst.msk [vmem:[#allocation2 + $0x578] sm:$0xff] %vm4088_vm1, %v3963_v61  ;;  %7949 = vmatmul.mubr.msk.f32.gmra.mxu1 %vm10812_vm3, %v8166_v57  ;;  %7732 = vmatprep.mubr.msk.f32.mxu0 %vm10826_vm4, %v8166_v57  ;;  %v3962_v34 = vadd.f32 %v3159_v28, %v2097_v55  ;;  %v7590_v6 = vpop.f32.mrf.mxu0  ;;  %vm10923_vm14 = vmand %vm1194_vm6, %vm10739_vm12  ;;  %vm1196_vm4 = vcmp.eq.s32.totalorder %v10679_v42, %v8995_v51  ;;  %v2101_v61 = vld [vmem:[#allocation2 + $0x590] sm:$0xff] }
 0x4fe   : > { %7951 = vmatprep.mubr.msk.f32.mxu1 %vm10841_vm9, %v8166_v57  ;;  %4117 = vst.msk [vmem:[#allocation2 + $0xe0] sm:$0xff] %vm4088_vm1, %v3816_v0  ;;  %v3819_v49 = vadd.f32 %v7590_v6, %v1954_v54  ;;  %v7809_v53 = vpop.f32.mrf.mxu1  ;;  %vm10938_vm3 = vmand %vm1817_vm10, %vm10880_vm2  ;;  %vm1197_vm10 = vcmp.eq.s32.totalorder %v10679_v42, %v9004_v52  ;;  %v1958_v0 = vld [vmem:[#allocation2 + $0x118] sm:$0xff] }
 0x4ff   : > { %4263 = vst.msk [vmem:[#allocation2 + $0x570] sm:$0xff] %vm4088_vm1, %v3962_v34  ;;  %v3965_v7 = vadd.f32 %v7809_v53, %v2100_v19  ;;  %v2439_v56 = vpop.f32.mrf.mxu0  ;;  %vm10950_vm9 = vmand %vm1195_vm8, %vm10739_vm12  ;;  %vm1820_vm8 = vcmp.eq.s32.totalorder %v9027_v60, %v8977_v43  ;;  %v2104_v34 = vld [vmem:[#allocation2 + $0x5a8] sm:$0xff] }
 0x500   : > { %4120 = vst.msk [vmem:[#allocation2 + $0xf8] sm:$0xff] %vm4088_vm1, %v3819_v49  ;;  %7733 = vmatmul.mubr.msk.f32.gmra.mxu0 %vm10859_vm15, %v8166_v57  ;;  %v3818_v1 = vadd.f32 %v2439_v56, %v1953_v33  ;;  %v3169_v39 = vpop.f32.mrf.mxu1  ;;  %vm10965_vm6 = vmand %vm1818_vm5, %vm10880_vm2  ;;  %vm1821_vm5 = vcmp.eq.s32.totalorder %v9027_v60, %v8987_v47  ;;  %v1957_v49 = vld [vmem:[#allocation2 + $0x110] sm:$0xff] }
 0x501   : > { %4266 = vst.msk [vmem:[#allocation2 + $0x588] sm:$0xff] %vm4088_vm1, %v3965_v7  ;;  %7952 = vmatmul.mubr.msk.f32.gmra.mxu1 %vm10874_vm0, %v8166_v57  ;;  %7735 = vmatprep.mubr.msk.f32.mxu0 %vm10890_vm13, %v8166_v57  ;;  %v3964_v5 = vadd.f32 %v3169_v39, %v2099_v35  ;;  %v7593_v30 = vpop.f32.mrf.mxu0  ;;  %vm10983_vm15 = vmand %vm1196_vm4, %vm10739_vm12  ;;  %vm1198_vm13 = vcmp.eq.s32.totalorder %v10679_v42, %v9021_v58  ;;  %v2103_v7 = vld [vmem:[#allocation2 + $0x5a0] sm:$0xff] }
 0x502   : > { %7954 = vmatprep.mubr.msk.f32.mxu1 %vm10905_vm11, %v8166_v57  ;;  %4119 = vst.msk [vmem:[#allocation2 + $0xf0] sm:$0xff] %vm4088_vm1, %v3818_v1  ;;  %v3821_v55 = vadd.f32 %v7593_v30, %v1956_v20  ;;  %v7812_v40 = vpop.f32.mrf.mxu1  ;;  %vm10998_vm0 = vmand %vm1819_vm7, %vm10880_vm2  ;;  %vm1199_vm7 = vcmp.eq.s32.totalorder %v10679_v42, %v9076_v3  ;;  %v1960_v1 = vld [vmem:[#allocation2 + $0x128] sm:$0xff] }
 0x503   : > { %4265 = vst.msk [vmem:[#allocation2 + $0x580] sm:$0xff] %vm4088_vm1, %v3964_v5  ;;  %v3967_v54 = vadd.f32 %v7812_v40, %v2102_v36  ;;  %v2449_v11 = vpop.f32.mrf.mxu0  ;;  %vm11010_vm11 = vmand %vm1197_vm10, %vm10739_vm12  ;;  %vm1822_vm10 = vcmp.eq.s32.totalorder %v9027_v60, %v8992_v50  ;;  %v2106_v5 = vld [vmem:[#allocation2 + $0x5b8] sm:$0xff] }
 0x504   : > { %4122 = vst.msk [vmem:[#allocation2 + $0x108] sm:$0xff] %vm4088_vm1, %v3821_v55  ;;  %7736 = vmatmul.mubr.msk.f32.gmra.mxu0 %vm10923_vm14, %v8166_v57  ;;  %v3820_v19 = vadd.f32 %v2449_v11, %v1955_v29  ;;  %v3179_v63 = vpop.f32.mrf.mxu1  ;;  %vm11025_vm4 = vmand %vm1820_vm8, %vm10880_vm2  ;;  %vm1823_vm8 = vcmp.eq.s32.totalorder %v9027_v60, %v8995_v51  ;;  %v1959_v55 = vld [vmem:[#allocation2 + $0x120] sm:$0xff] }
 0x505   : > { %4268 = vst.msk [vmem:[#allocation2 + $0x598] sm:$0xff] %vm4088_vm1, %v3967_v54  ;;  %7955 = vmatmul.mubr.msk.f32.gmra.mxu1 %vm10938_vm3, %v8166_v57  ;;  %7738 = vmatprep.mubr.msk.f32.mxu0 %vm10950_vm9, %v8166_v57  ;;  %v3966_v33 = vadd.f32 %v3179_v63, %v2101_v61  ;;  %v7596_v2 = vpop.f32.mrf.mxu0  ;;  %vm11043_vm14 = vmand %vm1198_vm13, %vm10739_vm12  ;;  %vm1200_vm9 = vcmp.eq.s32.totalorder %v10679_v42, %v9095_v8  ;;  %v2105_v54 = vld [vmem:[#allocation2 + $0x5b0] sm:$0xff] }
 0x506   : > { %7957 = vmatprep.mubr.msk.f32.mxu1 %vm10965_vm6, %v8166_v57  ;;  %4121 = vst.msk [vmem:[#allocation2 + $0x100] sm:$0xff] %vm4088_vm1, %v3820_v19  ;;  %v3823_v35 = vadd.f32 %v7596_v2, %v1958_v0  ;;  %v7815_v59 = vpop.f32.mrf.mxu1  ;;  %vm11058_vm3 = vmand %vm1821_vm5, %vm10880_vm2  ;;  %vm1201_vm5 = vcmp.eq.s32.totalorder %v10679_v42, %v9114_v9  ;;  %v1962_v19 = vld [vmem:[#allocation2 + $0x138] sm:$0xff] }
 0x507   : > { %4267 = vst.msk [vmem:[#allocation2 + $0x590] sm:$0xff] %vm4088_vm1, %v3966_v33  ;;  %v3969_v20 = vadd.f32 %v7815_v59, %v2104_v34  ;;  %v2459_v62 = vpop.f32.mrf.mxu0  ;;  %vm11070_vm6 = vmand %vm1199_vm7, %vm10739_vm12  ;;  %vm1824_vm7 = vcmp.eq.s32.totalorder %v9027_v60, %v9004_v52  ;;  %v2108_v33 = vld [vmem:[#allocation2 + $0x5c8] sm:$0xff] }
 0x508   : > { %4124 = vst.msk [vmem:[#allocation2 + $0x118] sm:$0xff] %vm4088_vm1, %v3823_v35  ;;  %7739 = vmatmul.mubr.msk.f32.gmra.mxu0 %vm10983_vm15, %v8166_v57  ;;  %v3822_v36 = vadd.f32 %v2459_v62, %v1957_v49  ;;  %v3189_v38 = vpop.f32.mrf.mxu1  ;;  %vm11085_vm13 = vmand %vm1822_vm10, %vm10880_vm2  ;;  %vm1825_vm10 = vcmp.eq.s32.totalorder %v9027_v60, %v9021_v58  ;;  %v1961_v35 = vld [vmem:[#allocation2 + $0x130] sm:$0xff] }
 0x509   : > { %4270 = vst.msk [vmem:[#allocation2 + $0x5a8] sm:$0xff] %vm4088_vm1, %v3969_v20  ;;  %7958 = vmatmul.mubr.msk.f32.gmra.mxu1 %vm10998_vm0, %v8166_v57  ;;  %7741 = vmatprep.mubr.msk.f32.mxu0 %vm11010_vm11, %v8166_v57  ;;  %v3968_v29 = vadd.f32 %v3189_v38, %v2103_v7  ;;  %v7599_v48 = vpop.f32.mrf.mxu0  ;;  %vm11103_vm15 = vmand %vm1200_vm9, %vm10739_vm12  ;;  %vm1202_vm11 = vcmp.eq.s32.totalorder %v10679_v42, %v9126_v10  ;;  %v2107_v20 = vld [vmem:[#allocation2 + $0x5c0] sm:$0xff] }
 0x50a   : > { %7960 = vmatprep.mubr.msk.f32.mxu1 %vm11025_vm4, %v8166_v57  ;;  %4123 = vst.msk [vmem:[#allocation2 + $0x110] sm:$0xff] %vm4088_vm1, %v3822_v36  ;;  %v3825_v61 = vadd.f32 %v7599_v48, %v1960_v1  ;;  %v7818_v46 = vpop.f32.mrf.mxu1  ;;  %vm11118_vm0 = vmand %vm1823_vm8, %vm10880_vm2  ;;  %vm1203_vm8 = vcmp.eq.s32.totalorder %v10679_v42, %v9144_v13  ;;  %v1964_v36 = vld [vmem:[#allocation2 + $0x148] sm:$0xff] }
 0x50b   : > { %4269 = vst.msk [vmem:[#allocation2 + $0x5a0] sm:$0xff] %vm4088_vm1, %v3968_v29  ;;  %v3971_v0 = vadd.f32 %v7818_v46, %v2106_v5  ;;  %v2469_v28 = vpop.f32.mrf.mxu0  ;;  %vm11130_vm4 = vmand %vm1201_vm5, %vm10739_vm12  ;;  %vm1826_vm5 = vcmp.eq.s32.totalorder %v9027_v60, %v9076_v3  ;;  %v2110_v29 = vld [vmem:[#allocation2 + $0x5d8] sm:$0xff] }
 0x50c   : > { %4126 = vst.msk [vmem:[#allocation2 + $0x128] sm:$0xff] %vm4088_vm1, %v3825_v61  ;;  %7742 = vmatmul.mubr.msk.f32.gmra.mxu0 %vm11043_vm14, %v8166_v57  ;;  %v3824_v34 = vadd.f32 %v2469_v28, %v1959_v55  ;;  %v3199_v6 = vpop.f32.mrf.mxu1  ;;  %vm11145_vm9 = vmand %vm1824_vm7, %vm10880_vm2  ;;  %vm1827_vm7 = vcmp.eq.s32.totalorder %v9027_v60, %v9095_v8  ;;  %v1963_v61 = vld [vmem:[#allocation2 + $0x140] sm:$0xff] }
 0x50d   : > { %4272 = vst.msk [vmem:[#allocation2 + $0x5b8] sm:$0xff] %vm4088_vm1, %v3971_v0  ;;  %7961 = vmatmul.mubr.msk.f32.gmra.mxu1 %vm11058_vm3, %v8166_v57  ;;  %7744 = vmatprep.mubr.msk.f32.mxu0 %vm11070_vm6, %v8166_v57  ;;  %v3970_v49 = vadd.f32 %v3199_v6, %v2105_v54  ;;  %v7602_v53 = vpop.f32.mrf.mxu0  ;;  %vm11163_vm14 = vmand %vm1202_vm11, %vm10739_vm12  ;;  %vm1204_vm6 = vcmp.eq.s32.totalorder %v10679_v42, %v9156_v14  ;;  %v2109_v0 = vld [vmem:[#allocation2 + $0x5d0] sm:$0xff] }
 0x50e   : > { %7963 = vmatprep.mubr.msk.f32.mxu1 %vm11085_vm13, %v8166_v57  ;;  %4125 = vst.msk [vmem:[#allocation2 + $0x120] sm:$0xff] %vm4088_vm1, %v3824_v34  ;;  %v3827_v7 = vadd.f32 %v7602_v53, %v1962_v19  ;;  %v7821_v56 = vpop.f32.mrf.mxu1  ;;  %vm11178_vm3 = vmand %vm1825_vm10, %vm10880_vm2  ;;  %vm1205_vm10 = vcmp.eq.s32.totalorder %v10679_v42, %v9170_v15  ;;  %v1966_v34 = vld [vmem:[#allocation2 + $0x158] sm:$0xff] }
 0x50f   : > { %4271 = vst.msk [vmem:[#allocation2 + $0x5b0] sm:$0xff] %vm4088_vm1, %v3970_v49  ;;  %v3973_v1 = vadd.f32 %v7821_v56, %v2108_v33  ;;  %v2479_v39 = vpop.f32.mrf.mxu0  ;;  %vm11190_vm13 = vmand %vm1203_vm8, %vm10739_vm12  ;;  %vm1828_vm8 = vcmp.eq.s32.totalorder %v9027_v60, %v9114_v9  ;;  %v2112_v49 = vld [vmem:[#allocation2 + $0x5e8] sm:$0xff] }
 0x510   : > { %4128 = vst.msk [vmem:[#allocation2 + $0x138] sm:$0xff] %vm4088_vm1, %v3827_v7  ;;  %7745 = vmatmul.mubr.msk.f32.gmra.mxu0 %vm11103_vm15, %v8166_v57  ;;  %v3826_v5 = vadd.f32 %v2479_v39, %v1961_v35  ;;  %v3209_v30 = vpop.f32.mrf.mxu1  ;;  %vm11205_vm11 = vmand %vm1826_vm5, %vm10880_vm2  ;;  %vm1829_vm5 = vcmp.eq.s32.totalorder %v9027_v60, %v9126_v10  ;;  %v1965_v7 = vld [vmem:[#allocation2 + $0x150] sm:$0xff] }
 0x511   : > { %4274 = vst.msk [vmem:[#allocation2 + $0x5c8] sm:$0xff] %vm4088_vm1, %v3973_v1  ;;  %7964 = vmatmul.mubr.msk.f32.gmra.mxu1 %vm11118_vm0, %v8166_v57  ;;  %7747 = vmatprep.mubr.msk.f32.mxu0 %vm11130_vm4, %v8166_v57  ;;  %v3972_v55 = vadd.f32 %v3209_v30, %v2107_v20  ;;  %v7605_v40 = vpop.f32.mrf.mxu0  ;;  %vm11223_vm15 = vmand %vm1204_vm6, %vm10739_vm12  ;;  %vm1206_vm4 = vcmp.eq.s32.totalorder %v10679_v42, %v9182_v16  ;;  %v2111_v1 = vld [vmem:[#allocation2 + $0x5e0] sm:$0xff] }
 0x512   : > { %7966 = vmatprep.mubr.msk.f32.mxu1 %vm11145_vm9, %v8166_v57  ;;  %4127 = vst.msk [vmem:[#allocation2 + $0x130] sm:$0xff] %vm4088_vm1, %v3826_v5  ;;  %v3829_v54 = vadd.f32 %v7605_v40, %v1964_v36  ;;  %v7824_v11 = vpop.f32.mrf.mxu1  ;;  %vm11238_vm0 = vmand %vm1827_vm7, %vm10880_vm2  ;;  %vm1207_vm7 = vcmp.eq.s32.totalorder %v10679_v42, %v9196_v18  ;;  %v1968_v5 = vld [vmem:[#allocation2 + $0x168] sm:$0xff] }
 0x513   : > { %4273 = vst.msk [vmem:[#allocation2 + $0x5c0] sm:$0xff] %vm4088_vm1, %v3972_v55  ;;  %v3975_v19 = vadd.f32 %v7824_v11, %v2110_v29  ;;  %v2489_v63 = vpop.f32.mrf.mxu0  ;;  %vm11250_vm9 = vmand %vm1205_vm10, %vm10739_vm12  ;;  %vm1830_vm10 = vcmp.eq.s32.totalorder %v9027_v60, %v9144_v13  ;;  %v2114_v55 = vld [vmem:[#allocation2 + $0x5f8] sm:$0xff] }
 0x514   : > { %4130 = vst.msk [vmem:[#allocation2 + $0x148] sm:$0xff] %vm4088_vm1, %v3829_v54  ;;  %7748 = vmatmul.mubr.msk.f32.gmra.mxu0 %vm11163_vm14, %v8166_v57  ;;  %v3828_v33 = vadd.f32 %v2489_v63, %v1963_v61  ;;  %v3219_v2 = vpop.f32.mrf.mxu1  ;;  %vm11265_vm6 = vmand %vm1828_vm8, %vm10880_vm2  ;;  %vm1831_vm8 = vcmp.eq.s32.totalorder %v9027_v60, %v9156_v14  ;;  %v1967_v54 = vld [vmem:[#allocation2 + $0x160] sm:$0xff] }
 0x515   : > { %4276 = vst.msk [vmem:[#allocation2 + $0x5d8] sm:$0xff] %vm4088_vm1, %v3975_v19  ;;  %7967 = vmatmul.mubr.msk.f32.gmra.mxu1 %vm11178_vm3, %v8166_v57  ;;  %7750 = vmatprep.mubr.msk.f32.mxu0 %vm11190_vm13, %v8166_v57  ;;  %v3974_v35 = vadd.f32 %v3219_v2, %v2109_v0  ;;  %v7608_v59 = vpop.f32.mrf.mxu0  ;;  %vm11283_vm14 = vmand %vm1206_vm4, %vm10739_vm12  ;;  %vm1208_vm13 = vcmp.eq.s32.totalorder %v10679_v42, %v9208_v22  ;;  %v2113_v19 = vld [vmem:[#allocation2 + $0x5f0] sm:$0xff] }
 0x516   : > { %7969 = vmatprep.mubr.msk.f32.mxu1 %vm11205_vm11, %v8166_v57  ;;  %4129 = vst.msk [vmem:[#allocation2 + $0x140] sm:$0xff] %vm4088_vm1, %v3828_v33  ;;  %v3831_v20 = vadd.f32 %v7608_v59, %v1966_v34  ;;  %v7827_v62 = vpop.f32.mrf.mxu1  ;;  %vm11298_vm3 = vmand %vm1829_vm5, %vm10880_vm2  ;;  %vm1209_vm5 = vcmp.eq.s32.totalorder %v10679_v42, %v9222_v23  ;;  %v1970_v33 = vld [vmem:[#allocation2 + $0x178] sm:$0xff] }
 0x517   : > { %4275 = vst.msk [vmem:[#allocation2 + $0x5d0] sm:$0xff] %vm4088_vm1, %v3974_v35  ;;  %v3977_v36 = vadd.f32 %v7827_v62, %v2112_v49  ;;  %v2499_v38 = vpop.f32.mrf.mxu0  ;;  %vm11310_vm11 = vmand %vm1207_vm7, %vm10739_vm12  ;;  %vm1832_vm7 = vcmp.eq.s32.totalorder %v9027_v60, %v9170_v15  ;;  %v2116_v35 = vld [vmem:[#allocation2 + $0x608] sm:$0xff] }
 0x518   : > { %4132 = vst.msk [vmem:[#allocation2 + $0x158] sm:$0xff] %vm4088_vm1, %v3831_v20  ;;  %7751 = vmatmul.mubr.msk.f32.gmra.mxu0 %vm11223_vm15, %v8166_v57  ;;  %v3830_v29 = vadd.f32 %v2499_v38, %v1965_v7  ;;  %v3229_v48 = vpop.f32.mrf.mxu1  ;;  %vm11325_vm4 = vmand %vm1830_vm10, %vm10880_vm2  ;;  %vm1833_vm10 = vcmp.eq.s32.totalorder %v9027_v60, %v9182_v16  ;;  %v1969_v20 = vld [vmem:[#allocation2 + $0x170] sm:$0xff] }
 0x519   : > { %4278 = vst.msk [vmem:[#allocation2 + $0x5e8] sm:$0xff] %vm4088_vm1, %v3977_v36  ;;  %7970 = vmatmul.mubr.msk.f32.gmra.mxu1 %vm11238_vm0, %v8166_v57  ;;  %7753 = vmatprep.mubr.msk.f32.mxu0 %vm11250_vm9, %v8166_v57  ;;  %v3976_v61 = vadd.f32 %v3229_v48, %v2111_v1  ;;  %v7611_v46 = vpop.f32.mrf.mxu0  ;;  %vm11343_vm15 = vmand %vm1208_vm13, %vm10739_vm12  ;;  %vm1210_vm9 = vcmp.eq.s32.totalorder %v10679_v42, %v9234_v24  ;;  %v2115_v36 = vld [vmem:[#allocation2 + $0x600] sm:$0xff] }
 0x51a   : > { %7972 = vmatprep.mubr.msk.f32.mxu1 %vm11265_vm6, %v8166_v57  ;;  %4131 = vst.msk [vmem:[#allocation2 + $0x150] sm:$0xff] %vm4088_vm1, %v3830_v29  ;;  %v3833_v0 = vadd.f32 %v7611_v46, %v1968_v5  ;;  %v7830_v28 = vpop.f32.mrf.mxu1  ;;  %vm11358_vm0 = vmand %vm1831_vm8, %vm10880_vm2  ;;  %vm1211_vm8 = vcmp.eq.s32.totalorder %v10679_v42, %v9248_v25  ;;  %v1972_v29 = vld [vmem:[#allocation2 + $0x188] sm:$0xff] }
 0x51b   : > { %4277 = vst.msk [vmem:[#allocation2 + $0x5e0] sm:$0xff] %vm4088_vm1, %v3976_v61  ;;  %v3979_v34 = vadd.f32 %v7830_v28, %v2114_v55  ;;  %v2509_v6 = vpop.f32.mrf.mxu0  ;;  %vm11370_vm6 = vmand %vm1209_vm5, %vm10739_vm12  ;;  %vm1834_vm5 = vcmp.eq.s32.totalorder %v9027_v60, %v9196_v18  ;;  %v2118_v61 = vld [vmem:[#allocation2 + $0x618] sm:$0xff] }
 0x51c   : > { %4134 = vst.msk [vmem:[#allocation2 + $0x168] sm:$0xff] %vm4088_vm1, %v3833_v0  ;;  %7754 = vmatmul.mubr.msk.f32.gmra.mxu0 %vm11283_vm14, %v8166_v57  ;;  %v3832_v49 = vadd.f32 %v2509_v6, %v1967_v54  ;;  %v3239_v53 = vpop.f32.mrf.mxu1  ;;  %vm11385_vm13 = vmand %vm1832_vm7, %vm10880_vm2  ;;  %vm1835_vm7 = vcmp.eq.s32.totalorder %v9027_v60, %v9208_v22  ;;  %v1971_v0 = vld [vmem:[#allocation2 + $0x180] sm:$0xff] }
 0x51d   : > { %4280 = vst.msk [vmem:[#allocation2 + $0x5f8] sm:$0xff] %vm4088_vm1, %v3979_v34  ;;  %7973 = vmatmul.mubr.msk.f32.gmra.mxu1 %vm11298_vm3, %v8166_v57  ;;  %7756 = vmatprep.mubr.msk.f32.mxu0 %vm11310_vm11, %v8166_v57  ;;  %v3978_v7 = vadd.f32 %v3239_v53, %v2113_v19  ;;  %v7614_v56 = vpop.f32.mrf.mxu0  ;;  %vm11403_vm14 = vmand %vm1210_vm9, %vm10739_vm12  ;;  %vm1212_vm11 = vcmp.eq.s32.totalorder %v10679_v42, %v9260_v26  ;;  %v2117_v34 = vld [vmem:[#allocation2 + $0x610] sm:$0xff] }
 0x51e   : > { %7975 = vmatprep.mubr.msk.f32.mxu1 %vm11325_vm4, %v8166_v57  ;;  %4133 = vst.msk [vmem:[#allocation2 + $0x160] sm:$0xff] %vm4088_vm1, %v3832_v49  ;;  %v3835_v1 = vadd.f32 %v7614_v56, %v1970_v33  ;;  %v7833_v39 = vpop.f32.mrf.mxu1  ;;  %vm11418_vm3 = vmand %vm1833_vm10, %vm10880_vm2  ;;  %vm1213_vm10 = vcmp.eq.s32.totalorder %v10679_v42, %v9275_v31  ;;  %v1974_v49 = vld [vmem:[#allocation2 + $0x198] sm:$0xff] }
 0x51f   : > { %4279 = vst.msk [vmem:[#allocation2 + $0x5f0] sm:$0xff] %vm4088_vm1, %v3978_v7  ;;  %v3981_v5 = vadd.f32 %v7833_v39, %v2116_v35  ;;  %v2519_v30 = vpop.f32.mrf.mxu0  ;;  %vm11430_vm4 = vmand %vm1211_vm8, %vm10739_vm12  ;;  %vm1836_vm8 = vcmp.eq.s32.totalorder %v9027_v60, %v9222_v23  ;;  %v2120_v7 = vld [vmem:[#allocation2 + $0x628] sm:$0xff] }
 0x520   : > { %4136 = vst.msk [vmem:[#allocation2 + $0x178] sm:$0xff] %vm4088_vm1, %v3835_v1  ;;  %7757 = vmatmul.mubr.msk.f32.gmra.mxu0 %vm11343_vm15, %v8166_v57  ;;  %v3834_v55 = vadd.f32 %v2519_v30, %v1969_v20  ;;  %v3249_v40 = vpop.f32.mrf.mxu1  ;;  %vm11445_vm9 = vmand %vm1834_vm5, %vm10880_vm2  ;;  %vm1837_vm5 = vcmp.eq.s32.totalorder %v9027_v60, %v9234_v24  ;;  %v1973_v1 = vld [vmem:[#allocation2 + $0x190] sm:$0xff] }
 0x521   : > { %4282 = vst.msk [vmem:[#allocation2 + $0x608] sm:$0xff] %vm4088_vm1, %v3981_v5  ;;  %7976 = vmatmul.mubr.msk.f32.gmra.mxu1 %vm11358_vm0, %v8166_v57  ;;  %7759 = vmatprep.mubr.msk.f32.mxu0 %vm11370_vm6, %v8166_v57  ;;  %v3980_v54 = vadd.f32 %v3249_v40, %v2115_v36  ;;  %v7617_v11 = vpop.f32.mrf.mxu0  ;;  %vm11463_vm15 = vmand %vm1212_vm11, %vm10739_vm12  ;;  %vm1214_vm6 = vcmp.eq.s32.totalorder %v10679_v42, %v9287_v32  ;;  %v2119_v5 = vld [vmem:[#allocation2 + $0x620] sm:$0xff]  ;;  %v2126_v42 = vld [vmem:[#allocation2 + $0x658] sm:$0xff] }
 0x522   : > { %7978 = vmatprep.mubr.msk.f32.mxu1 %vm11385_vm13, %v8166_v57  ;;  %4135 = vst.msk [vmem:[#allocation2 + $0x170] sm:$0xff] %vm4088_vm1, %v3834_v55  ;;  %v3837_v19 = vadd.f32 %v7617_v11, %v1972_v29  ;;  %v7836_v63 = vpop.f32.mrf.mxu1  ;;  %vm11478_vm0 = vmand %vm1835_vm7, %vm10880_vm2  ;;  %vm1838_vm7 = vcmp.eq.s32.totalorder %v9027_v60, %v9248_v25  ;;  %v1976_v29 = vld [vmem:[#allocation2 + $0x1a8] sm:$0xff] }
 0x523   : > { %4281 = vst.msk [vmem:[#allocation2 + $0x600] sm:$0xff] %vm4088_vm1, %v3980_v54  ;;  %v3983_v33 = vadd.f32 %v7836_v63, %v2118_v61  ;;  %v2529_v2 = vpop.f32.mrf.mxu0  ;;  %vm11490_vm13 = vmand %vm1213_vm10, %vm10739_vm12  ;;  %vm1839_vm10 = vcmp.eq.s32.totalorder %v9027_v60, %v9260_v26  ;;  %v2122_v61 = vld [vmem:[#allocation2 + $0x638] sm:$0xff] }
 0x524   : > { %4138 = vst.msk [vmem:[#allocation2 + $0x188] sm:$0xff] %vm4088_vm1, %v3837_v19  ;;  %7760 = vmatmul.mubr.msk.f32.gmra.mxu0 %vm11403_vm14, %v8166_v57  ;;  %v3836_v35 = vadd.f32 %v2529_v2, %v1971_v0  ;;  %v3259_v59 = vpop.f32.mrf.mxu1  ;;  %vm11505_vm11 = vmand %vm1836_vm8, %vm10880_vm2  ;;  %v1975_v0 = vld [vmem:[#allocation2 + $0x1a0] sm:$0xff] }
 0x525   : > { %4284 = vst.msk [vmem:[#allocation2 + $0x618] sm:$0xff] %vm4088_vm1, %v3983_v33  ;;  %7979 = vmatmul.mubr.msk.f32.gmra.mxu1 %vm11418_vm3, %v8166_v57  ;;  %7762 = vmatprep.mubr.msk.f32.mxu0 %vm11430_vm4, %v8166_v57  ;;  %v3982_v20 = vadd.f32 %v3259_v59, %v2117_v34  ;;  %v7620_v62 = vpop.f32.mrf.mxu0  ;;  %vm11523_vm14 = vmand %vm1214_vm6, %vm10739_vm12  ;;  %vm1840_vm3 = vcmp.eq.s32.totalorder %v9027_v60, %v9275_v31  ;;  %v2121_v34 = vld [vmem:[#allocation2 + $0x630] sm:$0xff] }
 0x526   : > { %7981 = vmatprep.mubr.msk.f32.mxu1 %vm11445_vm9, %v8166_v57  ;;  %4137 = vst.msk [vmem:[#allocation2 + $0x180] sm:$0xff] %vm4088_vm1, %v3836_v35  ;;  %v3839_v36 = vadd.f32 %v7620_v62, %v1974_v49  ;;  %v7839_v38 = vpop.f32.mrf.mxu1  ;;  %vm11538_vm12 = vmand %vm1837_vm5, %vm10880_vm2  ;;  %vm1841_vm9 = vcmp.eq.s32.totalorder %v9027_v60, %v9287_v32  ;;  %v1978_v49 = vld [vmem:[#allocation2 + $0x1b8] sm:$0xff]  ;;  %v2124_v35 = vld [vmem:[#allocation2 + $0x648] sm:$0xff] }
 0x527   : > { %4283 = vst.msk [vmem:[#allocation2 + $0x610] sm:$0xff] %vm4088_vm1, %v3982_v20  ;;  %v3985_v4 = vadd.f32 %v7839_v38, %v2120_v7  ;;  %v2539_v30 = vpop.f32.mrf.mxu0  ;;  %vm11550_vm4 = vmand %vm1838_vm7, %vm10880_vm2  ;;  %v1977_v7 = vld [vmem:[#allocation2 + $0x1b0] sm:$0xff]  ;;  %v2123_v62 = vld [vmem:[#allocation2 + $0x640] sm:$0xff] }
 0x528   : > { %4140 = vst.msk [vmem:[#allocation2 + $0x198] sm:$0xff] %vm4088_vm1, %v3839_v36  ;;  %7763 = vmatmul.mubr.msk.f32.gmra.mxu0 %vm11463_vm15, %v8166_v57  ;;  %v3838_v55 = vadd.f32 %v2539_v30, %v1973_v1  ;;  %v3269_v40 = vpop.f32.mrf.mxu1  ;;  %vm11565_vm8 = vmand %vm1839_vm10, %vm10880_vm2  ;;  %v1980_v36 = vld [vmem:[#allocation2 + $0x1c8] sm:$0xff] }
 0x529   : > { %4286 = vst.msk [vmem:[#allocation2 + $0x628] sm:$0xff] %vm4088_vm1, %v3985_v4  ;;  %7982 = vmatmul.mubr.msk.f32.gmra.mxu1 %vm11478_vm0, %v8166_v57  ;;  %7765 = vmatprep.mubr.msk.f32.mxu0 %vm11490_vm13, %v8166_v57  ;;  %v3984_v54 = vadd.f32 %v3269_v40, %v2119_v5  ;;  %v7623_v11 = vpop.f32.mrf.mxu0  ;;  %vm11581_vm15 = vmand %vm1840_vm3, %vm10880_vm2  ;;  %v2125_v40 = vld [vmem:[#allocation2 + $0x650] sm:$0xff] }
 0x52a   : > { %7984 = vmatprep.mubr.msk.f32.mxu1 %vm11505_vm11, %v8166_v57  ;;  %4139 = vst.msk [vmem:[#allocation2 + $0x190] sm:$0xff] %vm4088_vm1, %v3838_v55  ;;  %v3841_v19 = vadd.f32 %v7623_v11, %v1976_v29  ;;  %v7842_v63 = vpop.f32.mrf.mxu1  ;;  %vm11594_vm0 = vmand %vm1841_vm9, %vm10880_vm2  ;;  %v1979_v29 = vld [vmem:[#allocation2 + $0x1c0] sm:$0xff]  ;;  %v1982_v11 = vld [vmem:[#allocation2 + $0x1d8] sm:$0xff]  ;;  %vm588_vm2 = vcmask 7168  }
 0x52b   : > { %4285 = vst.msk [vmem:[#allocation2 + $0x620] sm:$0xff] %vm4088_vm1, %v3984_v54  ;;  %v3987_v33 = vadd.f32 %v7842_v63, %v2122_v61  ;;  %v2549_v2 = vpop.f32.mrf.mxu0 }
 0x52c   : > { %4142 = vst.msk [vmem:[#allocation2 + $0x1a8] sm:$0xff] %vm4088_vm1, %v3841_v19  ;;  %7766 = vmatmul.mubr.msk.f32.gmra.mxu0 %vm11523_vm14, %v8166_v57  ;;  %v3840_v53 = vadd.f32 %v2549_v2, %v1975_v0  ;;  %v3279_v44 = vpop.f32.mrf.mxu1  ;;  %v2128_v19 = vld [vmem:[#allocation2 + $0x668] sm:$0xff] }
 0x52d   : > { %4288 = vst.msk [vmem:[#allocation2 + $0x638] sm:$0xff] %vm4088_vm1, %v3987_v33  ;;  %7985 = vmatmul.mubr.msk.f32.gmra.mxu1 %vm11538_vm12, %v8166_v57  ;;  %v3986_v60 = vadd.f32 %v3279_v44, %v2121_v34  ;;  %v7626_v59 = vpop.f32.mrf.mxu0  ;;  %v1981_v34 = vld [vmem:[#allocation2 + $0x1d0] sm:$0xff] }
 0x52e   : > { %7987 = vmatprep.mubr.msk.f32.mxu1 %vm11550_vm4, %v8166_v57  ;;  %4141 = vst.msk [vmem:[#allocation2 + $0x1a0] sm:$0xff] %vm4088_vm1, %v3840_v53  ;;  %v3843_v56 = vadd.f32 %v7626_v59, %v1978_v49  ;;  %v7845_v20 = vpop.f32.mrf.mxu1  ;;  %v2127_v49 = vld [vmem:[#allocation2 + $0x660] sm:$0xff] }
 0x52f   : > { %4287 = vst.msk [vmem:[#allocation2 + $0x630] sm:$0xff] %vm4088_vm1, %v3986_v60  ;;  %v3989_v1 = vadd.f32 %v7845_v20, %v2124_v35  ;;  %v2559_v39 = vpop.f32.mrf.mxu0  ;;  %v1984_v35 = vld [vmem:[#allocation2 + $0x1e8] sm:$0xff] }
 0x530   : > { %4144 = vst.msk [vmem:[#allocation2 + $0x1b8] sm:$0xff] %vm4088_vm1, %v3843_v56  ;;  %v3842_v38 = vadd.f32 %v2559_v39, %v1977_v7  ;;  %v3289_v5 = vpop.f32.mrf.mxu1  ;;  %v2130_v7 = vld [vmem:[#allocation2 + $0x678] sm:$0xff]  ;;  %v1983_v56 = vld [vmem:[#allocation2 + $0x1e0] sm:$0xff] }
 0x531   : > { %4290 = vst.msk [vmem:[#allocation2 + $0x648] sm:$0xff] %vm4088_vm1, %v3989_v1  ;;  %7988 = vmatmul.mubr.msk.f32.gmra.mxu1 %vm11565_vm8, %v8166_v57  ;;  %v3988_v4 = vadd.f32 %v3289_v5, %v2123_v62  ;;  %v7629_v30 = vpop.f32.mrf.mxu0  ;;  %v2129_v1 = vld [vmem:[#allocation2 + $0x670] sm:$0xff] }
 0x532   : > { %7990 = vmatprep.mubr.msk.f32.mxu1 %vm11581_vm15, %v8166_v57  ;;  %4143 = vst.msk [vmem:[#allocation2 + $0x1b0] sm:$0xff] %vm4088_vm1, %v3842_v38  ;;  %v3845_v48 = vadd.f32 %v7629_v30, %v1980_v36  ;;  %v7848_v55 = vpop.f32.mrf.mxu1  ;;  %v1986_v38 = vld [vmem:[#allocation2 + $0x1f8] sm:$0xff] }
 0x533   : > { %4289 = vst.msk [vmem:[#allocation2 + $0x640] sm:$0xff] %vm4088_vm1, %v3988_v4  ;;  %v3991_v61 = vadd.f32 %v7848_v55, %v2126_v42  ;;  %v2569_v54 = vpop.f32.mrf.mxu0  ;;  %v2132_v4 = vld [vmem:[#allocation2 + $0x688] sm:$0xff] }
 0x534   : > { %4146 = vst.msk [vmem:[#allocation2 + $0x1c8] sm:$0xff] %vm4088_vm1, %v3845_v48  ;;  %v3844_v46 = vadd.f32 %v2569_v54, %v1979_v29  ;;  %v3299_v0 = vpop.f32.mrf.mxu1  ;;  %v1985_v48 = vld [vmem:[#allocation2 + $0x1f0] sm:$0xff] }
 0x535   : > { %4292 = vst.msk [vmem:[#allocation2 + $0x658] sm:$0xff] %vm4088_vm1, %v3991_v61  ;;  %7991 = vmatmul.mubr.msk.f32.gmra.mxu1 %vm11594_vm0, %v8166_v57  ;;  %v3990_v28 = vadd.f32 %v3299_v0, %v2125_v40  ;;  %v7632_v63 = vpop.f32.mrf.mxu0  ;;  %v2131_v61 = vld [vmem:[#allocation2 + $0x680] sm:$0xff] }
 0x536   : > { %4145 = vst.msk [vmem:[#allocation2 + $0x1c0] sm:$0xff] %vm4088_vm1, %v3844_v46  ;;  %v3847_v33 = vadd.f32 %v7632_v63, %v1982_v11  ;;  %v7851_v2 = vpop.f32.mrf.mxu1  ;;  %v1988_v46 = vld [vmem:[#allocation2 + $0x208] sm:$0xff] }
 0x537   : > { %4291 = vst.msk [vmem:[#allocation2 + $0x650] sm:$0xff] %vm4088_vm1, %v3990_v28  ;;  %v3993_v53 = vadd.f32 %v7851_v2, %v2128_v19  ;;  %v2579_v44 = vpop.f32.mrf.mxu0  ;;  %v2134_v28 = vld [vmem:[#allocation2 + $0x698] sm:$0xff] }
 0x538   : > { %4148 = vst.msk [vmem:[#allocation2 + $0x1d8] sm:$0xff] %vm4088_vm1, %v3847_v33  ;;  %v3846_v60 = vadd.f32 %v2579_v44, %v1981_v34  ;;  %v3309_v59 = vpop.f32.mrf.mxu1  ;;  %v1987_v33 = vld [vmem:[#allocation2 + $0x200] sm:$0xff] }
 0x539   : > { %4294 = vst.msk [vmem:[#allocation2 + $0x668] sm:$0xff] %vm4088_vm1, %v3993_v53  ;;  %v3992_v57 = vadd.f32 %v3309_v59, %v2127_v49  ;;  %v7635_v6 = vpop.f32.mrf.mxu0  ;;  %v2133_v53 = vld [vmem:[#allocation2 + $0x690] sm:$0xff] }
 0x53a   : > { %4147 = vst.msk [vmem:[#allocation2 + $0x1d0] sm:$0xff] %vm4088_vm1, %v3846_v60  ;;  %v3849_v20 = vadd.f32 %v7635_v6, %v1984_v35  ;;  %v7854_v62 = vpop.f32.mrf.mxu1  ;;  %v1990_v60 = vld [vmem:[#allocation2 + $0x218] sm:$0xff] }
 0x53b   : > { %4293 = vst.msk [vmem:[#allocation2 + $0x660] sm:$0xff] %vm4088_vm1, %v3992_v57  ;;  %v3995_v39 = vadd.f32 %v7854_v62, %v2130_v7  ;;  %v2589_v36 = vpop.f32.mrf.mxu0  ;;  %v2136_v57 = vld [vmem:[#allocation2 + $0x6a8] sm:$0xff] }
 0x53c   : > { %4150 = vst.msk [vmem:[#allocation2 + $0x1e8] sm:$0xff] %vm4088_vm1, %v3849_v20  ;;  %v3848_v5 = vadd.f32 %v2589_v36, %v1983_v56  ;;  %v3319_v42 = vpop.f32.mrf.mxu1  ;;  %v1989_v20 = vld [vmem:[#allocation2 + $0x210] sm:$0xff] }
 0x53d   : > { %4296 = vst.msk [vmem:[#allocation2 + $0x678] sm:$0xff] %vm4088_vm1, %v3995_v39  ;;  %v3994_v30 = vadd.f32 %v3319_v42, %v2129_v1  ;;  %v7638_v29 = vpop.f32.mrf.mxu0  ;;  %v2135_v39 = vld [vmem:[#allocation2 + $0x6a0] sm:$0xff] }
 0x53e   : > { %4149 = vst.msk [vmem:[#allocation2 + $0x1e0] sm:$0xff] %vm4088_vm1, %v3848_v5  ;;  %v3851_v55 = vadd.f32 %v7638_v29, %v1986_v38  ;;  %v7857_v40 = vpop.f32.mrf.mxu1  ;;  %v1992_v5 = vld [vmem:[#allocation2 + $0x228] sm:$0xff] }
 0x53f   : > { %4295 = vst.msk [vmem:[#allocation2 + $0x670] sm:$0xff] %vm4088_vm1, %v3994_v30  ;;  %v3997_v54 = vadd.f32 %v7857_v40, %v2132_v4  ;;  %v2599_v11 = vpop.f32.mrf.mxu0  ;;  %v2138_v30 = vld [vmem:[#allocation2 + $0x6b8] sm:$0xff] }
 0x540   : > { %4152 = vst.msk [vmem:[#allocation2 + $0x1f8] sm:$0xff] %vm4088_vm1, %v3851_v55  ;;  %v3850_v0 = vadd.f32 %v2599_v11, %v1985_v48  ;;  %v3329_v19 = vpop.f32.mrf.mxu1  ;;  %v1991_v55 = vld [vmem:[#allocation2 + $0x220] sm:$0xff] }
 0x541   : > { %4298 = vst.msk [vmem:[#allocation2 + $0x688] sm:$0xff] %vm4088_vm1, %v3997_v54  ;;  %v3996_v63 = vadd.f32 %v3329_v19, %v2131_v61  ;;  %v7641_v34 = vpop.f32.mrf.mxu0  ;;  %v2137_v54 = vld [vmem:[#allocation2 + $0x6b0] sm:$0xff] }
 0x542   : > { %4151 = vst.msk [vmem:[#allocation2 + $0x1f0] sm:$0xff] %vm4088_vm1, %v3850_v0  ;;  %v3853_v2 = vadd.f32 %v7641_v34, %v1988_v46  ;;  %v7860_v49 = vpop.f32.mrf.mxu1  ;;  %v1994_v0 = vld [vmem:[#allocation2 + $0x238] sm:$0xff] }
 0x543   : > { %4297 = vst.msk [vmem:[#allocation2 + $0x680] sm:$0xff] %vm4088_vm1, %v3996_v63  ;;  %v3999_v44 = vadd.f32 %v7860_v49, %v2134_v28  ;;  %v2609_v35 = vpop.f32.mrf.mxu0  ;;  %v2140_v63 = vld [vmem:[#allocation2 + $0x6c8] sm:$0xff] }
 0x544   : > { %4154 = vst.msk [vmem:[#allocation2 + $0x208] sm:$0xff] %vm4088_vm1, %v3853_v2  ;;  %v3852_v59 = vadd.f32 %v2609_v35, %v1987_v33  ;;  %v3339_v7 = vpop.f32.mrf.mxu1  ;;  %v1993_v2 = vld [vmem:[#allocation2 + $0x230] sm:$0xff] }
 0x545   : > { %4300 = vst.msk [vmem:[#allocation2 + $0x698] sm:$0xff] %vm4088_vm1, %v3999_v44  ;;  %v3998_v6 = vadd.f32 %v3339_v7, %v2133_v53  ;;  %v7644_v56 = vpop.f32.mrf.mxu0  ;;  %v2139_v44 = vld [vmem:[#allocation2 + $0x6c0] sm:$0xff] }
 0x546   : > { %4153 = vst.msk [vmem:[#allocation2 + $0x200] sm:$0xff] %vm4088_vm1, %v3852_v59  ;;  %v3855_v62 = vadd.f32 %v7644_v56, %v1990_v60  ;;  %v7863_v1 = vpop.f32.mrf.mxu1  ;;  %v1996_v59 = vld [vmem:[#allocation2 + $0x248] sm:$0xff] }
 0x547   : > { %4299 = vst.msk [vmem:[#allocation2 + $0x690] sm:$0xff] %vm4088_vm1, %v3998_v6  ;;  %v4001_v36 = vadd.f32 %v7863_v1, %v2136_v57  ;;  %v2619_v38 = vpop.f32.mrf.mxu0 }
 0x548   : > { %4156 = vst.msk [vmem:[#allocation2 + $0x218] sm:$0xff] %vm4088_vm1, %v3855_v62  ;;  %v3854_v42 = vadd.f32 %v2619_v38, %v1989_v20  ;;  %v3349_v4 = vpop.f32.mrf.mxu1  ;;  %v2142_v20 = vld [vmem:[#allocation2 + $0x6d8] sm:$0xff]  ;;  %v1995_v62 = vld [vmem:[#allocation2 + $0x240] sm:$0xff]  ;;  %v2141_v38 = vld [vmem:[#allocation2 + $0x6d0] sm:$0xff] }
 0x549   : > { %4302 = vst.msk [vmem:[#allocation2 + $0x6a8] sm:$0xff] %vm4088_vm1, %v4001_v36  ;;  %v4000_v29 = vadd.f32 %v3349_v4, %v2135_v39  ;;  %v7647_v48 = vpop.f32.mrf.mxu0  ;;  %v1998_v4 = vld [vmem:[#allocation2 + $0x258] sm:$0xff] }
 0x54a   : > { %4155 = vst.msk [vmem:[#allocation2 + $0x210] sm:$0xff] %vm4088_vm1, %v3854_v42  ;;  %v3857_v40 = vadd.f32 %v7647_v48, %v1992_v5  ;;  %v7866_v61 = vpop.f32.mrf.mxu1 }
 0x54b   : > { %4301 = vst.msk [vmem:[#allocation2 + $0x6a0] sm:$0xff] %vm4088_vm1, %v4000_v29  ;;  %v4003_v11 = vadd.f32 %v7866_v61, %v2138_v30  ;;  %v2629_v46 = vpop.f32.mrf.mxu0 }
 0x54c   : > { %4158 = vst.msk [vmem:[#allocation2 + $0x228] sm:$0xff] %vm4088_vm1, %v3857_v40  ;;  %v3856_v19 = vadd.f32 %v2629_v46, %v1991_v55  ;;  %v3359_v28 = vpop.f32.mrf.mxu1  ;;  %v2144_v55 = vld [vmem:[#allocation2 + $0x6e8] sm:$0xff]  ;;  %v1997_v40 = vld [vmem:[#allocation2 + $0x250] sm:$0xff]  ;;  %v2143_v46 = vld [vmem:[#allocation2 + $0x6e0] sm:$0xff] }
 0x54d   : > { %4304 = vst.msk [vmem:[#allocation2 + $0x6b8] sm:$0xff] %vm4088_vm1, %v4003_v11  ;;  %v4002_v34 = vadd.f32 %v3359_v28, %v2137_v54  ;;  %v7650_v33 = vpop.f32.mrf.mxu0  ;;  %v2000_v28 = vld [vmem:[#allocation2 + $0x268] sm:$0xff] }
 0x54e   : > { %4157 = vst.msk [vmem:[#allocation2 + $0x220] sm:$0xff] %vm4088_vm1, %v3856_v19  ;;  %v3859_v49 = vadd.f32 %v7650_v33, %v1994_v0  ;;  %v7869_v53 = vpop.f32.mrf.mxu1 }
 0x54f   : > { %4303 = vst.msk [vmem:[#allocation2 + $0x6b0] sm:$0xff] %vm4088_vm1, %v4002_v34  ;;  %v4005_v35 = vadd.f32 %v7869_v53, %v2140_v63  ;;  %v2639_v60 = vpop.f32.mrf.mxu0 }
 0x550   : > { %4160 = vst.msk [vmem:[#allocation2 + $0x238] sm:$0xff] %vm4088_vm1, %v3859_v49  ;;  %v3858_v7 = vadd.f32 %v2639_v60, %v1993_v2  ;;  %v3369_v57 = vpop.f32.mrf.mxu1  ;;  %v2146_v2 = vld [vmem:[#allocation2 + $0x6f8] sm:$0xff]  ;;  %v1999_v49 = vld [vmem:[#allocation2 + $0x260] sm:$0xff]  ;;  %v2145_v60 = vld [vmem:[#allocation2 + $0x6f0] sm:$0xff] }
 0x551   : > { %4306 = vst.msk [vmem:[#allocation2 + $0x6c8] sm:$0xff] %vm4088_vm1, %v4005_v35  ;;  %v4004_v6 = vadd.f32 %v3369_v57, %v2139_v44  ;;  %v7653_v56 = vpop.f32.mrf.mxu0  ;;  %v2002_v57 = vld [vmem:[#allocation2 + $0x278] sm:$0xff] }
 0x552   : > { %4159 = vst.msk [vmem:[#allocation2 + $0x230] sm:$0xff] %vm4088_vm1, %v3858_v7  ;;  %v3861_v1 = vadd.f32 %v7653_v56, %v1996_v59  ;;  %v2148_v56 = vld [vmem:[#allocation2 + $0x708] sm:$0xff] }
 0x553   : > { %4305 = vst.msk [vmem:[#allocation2 + $0x6c0] sm:$0xff] %vm4088_vm1, %v4004_v6  ;;  %v7872_v39 = vpop.f32.mrf.mxu1  ;;  %v2649_v36 = vpop.f32.mrf.mxu0 }
 0x554   : > { %4162 = vst.msk [vmem:[#allocation2 + $0x248] sm:$0xff] %vm4088_vm1, %v3861_v1  ;;  %v4007_v5 = vadd.f32 %v7872_v39, %v2142_v20  ;;  %v3860_v42 = vadd.f32 %v2649_v36, %v1995_v62  ;;  %v2001_v1 = vld [vmem:[#allocation2 + $0x270] sm:$0xff] }
 0x555   : > { %v3379_v30 = vpop.f32.mrf.mxu1 }
 0x556   : > { %4308 = vst.msk [vmem:[#allocation2 + $0x6d8] sm:$0xff] %vm4088_vm1, %v4007_v5  ;;  %4161 = vst.msk [vmem:[#allocation2 + $0x240] sm:$0xff] %vm4088_vm1, %v3860_v42  ;;  %v4006_v29 = vadd.f32 %v3379_v30, %v2141_v38  ;;  %v7656_v48 = vpop.f32.mrf.mxu0  ;;  %v2147_v38 = vld [vmem:[#allocation2 + $0x700] sm:$0xff] }
 0x557   : > { %v3863_v61 = vadd.f32 %v7656_v48, %v1998_v4  ;;  %v2004_v4 = vld [vmem:[#allocation2 + $0x288] sm:$0xff]  ;;  %v2150_v48 = vld [vmem:[#allocation2 + $0x718] sm:$0xff] }
 0x558   : > { %4307 = vst.msk [vmem:[#allocation2 + $0x6d0] sm:$0xff] %vm4088_vm1, %v4006_v29  ;;  %v7875_v54 = vpop.f32.mrf.mxu1  ;;  %v2659_v11 = vpop.f32.mrf.mxu0 }
 0x559   : > { %4164 = vst.msk [vmem:[#allocation2 + $0x258] sm:$0xff] %vm4088_vm1, %v3863_v61  ;;  %v4009_v0 = vadd.f32 %v7875_v54, %v2144_v55  ;;  %v3862_v19 = vadd.f32 %v2659_v11, %v1997_v40  ;;  %v2003_v61 = vld [vmem:[#allocation2 + $0x280] sm:$0xff] }
 0x55a   : > { %v3389_v63 = vpop.f32.mrf.mxu1 }
 0x55b   : > { %4310 = vst.msk [vmem:[#allocation2 + $0x6e8] sm:$0xff] %vm4088_vm1, %v4009_v0  ;;  %4163 = vst.msk [vmem:[#allocation2 + $0x250] sm:$0xff] %vm4088_vm1, %v3862_v19  ;;  %v4008_v34 = vadd.f32 %v3389_v63, %v2143_v46  ;;  %v7659_v33 = vpop.f32.mrf.mxu0  ;;  %v2149_v46 = vld [vmem:[#allocation2 + $0x710] sm:$0xff] }
 0x55c   : > { %v3865_v53 = vadd.f32 %v7659_v33, %v2000_v28  ;;  %v2006_v28 = vld [vmem:[#allocation2 + $0x298] sm:$0xff]  ;;  %v2152_v33 = vld [vmem:[#allocation2 + $0x728] sm:$0xff] }
 0x55d   : > { %4309 = vst.msk [vmem:[#allocation2 + $0x6e0] sm:$0xff] %vm4088_vm1, %v4008_v34  ;;  %v7878_v44 = vpop.f32.mrf.mxu1  ;;  %v2669_v35 = vpop.f32.mrf.mxu0 }
 0x55e   : > { %4166 = vst.msk [vmem:[#allocation2 + $0x268] sm:$0xff] %vm4088_vm1, %v3865_v53  ;;  %v4011_v59 = vadd.f32 %v7878_v44, %v2146_v2  ;;  %v3864_v7 = vadd.f32 %v2669_v35, %v1999_v49  ;;  %v2005_v53 = vld [vmem:[#allocation2 + $0x290] sm:$0xff] }
 0x55f   : > { %v3399_v6 = vpop.f32.mrf.mxu1 }
 0x560   : > { %4312 = vst.msk [vmem:[#allocation2 + $0x6f8] sm:$0xff] %vm4088_vm1, %v4011_v59  ;;  %4165 = vst.msk [vmem:[#allocation2 + $0x260] sm:$0xff] %vm4088_vm1, %v3864_v7  ;;  %v4010_v20 = vadd.f32 %v3399_v6, %v2145_v60  ;;  %v7662_v62 = vpop.f32.mrf.mxu0  ;;  %v2151_v60 = vld [vmem:[#allocation2 + $0x720] sm:$0xff] }
 0x561   : > { %v3867_v39 = vadd.f32 %v7662_v62, %v2002_v57  ;;  %v7881_v36 = vpop.f32.mrf.mxu1  ;;  %v2008_v57 = vld [vmem:[#allocation2 + $0x2a8] sm:$0xff] }
 0x562   : > { %4311 = vst.msk [vmem:[#allocation2 + $0x6f0] sm:$0xff] %vm4088_vm1, %v4010_v20  ;;  %v4013_v5 = vadd.f32 %v7881_v36, %v2148_v56  ;;  %v2679_v42 = vpop.f32.mrf.mxu0  ;;  %v2154_v20 = vld [vmem:[#allocation2 + $0x738] sm:$0xff] }
 0x563   : > { %4168 = vst.msk [vmem:[#allocation2 + $0x278] sm:$0xff] %vm4088_vm1, %v3867_v39  ;;  %v3866_v30 = vadd.f32 %v2679_v42, %v2001_v1  ;;  %v3409_v29 = vpop.f32.mrf.mxu1  ;;  %v2007_v39 = vld [vmem:[#allocation2 + $0x2a0] sm:$0xff] }
 0x564   : > { %4314 = vst.msk [vmem:[#allocation2 + $0x708] sm:$0xff] %vm4088_vm1, %v4013_v5  ;;  %v4012_v55 = vadd.f32 %v3409_v29, %v2147_v38  ;;  %v7665_v40 = vpop.f32.mrf.mxu0  ;;  %v2153_v5 = vld [vmem:[#allocation2 + $0x730] sm:$0xff] }
 0x565   : > { %4167 = vst.msk [vmem:[#allocation2 + $0x270] sm:$0xff] %vm4088_vm1, %v3866_v30  ;;  %v3869_v54 = vadd.f32 %v7665_v40, %v2004_v4  ;;  %v7884_v11 = vpop.f32.mrf.mxu1  ;;  %v2010_v30 = vld [vmem:[#allocation2 + $0x2b8] sm:$0xff] }
 0x566   : > { %4313 = vst.msk [vmem:[#allocation2 + $0x700] sm:$0xff] %vm4088_vm1, %v4012_v55  ;;  %v4015_v0 = vadd.f32 %v7884_v11, %v2150_v48  ;;  %v2689_v19 = vpop.f32.mrf.mxu0  ;;  %v2156_v55 = vld [vmem:[#allocation2 + $0x748] sm:$0xff] }
 0x567   : > { %4170 = vst.msk [vmem:[#allocation2 + $0x288] sm:$0xff] %vm4088_vm1, %v3869_v54  ;;  %v3868_v63 = vadd.f32 %v2689_v19, %v2003_v61  ;;  %v3419_v34 = vpop.f32.mrf.mxu1  ;;  %v2009_v54 = vld [vmem:[#allocation2 + $0x2b0] sm:$0xff] }
 0x568   : > { %4316 = vst.msk [vmem:[#allocation2 + $0x718] sm:$0xff] %vm4088_vm1, %v4015_v0  ;;  %v4014_v2 = vadd.f32 %v3419_v34, %v2149_v46  ;;  %v7668_v49 = vpop.f32.mrf.mxu0  ;;  %v2155_v0 = vld [vmem:[#allocation2 + $0x740] sm:$0xff] }
 0x569   : > { %4169 = vst.msk [vmem:[#allocation2 + $0x280] sm:$0xff] %vm4088_vm1, %v3868_v63  ;;  %v3871_v44 = vadd.f32 %v7668_v49, %v2006_v28  ;;  %v7887_v35 = vpop.f32.mrf.mxu1  ;;  %v2012_v63 = vld [vmem:[#allocation2 + $0x2c8] sm:$0xff] }
 0x56a   : > { %4315 = vst.msk [vmem:[#allocation2 + $0x710] sm:$0xff] %vm4088_vm1, %v4014_v2  ;;  %v4017_v59 = vadd.f32 %v7887_v35, %v2152_v33  ;;  %v2699_v7 = vpop.f32.mrf.mxu0  ;;  %v2158_v2 = vld [vmem:[#allocation2 + $0x758] sm:$0xff] }
 0x56b   : > { %4172 = vst.msk [vmem:[#allocation2 + $0x298] sm:$0xff] %vm4088_vm1, %v3871_v44  ;;  %v3870_v6 = vadd.f32 %v2699_v7, %v2005_v53  ;;  %v3429_v56 = vpop.f32.mrf.mxu1  ;;  %v2011_v44 = vld [vmem:[#allocation2 + $0x2c0] sm:$0xff] }
 0x56c   : > { %4318 = vst.msk [vmem:[#allocation2 + $0x728] sm:$0xff] %vm4088_vm1, %v4017_v59  ;;  %v4016_v62 = vadd.f32 %v3429_v56, %v2151_v60  ;;  %v7671_v1 = vpop.f32.mrf.mxu0  ;;  %v2157_v59 = vld [vmem:[#allocation2 + $0x750] sm:$0xff]  ;;  %v585_v56 = vpop.xlane.xlu1 %584 }
 0x56d   : > { %4171 = vst.msk [vmem:[#allocation2 + $0x290] sm:$0xff] %vm4088_vm1, %v3870_v6  ;;  %v3873_v36 = vadd.f32 %v7671_v1, %v2008_v57  ;;  %v7890_v38 = vpop.f32.mrf.mxu1  ;;  %v2014_v6 = vld [vmem:[#allocation2 + $0x2d8] sm:$0xff]  ;;  %v2160_v1 = vld [vmem:[#allocation2 + $0x768] sm:$0xff] }
 0x56e   : > { %4317 = vst.msk [vmem:[#allocation2 + $0x720] sm:$0xff] %vm4088_vm1, %v4016_v62  ;;  %v4019_v42 = vadd.f32 %v7890_v38, %v2154_v20  ;;  %v2709_v4 = vpop.f32.mrf.mxu0 }
 0x56f   : > { %4174 = vst.msk [vmem:[#allocation2 + $0x2a8] sm:$0xff] %vm4088_vm1, %v3873_v36  ;;  %v3872_v29 = vadd.f32 %v2709_v4, %v2007_v39  ;;  %v3439_v48 = vpop.f32.mrf.mxu1  ;;  %v8027_v39 = vtrunc.f32 %v585_v56 }
 0x570   : > { %4320 = vst.msk [vmem:[#allocation2 + $0x738] sm:$0xff] %vm4088_vm1, %v4019_v42  ;;  %v4018_v40 = vadd.f32 %v3439_v48, %v2153_v5  ;;  %v7674_v61 = vpop.f32.mrf.mxu0  ;;  %v2013_v5 = vld [vmem:[#allocation2 + $0x2d0] sm:$0xff] }
 0x571   : > { %4173 = vst.msk [vmem:[#allocation2 + $0x2a0] sm:$0xff] %vm4088_vm1, %v3872_v29  ;;  %v3875_v11 = vadd.f32 %v7674_v61, %v2010_v30  ;;  %v7893_v46 = vpop.f32.mrf.mxu1  ;;  %v2159_v30 = vld [vmem:[#allocation2 + $0x760] sm:$0xff]  ;;  %v8028_v29 = vcvt.f32.s32 %v8027_v39 }
 0x572   : > { %4319 = vst.msk [vmem:[#allocation2 + $0x730] sm:$0xff] %vm4088_vm1, %v4018_v40  ;;  %v4021_v19 = vadd.f32 %v7893_v46, %v2156_v55  ;;  %v2719_v28 = vpop.f32.mrf.mxu0  ;;  %v2016_v40 = vld [vmem:[#allocation2 + $0x2e8] sm:$0xff]  ;;  %v8069_v46 = vld [vmem:[#allocation3] sm:$0xff] }
 0x573   : > { %4176 = vst.msk [vmem:[#allocation2 + $0x2b8] sm:$0xff] %vm4088_vm1, %v3875_v11  ;;  %v3874_v34 = vadd.f32 %v2719_v28, %v2009_v54  ;;  %v3449_v33 = vpop.f32.mrf.mxu1  ;;  %v2162_v11 = vld [vmem:[#allocation2 + $0x778] sm:$0xff] }
 0x574   : > { %4322 = vst.msk [vmem:[#allocation2 + $0x748] sm:$0xff] %vm4088_vm1, %v4021_v19  ;;  %v4020_v49 = vadd.f32 %v3449_v33, %v2155_v0  ;;  %v7677_v53 = vpop.f32.mrf.mxu0  ;;  %v11694_v0 = vadd.s32 %v8069_v46, %v8028_v29  ;;  %v2019_v29 = vld [vmem:[#allocation2 + $0x300] sm:$0xff] }
 0x575   : > { %4175 = vst.msk [vmem:[#allocation2 + $0x2b0] sm:$0xff] %vm4088_vm1, %v3874_v34  ;;  %v3877_v35 = vadd.f32 %v7677_v53, %v2012_v63  ;;  %v7896_v60 = vpop.f32.mrf.mxu1  ;;  %v2015_v63 = vld [vmem:[#allocation2 + $0x2e0] sm:$0xff] }
 0x576   : > { %4321 = vst.msk [vmem:[#allocation2 + $0x740] sm:$0xff] %vm4088_vm1, %v4020_v49  ;;  %v4023_v7 = vadd.f32 %v7896_v60, %v2158_v2  ;;  %v2729_v57 = vpop.f32.mrf.mxu0  ;;  %13862 = vst [vmem:[#allocation36_spill] sm:$0xff] %v11694_v0  ;;  %v2161_v2 = vld [vmem:[#allocation2 + $0x770] sm:$0xff] }
 0x577   : > { %4178 = vst.msk [vmem:[#allocation2 + $0x2c8] sm:$0xff] %vm4088_vm1, %v3877_v35  ;;  %v3876_v20 = vadd.f32 %v2729_v57, %v2011_v44  ;;  %v3459_v62 = vpop.f32.mrf.mxu1  ;;  %v2018_v44 = vld [vmem:[#allocation2 + $0x2f8] sm:$0xff] }
 0x578   : > { %4324 = vst.msk [vmem:[#allocation2 + $0x758] sm:$0xff] %vm4088_vm1, %v4023_v7  ;;  %v4022_v36 = vadd.f32 %v3459_v62, %v2157_v59  ;;  %v7680_v38 = vpop.f32.mrf.mxu0  ;;  %v2164_v59 = vld [vmem:[#allocation2 + $0x788] sm:$0xff]  ;;  %v2163_v62 = vld [vmem:[#allocation2 + $0x780] sm:$0xff] }
 0x579   : > { %4177 = vst.msk [vmem:[#allocation2 + $0x2c0] sm:$0xff] %vm4088_vm1, %v3876_v20  ;;  %v3879_v42 = vadd.f32 %v7680_v38, %v2014_v6  ;;  %v7899_v4 = vpop.f32.mrf.mxu1  ;;  %v2017_v6 = vld [vmem:[#allocation2 + $0x2f0] sm:$0xff] }
 0x57a   : > { %4323 = vst.msk [vmem:[#allocation2 + $0x750] sm:$0xff] %vm4088_vm1, %v4022_v36  ;;  %v4025_v48 = vadd.f32 %v7899_v4, %v2160_v1  ;;  %v2739_v55 = vpop.f32.mrf.mxu0  ;;  %v2020_v36 = vld [vmem:[#allocation2 + $0x308] sm:$0xff] }
 0x57b   : > { %4180 = vst.msk [vmem:[#allocation2 + $0x2d8] sm:$0xff] %vm4088_vm1, %v3879_v42  ;;  %v3878_v61 = vadd.f32 %v2739_v55, %v2013_v5  ;;  %v3469_v54 = vpop.f32.mrf.mxu1  ;;  %v2166_v42 = vld [vmem:[#allocation2 + $0x798] sm:$0xff] }
 0x57c   : > { %4326 = vst.msk [vmem:[#allocation2 + $0x768] sm:$0xff] %vm4088_vm1, %v4025_v48  ;;  %v4024_v19 = vadd.f32 %v3469_v54, %v2159_v30  ;;  %v7683_v28 = vpop.f32.mrf.mxu0 }
 0x57d   : > { %4179 = vst.msk [vmem:[#allocation2 + $0x2d0] sm:$0xff] %vm4088_vm1, %v3878_v61  ;;  %v3881_v34 = vadd.f32 %v7683_v28, %v2016_v40  ;;  %v7902_v33 = vpop.f32.mrf.mxu1  ;;  %v2165_v40 = vld [vmem:[#allocation2 + $0x790] sm:$0xff]  ;;  %v2168_v28 = vld [vmem:[#allocation2 + $0x7a8] sm:$0xff] }
 0x57e   : > { %589 = vst.msk [vmem:[#allocation3] sm:$0xff] %vm588_vm2, %v11694_v0  ;;  %v4027_v49 = vadd.f32 %v7902_v33, %v2162_v11  ;;  %v2749_v53 = vpop.f32.mrf.mxu0  ;;  %v2022_v11 = vld [vmem:[#allocation2 + $0x318] sm:$0xff]  ;;  %v2021_v33 = vld [vmem:[#allocation2 + $0x310] sm:$0xff] }
 0x57f   : > { %4325 = vst.msk [vmem:[#allocation2 + $0x760] sm:$0xff] %vm4088_vm1, %v4024_v19  ;;  %4182 = vst.msk [vmem:[#allocation2 + $0x2e8] sm:$0xff] %vm4088_vm1, %v3881_v34  ;;  %v3880_v35 = vadd.f32 %v2749_v53, %v2015_v63  ;;  %v3479_v60 = vpop.f32.mrf.mxu1  ;;  %v2167_v53 = vld [vmem:[#allocation2 + $0x7a0] sm:$0xff] }
 0x580   : > { %4328 = vst.msk [vmem:[#allocation2 + $0x778] sm:$0xff] %vm4088_vm1, %v4027_v49  ;;  %v4026_v7 = vadd.f32 %v3479_v60, %v2161_v2  ;;  %v7686_v57 = vpop.f32.mrf.mxu0  ;;  %v2024_v60 = vld [vmem:[#allocation2 + $0x328] sm:$0xff] }
 0x581   : > { %4181 = vst.msk [vmem:[#allocation2 + $0x2e0] sm:$0xff] %vm4088_vm1, %v3880_v35  ;;  %v3883_v56 = vadd.f32 %v7686_v57, %v2018_v44  ;;  %v7905_v20 = vpop.f32.mrf.mxu1  ;;  %v2170_v57 = vld [vmem:[#allocation2 + $0x7b8] sm:$0xff] }
 0x582   : > { %4327 = vst.msk [vmem:[#allocation2 + $0x770] sm:$0xff] %vm4088_vm1, %v4026_v7  ;;  %v4029_v1 = vadd.f32 %v7905_v20, %v2164_v59  ;;  %v2759_v39 = vpop.f32.mrf.mxu0  ;;  %v2023_v20 = vld [vmem:[#allocation2 + $0x320] sm:$0xff] }
 0x583   : > { %4184 = vst.msk [vmem:[#allocation2 + $0x2f8] sm:$0xff] %vm4088_vm1, %v3883_v56  ;;  %v3882_v38 = vadd.f32 %v2759_v39, %v2017_v6  ;;  %v3489_v5 = vpop.f32.mrf.mxu1  ;;  %v2169_v39 = vld [vmem:[#allocation2 + $0x7b0] sm:$0xff] }
 0x584   : > { %4330 = vst.msk [vmem:[#allocation2 + $0x788] sm:$0xff] %vm4088_vm1, %v4029_v1  ;;  %v4028_v4 = vadd.f32 %v3489_v5, %v2163_v62  ;;  %v7689_v30 = vpop.f32.mrf.mxu0  ;;  %v2026_v5 = vld [vmem:[#allocation2 + $0x338] sm:$0xff] }
 0x585   : > { %4183 = vst.msk [vmem:[#allocation2 + $0x2f0] sm:$0xff] %vm4088_vm1, %v3882_v38  ;;  %v3885_v48 = vadd.f32 %v7689_v30, %v2020_v36  ;;  %v7908_v55 = vpop.f32.mrf.mxu1  ;;  %v2172_v30 = vld [vmem:[#allocation2 + $0x7c8] sm:$0xff] }
 0x586   : > { %4329 = vst.msk [vmem:[#allocation2 + $0x780] sm:$0xff] %vm4088_vm1, %v4028_v4  ;;  %v4031_v61 = vadd.f32 %v7908_v55, %v2166_v42  ;;  %v2769_v54 = vpop.f32.mrf.mxu0  ;;  %v2025_v55 = vld [vmem:[#allocation2 + $0x330] sm:$0xff] }
 0x587   : > { %4186 = vst.msk [vmem:[#allocation2 + $0x308] sm:$0xff] %vm4088_vm1, %v3885_v48  ;;  %v3884_v46 = vadd.f32 %v2769_v54, %v2019_v29  ;;  %v3499_v19 = vpop.f32.mrf.mxu1  ;;  %v2171_v54 = vld [vmem:[#allocation2 + $0x7c0] sm:$0xff] }
 0x588   : > { %4332 = vst.msk [vmem:[#allocation2 + $0x798] sm:$0xff] %vm4088_vm1, %v4031_v61  ;;  %v4030_v63 = vadd.f32 %v3499_v19, %v2165_v40  ;;  %v7692_v34 = vpop.f32.mrf.mxu0  ;;  %v2028_v19 = vld [vmem:[#allocation2 + $0x348] sm:$0xff] }
 0x589   : > { %4185 = vst.msk [vmem:[#allocation2 + $0x300] sm:$0xff] %vm4088_vm1, %v3884_v46  ;;  %v3887_v2 = vadd.f32 %v7692_v34, %v2022_v11  ;;  %v7911_v49 = vpop.f32.mrf.mxu1  ;;  %v2174_v34 = vld [vmem:[#allocation2 + $0x7d8] sm:$0xff] }
 0x58a   : > { %4331 = vst.msk [vmem:[#allocation2 + $0x790] sm:$0xff] %vm4088_vm1, %v4030_v63  ;;  %v4033_v44 = vadd.f32 %v7911_v49, %v2168_v28  ;;  %v2779_v35 = vpop.f32.mrf.mxu0  ;;  %v2027_v49 = vld [vmem:[#allocation2 + $0x340] sm:$0xff] }
 0x58b   : > { %4188 = vst.msk [vmem:[#allocation2 + $0x318] sm:$0xff] %vm4088_vm1, %v3887_v2  ;;  %v3886_v59 = vadd.f32 %v2779_v35, %v2021_v33  ;;  %v3509_v7 = vpop.f32.mrf.mxu1  ;;  %v2173_v35 = vld [vmem:[#allocation2 + $0x7d0] sm:$0xff] }
 0x58c   : > { %4334 = vst.msk [vmem:[#allocation2 + $0x7a8] sm:$0xff] %vm4088_vm1, %v4033_v44  ;;  %v4032_v6 = vadd.f32 %v3509_v7, %v2167_v53  ;;  %v7695_v56 = vpop.f32.mrf.mxu0  ;;  %v2030_v7 = vld [vmem:[#allocation2 + $0x358] sm:$0xff] }
 0x58d   : > { %4187 = vst.msk [vmem:[#allocation2 + $0x310] sm:$0xff] %vm4088_vm1, %v3886_v59  ;;  %v3889_v62 = vadd.f32 %v7695_v56, %v2024_v60  ;;  %v7914_v1 = vpop.f32.mrf.mxu1  ;;  %v2176_v56 = vld [vmem:[#allocation2 + $0x7e8] sm:$0xff] }
 0x58e   : > { %4333 = vst.msk [vmem:[#allocation2 + $0x7a0] sm:$0xff] %vm4088_vm1, %v4032_v6  ;;  %v4035_v36 = vadd.f32 %v7914_v1, %v2170_v57  ;;  %v2789_v38 = vpop.f32.mrf.mxu0  ;;  %v2029_v1 = vld [vmem:[#allocation2 + $0x350] sm:$0xff] }
 0x58f   : > { %4190 = vst.msk [vmem:[#allocation2 + $0x328] sm:$0xff] %vm4088_vm1, %v3889_v62  ;;  %v3888_v42 = vadd.f32 %v2789_v38, %v2023_v20  ;;  %v3519_v4 = vpop.f32.mrf.mxu1  ;;  %v2175_v38 = vld [vmem:[#allocation2 + $0x7e0] sm:$0xff] }
 0x590   : > { %4336 = vst.msk [vmem:[#allocation2 + $0x7b8] sm:$0xff] %vm4088_vm1, %v4035_v36  ;;  %v4034_v29 = vadd.f32 %v3519_v4, %v2169_v39  ;;  %v7698_v48 = vpop.f32.mrf.mxu0  ;;  %v2032_v4 = vld [vmem:[#allocation2 + $0x368] sm:$0xff] }
 0x591   : > { %4189 = vst.msk [vmem:[#allocation2 + $0x320] sm:$0xff] %vm4088_vm1, %v3888_v42  ;;  %v3891_v40 = vadd.f32 %v7698_v48, %v2026_v5  ;;  %v7917_v61 = vpop.f32.mrf.mxu1  ;;  %v2178_v48 = vld [vmem:[#allocation2 + $0x7f8] sm:$0xff] }
 0x592   : > { %4335 = vst.msk [vmem:[#allocation2 + $0x7b0] sm:$0xff] %vm4088_vm1, %v4034_v29  ;;  %v4037_v11 = vadd.f32 %v7917_v61, %v2172_v30  ;;  %v2799_v46 = vpop.f32.mrf.mxu0  ;;  %v2031_v61 = vld [vmem:[#allocation2 + $0x360] sm:$0xff] }
 0x593   : > { %4192 = vst.msk [vmem:[#allocation2 + $0x338] sm:$0xff] %vm4088_vm1, %v3891_v40  ;;  %v3890_v28 = vadd.f32 %v2799_v46, %v2025_v55  ;;  %v3529_v63 = vpop.f32.mrf.mxu1  ;;  %v2177_v46 = vld [vmem:[#allocation2 + $0x7f0] sm:$0xff] }
 0x594   : > { %4338 = vst.msk [vmem:[#allocation2 + $0x7c8] sm:$0xff] %vm4088_vm1, %v4037_v11  ;;  %v4036_v33 = vadd.f32 %v3529_v63, %v2171_v54  ;;  %v7701_v2 = vpop.f32.mrf.mxu0  ;;  %v2034_v63 = vld [vmem:[#allocation2 + $0x378] sm:$0xff] }
 0x595   : > { %4191 = vst.msk [vmem:[#allocation2 + $0x330] sm:$0xff] %vm4088_vm1, %v3890_v28  ;;  %v3893_v53 = vadd.f32 %v7701_v2, %v2028_v19  ;;  %v7920_v44 = vpop.f32.mrf.mxu1  ;;  %v2180_v2 = vld [vmem:[#allocation2 + $0x808] sm:$0xff] }
 0x596   : > { %4337 = vst.msk [vmem:[#allocation2 + $0x7c0] sm:$0xff] %vm4088_vm1, %v4036_v33  ;;  %v4039_v60 = vadd.f32 %v7920_v44, %v2174_v34  ;;  %v2809_v59 = vpop.f32.mrf.mxu0  ;;  %v2033_v44 = vld [vmem:[#allocation2 + $0x370] sm:$0xff] }
 0x597   : > { %4194 = vst.msk [vmem:[#allocation2 + $0x348] sm:$0xff] %vm4088_vm1, %v3893_v53  ;;  %v3892_v57 = vadd.f32 %v2809_v59, %v2027_v49  ;;  %v3539_v6 = vpop.f32.mrf.mxu1  ;;  %v2179_v59 = vld [vmem:[#allocation2 + $0x800] sm:$0xff] }
 0x598   : > { %4340 = vst.msk [vmem:[#allocation2 + $0x7d8] sm:$0xff] %vm4088_vm1, %v4039_v60  ;;  %v4038_v20 = vadd.f32 %v3539_v6, %v2173_v35  ;;  %v7704_v62 = vpop.f32.mrf.mxu0  ;;  %v2036_v6 = vld [vmem:[#allocation2 + $0x388] sm:$0xff] }
 0x599   : > { %4193 = vst.msk [vmem:[#allocation2 + $0x340] sm:$0xff] %vm4088_vm1, %v3892_v57  ;;  %v3895_v39 = vadd.f32 %v7704_v62, %v2030_v7  ;;  %v7923_v36 = vpop.f32.mrf.mxu1  ;;  %v2182_v62 = vld [vmem:[#allocation2 + $0x818] sm:$0xff] }
 0x59a   : > { %4339 = vst.msk [vmem:[#allocation2 + $0x7d0] sm:$0xff] %vm4088_vm1, %v4038_v20  ;;  %v4041_v5 = vadd.f32 %v7923_v36, %v2176_v56  ;;  %v2819_v42 = vpop.f32.mrf.mxu0  ;;  %v2035_v36 = vld [vmem:[#allocation2 + $0x380] sm:$0xff] }
 0x59b   : > { %4196 = vst.msk [vmem:[#allocation2 + $0x358] sm:$0xff] %vm4088_vm1, %v3895_v39  ;;  %v3894_v30 = vadd.f32 %v2819_v42, %v2029_v1  ;;  %v3549_v29 = vpop.f32.mrf.mxu1  ;;  %v2181_v42 = vld [vmem:[#allocation2 + $0x810] sm:$0xff] }
 0x59c   : > { %4342 = vst.msk [vmem:[#allocation2 + $0x7e8] sm:$0xff] %vm4088_vm1, %v4041_v5  ;;  %v4040_v55 = vadd.f32 %v3549_v29, %v2175_v38  ;;  %v7707_v40 = vpop.f32.mrf.mxu0  ;;  %v2038_v29 = vld [vmem:[#allocation2 + $0x398] sm:$0xff] }
 0x59d   : > { %4195 = vst.msk [vmem:[#allocation2 + $0x350] sm:$0xff] %vm4088_vm1, %v3894_v30  ;;  %v3897_v54 = vadd.f32 %v7707_v40, %v2032_v4  ;;  %v7926_v11 = vpop.f32.mrf.mxu1  ;;  %v2184_v40 = vld [vmem:[#allocation2 + $0x828] sm:$0xff] }
 0x59e   : > { %4341 = vst.msk [vmem:[#allocation2 + $0x7e0] sm:$0xff] %vm4088_vm1, %v4040_v55  ;;  %v4043_v19 = vadd.f32 %v7926_v11, %v2178_v48  ;;  %v2829_v28 = vpop.f32.mrf.mxu0  ;;  %v2037_v11 = vld [vmem:[#allocation2 + $0x390] sm:$0xff] }
 0x59f   : > { %4198 = vst.msk [vmem:[#allocation2 + $0x368] sm:$0xff] %vm4088_vm1, %v3897_v54  ;;  %v3896_v34 = vadd.f32 %v2829_v28, %v2031_v61  ;;  %v3559_v33 = vpop.f32.mrf.mxu1  ;;  %v2183_v28 = vld [vmem:[#allocation2 + $0x820] sm:$0xff] }
 0x5a0   : > { %4344 = vst.msk [vmem:[#allocation2 + $0x7f8] sm:$0xff] %vm4088_vm1, %v4043_v19  ;;  %v4042_v49 = vadd.f32 %v3559_v33, %v2177_v46  ;;  %v7710_v53 = vpop.f32.mrf.mxu0  ;;  %v2040_v33 = vld [vmem:[#allocation2 + $0x3a8] sm:$0xff] }
 0x5a1   : > { %4197 = vst.msk [vmem:[#allocation2 + $0x360] sm:$0xff] %vm4088_vm1, %v3896_v34  ;;  %v3899_v35 = vadd.f32 %v7710_v53, %v2034_v63  ;;  %v7929_v60 = vpop.f32.mrf.mxu1  ;;  %v2186_v53 = vld [vmem:[#allocation2 + $0x838] sm:$0xff] }
 0x5a2   : > { %4343 = vst.msk [vmem:[#allocation2 + $0x7f0] sm:$0xff] %vm4088_vm1, %v4042_v49  ;;  %v4045_v7 = vadd.f32 %v7929_v60, %v2180_v2  ;;  %v2839_v57 = vpop.f32.mrf.mxu0  ;;  %v2039_v60 = vld [vmem:[#allocation2 + $0x3a0] sm:$0xff] }
 0x5a3   : > { %4200 = vst.msk [vmem:[#allocation2 + $0x378] sm:$0xff] %vm4088_vm1, %v3899_v35  ;;  %v3898_v56 = vadd.f32 %v2839_v57, %v2033_v44  ;;  %v3569_v20 = vpop.f32.mrf.mxu1  ;;  %v2185_v57 = vld [vmem:[#allocation2 + $0x830] sm:$0xff] }
 0x5a4   : > { %4346 = vst.msk [vmem:[#allocation2 + $0x808] sm:$0xff] %vm4088_vm1, %v4045_v7  ;;  %v4044_v1 = vadd.f32 %v3569_v20, %v2179_v59  ;;  %v7713_v39 = vpop.f32.mrf.mxu0  ;;  %v2042_v20 = vld [vmem:[#allocation2 + $0x3b8] sm:$0xff] }
 0x5a5   : > { %4199 = vst.msk [vmem:[#allocation2 + $0x370] sm:$0xff] %vm4088_vm1, %v3898_v56  ;;  %v3901_v38 = vadd.f32 %v7713_v39, %v2036_v6  ;;  %v7932_v5 = vpop.f32.mrf.mxu1  ;;  %v2188_v39 = vld [vmem:[#allocation2 + $0x848] sm:$0xff] }
 0x5a6   : > { %4345 = vst.msk [vmem:[#allocation2 + $0x800] sm:$0xff] %vm4088_vm1, %v4044_v1  ;;  %v4047_v4 = vadd.f32 %v7932_v5, %v2182_v62  ;;  %v2849_v30 = vpop.f32.mrf.mxu0  ;;  %v2041_v5 = vld [vmem:[#allocation2 + $0x3b0] sm:$0xff] }
 0x5a7   : > { %4202 = vst.msk [vmem:[#allocation2 + $0x388] sm:$0xff] %vm4088_vm1, %v3901_v38  ;;  %v3900_v48 = vadd.f32 %v2849_v30, %v2035_v36  ;;  %v3579_v55 = vpop.f32.mrf.mxu1  ;;  %v2187_v30 = vld [vmem:[#allocation2 + $0x840] sm:$0xff] }
 0x5a8   : > { %4348 = vst.msk [vmem:[#allocation2 + $0x818] sm:$0xff] %vm4088_vm1, %v4047_v4  ;;  %v4046_v61 = vadd.f32 %v3579_v55, %v2181_v42  ;;  %v7716_v54 = vpop.f32.mrf.mxu0  ;;  %v2044_v55 = vld [vmem:[#allocation2 + $0x3c8] sm:$0xff] }
 0x5a9   : > { %4201 = vst.msk [vmem:[#allocation2 + $0x380] sm:$0xff] %vm4088_vm1, %v3900_v48  ;;  %v3903_v46 = vadd.f32 %v7716_v54, %v2038_v29  ;;  %v7935_v19 = vpop.f32.mrf.mxu1  ;;  %v2190_v54 = vld [vmem:[#allocation2 + $0x858] sm:$0xff] }
 0x5aa   : > { %4347 = vst.msk [vmem:[#allocation2 + $0x810] sm:$0xff] %vm4088_vm1, %v4046_v61  ;;  %v4049_v63 = vadd.f32 %v7935_v19, %v2184_v40  ;;  %v2859_v34 = vpop.f32.mrf.mxu0  ;;  %v2043_v19 = vld [vmem:[#allocation2 + $0x3c0] sm:$0xff] }
 0x5ab   : > { %4204 = vst.msk [vmem:[#allocation2 + $0x398] sm:$0xff] %vm4088_vm1, %v3903_v46  ;;  %v3902_v2 = vadd.f32 %v2859_v34, %v2037_v11  ;;  %v3589_v49 = vpop.f32.mrf.mxu1  ;;  %v2189_v34 = vld [vmem:[#allocation2 + $0x850] sm:$0xff] }
 0x5ac   : > { %4350 = vst.msk [vmem:[#allocation2 + $0x828] sm:$0xff] %vm4088_vm1, %v4049_v63  ;;  %v4048_v44 = vadd.f32 %v3589_v49, %v2183_v28  ;;  %v7719_v35 = vpop.f32.mrf.mxu0  ;;  %v2046_v49 = vld [vmem:[#allocation2 + $0x3d8] sm:$0xff] }
 0x5ad   : > { %4203 = vst.msk [vmem:[#allocation2 + $0x390] sm:$0xff] %vm4088_vm1, %v3902_v2  ;;  %v3905_v59 = vadd.f32 %v7719_v35, %v2040_v33  ;;  %v7938_v7 = vpop.f32.mrf.mxu1  ;;  %v2192_v35 = vld [vmem:[#allocation2 + $0x868] sm:$0xff] }
 0x5ae   : > { %4349 = vst.msk [vmem:[#allocation2 + $0x820] sm:$0xff] %vm4088_vm1, %v4048_v44  ;;  %v4051_v6 = vadd.f32 %v7938_v7, %v2186_v53  ;;  %v2869_v56 = vpop.f32.mrf.mxu0  ;;  %v2045_v7 = vld [vmem:[#allocation2 + $0x3d0] sm:$0xff] }
 0x5af   : > { %4206 = vst.msk [vmem:[#allocation2 + $0x3a8] sm:$0xff] %vm4088_vm1, %v3905_v59  ;;  %v3904_v62 = vadd.f32 %v2869_v56, %v2039_v60  ;;  %v3599_v1 = vpop.f32.mrf.mxu1  ;;  %v2191_v56 = vld [vmem:[#allocation2 + $0x860] sm:$0xff] }
 0x5b0   : > { %4352 = vst.msk [vmem:[#allocation2 + $0x838] sm:$0xff] %vm4088_vm1, %v4051_v6  ;;  %v4050_v36 = vadd.f32 %v3599_v1, %v2185_v57  ;;  %v7722_v38 = vpop.f32.mrf.mxu0  ;;  %v2048_v1 = vld [vmem:[#allocation2 + $0x3e8] sm:$0xff] }
 0x5b1   : > { %4205 = vst.msk [vmem:[#allocation2 + $0x3a0] sm:$0xff] %vm4088_vm1, %v3904_v62  ;;  %v3907_v42 = vadd.f32 %v7722_v38, %v2042_v20  ;;  %v7941_v4 = vpop.f32.mrf.mxu1  ;;  %v2194_v38 = vld [vmem:[#allocation2 + $0x878] sm:$0xff] }
 0x5b2   : > { %4351 = vst.msk [vmem:[#allocation2 + $0x830] sm:$0xff] %vm4088_vm1, %v4050_v36  ;;  %v4053_v29 = vadd.f32 %v7941_v4, %v2188_v39  ;;  %v2879_v48 = vpop.f32.mrf.mxu0  ;;  %v2047_v4 = vld [vmem:[#allocation2 + $0x3e0] sm:$0xff] }
 0x5b3   : > { %4208 = vst.msk [vmem:[#allocation2 + $0x3b8] sm:$0xff] %vm4088_vm1, %v3907_v42  ;;  %v3906_v40 = vadd.f32 %v2879_v48, %v2041_v5  ;;  %v3609_v61 = vpop.f32.mrf.mxu1  ;;  %v2193_v48 = vld [vmem:[#allocation2 + $0x870] sm:$0xff] }
 0x5b4   : > { %4354 = vst.msk [vmem:[#allocation2 + $0x848] sm:$0xff] %vm4088_vm1, %v4053_v29  ;;  %v4052_v11 = vadd.f32 %v3609_v61, %v2187_v30  ;;  %v7725_v46 = vpop.f32.mrf.mxu0  ;;  %v2050_v61 = vld [vmem:[#allocation2 + $0x3f8] sm:$0xff] }
 0x5b5   : > { %4207 = vst.msk [vmem:[#allocation2 + $0x3b0] sm:$0xff] %vm4088_vm1, %v3906_v40  ;;  %v3909_v28 = vadd.f32 %v7725_v46, %v2044_v55  ;;  %v7944_v63 = vpop.f32.mrf.mxu1  ;;  %v2196_v46 = vld [vmem:[#allocation2 + $0x888] sm:$0xff] }
 0x5b6   : > { %4353 = vst.msk [vmem:[#allocation2 + $0x840] sm:$0xff] %vm4088_vm1, %v4052_v11  ;;  %v4055_v33 = vadd.f32 %v7944_v63, %v2190_v54  ;;  %v2889_v2 = vpop.f32.mrf.mxu0  ;;  %v2049_v63 = vld [vmem:[#allocation2 + $0x3f0] sm:$0xff] }
 0x5b7   : > { %4210 = vst.msk [vmem:[#allocation2 + $0x3c8] sm:$0xff] %vm4088_vm1, %v3909_v28  ;;  %v3908_v53 = vadd.f32 %v2889_v2, %v2043_v19  ;;  %v3619_v44 = vpop.f32.mrf.mxu1  ;;  %v2195_v2 = vld [vmem:[#allocation2 + $0x880] sm:$0xff] }
 0x5b8   : > { %4356 = vst.msk [vmem:[#allocation2 + $0x858] sm:$0xff] %vm4088_vm1, %v4055_v33  ;;  %v4054_v60 = vadd.f32 %v3619_v44, %v2189_v34  ;;  %v7728_v59 = vpop.f32.mrf.mxu0  ;;  %v2052_v44 = vld [vmem:[#allocation2 + $0x408] sm:$0xff] }
 0x5b9   : > { %4209 = vst.msk [vmem:[#allocation2 + $0x3c0] sm:$0xff] %vm4088_vm1, %v3908_v53  ;;  %v3911_v57 = vadd.f32 %v7728_v59, %v2046_v49  ;;  %v7947_v6 = vpop.f32.mrf.mxu1  ;;  %v2198_v59 = vld [vmem:[#allocation2 + $0x898] sm:$0xff] }
 0x5ba   : > { %4355 = vst.msk [vmem:[#allocation2 + $0x850] sm:$0xff] %vm4088_vm1, %v4054_v60  ;;  %v4057_v20 = vadd.f32 %v7947_v6, %v2192_v35  ;;  %v2899_v62 = vpop.f32.mrf.mxu0  ;;  %v2051_v6 = vld [vmem:[#allocation2 + $0x400] sm:$0xff] }
 0x5bb   : > { %4212 = vst.msk [vmem:[#allocation2 + $0x3d8] sm:$0xff] %vm4088_vm1, %v3911_v57  ;;  %v3910_v39 = vadd.f32 %v2899_v62, %v2045_v7  ;;  %v3629_v36 = vpop.f32.mrf.mxu1  ;;  %v2197_v62 = vld [vmem:[#allocation2 + $0x890] sm:$0xff] }
 0x5bc   : > { %4358 = vst.msk [vmem:[#allocation2 + $0x868] sm:$0xff] %vm4088_vm1, %v4057_v20  ;;  %v4056_v5 = vadd.f32 %v3629_v36, %v2191_v56  ;;  %v7731_v42 = vpop.f32.mrf.mxu0  ;;  %v2054_v36 = vld [vmem:[#allocation2 + $0x418] sm:$0xff] }
 0x5bd   : > { %4211 = vst.msk [vmem:[#allocation2 + $0x3d0] sm:$0xff] %vm4088_vm1, %v3910_v39  ;;  %v3913_v30 = vadd.f32 %v7731_v42, %v2048_v1  ;;  %v7950_v29 = vpop.f32.mrf.mxu1  ;;  %v2200_v42 = vld [vmem:[#allocation2 + $0x8a8] sm:$0xff] }
 0x5be   : > { %4357 = vst.msk [vmem:[#allocation2 + $0x860] sm:$0xff] %vm4088_vm1, %v4056_v5  ;;  %v4059_v55 = vadd.f32 %v7950_v29, %v2194_v38  ;;  %v2909_v40 = vpop.f32.mrf.mxu0  ;;  %v2053_v29 = vld [vmem:[#allocation2 + $0x410] sm:$0xff] }
 0x5bf   : > { %4214 = vst.msk [vmem:[#allocation2 + $0x3e8] sm:$0xff] %vm4088_vm1, %v3913_v30  ;;  %v3912_v54 = vadd.f32 %v2909_v40, %v2047_v4  ;;  %v3639_v11 = vpop.f32.mrf.mxu1  ;;  %v2199_v40 = vld [vmem:[#allocation2 + $0x8a0] sm:$0xff] }
 0x5c0   : > { %4360 = vst.msk [vmem:[#allocation2 + $0x878] sm:$0xff] %vm4088_vm1, %v4059_v55  ;;  %v4058_v19 = vadd.f32 %v3639_v11, %v2193_v48  ;;  %v7734_v28 = vpop.f32.mrf.mxu0  ;;  %v2056_v11 = vld [vmem:[#allocation2 + $0x428] sm:$0xff] }
 0x5c1   : > { %4213 = vst.msk [vmem:[#allocation2 + $0x3e0] sm:$0xff] %vm4088_vm1, %v3912_v54  ;;  %v3915_v34 = vadd.f32 %v7734_v28, %v2050_v61  ;;  %v7953_v33 = vpop.f32.mrf.mxu1  ;;  %v2202_v28 = vld [vmem:[#allocation2 + $0x8b8] sm:$0xff] }
 0x5c2   : > { %4359 = vst.msk [vmem:[#allocation2 + $0x870] sm:$0xff] %vm4088_vm1, %v4058_v19  ;;  %v4061_v49 = vadd.f32 %v7953_v33, %v2196_v46  ;;  %v2919_v53 = vpop.f32.mrf.mxu0  ;;  %v2055_v33 = vld [vmem:[#allocation2 + $0x420] sm:$0xff] }
 0x5c3   : > { %4216 = vst.msk [vmem:[#allocation2 + $0x3f8] sm:$0xff] %vm4088_vm1, %v3915_v34  ;;  %v3914_v35 = vadd.f32 %v2919_v53, %v2049_v63  ;;  %v3649_v60 = vpop.f32.mrf.mxu1  ;;  %v2201_v53 = vld [vmem:[#allocation2 + $0x8b0] sm:$0xff] }
 0x5c4   : > { %4362 = vst.msk [vmem:[#allocation2 + $0x888] sm:$0xff] %vm4088_vm1, %v4061_v49  ;;  %v4060_v7 = vadd.f32 %v3649_v60, %v2195_v2  ;;  %v7737_v57 = vpop.f32.mrf.mxu0  ;;  %v2058_v60 = vld [vmem:[#allocation2 + $0x438] sm:$0xff] }
 0x5c5   : > { %4215 = vst.msk [vmem:[#allocation2 + $0x3f0] sm:$0xff] %vm4088_vm1, %v3914_v35  ;;  %v3917_v56 = vadd.f32 %v7737_v57, %v2052_v44  ;;  %v7956_v20 = vpop.f32.mrf.mxu1  ;;  %v2204_v57 = vld [vmem:[#allocation2 + $0x8c8] sm:$0xff] }
 0x5c6   : > { %4361 = vst.msk [vmem:[#allocation2 + $0x880] sm:$0xff] %vm4088_vm1, %v4060_v7  ;;  %v4063_v1 = vadd.f32 %v7956_v20, %v2198_v59  ;;  %v2929_v39 = vpop.f32.mrf.mxu0  ;;  %v2057_v20 = vld [vmem:[#allocation2 + $0x430] sm:$0xff] }
 0x5c7   : > { %4218 = vst.msk [vmem:[#allocation2 + $0x408] sm:$0xff] %vm4088_vm1, %v3917_v56  ;;  %v3916_v38 = vadd.f32 %v2929_v39, %v2051_v6  ;;  %v3659_v5 = vpop.f32.mrf.mxu1  ;;  %v2203_v39 = vld [vmem:[#allocation2 + $0x8c0] sm:$0xff] }
 0x5c8   : > { %4364 = vst.msk [vmem:[#allocation2 + $0x898] sm:$0xff] %vm4088_vm1, %v4063_v1  ;;  %v4062_v4 = vadd.f32 %v3659_v5, %v2197_v62  ;;  %v7740_v30 = vpop.f32.mrf.mxu0  ;;  %v2060_v5 = vld [vmem:[#allocation2 + $0x448] sm:$0xff] }
 0x5c9   : > { %4217 = vst.msk [vmem:[#allocation2 + $0x400] sm:$0xff] %vm4088_vm1, %v3916_v38  ;;  %v3919_v48 = vadd.f32 %v7740_v30, %v2054_v36  ;;  %v7959_v55 = vpop.f32.mrf.mxu1  ;;  %v2206_v30 = vld [vmem:[#allocation2 + $0x8d8] sm:$0xff] }
 0x5ca   : > { %4363 = vst.msk [vmem:[#allocation2 + $0x890] sm:$0xff] %vm4088_vm1, %v4062_v4  ;;  %v4065_v61 = vadd.f32 %v7959_v55, %v2200_v42  ;;  %v2939_v54 = vpop.f32.mrf.mxu0  ;;  %v2059_v55 = vld [vmem:[#allocation2 + $0x440] sm:$0xff] }
 0x5cb   : > { %4220 = vst.msk [vmem:[#allocation2 + $0x418] sm:$0xff] %vm4088_vm1, %v3919_v48  ;;  %v3918_v46 = vadd.f32 %v2939_v54, %v2053_v29  ;;  %v3669_v19 = vpop.f32.mrf.mxu1  ;;  %v2205_v54 = vld [vmem:[#allocation2 + $0x8d0] sm:$0xff] }
 0x5cc   : > { %4366 = vst.msk [vmem:[#allocation2 + $0x8a8] sm:$0xff] %vm4088_vm1, %v4065_v61  ;;  %v4064_v63 = vadd.f32 %v3669_v19, %v2199_v40  ;;  %v7743_v34 = vpop.f32.mrf.mxu0  ;;  %v2062_v19 = vld [vmem:[#allocation2 + $0x458] sm:$0xff] }
 0x5cd   : > { %4219 = vst.msk [vmem:[#allocation2 + $0x410] sm:$0xff] %vm4088_vm1, %v3918_v46  ;;  %v3921_v2 = vadd.f32 %v7743_v34, %v2056_v11  ;;  %v7962_v49 = vpop.f32.mrf.mxu1  ;;  %v2208_v34 = vld [vmem:[#allocation2 + $0x8e8] sm:$0xff] }
 0x5ce   : > { %4365 = vst.msk [vmem:[#allocation2 + $0x8a0] sm:$0xff] %vm4088_vm1, %v4064_v63  ;;  %v4067_v44 = vadd.f32 %v7962_v49, %v2202_v28  ;;  %v2949_v35 = vpop.f32.mrf.mxu0  ;;  %v2061_v49 = vld [vmem:[#allocation2 + $0x450] sm:$0xff] }
 0x5cf   : > { %4222 = vst.msk [vmem:[#allocation2 + $0x428] sm:$0xff] %vm4088_vm1, %v3921_v2  ;;  %v3920_v59 = vadd.f32 %v2949_v35, %v2055_v33  ;;  %v3679_v7 = vpop.f32.mrf.mxu1  ;;  %v2207_v35 = vld [vmem:[#allocation2 + $0x8e0] sm:$0xff] }
 0x5d0   : > { %4368 = vst.msk [vmem:[#allocation2 + $0x8b8] sm:$0xff] %vm4088_vm1, %v4067_v44  ;;  %v4066_v6 = vadd.f32 %v3679_v7, %v2201_v53  ;;  %v7746_v56 = vpop.f32.mrf.mxu0  ;;  %v2064_v7 = vld [vmem:[#allocation2 + $0x468] sm:$0xff] }
 0x5d1   : > { %4221 = vst.msk [vmem:[#allocation2 + $0x420] sm:$0xff] %vm4088_vm1, %v3920_v59  ;;  %v3923_v62 = vadd.f32 %v7746_v56, %v2058_v60  ;;  %v7965_v1 = vpop.f32.mrf.mxu1  ;;  %v2210_v56 = vld [vmem:[#allocation2 + $0x8f8] sm:$0xff] }
 0x5d2   : > { %4367 = vst.msk [vmem:[#allocation2 + $0x8b0] sm:$0xff] %vm4088_vm1, %v4066_v6  ;;  %v4069_v36 = vadd.f32 %v7965_v1, %v2204_v57  ;;  %v2959_v38 = vpop.f32.mrf.mxu0  ;;  %v2063_v1 = vld [vmem:[#allocation2 + $0x460] sm:$0xff] }
 0x5d3   : > { %4224 = vst.msk [vmem:[#allocation2 + $0x438] sm:$0xff] %vm4088_vm1, %v3923_v62  ;;  %v3922_v42 = vadd.f32 %v2959_v38, %v2057_v20  ;;  %v3689_v4 = vpop.f32.mrf.mxu1  ;;  %v2209_v38 = vld [vmem:[#allocation2 + $0x8f0] sm:$0xff] }
 0x5d4   : > { %4370 = vst.msk [vmem:[#allocation2 + $0x8c8] sm:$0xff] %vm4088_vm1, %v4069_v36  ;;  %v4068_v29 = vadd.f32 %v3689_v4, %v2203_v39  ;;  %v7749_v48 = vpop.f32.mrf.mxu0  ;;  %v2066_v4 = vld [vmem:[#allocation2 + $0x478] sm:$0xff] }
 0x5d5   : > { %4223 = vst.msk [vmem:[#allocation2 + $0x430] sm:$0xff] %vm4088_vm1, %v3922_v42  ;;  %v3925_v40 = vadd.f32 %v7749_v48, %v2060_v5  ;;  %v7968_v61 = vpop.f32.mrf.mxu1  ;;  %v2212_v48 = vld [vmem:[#allocation2 + $0x908] sm:$0xff] }
 0x5d6   : > { %4369 = vst.msk [vmem:[#allocation2 + $0x8c0] sm:$0xff] %vm4088_vm1, %v4068_v29  ;;  %v4071_v11 = vadd.f32 %v7968_v61, %v2206_v30  ;;  %v2969_v46 = vpop.f32.mrf.mxu0  ;;  %v2065_v61 = vld [vmem:[#allocation2 + $0x470] sm:$0xff] }
 0x5d7   : > { %4226 = vst.msk [vmem:[#allocation2 + $0x448] sm:$0xff] %vm4088_vm1, %v3925_v40  ;;  %v3924_v28 = vadd.f32 %v2969_v46, %v2059_v55  ;;  %v3699_v63 = vpop.f32.mrf.mxu1  ;;  %v2211_v46 = vld [vmem:[#allocation2 + $0x900] sm:$0xff] }
 0x5d8   : > { %4372 = vst.msk [vmem:[#allocation2 + $0x8d8] sm:$0xff] %vm4088_vm1, %v4071_v11  ;;  %v4070_v33 = vadd.f32 %v3699_v63, %v2205_v54  ;;  %v7752_v2 = vpop.f32.mrf.mxu0  ;;  %v2068_v63 = vld [vmem:[#allocation2 + $0x488] sm:$0xff] }
 0x5d9   : > { %4225 = vst.msk [vmem:[#allocation2 + $0x440] sm:$0xff] %vm4088_vm1, %v3924_v28  ;;  %v3927_v53 = vadd.f32 %v7752_v2, %v2062_v19  ;;  %v7971_v44 = vpop.f32.mrf.mxu1  ;;  %v2214_v2 = vld [vmem:[#allocation2 + $0x918] sm:$0xff] }
 0x5da   : > { %4371 = vst.msk [vmem:[#allocation2 + $0x8d0] sm:$0xff] %vm4088_vm1, %v4070_v33  ;;  %v4073_v60 = vadd.f32 %v7971_v44, %v2208_v34  ;;  %v2979_v59 = vpop.f32.mrf.mxu0  ;;  %v2067_v44 = vld [vmem:[#allocation2 + $0x480] sm:$0xff] }
 0x5db   : > { %4228 = vst.msk [vmem:[#allocation2 + $0x458] sm:$0xff] %vm4088_vm1, %v3927_v53  ;;  %v3926_v57 = vadd.f32 %v2979_v59, %v2061_v49  ;;  %v3709_v6 = vpop.f32.mrf.mxu1  ;;  %v2213_v59 = vld [vmem:[#allocation2 + $0x910] sm:$0xff] }
 0x5dc   : > { %4374 = vst.msk [vmem:[#allocation2 + $0x8e8] sm:$0xff] %vm4088_vm1, %v4073_v60  ;;  %v4072_v20 = vadd.f32 %v3709_v6, %v2207_v35  ;;  %v7755_v62 = vpop.f32.mrf.mxu0  ;;  %v2070_v6 = vld [vmem:[#allocation2 + $0x498] sm:$0xff] }
 0x5dd   : > { %4227 = vst.msk [vmem:[#allocation2 + $0x450] sm:$0xff] %vm4088_vm1, %v3926_v57  ;;  %v3929_v39 = vadd.f32 %v7755_v62, %v2064_v7  ;;  %v7974_v36 = vpop.f32.mrf.mxu1  ;;  %v2216_v62 = vld [vmem:[#allocation2 + $0x928] sm:$0xff] }
 0x5de   : > { %4373 = vst.msk [vmem:[#allocation2 + $0x8e0] sm:$0xff] %vm4088_vm1, %v4072_v20  ;;  %v4075_v5 = vadd.f32 %v7974_v36, %v2210_v56  ;;  %v2989_v42 = vpop.f32.mrf.mxu0  ;;  %v2069_v36 = vld [vmem:[#allocation2 + $0x490] sm:$0xff] }
 0x5df   : > { %4230 = vst.msk [vmem:[#allocation2 + $0x468] sm:$0xff] %vm4088_vm1, %v3929_v39  ;;  %v3928_v30 = vadd.f32 %v2989_v42, %v2063_v1  ;;  %v3719_v29 = vpop.f32.mrf.mxu1  ;;  %v2215_v42 = vld [vmem:[#allocation2 + $0x920] sm:$0xff] }
 0x5e0   : > { %4376 = vst.msk [vmem:[#allocation2 + $0x8f8] sm:$0xff] %vm4088_vm1, %v4075_v5  ;;  %v4074_v55 = vadd.f32 %v3719_v29, %v2209_v38  ;;  %v7758_v40 = vpop.f32.mrf.mxu0  ;;  %v2072_v29 = vld [vmem:[#allocation2 + $0x4a8] sm:$0xff] }
 0x5e1   : > { %4229 = vst.msk [vmem:[#allocation2 + $0x460] sm:$0xff] %vm4088_vm1, %v3928_v30  ;;  %v3931_v54 = vadd.f32 %v7758_v40, %v2066_v4  ;;  %v7977_v11 = vpop.f32.mrf.mxu1  ;;  %v2218_v40 = vld [vmem:[#allocation2 + $0x938] sm:$0xff] }
 0x5e2   : > { %4375 = vst.msk [vmem:[#allocation2 + $0x8f0] sm:$0xff] %vm4088_vm1, %v4074_v55  ;;  %v4077_v19 = vadd.f32 %v7977_v11, %v2212_v48  ;;  %v2999_v28 = vpop.f32.mrf.mxu0  ;;  %v2071_v11 = vld [vmem:[#allocation2 + $0x4a0] sm:$0xff] }
 0x5e3   : > { %4232 = vst.msk [vmem:[#allocation2 + $0x478] sm:$0xff] %vm4088_vm1, %v3931_v54  ;;  %v3930_v34 = vadd.f32 %v2999_v28, %v2065_v61  ;;  %v3729_v33 = vpop.f32.mrf.mxu1  ;;  %v2217_v28 = vld [vmem:[#allocation2 + $0x930] sm:$0xff] }
 0x5e4   : > { %4378 = vst.msk [vmem:[#allocation2 + $0x908] sm:$0xff] %vm4088_vm1, %v4077_v19  ;;  %v4076_v49 = vadd.f32 %v3729_v33, %v2211_v46  ;;  %v7761_v53 = vpop.f32.mrf.mxu0 }
 0x5e5   : > { %4231 = vst.msk [vmem:[#allocation2 + $0x470] sm:$0xff] %vm4088_vm1, %v3930_v34  ;;  %v3933_v35 = vadd.f32 %v7761_v53, %v2068_v63  ;;  %v7980_v60 = vpop.f32.mrf.mxu1 }
 0x5e6   : > { %4377 = vst.msk [vmem:[#allocation2 + $0x900] sm:$0xff] %vm4088_vm1, %v4076_v49  ;;  %v4079_v7 = vadd.f32 %v7980_v60, %v2214_v2  ;;  %v3009_v57 = vpop.f32.mrf.mxu0  ;;  %v2220_v49 = vld [vmem:[#allocation2 + $0x948] sm:$0xff] }
 0x5e7   : > { %4234 = vst.msk [vmem:[#allocation2 + $0x488] sm:$0xff] %vm4088_vm1, %v3933_v35  ;;  %v3932_v56 = vadd.f32 %v3009_v57, %v2067_v44  ;;  %v3739_v20 = vpop.f32.mrf.mxu1  ;;  %v2219_v35 = vld [vmem:[#allocation2 + $0x940] sm:$0xff] }
 0x5e8   : > { %4380 = vst.msk [vmem:[#allocation2 + $0x918] sm:$0xff] %vm4088_vm1, %v4079_v7  ;;  %v4078_v1 = vadd.f32 %v3739_v20, %v2213_v59  ;;  %v7764_v39 = vpop.f32.mrf.mxu0  ;;  %v2222_v7 = vld [vmem:[#allocation2 + $0x958] sm:$0xff] }
 0x5e9   : > { %4233 = vst.msk [vmem:[#allocation2 + $0x480] sm:$0xff] %vm4088_vm1, %v3932_v56  ;;  %v3935_v38 = vadd.f32 %v7764_v39, %v2070_v6  ;;  %v7983_v5 = vpop.f32.mrf.mxu1  ;;  %v2221_v56 = vld [vmem:[#allocation2 + $0x950] sm:$0xff] }
 0x5ea   : > { %4379 = vst.msk [vmem:[#allocation2 + $0x910] sm:$0xff] %vm4088_vm1, %v4078_v1  ;;  %v4081_v4 = vadd.f32 %v7983_v5, %v2216_v62  ;;  %v3019_v30 = vpop.f32.mrf.mxu0 }
 0x5eb   : > { %4236 = vst.msk [vmem:[#allocation2 + $0x498] sm:$0xff] %vm4088_vm1, %v3935_v38  ;;  %v3934_v48 = vadd.f32 %v3019_v30, %v2069_v36  ;;  %v3749_v55 = vpop.f32.mrf.mxu1 }
 0x5ec   : > { %4382 = vst.msk [vmem:[#allocation2 + $0x928] sm:$0xff] %vm4088_vm1, %v4081_v4  ;;  %v4080_v61 = vadd.f32 %v3749_v55, %v2215_v42  ;;  %v7767_v54 = vpop.f32.mrf.mxu0 }
 0x5ed   : > { %4235 = vst.msk [vmem:[#allocation2 + $0x490] sm:$0xff] %vm4088_vm1, %v3934_v48  ;;  %v3937_v46 = vadd.f32 %v7767_v54, %v2072_v29  ;;  %v7986_v19 = vpop.f32.mrf.mxu1 }
 0x5ee   : > { %4381 = vst.msk [vmem:[#allocation2 + $0x920] sm:$0xff] %vm4088_vm1, %v4080_v61  ;;  %v4083_v63 = vadd.f32 %v7986_v19, %v2218_v40  ;;  %v3029_v34 = vpop.f32.mrf.mxu0 }
 0x5ef   : > { %4238 = vst.msk [vmem:[#allocation2 + $0x4a8] sm:$0xff] %vm4088_vm1, %v3937_v46  ;;  %v3936_v33 = vadd.f32 %v3029_v34, %v2071_v11  ;;  %v3759_v2 = vpop.f32.mrf.mxu1 }
 0x5f0   : > { %4384 = vst.msk [vmem:[#allocation2 + $0x938] sm:$0xff] %vm4088_vm1, %v4083_v63  ;;  %v4082_v53 = vadd.f32 %v3759_v2, %v2217_v28 }
 0x5f1   : > { %4237 = vst.msk [vmem:[#allocation2 + $0x4a0] sm:$0xff] %vm4088_vm1, %v3936_v33  ;;  %v7989_v44 = vpop.f32.mrf.mxu1 }
 0x5f2   : > { %4383 = vst.msk [vmem:[#allocation2 + $0x930] sm:$0xff] %vm4088_vm1, %v4082_v53  ;;  %v4085_v60 = vadd.f32 %v7989_v44, %v2220_v49 }
 0x5f3   : > { %v3769_v59 = vpop.f32.mrf.mxu1 }
 0x5f4   : > { %4386 = vst.msk [vmem:[#allocation2 + $0x948] sm:$0xff] %vm4088_vm1, %v4085_v60  ;;  %v4084_v57 = vadd.f32 %v3769_v59, %v2219_v35 }
 0x5f5   : > { %v7992_v6 = vpop.f32.mrf.mxu1 }
 0x5f6   : > { %4385 = vst.msk [vmem:[#allocation2 + $0x940] sm:$0xff] %vm4088_vm1, %v4084_v57  ;;  %v4087_v20 = vadd.f32 %v7992_v6, %v2222_v7  ;;  %4392 = sbr.rel (%p7084_p6) target bundleno = 1957 (0x7a5), region = 36 }
 0x5f7   : > { %v3779_v62 = vpop.f32.mrf.mxu1 }
 0x5f8   : > { %4388 = vst.msk [vmem:[#allocation2 + $0x958] sm:$0xff] %vm4088_vm1, %v4087_v20  ;;  %v4086_v1 = vadd.f32 %v3779_v62, %v2221_v56 }
 0x5fa   : > { %4387 = vst.msk [vmem:[#allocation2 + $0x950] sm:$0xff] %vm4088_vm1, %v4086_v1 }
 0x5fb   : > { %v4395_v39 = vld [vmem:[#allocation2 + $0x10] sm:$0xff]  ;;  %v4520_v36 = vld [vmem:[#allocation2 + $0x3f8] sm:$0xff]  ;;  %v11822_v38 = vld [vmem:[#allocation2 + $0x8a8] sm:$0xff] }
 0x5fc   : > { %v4705_v5 = vsub.f32 %v11822_v38, %v4520_v36  ;;  %v4393_v42 = vld [vmem:[#allocation2] sm:$0xff]  ;;  %v4518_v4 = vld [vmem:[#allocation2 + $0x3e8] sm:$0xff]  ;;  %v11825_v30 = vld [vmem:[#allocation2 + $0x898] sm:$0xff] }
 0x5fd   : > { %v4703_v29 = vsub.f32 %v11825_v30, %v4518_v4  ;;  %v4396_v48 = vld [vmem:[#allocation2 + $0x18] sm:$0xff]  ;;  %v4521_v55 = vld [vmem:[#allocation2 + $0x400] sm:$0xff]  ;;  %v11828_v40 = vld [vmem:[#allocation2 + $0x8b0] sm:$0xff] }
 0x5fe   : > { %v4730_v61 = vmul.f32 %v4705_v5, %v4395_v39  ;;  %v4706_v54 = vsub.f32 %v11828_v40, %v4521_v55  ;;  %v4394_v11 = vld [vmem:[#allocation2 + $0x8] sm:$0xff]  ;;  %v4519_v46 = vld [vmem:[#allocation2 + $0x3f0] sm:$0xff]  ;;  %v11831_v19 = vld [vmem:[#allocation2 + $0x8a0] sm:$0xff] }
 0x5ff   : > { %v4728_v28 = vmul.f32 %v4703_v29, %v4393_v42  ;;  %v4704_v63 = vsub.f32 %v11831_v19, %v4519_v46  ;;  %v4398_v34 = vld [vmem:[#allocation2 + $0x28] sm:$0xff]  ;;  %v4523_v33 = vld [vmem:[#allocation2 + $0x410] sm:$0xff]  ;;  %v11834_v2 = vld [vmem:[#allocation2 + $0x8c0] sm:$0xff] }
 0x600   : > { %v4759_v49 = vsel %vm4088_vm1, %v4730_v61, 0.0  ;;  %v4731_v53 = vmul.f32 %v4706_v54, %v4396_v48  ;;  %v4708_v44 = vsub.f32 %v11834_v2, %v4523_v33  ;;  %v4397_v35 = vld [vmem:[#allocation2 + $0x20] sm:$0xff]  ;;  %v4522_v60 = vld [vmem:[#allocation2 + $0x408] sm:$0xff]  ;;  %v11838_v59 = vld [vmem:[#allocation2 + $0x8b8] sm:$0xff] }
 0x601   : > { %4760 = vadd.xlane.f32.xlu1 %v4759_v49  ;;  %v4753_v7 = vsel %vm4088_vm1, %v4728_v28, 0.0  ;;  %v4729_v57 = vmul.f32 %v4704_v63, %v4394_v11  ;;  %v4707_v6 = vsub.f32 %v11838_v59, %v4522_v60  ;;  %v4525_v56 = vld [vmem:[#allocation2 + $0x420] sm:$0xff]  ;;  %v11842_v20 = vld [vmem:[#allocation2 + $0x8d0] sm:$0xff]  ;;  %v4524_v36 = vld [vmem:[#allocation2 + $0x418] sm:$0xff] }
 0x602   : > { %4754 = vadd.xlane.f32.xlu0 %v4753_v7  ;;  %v4762_v62 = vsel %vm4088_vm1, %v4731_v53, 0.0  ;;  %v4733_v1 = vmul.f32 %v4708_v44, %v4398_v34  ;;  %v4710_v39 = vsub.f32 %v11842_v20, %v4525_v56  ;;  %v11846_v5 = vld [vmem:[#allocation2 + $0x8c8] sm:$0xff]  ;;  %v4400_v29 = vld [vmem:[#allocation2 + $0x38] sm:$0xff]  ;;  %v4527_v55 = vld [vmem:[#allocation2 + $0x430] sm:$0xff] }
 0x603   : > { %v4756_v42 = vsel %vm4088_vm1, %v4729_v57, 0.0  ;;  %v4732_v4 = vmul.f32 %v4707_v6, %v4397_v35  ;;  %v4709_v48 = vsub.f32 %v11846_v5, %v4524_v36  ;;  %v11850_v61 = vld [vmem:[#allocation2 + $0x8e0] sm:$0xff]  ;;  %v4399_v54 = vld [vmem:[#allocation2 + $0x30] sm:$0xff]  ;;  %v4526_v11 = vld [vmem:[#allocation2 + $0x428] sm:$0xff] }
 0x604   : > { %v11852_v46 = vld [vmem:[#allocation2 + $0x8d8] sm:$0xff]  ;;  %v4768_v28 = vsel %vm4088_vm1, %v4733_v1, 0.0  ;;  %v4735_v63 = vmul.f32 %v4710_v39, %v4400_v29  ;;  %v4712_v34 = vsub.f32 %v11850_v61, %v4527_v55  ;;  %v4402_v53 = vld [vmem:[#allocation2 + $0x48] sm:$0xff]  ;;  %v4529_v35 = vld [vmem:[#allocation2 + $0x440] sm:$0xff] }
 0x605   : > { %4763 = vadd.xlane.f32.xlu1 %v4762_v62  ;;  %v4765_v33 = vsel %vm4088_vm1, %v4732_v4, 0.0  ;;  %v4734_v49 = vmul.f32 %v4709_v48, %v4399_v54  ;;  %v4711_v44 = vsub.f32 %v11852_v46, %v4526_v11  ;;  %v11858_v60 = vld [vmem:[#allocation2 + $0x8f0] sm:$0xff]  ;;  %v4401_v7 = vld [vmem:[#allocation2 + $0x40] sm:$0xff]  ;;  %v4528_v57 = vld [vmem:[#allocation2 + $0x438] sm:$0xff] }
 0x606   : > { %4757 = vadd.xlane.f32.xlu0 %v4756_v42  ;;  %v11860_v6 = vld [vmem:[#allocation2 + $0x8e8] sm:$0xff]  ;;  %v4774_v56 = vsel %vm4088_vm1, %v4735_v63, 0.0  ;;  %v4737_v62 = vmul.f32 %v4712_v34, %v4402_v53  ;;  %v4714_v1 = vsub.f32 %v11858_v60, %v4529_v35  ;;  %v4404_v42 = vld [vmem:[#allocation2 + $0x58] sm:$0xff]  ;;  %v4531_v29 = vld [vmem:[#allocation2 + $0x450] sm:$0xff] }
 0x607   : > { %v4771_v39 = vsel %vm4088_vm1, %v4734_v49, 0.0  ;;  %v4736_v36 = vmul.f32 %v4711_v44, %v4401_v7  ;;  %v4713_v4 = vsub.f32 %v11860_v6, %v4528_v57  ;;  %v11866_v48 = vld [vmem:[#allocation2 + $0x900] sm:$0xff]  ;;  %v4403_v55 = vld [vmem:[#allocation2 + $0x50] sm:$0xff]  ;;  %v4530_v54 = vld [vmem:[#allocation2 + $0x448] sm:$0xff] }
 0x608   : > { %v11868_v11 = vld [vmem:[#allocation2 + $0x8f8] sm:$0xff]  ;;  %v4739_v63 = vmul.f32 %v4714_v1, %v4404_v42  ;;  %v4716_v34 = vsub.f32 %v11866_v48, %v4531_v29  ;;  %v4406_v53 = vld [vmem:[#allocation2 + $0x68] sm:$0xff]  ;;  %v4533_v35 = vld [vmem:[#allocation2 + $0x460] sm:$0xff] }
 0x609   : > { %4769 = vadd.xlane.f32.xlu1 %v4768_v28  ;;  %v4780_v28 = vsel %vm4088_vm1, %v4737_v62, 0.0  ;;  %v4738_v49 = vmul.f32 %v4713_v4, %v4403_v55  ;;  %v4715_v44 = vsub.f32 %v11868_v11, %v4530_v54  ;;  %v11874_v7 = vld [vmem:[#allocation2 + $0x910] sm:$0xff]  ;;  %v4405_v57 = vld [vmem:[#allocation2 + $0x60] sm:$0xff]  ;;  %v4532_v21 = vld [vmem:[#allocation2 + $0x458] sm:$0xff] }
 0x60a   : > { %4766 = vadd.xlane.f32.xlu0 %v4765_v33  ;;  %v4777_v33 = vsel %vm4088_vm1, %v4736_v36, 0.0  ;;  %v11876_v27 = vld [vmem:[#allocation2 + $0x908] sm:$0xff]  ;;  %v4741_v62 = vmul.f32 %v4716_v34, %v4406_v53  ;;  %v4718_v1 = vsub.f32 %v11874_v7, %v4533_v35  ;;  %v4408_v42 = vld [vmem:[#allocation2 + $0x78] sm:$0xff]  ;;  %v4535_v29 = vld [vmem:[#allocation2 + $0x470] sm:$0xff] }
 0x60b   : > { %13863 = vst [vmem:[#allocation37_spill] sm:$0xff] %v11876_v27  ;;  %v4740_v36 = vmul.f32 %v4715_v44, %v4405_v57  ;;  %v4717_v4 = vsub.f32 %v11876_v27, %v4532_v21  ;;  %v11882_v55 = vld [vmem:[#allocation2 + $0x920] sm:$0xff]  ;;  %v4407_v54 = vld [vmem:[#allocation2 + $0x70] sm:$0xff]  ;;  %v4534_v45 = vld [vmem:[#allocation2 + $0x468] sm:$0xff] }
 0x60c   : > { %v11884_v32 = vld [vmem:[#allocation2 + $0x918] sm:$0xff]  ;;  %v4720_v34 = vsub.f32 %v11882_v55, %v4535_v29  ;;  %v4410_v53 = vld [vmem:[#allocation2 + $0x88] sm:$0xff]  ;;  %v4537_v44 = vld [vmem:[#allocation2 + $0x480] sm:$0xff] }
 0x60d   : > { %4775 = vadd.xlane.f32.xlu1 %v4774_v56  ;;  %v4786_v56 = vsel %vm4088_vm1, %v4739_v63, 0.0  ;;  %v4743_v63 = vmul.f32 %v4718_v1, %v4408_v42  ;;  %v4719_v21 = vsub.f32 %v11884_v32, %v4534_v45  ;;  %v11890_v35 = vld [vmem:[#allocation2 + $0x930] sm:$0xff]  ;;  %v4409_v57 = vld [vmem:[#allocation2 + $0x80] sm:$0xff]  ;;  %v4536_v26 = vld [vmem:[#allocation2 + $0x478] sm:$0xff] }
 0x60e   : > { %4772 = vadd.xlane.f32.xlu0 %v4771_v39  ;;  %v4783_v39 = vsel %vm4088_vm1, %v4738_v49, 0.0  ;;  %v4742_v49 = vmul.f32 %v4717_v4, %v4407_v54  ;;  %v11892_v31 = vld [vmem:[#allocation2 + $0x928] sm:$0xff]  ;;  %v4722_v1 = vsub.f32 %v11890_v35, %v4537_v44  ;;  %v4412_v42 = vld [vmem:[#allocation2 + $0x98] sm:$0xff]  ;;  %v4539_v4 = vld [vmem:[#allocation2 + $0x490] sm:$0xff] }
 0x60f   : > { %v4721_v45 = vsub.f32 %v11892_v31, %v4536_v26  ;;  %v11898_v29 = vld [vmem:[#allocation2 + $0x940] sm:$0xff]  ;;  %v4411_v54 = vld [vmem:[#allocation2 + $0x90] sm:$0xff]  ;;  %v4538_v24 = vld [vmem:[#allocation2 + $0x488] sm:$0xff] }
 0x610   : > { %v11900_v25 = vld [vmem:[#allocation2 + $0x938] sm:$0xff]  ;;  %v11906_v44 = vld [vmem:[#allocation2 + $0x950] sm:$0xff]  ;;  %v11908_v23 = vld [vmem:[#allocation2 + $0x948] sm:$0xff] }
 0x611   : > { %4781 = vadd.xlane.f32.xlu1 %v4780_v28  ;;  %v4792_v28 = vsel %vm4088_vm1, %v4741_v62, 0.0  ;;  %v4745_v62 = vmul.f32 %v4720_v34, %v4410_v53  ;;  %v4724_v34 = vsub.f32 %v11898_v29, %v4539_v4  ;;  %v4414_v53 = vld [vmem:[#allocation2 + $0xa8] sm:$0xff]  ;;  %v4723_v26 = vsub.f32 %v11900_v25, %v4538_v24  ;;  %v4540_v22 = vld [vmem:[#allocation2 + $0x498] sm:$0xff]  ;;  %v4415_v4 = vld [vmem:[#allocation2 + $0xb0] sm:$0xff] }
 0x612   : > { %4778 = vadd.xlane.f32.xlu0 %v4777_v33  ;;  %v4789_v33 = vsel %vm4088_vm1, %v4740_v36, 0.0  ;;  %v4744_v36 = vmul.f32 %v4719_v21, %v4409_v57  ;;  %v4541_v21 = vld [vmem:[#allocation2 + $0x4a0] sm:$0xff]  ;;  %v4725_v24 = vsub.f32 %v11908_v23, %v4540_v22  ;;  %v4692_v16 = vld [vmem:[#allocation2 + $0x958] sm:$0xff] }
 0x613   : > { %v4413_v57 = vld [vmem:[#allocation2 + $0xa0] sm:$0xff]  ;;  %v4544_v18 = vld [vmem:[#allocation2 + $0x4b8] sm:$0xff] }
 0x615   : > { %4787 = vadd.xlane.f32.xlu1 %v4786_v56  ;;  %v4798_v56 = vsel %vm4088_vm1, %v4743_v63, 0.0  ;;  %v4747_v63 = vmul.f32 %v4722_v1, %v4412_v42  ;;  %v4726_v1 = vsub.f32 %v11906_v44, %v4541_v21  ;;  %v4416_v42 = vld [vmem:[#allocation2 + $0xb8] sm:$0xff]  ;;  %v4418_v21 = vld [vmem:[#allocation2 + $0xc8] sm:$0xff] }
 0x616   : > { %4784 = vadd.xlane.f32.xlu0 %v4783_v39  ;;  %v4795_v39 = vsel %vm4088_vm1, %v4742_v49, 0.0  ;;  %v4746_v49 = vmul.f32 %v4721_v45, %v4411_v54  ;;  %v4543_v45 = vld [vmem:[#allocation2 + $0x4b0] sm:$0xff]  ;;  %v4542_v54 = vld [vmem:[#allocation2 + $0x4a8] sm:$0xff] }
 0x619   : > { %4793 = vadd.xlane.f32.xlu1 %v4792_v28  ;;  %v4804_v28 = vsel %vm4088_vm1, %v4745_v62, 0.0  ;;  %v4749_v62 = vmul.f32 %v4724_v34, %v4414_v53  ;;  %v4750_v53 = vmul.f32 %v4725_v24, %v4415_v4  ;;  %v4419_v24 = vld [vmem:[#allocation2 + $0xd0] sm:$0xff] }
 0x61a   : > { %4790 = vadd.xlane.f32.xlu0 %v4789_v33  ;;  %v4801_v33 = vsel %vm4088_vm1, %v4744_v36, 0.0  ;;  %v4748_v36 = vmul.f32 %v4723_v26, %v4413_v57  ;;  %v4545_v26 = vld [vmem:[#allocation2 + $0x4c0] sm:$0xff] }
 0x61b   : > { %v4417_v57 = vld [vmem:[#allocation2 + $0xc0] sm:$0xff] }
 0x61c   : > { %v4813_v34 = vsel %vm4088_vm1, %v4748_v36, 0.0  ;;  %v4547_v36 = vld [vmem:[#allocation2 + $0x4d0] sm:$0xff] }
 0x61d   : > { %4799 = vadd.xlane.f32.xlu1 %v4798_v56  ;;  %v4810_v56 = vsel %vm4088_vm1, %v4747_v63, 0.0  ;;  %v5055_v63 = vsub.f32 %v11825_v30, %v4543_v45  ;;  %v4546_v45 = vld [vmem:[#allocation2 + $0x4c8] sm:$0xff] }
 0x61e   : > { %4796 = vadd.xlane.f32.xlu0 %v4795_v39  ;;  %v4807_v39 = vsel %vm4088_vm1, %v4746_v49, 0.0  ;;  %v4727_v49 = vsub.f32 %v4692_v16, %v4542_v54  ;;  %v5059_v54 = vsub.f32 %v11838_v59, %v4547_v36 }
 0x61f   : > { %v5080_v14 = vmul.f32 %v5055_v63, %v4418_v21  ;;  %v4422_v63 = vld [vmem:[#allocation2 + $0xe8] sm:$0xff]  ;;  %v4421_v21 = vld [vmem:[#allocation2 + $0xe0] sm:$0xff] }
 0x621   : > { %4805 = vadd.xlane.f32.xlu1 %v4804_v28  ;;  %v4816_v28 = vsel %vm4088_vm1, %v4749_v62, 0.0  ;;  %v4819_v62 = vsel %vm4088_vm1, %v4750_v53, 0.0  ;;  %v5105_v16 = vsel %vm4088_vm1, %v5080_v14, 0.0  ;;  %v4549_v53 = vld [vmem:[#allocation2 + $0x4e0] sm:$0xff] }
 0x622   : > { %4802 = vadd.xlane.f32.xlu0 %v4801_v33  ;;  %v4751_v33 = vmul.f32 %v4726_v1, %v4416_v42  ;;  %v4752_v1 = vmul.f32 %v4727_v49, %v4417_v57  ;;  %v5056_v42 = vsub.f32 %v11831_v19, %v4544_v18  ;;  %v4548_v49 = vld [vmem:[#allocation2 + $0x4d8] sm:$0xff]  ;;  %v5061_v57 = vsub.f32 %v11846_v5, %v4549_v53 }
 0x624   : > { %v4822_v22 = vsel %vm4088_vm1, %v4751_v33, 0.0  ;;  %v5081_v33 = vmul.f32 %v5056_v42, %v4419_v24  ;;  %v4550_v42 = vld [vmem:[#allocation2 + $0x4e8] sm:$0xff] }
 0x625   : > { %4811 = vadd.xlane.f32.xlu1 %v4810_v56  ;;  %v5057_v56 = vsub.f32 %v11822_v38, %v4545_v26  ;;  %v5084_v26 = vmul.f32 %v5059_v54, %v4422_v63  ;;  %v4426_v54 = vld [vmem:[#allocation2 + $0x108] sm:$0xff]  ;;  %v4425_v63 = vld [vmem:[#allocation2 + $0x100] sm:$0xff] }
 0x626   : > { %4808 = vadd.xlane.f32.xlu0 %v4807_v39  ;;  %v4420_v39 = vld [vmem:[#allocation2 + $0xd8] sm:$0xff]  ;;  %v5108_v14 = vsel %vm4088_vm1, %v5081_v33, 0.0  ;;  %v4553_v33 = vld [vmem:[#allocation2 + $0x500] sm:$0xff] }
 0x627   : > { %v5082_v4 = vmul.f32 %v5057_v56, %v4420_v39  ;;  %v4424_v56 = vld [vmem:[#allocation2 + $0xf8] sm:$0xff]  ;;  %v4423_v39 = vld [vmem:[#allocation2 + $0xf0] sm:$0xff]  ;;  %v5117_v36 = vsel %vm4088_vm1, %v5084_v26, 0.0 }
 0x628   : > { %v5086_v24 = vmul.f32 %v5061_v57, %v4424_v56  ;;  %v4428_v57 = vld [vmem:[#allocation2 + $0x118] sm:$0xff]  ;;  %v4427_v56 = vld [vmem:[#allocation2 + $0x110] sm:$0xff] }
 0x629   : > { %4817 = vadd.xlane.f32.xlu1 %v4816_v28  ;;  %v4825_v28 = vsel %vm4088_vm1, %v4752_v1, 0.0  ;;  %v5111_v18 = vsel %vm4088_vm1, %v5082_v4, 0.0  ;;  %v4551_v1 = vld [vmem:[#allocation2 + $0x4f0] sm:$0xff] }
 0x62a   : > { %4814 = vadd.xlane.f32.xlu0 %v4813_v34  ;;  %v5058_v34 = vsub.f32 %v11828_v40, %v4546_v45  ;;  %v5063_v45 = vsub.f32 %v11852_v46, %v4551_v1  ;;  %v5123_v53 = vsel %vm4088_vm1, %v5086_v24, 0.0  ;;  %v11938_v1 = vrot.slane %v11694_v0, 1 }
 0x62c   : > { %13864 = vst [vmem:[#allocation38_spill] sm:$0xff] %v11938_v1 }
 0x62d   : > { %4823 = vadd.xlane.f32.xlu1 %v4822_v22  ;;  %v5083_v22 = vmul.f32 %v5058_v34, %v4421_v21  ;;  %v4552_v34 = vld [vmem:[#allocation2 + $0x4f8] sm:$0xff]  ;;  %v5088_v21 = vmul.f32 %v5063_v45, %v4426_v54  ;;  %v4557_v54 = vld [vmem:[#allocation2 + $0x520] sm:$0xff] }
 0x62e   : > { %4820 = vadd.xlane.f32.xlu0 %v4819_v62  ;;  %v5060_v62 = vsub.f32 %v11834_v2, %v4548_v49  ;;  %v5065_v49 = vsub.f32 %v11860_v6, %v4553_v33  ;;  %v4556_v33 = vld [vmem:[#allocation2 + $0x518] sm:$0xff] }
 0x630   : > { %v5085_v4 = vmul.f32 %v5060_v62, %v4423_v39  ;;  %v4554_v62 = vld [vmem:[#allocation2 + $0x508] sm:$0xff]  ;;  %v5129_v39 = vsel %vm4088_vm1, %v5088_v21, 0.0  ;;  %v5069_v21 = vsub.f32 %v11876_v27, %v4557_v54  ;;  %v4561_v54 = vld [vmem:[#allocation2 + $0x540] sm:$0xff] }
 0x631   : > { %5106 = vadd.xlane.f32.xlu1 %v5105_v16  ;;  %v5114_v16 = vsel %vm4088_vm1, %v5083_v22, 0.0  ;;  %v4555_v22 = vld [vmem:[#allocation2 + $0x510] sm:$0xff]  ;;  %v4473_v27 = vld [vmem:[#allocation2 + $0x280] sm:$0xff] }
 0x632   : > { %4826 = vadd.xlane.f32.xlu0 %v4825_v28  ;;  %v5062_v28 = vsub.f32 %v11842_v20, %v4550_v42  ;;  %v5090_v42 = vmul.f32 %v5065_v49, %v4428_v57  ;;  %v5068_v57 = vsub.f32 %v11866_v48, %v4556_v33  ;;  %v4433_v33 = vld [vmem:[#allocation2 + $0x140] sm:$0xff] }
 0x634   : > { %v5087_v26 = vmul.f32 %v5062_v28, %v4425_v63  ;;  %v4429_v28 = vld [vmem:[#allocation2 + $0x120] sm:$0xff]  ;;  %v11946_v63 = vadd.s32 %v11938_v1, %v11694_v0  ;;  %v4560_v1 = vld [vmem:[#allocation2 + $0x538] sm:$0xff] }
 0x635   : > { %5112 = vadd.xlane.f32.xlu1 %v5111_v18  ;;  %v5120_v18 = vsel %vm4088_vm1, %v5085_v4, 0.0  ;;  %v5066_v4 = vsub.f32 %v11858_v60, %v4554_v62 }
 0x636   : > { %5109 = vadd.xlane.f32.xlu0 %v5108_v14  ;;  %v5064_v14 = vsub.f32 %v11850_v61, %v4552_v34  ;;  %v5126_v24 = vsel %vm4088_vm1, %v5087_v26, 0.0  ;;  %13865 = vst [vmem:[#allocation39_spill] sm:$0xff] %v11946_v63  ;;  %v5135_v34 = vsel %vm4088_vm1, %v5090_v42, 0.0  ;;  %v4432_v26 = vld [vmem:[#allocation2 + $0x138] sm:$0xff]  ;;  %v4695_v62 = vrot.slane %v11946_v63, 1 }
 0x637   : > { %vm4698_vm6 = vcmp.lt.s32.totalorder %v11946_v63, 200  ;;  %v5094_v42 = vmul.f32 %v5069_v21, %v4432_v26  ;;  %v5072_v26 = vsub.f32 %v11882_v55, %v4560_v1  ;;  %v4565_v55 = vld [vmem:[#allocation2 + $0x560] sm:$0xff] }
 0x638   : > { %v5089_v45 = vmul.f32 %v5064_v14, %v4427_v56  ;;  %v4559_v14 = vld [vmem:[#allocation2 + $0x530] sm:$0xff]  ;;  %v4558_v56 = vld [vmem:[#allocation2 + $0x528] sm:$0xff]  ;;  %vm4696_vm13 = vcmp.lt.s32.totalorder %v11694_v0, %v4695_v62  ;;  %v4437_v1 = vld [vmem:[#allocation2 + $0x160] sm:$0xff] }
 0x639   : > { %5118 = vadd.xlane.f32.xlu1 %v5117_v36  ;;  %v5067_v36 = vsub.f32 %v11868_v11, %v4555_v22  ;;  %v4431_v22 = vld [vmem:[#allocation2 + $0x130] sm:$0xff] }
 0x63a   : > { %5115 = vadd.xlane.f32.xlu0 %v5114_v16  ;;  %v4430_v16 = vld [vmem:[#allocation2 + $0x128] sm:$0xff]  ;;  %v5132_v49 = vsel %vm4088_vm1, %v5089_v45, 0.0  ;;  %v5093_v45 = vmul.f32 %v5068_v57, %v4431_v22  ;;  %v4563_v57 = vld [vmem:[#allocation2 + $0x550] sm:$0xff] }
 0x63b   : > { %v4435_v22 = vld [vmem:[#allocation2 + $0x150] sm:$0xff] }
 0x63d   : > { %5124 = vadd.xlane.f32.xlu1 %v5123_v53  ;;  %v5092_v53 = vmul.f32 %v5067_v36, %v4430_v16  ;;  %v5071_v36 = vsub.f32 %v11884_v32, %v4559_v14  ;;  %v4434_v16 = vld [vmem:[#allocation2 + $0x148] sm:$0xff]  ;;  %v5073_v32 = vsub.f32 %v11892_v31, %v4561_v54  ;;  %v4697_v14 = vsel %vm4696_vm13, %v11694_v0, %v4695_v62 }
 0x63e   : > { %5121 = vadd.xlane.f32.xlu0 %v5120_v18  ;;  %v5091_v18 = vmul.f32 %v5066_v4, %v4429_v28  ;;  %v5070_v4 = vsub.f32 %v11874_v7, %v4558_v56  ;;  %v11959_v28 = vsel %vm4698_vm6, %v11946_v63, 200  ;;  %v4562_v56 = vld [vmem:[#allocation2 + $0x548] sm:$0xff]  ;;  %v5075_v31 = vsub.f32 %v11900_v25, %v4563_v57  ;;  %v4568_v25 = vld [vmem:[#allocation2 + $0x578] sm:$0xff]  ;;  %v4569_v57 = vld [vmem:[#allocation2 + $0x580] sm:$0xff] }
 0x63f   : > { %13866 = vst [vmem:[#allocation40_spill] sm:$0xff] %v11959_v28  ;;  %v4700_v21 = vrot.slane %v11959_v28, 3  ;;  %v4446_v63 = vld [vmem:[#allocation2 + $0x1a8] sm:$0xff]  ;;  %v4623_v28 = vld [vmem:[#allocation2 + $0x730] sm:$0xff] }
 0x640   : > { %v5095_v7 = vmul.f32 %v5070_v4, %v4433_v33  ;;  %v4564_v4 = vld [vmem:[#allocation2 + $0x558] sm:$0xff] }
 0x641   : > { %5130 = vadd.xlane.f32.xlu1 %v5129_v39  ;;  %v5141_v39 = vsel %vm4088_vm1, %v5092_v53, 0.0  ;;  %v5096_v53 = vmul.f32 %v5071_v36, %v4434_v16  ;;  %vm4701_vm5 = vcmp.lt.s32.totalorder %v4697_v14, %v4700_v21  ;;  %v5074_v16 = vsub.f32 %v11890_v35, %v4562_v56 }
 0x642   : > { %5127 = vadd.xlane.f32.xlu0 %v5126_v24  ;;  %v5138_v24 = vsel %vm4088_vm1, %v5091_v18, 0.0  ;;  %v4436_v18 = vld [vmem:[#allocation2 + $0x158] sm:$0xff]  ;;  %v5150_v36 = vsel %vm4088_vm1, %v5095_v7, 0.0  ;;  %v11972_v62 = vsel %vm4701_vm5, %v4697_v14, %v4700_v21  ;;  %v5076_v35 = vsub.f32 %v11898_v29, %v4564_v4 }
 0x643   : > { %13867 = vst [vmem:[#allocation41_spill] sm:$0xff] %v11972_v62  ;;  %v4440_v7 = vld [vmem:[#allocation2 + $0x178] sm:$0xff]  ;;  %v11982_v14 = vrot.slane %v11972_v62, %v8853_v17  ;;  %v5411_v56 = vsub.f32 %v11825_v30, %v4568_v25 }
 0x644   : > { %v11978_v21 = vld [vmem:[#allocation2 + $0x7d8] sm:$0xff] }
 0x645   : > { %5136 = vadd.xlane.f32.xlu1 %v5135_v34  ;;  %v5147_v34 = vsel %vm4088_vm1, %v5094_v42, 0.0  ;;  %v5098_v42 = vmul.f32 %v5073_v32, %v4436_v18  ;;  %v4439_v18 = vld [vmem:[#allocation2 + $0x170] sm:$0xff]  ;;  %vm4884_vm11 = vcmp.lt.s32.totalorder %v8969_v41, %v11982_v14  ;;  %vm4882_vm7 = vcmp.lt.s32.totalorder %v8841_v12, %v11982_v14 }
 0x646   : > { %5133 = vadd.xlane.f32.xlu0 %v5132_v49  ;;  %v5144_v49 = vsel %vm4088_vm1, %v5093_v45, 0.0  ;;  %v4438_v45 = vld [vmem:[#allocation2 + $0x168] sm:$0xff]  ;;  %v5101_v30 = vmul.f32 %v5076_v35, %v4439_v18  ;;  %vm4885_vm14 = vcmp.lt.s32.totalorder %v8977_v43, %v11982_v14  ;;  %vm4883_vm10 = vcmp.lt.s32.totalorder %v8966_v37, %v11982_v14 }
 0x647   : > { %v5159_v54 = vsel %vm4088_vm1, %v5098_v42, 0.0  ;;  %v5100_v33 = vmul.f32 %v5075_v31, %v4438_v45  ;;  %v4593_v31 = vld [vmem:[#allocation2 + $0x640] sm:$0xff]  ;;  %v11988_v45 = vld [vmem:[#allocation2 + $0x7d0] sm:$0xff]  ;;  %v12003_v18 = vld [vmem:[#allocation2 + $0x7e8] sm:$0xff]  ;;  %vm4887_vm12 = vcmp.lt.s32.totalorder %v8992_v50, %v11982_v14  ;;  %vm4886_vm3 = vcmp.lt.s32.totalorder %v8987_v47, %v11982_v14 }
 0x648   : > { %vm4889_vm4 = vcmp.lt.s32.totalorder %v9004_v52, %v11982_v14  ;;  %vm4888_vm9 = vcmp.lt.s32.totalorder %v8995_v51, %v11982_v14  ;;  %vm4891_vm8 = vcmp.lt.s32.totalorder %v9076_v3, %v11982_v14  ;;  %vm4890_vm15 = vcmp.lt.s32.totalorder %v9021_v58, %v11982_v14 }
 0x649   : > { %5142 = vadd.xlane.f32.xlu1 %v5141_v39  ;;  %v5153_v39 = vsel %vm4088_vm1, %v5096_v53, 0.0  ;;  %v4566_v53 = vld [vmem:[#allocation2 + $0x568] sm:$0xff]  ;;  %v5165_v29 = vsel %vm4088_vm1, %v5100_v33, 0.0  ;;  %v4444_v33 = vld [vmem:[#allocation2 + $0x198] sm:$0xff]  ;;  %vm4893_vm0 = vcmp.lt.s32.totalorder %v9114_v9, %v11982_v14  ;;  %vm4892_vm6 = vcmp.lt.s32.totalorder %v9095_v8, %v11982_v14 }
 0x64a   : > { %5139 = vadd.xlane.f32.xlu0 %v5138_v24  ;;  %v5097_v24 = vmul.f32 %v5072_v26, %v4435_v22  ;;  %v4570_v26 = vld [vmem:[#allocation2 + $0x588] sm:$0xff]  ;;  %v5078_v42 = vsub.f32 %v11906_v44, %v4566_v53  ;;  %v5412_v44 = vsub.f32 %v11831_v19, %v4569_v57  ;;  %v4468_v57 = vld [vmem:[#allocation2 + $0x258] sm:$0xff]  ;;  %vm4895_vm13 = vcmp.lt.s32.totalorder %v9144_v13, %v11982_v14  ;;  %v4503_v13 = vld [vmem:[#allocation2 + $0x370] sm:$0xff] }
 0x64b   : > { %v4594_v22 = vld [vmem:[#allocation2 + $0x648] sm:$0xff]  ;;  %vm4894_vm5 = vcmp.lt.s32.totalorder %v9126_v10, %v11982_v14  ;;  %v12246_v9 = vld [vmem:[#allocation2 + $0x838] sm:$0xff] }
 0x64c   : > { %v5156_v32 = vsel %vm4088_vm1, %v5097_v24, 0.0  ;;  %v5413_v24 = vsub.f32 %v11822_v38, %v4570_v26  ;;  %v5770_v4 = vsub.f32 %v11978_v21, %v4594_v22  ;;  %v4619_v38 = vld [vmem:[#allocation2 + $0x710] sm:$0xff]  ;;  %v4618_v19 = vld [vmem:[#allocation2 + $0x708] sm:$0xff] }
 0x64d   : > { %5148 = vadd.xlane.f32.xlu1 %v5147_v34  ;;  %v5077_v34 = vsub.f32 %v11908_v23, %v4565_v55  ;;  %v4443_v23 = vld [vmem:[#allocation2 + $0x190] sm:$0xff]  ;;  %v11990_v55 = vld [vmem:[#allocation2 + $0x7e0] sm:$0xff]  ;;  %v4470_v22 = vld [vmem:[#allocation2 + $0x268] sm:$0xff] }
 0x64e   : > { %5145 = vadd.xlane.f32.xlu0 %v5144_v49  ;;  %v5099_v49 = vmul.f32 %v5074_v16, %v4437_v1  ;;  %v4595_v16 = vld [vmem:[#allocation2 + $0x650] sm:$0xff]  ;;  %v4445_v1 = vld [vmem:[#allocation2 + $0x1a0] sm:$0xff]  ;;  %v5436_v25 = vmul.f32 %v5411_v56, %v4443_v23  ;;  %v5168_v56 = vsel %vm4088_vm1, %v5101_v30, 0.0  ;;  %v4620_v30 = vld [vmem:[#allocation2 + $0x718] sm:$0xff] }
 0x64f   : > { %v5438_v26 = vmul.f32 %v5413_v24, %v4445_v1  ;;  %v4573_v24 = vld [vmem:[#allocation2 + $0x5a0] sm:$0xff]  ;;  %v6119_v1 = vsub.f32 %v11988_v45, %v4618_v19 }
 0x650   : > { %v5162_v17 = vsel %vm4088_vm1, %v5099_v49, 0.0  ;;  %v5771_v49 = vsub.f32 %v11990_v55, %v4595_v16  ;;  %v4493_v16 = vld [vmem:[#allocation2 + $0x320] sm:$0xff] }
 0x651   : > { %5154 = vadd.xlane.f32.xlu1 %v5153_v39  ;;  %v4441_v39 = vld [vmem:[#allocation2 + $0x180] sm:$0xff] }
 0x652   : > { %5151 = vadd.xlane.f32.xlu0 %v5150_v36  ;;  %v5102_v36 = vmul.f32 %v5077_v34, %v4440_v7  ;;  %v4469_v34 = vld [vmem:[#allocation2 + $0x260] sm:$0xff]  ;;  %v5103_v53 = vmul.f32 %v5078_v42, %v4441_v39  ;;  %v4596_v7 = vld [vmem:[#allocation2 + $0x658] sm:$0xff]  ;;  %v5437_v39 = vmul.f32 %v5412_v44, %v4444_v33  ;;  %v5461_v33 = vsel %vm4088_vm1, %v5436_v25, 0.0  ;;  %v4574_v25 = vld [vmem:[#allocation2 + $0x5a8] sm:$0xff] }
 0x653   : > { %v5795_v42 = vmul.f32 %v5770_v4, %v4469_v34  ;;  %v4621_v44 = vld [vmem:[#allocation2 + $0x720] sm:$0xff] }
 0x654   : > { %v5171_v35 = vsel %vm4088_vm1, %v5102_v36, 0.0  ;;  %v4572_v36 = vld [vmem:[#allocation2 + $0x598] sm:$0xff]  ;;  %v5174_v34 = vsel %vm4088_vm1, %v5103_v53, 0.0  ;;  %v4597_v19 = vld [vmem:[#allocation2 + $0x660] sm:$0xff]  ;;  %v5464_v53 = vsel %vm4088_vm1, %v5437_v39, 0.0 }
 0x655   : > { %5160 = vadd.xlane.f32.xlu1 %v5159_v54  ;;  %v4571_v54 = vld [vmem:[#allocation2 + $0x590] sm:$0xff]  ;;  %v5415_v43 = vsub.f32 %v11838_v59, %v4572_v36  ;;  %v6144_v59 = vmul.f32 %v6119_v1, %v4493_v16 }
 0x656   : > { %5157 = vadd.xlane.f32.xlu0 %v5156_v32  ;;  %v5769_v32 = vsub.f32 %v11988_v45, %v4593_v31  ;;  %v5414_v62 = vsub.f32 %v11828_v40, %v4571_v54  ;;  %v4494_v31 = vld [vmem:[#allocation2 + $0x328] sm:$0xff]  ;;  %v4471_v54 = vld [vmem:[#allocation2 + $0x270] sm:$0xff]  ;;  %v4448_v45 = vld [vmem:[#allocation2 + $0x1b8] sm:$0xff] }
 0x658   : > { %v5794_v41 = vmul.f32 %v5769_v32, %v4468_v57  ;;  %v5439_v12 = vmul.f32 %v5414_v62, %v4446_v63  ;;  %v12040_v32 = vsel %vm4088_vm1, %v5795_v42, 0.0  ;;  %v6121_v57 = vsub.f32 %v11990_v55, %v4620_v30  ;;  %v4575_v63 = vld [vmem:[#allocation2 + $0x5b0] sm:$0xff]  ;;  %v4449_v30 = vld [vmem:[#allocation2 + $0x1c0] sm:$0xff] }
 0x659   : > { %5166 = vadd.xlane.f32.xlu1 %v5165_v29  ;;  %v13552_v29 = vmov 0.0   ;;  %v5418_v1 = vsub.f32 %v11842_v20, %v4575_v63 }
 0x65a   : > { %5163 = vadd.xlane.f32.xlu0 %v5162_v17  ;;  %v12011_v23 = vsel %vm4884_vm11, 1.0, %v13552_v29  ;;  %v12018_v40 = vsel %vm4882_vm7, 1.0, %v13552_v29  ;;  %v6120_v17 = vsub.f32 %v11978_v21, %v4619_v38  ;;  %v12027_v4 = vsel %vm4885_vm14, 1.0, %v13552_v29  ;;  %v4447_v38 = vld [vmem:[#allocation2 + $0x1b0] sm:$0xff] }
 0x65b   : > { %13868 = vst [vmem:[#allocation42_spill] sm:$0xff] %v12011_v23  ;;  %13869 = vst [vmem:[#allocation43_spill] sm:$0xff] %v12018_v40  ;;  %v5772_v23 = vsub.f32 %v12003_v18, %v4596_v7  ;;  %v5796_v21 = vmul.f32 %v5771_v49, %v4470_v22  ;;  %v12031_v40 = vld [vmem:[#allocation2 + $0x7f0] sm:$0xff]  ;;  %v5467_v7 = vsel %vm4088_vm1, %v5438_v26, 0.0  ;;  %v5416_v29 = vsub.f32 %v11834_v2, %v4573_v24  ;;  %v4496_v22 = vld [vmem:[#allocation2 + $0x338] sm:$0xff] }
 0x65c   : > { %13870 = vst [vmem:[#allocation44_spill] sm:$0xff] %v12027_v4  ;;  %v12036_v4 = vld [vmem:[#allocation2 + $0x7f8] sm:$0xff]  ;;  %v4495_v49 = vld [vmem:[#allocation2 + $0x330] sm:$0xff]  ;;  %v6122_v26 = vsub.f32 %v12003_v18, %v4621_v44  ;;  %v6145_v62 = vmul.f32 %v6120_v17, %v4494_v31  ;;  %v5773_v36 = vsub.f32 %v12031_v40, %v4597_v19  ;;  %v4622_v24 = vld [vmem:[#allocation2 + $0x728] sm:$0xff]  ;;  %v5819_v39 = vsel %vm4088_vm1, %v5794_v41, 0.0 }
 0x65d   : > { %5172 = vadd.xlane.f32.xlu1 %v5171_v35  ;;  %v4598_v35 = vld [vmem:[#allocation2 + $0x668] sm:$0xff]  ;;  %v4472_v2 = vld [vmem:[#allocation2 + $0x278] sm:$0xff]  ;;  %v12047_v42 = vsel %vm4088_vm1, %v5796_v21, 0.0  ;;  %v5417_v18 = vsub.f32 %v11846_v5, %v4574_v25  ;;  %v4599_v31 = vld [vmem:[#allocation2 + $0x670] sm:$0xff]  ;;  %v5440_v16 = vmul.f32 %v5415_v43, %v4447_v38  ;;  %v5441_v17 = vmul.f32 %v5416_v29, %v4448_v45 }
 0x65e   : > { %5169 = vadd.xlane.f32.xlu0 %v5168_v56  ;;  %v5797_v56 = vmul.f32 %v5772_v23, %v4471_v54  ;;  %v5774_v55 = vsub.f32 %v12036_v4, %v4598_v35  ;;  %v12052_v23 = vsel %vm4088_vm1, %v5439_v12, 0.0  ;;  %v12055_v54 = vld [vmem:[#allocation2 + $0x800] sm:$0xff]  ;;  %v4600_v41 = vld [vmem:[#allocation2 + $0x678] sm:$0xff]  ;;  %v12057_v44 = vld [vmem:[#allocation2 + $0x808] sm:$0xff]  ;;  %v6147_v21 = vmul.f32 %v6122_v26, %v4496_v22 }
 0x65f   : > { %v4450_v19 = vld [vmem:[#allocation2 + $0x1c8] sm:$0xff]  ;;  %v6123_v35 = vsub.f32 %v12031_v40, %v4622_v24  ;;  %v6124_v5 = vsub.f32 %v12036_v4, %v4623_v28  ;;  %v12062_v12 = vsel %vm4088_vm1, %v6145_v62, 0.0  ;;  %v12065_v43 = vsel %vm4088_vm1, %v6144_v59, 0.0  ;;  %v4497_v38 = vld [vmem:[#allocation2 + $0x340] sm:$0xff]  ;;  %v4475_v59 = vld [vmem:[#allocation2 + $0x290] sm:$0xff] }
 0x660   : > { %v12068_v20 = vsel %vm4088_vm1, %v5797_v56, 0.0  ;;  %v5798_v29 = vmul.f32 %v5773_v36, %v4472_v2  ;;  %v4498_v45 = vld [vmem:[#allocation2 + $0x348] sm:$0xff]  ;;  %v5799_v25 = vmul.f32 %v5774_v55, %v4473_v27  ;;  %v5775_v40 = vsub.f32 %v12055_v54, %v4599_v31  ;;  %v4577_v4 = vld [vmem:[#allocation2 + $0x5c0] sm:$0xff]  ;;  %v4451_v56 = vld [vmem:[#allocation2 + $0x1d0] sm:$0xff] }
 0x661   : > { %5462 = vadd.xlane.f32.xlu1 %v5461_v33  ;;  %v6146_v33 = vmul.f32 %v6121_v57, %v4495_v49  ;;  %v5442_v49 = vmul.f32 %v5417_v18, %v4449_v30  ;;  %v5776_v28 = vsub.f32 %v12057_v44, %v4600_v41  ;;  %v4624_v57 = vld [vmem:[#allocation2 + $0x738] sm:$0xff]  ;;  %v12073_v22 = vsel %vm4088_vm1, %v5440_v16, 0.0  ;;  %v4474_v62 = vld [vmem:[#allocation2 + $0x288] sm:$0xff]  ;;  %v4625_v24 = vld [vmem:[#allocation2 + $0x740] sm:$0xff] }
 0x662   : > { %5175 = vadd.xlane.f32.xlu0 %v5174_v34  ;;  %v4576_v34 = vld [vmem:[#allocation2 + $0x5b8] sm:$0xff]  ;;  %v12076_v26 = vsel %vm4088_vm1, %v5441_v17, 0.0  ;;  %v5443_v63 = vmul.f32 %v5418_v1, %v4450_v19  ;;  %v12083_v2 = vsel %vm4088_vm1, %v6147_v21, 0.0  ;;  %v6148_v36 = vmul.f32 %v6123_v35, %v4497_v38  ;;  %v4601_v55 = vld [vmem:[#allocation2 + $0x680] sm:$0xff]  ;;  %v12085_v30 = vld [vmem:[#allocation2 + $0x810] sm:$0xff] }
 0x663   : > { %v5419_v27 = vsub.f32 %v11852_v46, %v4576_v34  ;;  %v12088_v18 = vsel %vm4088_vm1, %v5798_v29, 0.0  ;;  %v4452_v31 = vld [vmem:[#allocation2 + $0x1d8] sm:$0xff]  ;;  %v5420_v46 = vsub.f32 %v11850_v61, %v4577_v4  ;;  %v6125_v16 = vsub.f32 %v12055_v54, %v4624_v57  ;;  %v4499_v21 = vld [vmem:[#allocation2 + $0x350] sm:$0xff]  ;;  %v4602_v19 = vld [vmem:[#allocation2 + $0x688] sm:$0xff] }
 0x664   : > { %v12096_v17 = vsel %vm4088_vm1, %v5799_v25, 0.0  ;;  %v12099_v1 = vsel %vm4088_vm1, %v5442_v49, 0.0  ;;  %v5800_v41 = vmul.f32 %v5775_v40, %v4474_v62  ;;  %v12101_v35 = vld [vmem:[#allocation2 + $0x818] sm:$0xff]  ;;  %v6126_v54 = vsub.f32 %v12057_v44, %v4625_v24  ;;  %v4578_v34 = vld [vmem:[#allocation2 + $0x5c8] sm:$0xff]  ;;  %v4579_v49 = vld [vmem:[#allocation2 + $0x5d0] sm:$0xff] }
 0x665   : > { %5468 = vadd.xlane.f32.xlu1 %v5467_v7  ;;  %v12080_v7 = vsel %vm4088_vm1, %v6146_v33, 0.0  ;;  %v5801_v33 = vmul.f32 %v5776_v28, %v4475_v59  ;;  %v5444_v61 = vmul.f32 %v5419_v27, %v4451_v56  ;;  %v12109_v29 = vsel %vm4088_vm1, %v6148_v36, 0.0  ;;  %v4500_v25 = vld [vmem:[#allocation2 + $0x358] sm:$0xff]  ;;  %v4626_v57 = vld [vmem:[#allocation2 + $0x748] sm:$0xff]  ;;  %v4477_v59 = vld [vmem:[#allocation2 + $0x2a0] sm:$0xff] }
 0x666   : > { %5465 = vadd.xlane.f32.xlu0 %v5464_v53  ;;  %v6149_v53 = vmul.f32 %v6124_v5, %v4498_v45  ;;  %v12104_v5 = vsel %vm4088_vm1, %v5443_v63, 0.0  ;;  %v13871_v45 = vmov 0.0   ;;  %v4476_v44 = vld [vmem:[#allocation2 + $0x298] sm:$0xff]  ;;  %v5445_v40 = vmul.f32 %v5420_v46, %v4452_v31  ;;  %v4501_v46 = vld [vmem:[#allocation2 + $0x360] sm:$0xff] }
 0x667   : > { %v6150_v28 = vmul.f32 %v6125_v16, %v4499_v21  ;;  %v5778_v4 = vsub.f32 %v12101_v35, %v4602_v19  ;;  %v12127_v63 = vsel %vm4088_vm1, %v5800_v41, 0.0  ;;  %v12130_v62 = vsel %vm4088_vm1, %v5801_v33, 0.0  ;;  %v4603_v16 = vld [vmem:[#allocation2 + $0x690] sm:$0xff] }
 0x668   : > { %v12112_v38 = vsel %vm4088_vm1, %v6149_v53, 0.0  ;;  %v5421_v56 = vsub.f32 %v11860_v6, %v4578_v34  ;;  %v12137_v27 = vsel %vm4088_vm1, %v5444_v61, 0.0  ;;  %v6151_v36 = vmul.f32 %v6126_v54, %v4500_v25  ;;  %v12167_v61 = vld [vmem:[#allocation2 + $0x820] sm:$0xff]  ;;  %v4604_v54 = vld [vmem:[#allocation2 + $0x698] sm:$0xff] }
 0x669   : > { %5823 = vadd.xlane.f32.xlu1 %v12040_v32  ;;  %v5777_v32 = vsub.f32 %v12085_v30, %v4601_v55  ;;  %v5422_v24 = vsub.f32 %v11858_v60, %v4579_v49  ;;  %v4627_v55 = vld [vmem:[#allocation2 + $0x750] sm:$0xff]  ;;  %v12144_v31 = vsel %vm4887_vm12, 1.0, %v13871_v45  ;;  %v12150_v6 = vsel %vm4886_vm3, 1.0, %v13871_v45 }
 0x66a   : > { %5820 = vadd.xlane.f32.xlu0 %v5819_v39  ;;  %v12118_v39 = vsel %vm4883_vm10, 1.0, %v13871_v45  ;;  %v6127_v60 = vsub.f32 %v12085_v30, %v4626_v57  ;;  %v12156_v41 = vsel %vm4088_vm1, %v5445_v40, 0.0  ;;  %v12159_v33 = vsel %vm4088_vm1, %v6150_v28, 0.0  ;;  %v4502_v40 = vld [vmem:[#allocation2 + $0x368] sm:$0xff]  ;;  %v4580_v28 = vld [vmem:[#allocation2 + $0x5d8] sm:$0xff] }
 0x66b   : > { %v5802_v53 = vmul.f32 %v5777_v32, %v4476_v44  ;;  %v12165_v21 = vsel %vm4889_vm4, 1.0, %v13871_v45  ;;  %v5803_v19 = vmul.f32 %v5778_v4, %v4477_v59  ;;  %v12169_v32 = vld [vmem:[#allocation2 + $0x828] sm:$0xff]  ;;  %v6128_v34 = vsub.f32 %v12101_v35, %v4627_v55 }
 0x66c   : > { %v12179_v25 = vsel %vm4088_vm1, %v6151_v36, 0.0  ;;  %v6152_v4 = vmul.f32 %v6127_v60, %v4501_v46  ;;  %v5780_v35 = vsub.f32 %v12169_v32, %v4604_v54  ;;  %v12198_v59 = vsel %vm4891_vm8, 1.0, %v13871_v45  ;;  %v4478_v36 = vld [vmem:[#allocation2 + $0x2a8] sm:$0xff]  ;;  %v4628_v46 = vld [vmem:[#allocation2 + $0x758] sm:$0xff] }
 0x66d   : > { %5826 = vadd.xlane.f32.xlu1 %v12047_v42  ;;  %v4453_v42 = vld [vmem:[#allocation2 + $0x1e0] sm:$0xff]  ;;  %v12182_v44 = vsel %vm4088_vm1, %v5802_v53, 0.0  ;;  %v12195_v57 = vsel %vm4088_vm1, %v5803_v19, 0.0  ;;  %13872 = vst [vmem:[#allocation45_spill] sm:$0xff] %v12198_v59  ;;  %v4479_v53 = vld [vmem:[#allocation2 + $0x2b0] sm:$0xff]  ;;  %v5423_v55 = vsub.f32 %v11868_v11, %v4580_v28  ;;  %v12240_v28 = vsel %vm4895_vm13, 1.0, %v13871_v45 }
 0x66e   : > { %5471 = vadd.xlane.f32.xlu0 %v12052_v23  ;;  %v4454_v23 = vld [vmem:[#allocation2 + $0x1e8] sm:$0xff]  ;;  %v5446_v30 = vmul.f32 %v5421_v56, %v4453_v42  ;;  %v12201_v56 = vsel %vm4890_vm15, 1.0, %v13871_v45  ;;  %v4629_v19 = vld [vmem:[#allocation2 + $0x760] sm:$0xff]  ;;  %v12226_v54 = vsel %vm4088_vm1, %v6152_v4, 0.0  ;;  %13875 = vst [vmem:[#allocation48_spill] sm:$0xff] %v12240_v28  ;;  %vm4897_vm11 = vcmp.lt.s32.totalorder %v9170_v15, %v11982_v14  ;;  %v4583_v59 = vld [vmem:[#allocation2 + $0x5f0] sm:$0xff] }
 0x66f   : > { %v5447_v49 = vmul.f32 %v5422_v24, %v4454_v23  ;;  %v6153_v24 = vmul.f32 %v6128_v34, %v4502_v40  ;;  %v4581_v23 = vld [vmem:[#allocation2 + $0x5e0] sm:$0xff]  ;;  %v5805_v34 = vmul.f32 %v5780_v35, %v4479_v53  ;;  %v12234_v40 = vld [vmem:[#allocation2 + $0x830] sm:$0xff]  ;;  %v6129_v11 = vsub.f32 %v12167_v61, %v4628_v46  ;;  %v4456_v53 = vld [vmem:[#allocation2 + $0x1f8] sm:$0xff] }
 0x670   : > { %v12207_v42 = vsel %vm4088_vm1, %v5446_v30, 0.0  ;;  %v5424_v4 = vsub.f32 %v11866_v48, %v4581_v23  ;;  %v12256_v35 = vsel %vm4894_vm5, 1.0, %v13871_v45  ;;  %v6130_v48 = vsub.f32 %v12169_v32, %v4629_v19  ;;  %v13877_v23 = vld [vmem:[#allocation25_spill] sm:$0xff]  ;;  %v4480_v19 = vld [vmem:[#allocation2 + $0x2b8] sm:$0xff] }
 0x671   : > { %6173 = vadd.xlane.f32.xlu1 %v12062_v12  ;;  %v12188_v12 = vsel %vm4888_vm9, 1.0, %v13871_v45  ;;  %v12214_v60 = vsel %vm4088_vm1, %v5447_v49, 0.0  ;;  %v4605_v49 = vld [vmem:[#allocation2 + $0x6a0] sm:$0xff]  ;;  %13876 = vst [vmem:[#allocation49_spill] sm:$0xff] %v12256_v35  ;;  %vm4896_vm7 = vcmp.lt.s32.totalorder %v13877_v23, %v11982_v14  ;;  %v13879_v28 = vrot.slane %v11694_v0, 2  ;;  %v4483_v23 = vld [vmem:[#allocation2 + $0x2d0] sm:$0xff] }
 0x672   : > { %6170 = vadd.xlane.f32.xlu0 %v12065_v43  ;;  %v5779_v43 = vsub.f32 %v12167_v61, %v4603_v16  ;;  %v4455_v16 = vld [vmem:[#allocation2 + $0x1f0] sm:$0xff]  ;;  %v4582_v61 = vld [vmem:[#allocation2 + $0x5e8] sm:$0xff]  ;;  %v5781_v46 = vsub.f32 %v12234_v40, %v4605_v49  ;;  %v12274_v32 = vsel %vm4088_vm1, %v5805_v34, 0.0  ;;  %v5449_v35 = vmul.f32 %v5424_v4, %v4456_v53 }
 0x673   : > { %13881 = vst [vmem:[#allocation51_spill] sm:$0xff] %v12274_v32  ;;  %v6154_v10 = vmul.f32 %v6129_v11, %v4503_v13  ;;  %v12294_v15 = vsel %vm4896_vm7, 1.0, %v13871_v45  ;;  %v4457_v11 = vld [vmem:[#allocation2 + $0x200] sm:$0xff]  ;;  %v13888_v4 = vld [vmem:[#allocation30_spill] sm:$0xff] }
 0x674   : > { %v5804_v30 = vmul.f32 %v5779_v43, %v4478_v36  ;;  %v12250_v43 = vsel %vm4088_vm1, %v6153_v24, 0.0  ;;  %v5448_v36 = vmul.f32 %v5423_v55, %v4455_v16  ;;  %v4504_v24 = vld [vmem:[#allocation2 + $0x378] sm:$0xff]  ;;  %v12268_v55 = vadd.s32 %v13879_v28, %v11694_v0  ;;  %13886 = vst [vmem:[#allocation53_spill] sm:$0xff] %v12294_v15  ;;  %v4630_v53 = vld [vmem:[#allocation2 + $0x768] sm:$0xff]  ;;  %v8082_v32 = vld [vmem:[#allocation2 + $0x920] sm:$0xff] }
 0x675   : > { %5829 = vadd.xlane.f32.xlu1 %v12068_v20  ;;  %v12220_v20 = vsel %vm4893_vm0, 1.0, %v13871_v45  ;;  %v13883_v28 = vld [vmem:[#allocation27_spill] sm:$0xff]  ;;  %vm4901_vm12 = vcmp.lt.s32.totalorder %v13888_v4, %v11982_v14 }
 0x676   : > { %5474 = vadd.xlane.f32.xlu0 %v12073_v22  ;;  %13873 = vst [vmem:[#allocation46_spill] sm:$0xff] %v12220_v20  ;;  %v12232_v22 = vsel %vm4892_vm6, 1.0, %v13871_v45  ;;  %v4606_v20 = vld [vmem:[#allocation2 + $0x6a8] sm:$0xff]  ;;  %v12271_v16 = vsel %vm4088_vm1, %v5804_v30, 0.0  ;;  %vm4898_vm10 = vcmp.lt.s32.totalorder %v13883_v28, %v11982_v14  ;;  %v12288_v34 = vsel %vm4088_vm1, %v5448_v36, 0.0 }
 0x677   : > { %13874 = vst [vmem:[#allocation47_spill] sm:$0xff] %v12232_v22  ;;  %13880 = vst [vmem:[#allocation50_spill] sm:$0xff] %v12271_v16  ;;  %v5782_v49 = vsub.f32 %v12246_v9, %v4606_v20  ;;  %v4481_v22 = vld [vmem:[#allocation2 + $0x2c0] sm:$0xff]  ;;  %v6155_v20 = vmul.f32 %v6130_v48, %v4504_v24  ;;  %v4458_v28 = vld [vmem:[#allocation2 + $0x208] sm:$0xff] }
 0x678   : > { %v13884_v30 = vld [vmem:[#allocation37_spill] sm:$0xff]  ;;  %v13891_v24 = vld [vmem:[#allocation32_spill] sm:$0xff] }
 0x679   : > { %5477 = vadd.xlane.f32.xlu1 %v12076_v26  ;;  %v13878_v26 = vld [vmem:[#allocation28_spill] sm:$0xff]  ;;  %v5425_v16 = vsub.f32 %v13884_v30, %v4582_v61  ;;  %13885 = vst [vmem:[#allocation37_spill] sm:$0xff] %v12288_v34  ;;  %v13889_v36 = vld [vmem:[#allocation29_spill] sm:$0xff]  ;;  %v5049_v61 = vrot.slane %v12268_v55, 7  ;;  %v12312_v30 = vsel %vm4898_vm10, 1.0, %v13871_v45  ;;  %v5807_v48 = vmul.f32 %v5782_v49, %v4481_v22  ;;  %v4607_v49 = vld [vmem:[#allocation2 + $0x6b0] sm:$0xff] }
 0x67a   : > { %6176 = vadd.xlane.f32.xlu0 %v12080_v7  ;;  %vm4899_vm14 = vcmp.lt.s32.totalorder %v13878_v26, %v11982_v14  ;;  %v12280_v7 = vsel %vm4897_vm11, 1.0, %v13871_v45  ;;  %vm4900_vm3 = vcmp.lt.s32.totalorder %v13889_v36, %v11982_v14  ;;  %13890 = vst [vmem:[#allocation55_spill] sm:$0xff] %v12312_v30  ;;  %vm4903_vm4 = vcmp.lt.s32.totalorder %v13891_v24, %v11982_v14  ;;  %v4632_v36 = vld [vmem:[#allocation2 + $0x778] sm:$0xff]  ;;  %v13906_v30 = vld [vmem:[#allocation33_spill] sm:$0xff] }
 0x67b   : > { %13882 = vst [vmem:[#allocation52_spill] sm:$0xff] %v12280_v7  ;;  %v12300_v13 = vsel %vm4899_vm14, 1.0, %v13871_v45  ;;  %v12317_v26 = vsel %vm4088_vm1, %v5449_v35, 0.0  ;;  %v5450_v55 = vmul.f32 %v5425_v16, %v4457_v11  ;;  %v13894_v7 = vld [vmem:[#allocation31_spill] sm:$0xff]  ;;  %v12326_v22 = vsel %vm4088_vm1, %v6155_v20, 0.0  ;;  %v4505_v35 = vld [vmem:[#allocation2 + $0x380] sm:$0xff] }
 0x67c   : > { %13887 = vst [vmem:[#allocation54_spill] sm:$0xff] %v12300_v13  ;;  %13892 = vst [vmem:[#allocation56_spill] sm:$0xff] %v12317_v26  ;;  %v12320_v13 = vsel %vm4088_vm1, %v6154_v10, 0.0  ;;  %vm4902_vm9 = vcmp.lt.s32.totalorder %v13894_v7, %v11982_v14  ;;  %v12338_v10 = vsel %vm4900_vm3, 1.0, %v13871_v45  ;;  %v6131_v16 = vsub.f32 %v12234_v40, %v4630_v53  ;;  %v4608_v53 = vld [vmem:[#allocation2 + $0x6b8] sm:$0xff]  ;;  %v4633_v7 = vld [vmem:[#allocation2 + $0x780] sm:$0xff] }
 0x67d   : > { %6179 = vadd.xlane.f32.xlu1 %v12083_v2  ;;  %v5806_v2 = vmul.f32 %v5781_v46, %v4480_v19  ;;  %v4631_v19 = vld [vmem:[#allocation2 + $0x770] sm:$0xff]  ;;  %13893 = vst [vmem:[#allocation57_spill] sm:$0xff] %v12320_v13  ;;  %13895 = vst [vmem:[#allocation58_spill] sm:$0xff] %v12326_v22  ;;  %v12351_v11 = vsel %vm4903_vm4, 1.0, %v13871_v45  ;;  %vm12355_vm8 = vcmp.lt.s32.totalorder %v11694_v0, %v5049_v61  ;;  %v4609_v22 = vld [vmem:[#allocation2 + $0x6c0] sm:$0xff] }
 0x67e   : > { %5832 = vadd.xlane.f32.xlu0 %v12088_v18  ;;  %v8080_v18 = vld [vmem:[#allocation2 + $0x910] sm:$0xff]  ;;  %13897 = vst [vmem:[#allocation60_spill] sm:$0xff] %v12338_v10  ;;  %13899 = vst [vmem:[#allocation62_spill] sm:$0xff] %v12351_v11  ;;  %v6132_v4 = vsub.f32 %v12246_v9, %v4631_v19  ;;  %v4584_v9 = vld [vmem:[#allocation2 + $0x5f8] sm:$0xff]  ;;  %v12371_v10 = vsel %vm4088_vm1, %v5450_v55, 0.0  ;;  %vm4904_vm0 = vcmp.lt.s32.totalorder %v13906_v30, %v11982_v14 }
 0x67f   : > { %v5426_v46 = vsub.f32 %v8080_v18, %v4583_v59  ;;  %v12332_v59 = vsel %vm4901_vm12, 1.0, %v13871_v45  ;;  %v12345_v20 = vsel %vm4088_vm1, %v5806_v2, 0.0  ;;  %v4506_v18 = vld [vmem:[#allocation2 + $0x388] sm:$0xff]  ;;  %v12366_v2 = vsel %vm4902_vm9, 1.0, %v13871_v45  ;;  %v4585_v19 = vld [vmem:[#allocation2 + $0x600] sm:$0xff]  ;;  %13905 = vst [vmem:[#allocation65_spill] sm:$0xff] %v12371_v10 }
 0x680   : > { %13896 = vst [vmem:[#allocation59_spill] sm:$0xff] %v12332_v59  ;;  %13898 = vst [vmem:[#allocation61_spill] sm:$0xff] %v12345_v20  ;;  %v4658_v59 = vld [vmem:[#allocation2 + $0x848] sm:$0xff]  ;;  %v5051_v55 = vsel %vm12355_vm8, %v11694_v0, %v5049_v61  ;;  %v8081_v26 = vld [vmem:[#allocation2 + $0x918] sm:$0xff] }
 0x681   : > { %5835 = vadd.xlane.f32.xlu1 %v12096_v17  ;;  %v12341_v17 = vld [vmem:[#allocation2 + $0x840] sm:$0xff]  ;;  %13903 = vst [vmem:[#allocation64_spill] sm:$0xff] %v12366_v2  ;;  %v5451_v24 = vmul.f32 %v5426_v46, %v4458_v28  ;;  %v13904_v11 = vld [vmem:[#allocation34_spill] sm:$0xff]  ;;  %v6156_v28 = vmul.f32 %v6131_v16, %v4505_v35  ;;  %v5784_v13 = vsub.f32 %v4658_v59, %v4608_v53  ;;  %v4460_v16 = vld [vmem:[#allocation2 + $0x218] sm:$0xff] }
 0x682   : > { %5480 = vadd.xlane.f32.xlu0 %v12099_v1  ;;  %v12360_v1 = vsel %vm4088_vm1, %v5807_v48, 0.0  ;;  %vm4905_vm15 = vcmp.lt.s32.totalorder %v13904_v11, %v11982_v14  ;;  %v5783_v48 = vsub.f32 %v12341_v17, %v4607_v49  ;;  %v12377_v2 = vld [vmem:[#allocation2 + $0x850] sm:$0xff]  ;;  %v4482_v46 = vld [vmem:[#allocation2 + $0x2c8] sm:$0xff]  ;;  %v6157_v49 = vmul.f32 %v6132_v4, %v4506_v18  ;;  %v4461_v53 = vld [vmem:[#allocation2 + $0x220] sm:$0xff] }
 0x683   : > { %13902 = vst [vmem:[#allocation63_spill] sm:$0xff] %v12360_v1  ;;  %v13907_v1 = vld [vmem:[#allocation40_spill] sm:$0xff]  ;;  %v13908_v10 = vld [vmem:[#allocation41_spill] sm:$0xff]  ;;  %v5427_v34 = vsub.f32 %v8081_v26, %v4584_v9  ;;  %v12391_v35 = vsel %vm4905_vm15, 1.0, %v13871_v45  ;;  %v4459_v61 = vld [vmem:[#allocation2 + $0x210] sm:$0xff]  ;;  %v6133_v40 = vsub.f32 %v12341_v17, %v4632_v36  ;;  %v5785_v4 = vsub.f32 %v12377_v2, %v4609_v22 }
 0x684   : > { %v5052_v20 = vrot.slane %v13907_v1, 2  ;;  %v4957_v15 = vcvt.s32.f32 %v13908_v10  ;;  %v13909_v1 = vld [vmem:[#allocation35_spill] sm:$0xff]  ;;  %v12396_v18 = vsel %vm4088_vm1, %v5451_v24, 0.0  ;;  %v12402_v26 = vsel %vm4904_vm0, 1.0, %v13871_v45  ;;  %v4610_v17 = vld [vmem:[#allocation2 + $0x6c8] sm:$0xff] }
 0x685   : > { %5483 = vadd.xlane.f32.xlu1 %v12104_v5  ;;  %vm4906_vm6 = vcmp.lt.s32.totalorder %v13909_v1, %v11982_v14  ;;  %v5428_v5 = vsub.f32 %v8082_v32, %v4585_v19  ;;  %v5808_v32 = vmul.f32 %v5783_v48, %v4482_v46  ;;  %v4507_v9 = vld [vmem:[#allocation2 + $0x390] sm:$0xff]  ;;  %v4508_v19 = vld [vmem:[#allocation2 + $0x398] sm:$0xff]  ;;  %v12422_v0 = vsel %vm4088_vm1, %v6157_v49, 0.0  ;;  %v4586_v11 = vld [vmem:[#allocation2 + $0x608] sm:$0xff] }
 0x686   : > { %6182 = vadd.xlane.f32.xlu0 %v12109_v29  ;;  %v6134_v29 = vsub.f32 %v4658_v59, %v4633_v7  ;;  %vm12404_vm13 = vcmp.lt.s32.totalorder %v5051_v55, %v5052_v20  ;;  %v4484_v36 = vld [vmem:[#allocation2 + $0x2d8] sm:$0xff]  ;;  %v12410_v7 = vsel %vm4088_vm1, %v6156_v28, 0.0  ;;  %v12416_v24 = vsel %vm4906_vm6, 1.0, %v13871_v45 }
 0x687   : > { %13912 = vst [vmem:[#allocation41_spill] sm:$0xff] %v12416_v24  ;;  %v5038_v22 = vmax.f32 %v4957_v15, 1.0  ;;  %v5809_v59 = vmul.f32 %v5784_v13, %v4483_v23  ;;  %v12418_v48 = vld [vmem:[#allocation2 + $0x858] sm:$0xff]  ;;  %vm5041_vm5 = vcmp.gt.s32.totalorder %v13908_v10, 0  ;;  %v5453_v28 = vmul.f32 %v5428_v5, %v4460_v16 }
 0x688   : > { %v12427_v14 = vsel %vm12404_vm13, %v5051_v55, %v5052_v20  ;;  %v6158_v15 = vmul.f32 %v6133_v40, %v4507_v9  ;;  %v6159_v23 = vmul.f32 %v6134_v29, %v4508_v19  ;;  %v5810_v13 = vmul.f32 %v5785_v4, %v4484_v36  ;;  %v4485_v20 = vld [vmem:[#allocation2 + $0x2e0] sm:$0xff]  ;;  %v8083_v55 = vld [vmem:[#allocation2 + $0x928] sm:$0xff] }
 0x689   : > { %6185 = vadd.xlane.f32.xlu1 %v12112_v38  ;;  %v5452_v38 = vmul.f32 %v5427_v34, %v4459_v61  ;;  %13913 = vst [vmem:[#allocation66_spill] sm:$0xff] %v12427_v14  ;;  %v5786_v49 = vsub.f32 %v12418_v48, %v4610_v17  ;;  %8070 = vrcp.f32 %v5038_v22  ;;  %v12435_v34 = vsel %vm5041_vm5, 1.0, %v13871_v45  ;;  %v12440_v61 = vld [vmem:[#allocation2 + $0x610] sm:$0xff]  ;;  %v12454_v9 = vld [vmem:[#allocation2 + $0x788] sm:$0xff] }
 0x68a   : > { %5838 = vadd.xlane.f32.xlu0 %v12127_v63  ;;  %v4761_v46 = vpop.xlane.xlu1 %4760  ;;  %v12430_v63 = vsel %vm4088_vm1, %v5808_v32, 0.0  ;;  %13914 = vst [vmem:[#allocation67_spill] sm:$0xff] %v12435_v34  ;;  %v12438_v10 = vsel %vm4088_vm1, %v5809_v59, 0.0  ;;  %v5429_v5 = vsub.f32 %v8083_v55, %v4586_v11  ;;  %v13915_v40 = vld [vmem:[#allocation10_spill] sm:$0xff]  ;;  %v12452_v32 = vsel %vm4088_vm1, %v5453_v28, 0.0 }
 0x68b   : > { %v4755_v30 = vpop.xlane.xlu0 %4754  ;;  %v4830_v1 = vadd.f32 0.6, %v4761_v46  ;;  %v13916_v29 = vsub.s32 1, %v13915_v40  ;;  %v12449_v4 = vsel %vm4088_vm1, %v5452_v38, 0.0  ;;  %v12456_v11 = vld [vmem:[#allocation2 + $0x790] sm:$0xff]  ;;  %v12465_v22 = vsel %vm4088_vm1, %v5810_v13, 0.0 }
 0x68c   : > { %v4828_v24 = vadd.f32 0.6, %v4755_v30  ;;  %v12467_v59 = vld [vmem:[#allocation2 + $0x6d0] sm:$0xff]  ;;  %v5811_v38 = vmul.f32 %v5786_v49, %v4485_v20  ;;  %v12481_v13 = vmul.f32 %v5429_v5, %v4461_v53 }
 0x68d   : > { %5841 = vadd.xlane.f32.xlu1 %v12130_v62  ;;  %v12446_v62 = vrot.slane %v12427_v14, %v13916_v29  ;;  %v4855_v17 = vmax.f32 %v4830_v1, 0.0  ;;  %v12469_v28 = vld [vmem:[#allocation2 + $0x930] sm:$0xff]  ;;  %v12477_v29 = vld [vmem:[#allocation2 + $0x868] sm:$0xff] }
 0x68e   : > { %v4853_v30 = vmax.f32 %v4828_v24, 0.0  ;;  %5486 = vadd.xlane.f32.xlu0 %v12137_v27  ;;  %v4764_v16 = vpop.xlane.xlu1 %4763  ;;  %v12459_v27 = vsel %vm4088_vm1, %v6158_v15, 0.0  ;;  %v12462_v24 = vsel %vm4088_vm1, %v6159_v23, 0.0  ;;  %v12475_v15 = vld [vmem:[#allocation2 + $0x6d8] sm:$0xff] }
 0x68f   : > { %v4831_v19 = vadd.f32 0.6, %v4764_v16  ;;  %v4758_v36 = vpop.xlane.xlu0 %4757  ;;  %v12473_v16 = vld [vmem:[#allocation2 + $0x860] sm:$0xff]  ;;  %v13917_v23 = vld [vmem:[#allocation43_spill] sm:$0xff]  ;;  %vm5234_vm11 = vcmp.lt.s32.totalorder %v13915_v40, %v12446_v62  ;;  %vm5235_vm14 = vcmp.lt.s32.totalorder %v8966_v37, %v12446_v62  ;;  %vm5238_vm10 = vcmp.lt.s32.totalorder %v8987_v47, %v12446_v62 }
 0x690   : > { %v4829_v46 = vadd.f32 0.6, %v4758_v36  ;;  %v4958_v14 = vmul.f32 %v13917_v23, %v4853_v30  ;;  %v13918_v30 = vld [vmem:[#allocation12_spill] sm:$0xff]  ;;  %v12505_v1 = vsel %vm5234_vm11, 1.0, %v13871_v45  ;;  %v12519_v34 = vsel %vm5235_vm14, 1.0, %v13871_v45 }
 0x691   : > { %5489 = vadd.xlane.f32.xlu1 %v12156_v41  ;;  %v4856_v20 = vmax.f32 %v4831_v19, 0.0  ;;  %vm5236_vm7 = vcmp.lt.s32.totalorder %v13918_v30, %v12446_v62  ;;  %v13920_v19 = vld [vmem:[#allocation13_spill] sm:$0xff]  ;;  %vm5240_vm3 = vcmp.lt.s32.totalorder %v8995_v51, %v12446_v62  ;;  %vm5239_vm4 = vcmp.lt.s32.totalorder %v8992_v50, %v12446_v62  ;;  %v13950_v50 = vld [vmem:[#allocation26_spill] sm:$0xff] }
 0x692   : > { %v4854_v36 = vmax.f32 %v4829_v46, 0.0  ;;  %6188 = vadd.xlane.f32.xlu0 %v12159_v33  ;;  %v4770_v55 = vpop.xlane.xlu1 %4769  ;;  %v13919_v46 = vld [vmem:[#allocation42_spill] sm:$0xff]  ;;  %v12508_v53 = vsel %vm5236_vm7, 1.0, %v13871_v45  ;;  %vm5237_vm12 = vcmp.lt.s32.totalorder %v13920_v19, %v12446_v62  ;;  %vm5242_vm9 = vcmp.lt.s32.totalorder %v9021_v58, %v12446_v62 }
 0x693   : > { %v4833_v41 = vadd.f32 0.6, %v4770_v55  ;;  %v4767_v5 = vpop.xlane.xlu0 %4766  ;;  %v4960_v33 = vmul.f32 %v13919_v46, %v4855_v17  ;;  %v4983_v55 = vsel %vm588_vm2, %v4958_v14, 0.0  ;;  %v13921_v17 = vld [vmem:[#allocation44_spill] sm:$0xff]  ;;  %vm5241_vm8 = vcmp.lt.s32.totalorder %v9004_v52, %v12446_v62 }
 0x694   : > { %v4959_v23 = vmul.f32 %v12118_v39, %v4854_v36  ;;  %v4832_v49 = vadd.f32 0.6, %v4767_v5  ;;  %v4961_v46 = vmul.f32 %v13921_v17, %v4856_v20  ;;  %v12581_v51 = vsel %vm5242_vm9, 1.0, %v13871_v45 }
 0x695   : > { %6191 = vadd.xlane.f32.xlu1 %v12179_v25  ;;  %v4858_v36 = vmax.f32 %v4833_v41, 0.0  ;;  %v4986_v20 = vsel %vm588_vm2, %v4960_v33, 0.0  ;;  %v12538_v33 = vsel %vm5237_vm12, 1.0, %v13871_v45  ;;  %vm5244_vm15 = vcmp.lt.s32.totalorder %v9095_v8, %v12446_v62 }
 0x696   : > { %v4984_v39 = vsel %vm588_vm2, %v4959_v23, 0.0  ;;  %v4857_v5 = vmax.f32 %v4832_v49, 0.0  ;;  %5844 = vadd.xlane.f32.xlu0 %v12182_v44  ;;  %v4776_v14 = vpop.xlane.xlu1 %4775  ;;  %v12532_v23 = vsel %vm5238_vm10, 1.0, %v13871_v45  ;;  %vm5243_vm0 = vcmp.lt.s32.totalorder %v9076_v3, %v12446_v62 }
 0x697   : > { %v4985_v30 = vadd.f32 %v4984_v39, %v4983_v55  ;;  %v4835_v25 = vadd.f32 0.6, %v4776_v14  ;;  %v4773_v40 = vpop.xlane.xlu0 %4772  ;;  %vm5249_vm14 = vcmp.lt.s32.totalorder %v13950_v50, %v12446_v62 }
 0x698   : > { %v4962_v41 = vmul.f32 %v12150_v6, %v4857_v5  ;;  %v4834_v49 = vadd.f32 0.6, %v4773_v40  ;;  %v12541_v6 = vsel %vm4088_vm1, %v5811_v38, 0.0  ;;  %v12543_v40 = vpop.eup %8070  ;;  %v4462_v5 = vld [vmem:[#allocation2 + $0x228] sm:$0xff]  ;;  %v12552_v38 = vsel %vm5240_vm3, 1.0, %v13871_v45 }
 0x699   : > { %v4987_v44 = vadd.f32 %v4986_v20, %v4985_v30  ;;  %5847 = vadd.xlane.f32.xlu1 %v12195_v57  ;;  %v4988_v30 = vsel %vm588_vm2, %v4961_v46, 0.0  ;;  %v4963_v57 = vmul.f32 %v12144_v31, %v4858_v36  ;;  %v4860_v55 = vmax.f32 %v4835_v25, 0.0  ;;  %v4509_v25 = vld [vmem:[#allocation2 + $0x3a0] sm:$0xff] }
 0x69a   : > { %v4859_v17 = vmax.f32 %v4834_v49, 0.0  ;;  %5492 = vadd.xlane.f32.xlu0 %v12207_v42  ;;  %v4782_v39 = vpop.xlane.xlu1 %4781  ;;  %v12558_v31 = vsel %vm5239_vm4, 1.0, %v13871_v45  ;;  %v4990_v46 = vsel %vm588_vm2, %v4962_v41, 0.0  ;;  %v13922_v41 = vsub.f32 %v12469_v28, %v12440_v61 }
 0x69b   : > { %v4989_v14 = vadd.f32 %v4988_v30, %v4987_v44  ;;  %v4837_v20 = vadd.f32 0.6, %v4782_v39  ;;  %v4779_v47 = vpop.xlane.xlu0 %4778  ;;  %v12567_v44 = vsel %vm4088_vm1, %v12481_v13, 0.0  ;;  %v13923_v61 = vsub.f32 %v12377_v2, %v12454_v9  ;;  %v13924_v9 = vld [vmem:[#allocation45_spill] sm:$0xff] }
 0x69c   : > { %v4964_v42 = vmul.f32 %v12188_v12, %v4859_v17  ;;  %v4836_v36 = vadd.f32 0.6, %v4779_v47  ;;  %v5455_v30 = vmul.f32 %v13922_v41, %v4462_v5  ;;  %v4992_v47 = vsel %vm588_vm2, %v4963_v57, 0.0 }
 0x69d   : > { %v4991_v49 = vadd.f32 %v4990_v46, %v4989_v14  ;;  %5495 = vadd.xlane.f32.xlu1 %v12214_v60  ;;  %v4965_v12 = vmul.f32 %v12165_v21, %v4860_v55  ;;  %v4862_v17 = vmax.f32 %v4837_v20, 0.0  ;;  %v6160_v28 = vmul.f32 %v13923_v61, %v4509_v25  ;;  %v13925_v25 = vld [vmem:[#allocation50_spill] sm:$0xff]  ;;  %v13927_v61 = vld [vmem:[#allocation23_spill] sm:$0xff] }
 0x69e   : > { %v4861_v39 = vmax.f32 %v4836_v36, 0.0  ;;  %6194 = vadd.xlane.f32.xlu0 %v12226_v54  ;;  %v4788_v60 = vpop.xlane.xlu1 %4787  ;;  %v4994_v21 = vsel %vm588_vm2, %v4964_v42, 0.0  ;;  %v12595_v5 = vsel %vm5241_vm8, 1.0, %v13871_v45  ;;  %v12598_v2 = vsel %vm4088_vm1, %v5455_v30, 0.0 }
 0x69f   : > { %v4993_v14 = vadd.f32 %v4992_v47, %v4991_v49  ;;  %v4839_v46 = vadd.f32 0.6, %v4788_v60  ;;  %v4785_v13 = vpop.xlane.xlu0 %4784  ;;  %v4967_v20 = vmul.f32 %v13924_v9, %v4862_v17  ;;  %v4510_v49 = vld [vmem:[#allocation2 + $0x3a8] sm:$0xff]  ;;  %v12606_v60 = vsel %vm4088_vm1, %v6160_v28, 0.0  ;;  %v13926_v17 = vld [vmem:[#allocation47_spill] sm:$0xff] }
 0x6a0   : > { %v4966_v57 = vmul.f32 %v12201_v56, %v4861_v39  ;;  %v4838_v55 = vadd.f32 0.6, %v4785_v13  ;;  %v4996_v56 = vsel %vm588_vm2, %v4965_v12, 0.0  ;;  %v12612_v30 = vsel %vm5244_vm15, 1.0, %v13871_v45  ;;  %v4486_v13 = vld [vmem:[#allocation2 + $0x2e8] sm:$0xff] }
 0x6a1   : > { %v4995_v54 = vadd.f32 %v4994_v21, %v4993_v14  ;;  %6197 = vadd.xlane.f32.xlu1 %v12250_v43  ;;  %v4864_v42 = vmax.f32 %v4839_v46, 0.0  ;;  %vm5246_vm6 = vcmp.lt.s32.totalorder %v13927_v61, %v12446_v62  ;;  %v12623_v28 = vsel %vm5243_vm0, 1.0, %v13871_v45  ;;  %v13939_v61 = vld [vmem:[#allocation57_spill] sm:$0xff] }
 0x6a2   : > { %v4863_v36 = vmax.f32 %v4838_v55, 0.0  ;;  %5850 = vadd.xlane.f32.xlu0 %v13925_v25  ;;  %v4794_v43 = vpop.xlane.xlu1 %4793  ;;  %v4998_v12 = vsel %vm588_vm2, %v4966_v57, 0.0  ;;  %v13928_v55 = vld [vmem:[#allocation51_spill] sm:$0xff]  ;;  %v5000_v9 = vsel %vm588_vm2, %v4967_v20, 0.0  ;;  %v12640_v20 = vsel %vm5246_vm6, 1.0, %v13871_v45 }
 0x6a3   : > { %v4997_v41 = vadd.f32 %v4996_v56, %v4995_v54  ;;  %v4841_v47 = vadd.f32 0.6, %v4794_v43  ;;  %v4791_v39 = vpop.xlane.xlu0 %4790  ;;  %v13929_v54 = vsub.f32 %v12418_v48, %v12456_v11  ;;  %v13930_v56 = vld [vmem:[#allocation22_spill] sm:$0xff]  ;;  %v13933_v48 = vsub.f32 %v12473_v16, %v12467_v59  ;;  %v13935_v59 = vld [vmem:[#allocation56_spill] sm:$0xff] }
 0x6a4   : > { %v4968_v14 = vmul.f32 %v13926_v17, %v4863_v36  ;;  %v4840_v46 = vadd.f32 0.6, %v4791_v39  ;;  %vm5245_vm13 = vcmp.lt.s32.totalorder %v13930_v56, %v12446_v62  ;;  %v13931_v36 = vld [vmem:[#allocation46_spill] sm:$0xff]  ;;  %v13932_v39 = vld [vmem:[#allocation37_spill] sm:$0xff] }
 0x6a5   : > { %v4999_v21 = vadd.f32 %v4998_v12, %v4997_v41  ;;  %5853 = vadd.xlane.f32.xlu1 %v13928_v55  ;;  %v6161_v57 = vmul.f32 %v13929_v54, %v4510_v49  ;;  %v4969_v25 = vmul.f32 %v13931_v36, %v4864_v42  ;;  %v4866_v43 = vmax.f32 %v4841_v47, 0.0  ;;  %v4487_v17 = vld [vmem:[#allocation2 + $0x2f0] sm:$0xff]  ;;  %v4588_v55 = vld [vmem:[#allocation2 + $0x618] sm:$0xff]  ;;  %v13934_v49 = vld [vmem:[#allocation49_spill] sm:$0xff] }
 0x6a6   : > { %v4865_v41 = vmax.f32 %v4840_v46, 0.0  ;;  %5498 = vadd.xlane.f32.xlu0 %v13932_v39  ;;  %v4800_v12 = vpop.xlane.xlu1 %4799  ;;  %v5812_v11 = vmul.f32 %v13933_v48, %v4486_v13  ;;  %v5002_v42 = vsel %vm588_vm2, %v4968_v14, 0.0  ;;  %v13936_v13 = vsub.f32 %v12477_v29, %v12475_v15  ;;  %v8085_v36 = vld [vmem:[#allocation2 + $0x938] sm:$0xff]  ;;  %v13937_v14 = vld [vmem:[#allocation25_spill] sm:$0xff] }
 0x6a7   : > { %v5001_v8 = vadd.f32 %v5000_v9, %v4999_v21  ;;  %v4843_v3 = vadd.f32 0.6, %v4800_v12  ;;  %v4797_v58 = vpop.xlane.xlu0 %4796  ;;  %v12648_v21 = vsel %vm5245_vm13, 1.0, %v13871_v45  ;;  %v5431_v39 = vsub.f32 %v8085_v36, %v4588_v55  ;;  %v13942_v36 = vld [vmem:[#allocation58_spill] sm:$0xff] }
 0x6a8   : > { %v4970_v47 = vmul.f32 %v13934_v49, %v4865_v41  ;;  %v4842_v46 = vadd.f32 0.6, %v4797_v58  ;;  %v5813_v9 = vmul.f32 %v13936_v13, %v4487_v17  ;;  %vm5248_vm5 = vcmp.lt.s32.totalorder %v13937_v14, %v12446_v62  ;;  %v13938_v41 = vld [vmem:[#allocation48_spill] sm:$0xff] }
 0x6a9   : > { %v5003_v54 = vadd.f32 %v5002_v42, %v5001_v8  ;;  %5501 = vadd.xlane.f32.xlu1 %v13935_v59  ;;  %v5004_v58 = vsel %vm588_vm2, %v4969_v25, 0.0  ;;  %v4971_v12 = vmul.f32 %v13938_v41, %v4866_v43  ;;  %v4868_v48 = vmax.f32 %v4843_v3, 0.0  ;;  %v4463_v42 = vld [vmem:[#allocation2 + $0x230] sm:$0xff]  ;;  %v13940_v25 = vld [vmem:[#allocation53_spill] sm:$0xff]  ;;  %v13941_v3 = vld [vmem:[#allocation24_spill] sm:$0xff] }
 0x6aa   : > { %v4867_v49 = vmax.f32 %v4842_v46, 0.0  ;;  %6200 = vadd.xlane.f32.xlu0 %v13939_v61  ;;  %v4806_v8 = vpop.xlane.xlu1 %4805  ;;  %v12660_v15 = vsel %vm4088_vm1, %v6161_v57, 0.0  ;;  %v12663_v17 = vsel %vm4088_vm1, %v5812_v11, 0.0  ;;  %v5006_v55 = vsel %vm588_vm2, %v4970_v47, 0.0  ;;  %v4589_v61 = vld [vmem:[#allocation2 + $0x620] sm:$0xff] }
 0x6ab   : > { %v5005_v59 = vadd.f32 %v5004_v58, %v5003_v54  ;;  %v4845_v56 = vadd.f32 0.6, %v4806_v8  ;;  %v4803_v52 = vpop.xlane.xlu0 %4802  ;;  %vm5247_vm11 = vcmp.lt.s32.totalorder %v13941_v3, %v12446_v62  ;;  %v12671_v54 = vsel %vm4088_vm1, %v5813_v9, 0.0  ;;  %v13945_v8 = vld [vmem:[#allocation61_spill] sm:$0xff] }
 0x6ac   : > { %v4972_v13 = vmul.f32 %v13940_v25, %v4867_v49  ;;  %v4844_v43 = vadd.f32 0.6, %v4803_v52  ;;  %v5456_v57 = vmul.f32 %v5431_v39, %v4463_v42  ;;  %v12677_v11 = vsel %vm5248_vm5, 1.0, %v13871_v45  ;;  %v13944_v52 = vld [vmem:[#allocation52_spill] sm:$0xff] }
 0x6ad   : > { %v5007_v46 = vadd.f32 %v5006_v55, %v5005_v59  ;;  %6203 = vadd.xlane.f32.xlu1 %v13942_v36  ;;  %13943 = vst [vmem:[#allocation43_spill] sm:$0xff] %v12677_v11  ;;  %v5008_v47 = vsel %vm588_vm2, %v4971_v12, 0.0  ;;  %v4973_v58 = vmul.f32 %v13944_v52, %v4868_v48  ;;  %v4870_v41 = vmax.f32 %v4845_v56, 0.0  ;;  %v4636_v55 = vld [vmem:[#allocation2 + $0x798] sm:$0xff]  ;;  %v8086_v42 = vld [vmem:[#allocation2 + $0x940] sm:$0xff] }
 0x6ae   : > { %v4869_v49 = vmax.f32 %v4844_v43, 0.0  ;;  %5856 = vadd.xlane.f32.xlu0 %v13945_v8  ;;  %v4812_v59 = vpop.xlane.xlu1 %4811  ;;  %v12686_v39 = vsel %vm5247_vm11, 1.0, %v13871_v45  ;;  %v5432_v14 = vsub.f32 %v8086_v42, %v4589_v61  ;;  %v5010_v12 = vsel %vm588_vm2, %v4972_v13, 0.0  ;;  %v13947_v48 = vld [vmem:[#allocation55_spill] sm:$0xff]  ;;  %v4637_v8 = vld [vmem:[#allocation2 + $0x7a0] sm:$0xff]  ;;  %v13951_v61 = vld [vmem:[#allocation54_spill] sm:$0xff] }
 0x6af   : > { %v5009_v25 = vadd.f32 %v5008_v47, %v5007_v46  ;;  %v4847_v9 = vadd.f32 0.6, %v4812_v59  ;;  %v4809_v36 = vpop.xlane.xlu0 %4808  ;;  %13946 = vst [vmem:[#allocation42_spill] sm:$0xff] %v12686_v39  ;;  %v13948_v52 = vld [vmem:[#allocation27_spill] sm:$0xff]  ;;  %v12694_v59 = vsel %vm4088_vm1, %v5456_v57, 0.0  ;;  %v6137_v3 = vsub.f32 %v12473_v16, %v4636_v55  ;;  %v4613_v55 = vld [vmem:[#allocation2 + $0x6e0] sm:$0xff] }
 0x6b0   : > { %v4974_v56 = vmul.f32 %v13947_v48, %v4869_v49  ;;  %v4846_v43 = vadd.f32 0.6, %v4809_v36  ;;  %vm5250_vm7 = vcmp.lt.s32.totalorder %v13948_v52, %v12446_v62  ;;  %v13949_v47 = vld [vmem:[#allocation63_spill] sm:$0xff]  ;;  %v5012_v13 = vsel %vm588_vm2, %v4973_v58, 0.0  ;;  %v13952_v48 = vld [vmem:[#allocation65_spill] sm:$0xff] }
 0x6b1   : > { %v5011_v46 = vadd.f32 %v5010_v12, %v5009_v25  ;;  %5859 = vadd.xlane.f32.xlu1 %v13949_v47  ;;  %v4975_v49 = vmul.f32 %v13951_v61, %v4870_v41  ;;  %v4872_v36 = vmax.f32 %v4847_v9, 0.0  ;;  %v4464_v25 = vld [vmem:[#allocation2 + $0x238] sm:$0xff]  ;;  %v4511_v12 = vld [vmem:[#allocation2 + $0x3b0] sm:$0xff]  ;;  %v12706_v16 = vsel %vm5250_vm7, 1.0, %v13871_v45 }
 0x6b2   : > { %v4871_v42 = vmax.f32 %v4846_v43, 0.0  ;;  %5504 = vadd.xlane.f32.xlu0 %v13952_v48  ;;  %v4818_v19 = vpop.xlane.xlu1 %4817  ;;  %13953 = vst [vmem:[#allocation44_spill] sm:$0xff] %v12706_v16  ;;  %v6138_v58 = vsub.f32 %v12477_v29, %v4637_v8  ;;  %v5014_v41 = vsel %vm588_vm2, %v4974_v56, 0.0  ;;  %v13954_v9 = vld [vmem:[#allocation60_spill] sm:$0xff]  ;;  %v5457_v52 = vmul.f32 %v5432_v14, %v4464_v25  ;;  %v13956_v8 = vld [vmem:[#allocation29_spill] sm:$0xff] }
 0x6b3   : > { %v5013_v47 = vadd.f32 %v5012_v13, %v5011_v46  ;;  %v4849_v37 = vadd.f32 0.6, %v4818_v19  ;;  %v4815_v57 = vpop.xlane.xlu0 %4814  ;;  %v12715_v19 = vsel %vm5249_vm14, 1.0, %v13871_v45  ;;  %v4512_v46 = vld [vmem:[#allocation2 + $0x3b8] sm:$0xff]  ;;  %v12717_v13 = vld [vmem:[#allocation2 + $0x870] sm:$0xff]  ;;  %v6162_v29 = vmul.f32 %v6137_v3, %v4511_v12 }
 0x6b4   : > { %v4976_v43 = vmul.f32 %v13954_v9, %v4871_v42  ;;  %v4848_v61 = vadd.f32 0.6, %v4815_v57  ;;  %13955 = vst [vmem:[#allocation45_spill] sm:$0xff] %v12715_v19  ;;  %vm5252_vm10 = vcmp.lt.s32.totalorder %v13956_v8, %v12446_v62  ;;  %v5016_v56 = vsel %vm588_vm2, %v4975_v49, 0.0  ;;  %v13957_v42 = vld [vmem:[#allocation59_spill] sm:$0xff]  ;;  %v4614_v19 = vld [vmem:[#allocation2 + $0x6e8] sm:$0xff] }
 0x6b5   : > { %v5015_v48 = vadd.f32 %v5014_v41, %v5013_v47  ;;  %5507 = vadd.xlane.f32.xlu1 %v12396_v18  ;;  %v4977_v57 = vmul.f32 %v13957_v42, %v4872_v36  ;;  %v4874_v9 = vmax.f32 %v4849_v37, 0.0  ;;  %v12725_v39 = vld [vmem:[#allocation2 + $0x878] sm:$0xff]  ;;  %v6163_v14 = vmul.f32 %v6138_v58, %v4512_v46  ;;  %v4489_v42 = vld [vmem:[#allocation2 + $0x300] sm:$0xff] }
 0x6b6   : > { %v4873_v16 = vmax.f32 %v4848_v61, 0.0  ;;  %6206 = vadd.xlane.f32.xlu0 %v12410_v7  ;;  %v4824_v50 = vpop.xlane.xlu1 %4823  ;;  %v5789_v3 = vsub.f32 %v12717_v13, %v4613_v55  ;;  %v5018_v25 = vsel %vm588_vm2, %v4976_v43, 0.0  ;;  %v13958_v12 = vld [vmem:[#allocation64_spill] sm:$0xff]  ;;  %v12734_v37 = vsel %vm5252_vm10, 1.0, %v13871_v45  ;;  %v13960_v43 = vld [vmem:[#allocation62_spill] sm:$0xff] }
 0x6b7   : > { %v5017_v47 = vadd.f32 %v5016_v56, %v5015_v48  ;;  %v4851_v41 = vadd.f32 0.6, %v4824_v50  ;;  %v4821_v18 = vpop.xlane.xlu0 %4820  ;;  %v4488_v36 = vld [vmem:[#allocation2 + $0x2f8] sm:$0xff]  ;;  %v12738_v50 = vsel %vm4088_vm1, %v5457_v52, 0.0  ;;  %v5790_v55 = vsub.f32 %v12725_v39, %v4614_v19 }
 0x6b8   : > { %v4978_v49 = vmul.f32 %v13958_v12, %v4873_v16  ;;  %v4850_v11 = vadd.f32 0.6, %v4821_v18  ;;  %v13959_v58 = vld [vmem:[#allocation28_spill] sm:$0xff]  ;;  %v5020_v16 = vsel %vm588_vm2, %v4977_v57, 0.0  ;;  %v4979_v61 = vmul.f32 %v13960_v43, %v4874_v9  ;;  %v4567_v43 = vld [vmem:[#allocation2 + $0x570] sm:$0xff] }
 0x6b9   : > { %v5019_v7 = vadd.f32 %v5018_v25, %v5017_v47  ;;  %6209 = vadd.xlane.f32.xlu1 %v12422_v0  ;;  %vm5251_vm12 = vcmp.lt.s32.totalorder %v13959_v58, %v12446_v62  ;;  %v4876_v46 = vmax.f32 %v4851_v41, 0.0  ;;  %v12747_v52 = vsel %vm4088_vm1, %v6162_v29, 0.0 }
 0x6ba   : > { %v4875_v48 = vmax.f32 %v4850_v11, 0.0  ;;  %5862 = vadd.xlane.f32.xlu0 %v12430_v63  ;;  %v5107_v56 = vpop.xlane.xlu1 %5106  ;;  %v5814_v25 = vmul.f32 %v5789_v3, %v4488_v36  ;;  %v5022_v12 = vsel %vm588_vm2, %v4978_v49, 0.0  ;;  %v12755_v11 = vsel %vm5251_vm12, 1.0, %v13871_v45  ;;  %v4590_v63 = vld [vmem:[#allocation2 + $0x628] sm:$0xff]  ;;  %v13961_v3 = vld [vmem:[#allocation31_spill] sm:$0xff] }
 0x6bb   : > { %v5021_v47 = vadd.f32 %v5020_v16, %v5019_v7  ;;  %v5180_v0 = vadd.f32 0.6, %v5107_v56  ;;  %v4827_v18 = vpop.xlane.xlu0 %4826  ;;  %v12759_v41 = vsel %vm4088_vm1, %v6163_v14, 0.0  ;;  %v5815_v29 = vmul.f32 %v5790_v55, %v4489_v42  ;;  %v8087_v55 = vld [vmem:[#allocation2 + $0x948] sm:$0xff] }
 0x6bc   : > { %v4980_v19 = vmul.f32 %v12402_v26, %v4875_v48  ;;  %v4852_v57 = vadd.f32 0.6, %v4827_v18  ;;  %vm5254_vm3 = vcmp.lt.s32.totalorder %v13961_v3, %v12446_v62  ;;  %v5024_v26 = vsel %vm588_vm2, %v4979_v61, 0.0  ;;  %v13962_v18 = vld [vmem:[#allocation41_spill] sm:$0xff] }
 0x6bd   : > { %v5023_v9 = vadd.f32 %v5022_v12, %v5021_v47  ;;  %5865 = vadd.xlane.f32.xlu1 %v12438_v10  ;;  %v4981_v49 = vmul.f32 %v12391_v35, %v4876_v46  ;;  %v5205_v36 = vmax.f32 %v5180_v0, 0.0  ;;  %v12767_v14 = vsel %vm4088_vm1, %v5814_v25, 0.0  ;;  %v4465_v35 = vld [vmem:[#allocation2 + $0x240] sm:$0xff]  ;;  %v13963_v25 = vld [vmem:[#allocation30_spill] sm:$0xff] }
 0x6be   : > { %v4877_v7 = vmax.f32 %v4852_v57, 0.0  ;;  %5510 = vadd.xlane.f32.xlu0 %v12449_v4  ;;  %v5113_v16 = vpop.xlane.xlu1 %5112  ;;  %v5433_v42 = vsub.f32 %v8087_v55, %v4590_v63  ;;  %v5026_v47 = vsel %vm588_vm2, %v4980_v19, 0.0  ;;  %v12775_v4 = vsel %vm5254_vm3, 1.0, %v13871_v45  ;;  %v12780_v57 = vld [vmem:[#allocation2 + $0x958] sm:$0xff] }
 0x6bf   : > { %v5025_v48 = vadd.f32 %v5024_v26, %v5023_v9  ;;  %v5182_v56 = vadd.f32 0.6, %v5113_v16  ;;  %v5110_v10 = vpop.xlane.xlu0 %5109  ;;  %vm5253_vm4 = vcmp.lt.s32.totalorder %v13963_v25, %v12446_v62  ;;  %v5079_v19 = vsub.f32 %v12780_v57, %v4567_v43 }
 0x6c0   : > { %v4982_v61 = vmul.f32 %v13962_v18, %v4877_v7  ;;  %v5181_v12 = vadd.f32 0.6, %v5110_v10  ;;  %v5028_v63 = vsel %vm588_vm2, %v4981_v49, 0.0  ;;  %v5310_v9 = vmul.f32 %v12505_v1, %v5205_v36 }
 0x6c1   : > { %v5027_v46 = vadd.f32 %v5026_v47, %v5025_v48  ;;  %v5207_v0 = vmax.f32 %v5182_v56, 0.0  ;;  %5513 = vadd.xlane.f32.xlu1 %v12452_v32  ;;  %v12787_v16 = vsel %vm4088_vm1, %v5815_v29, 0.0  ;;  %v4442_v48 = vld [vmem:[#allocation2 + $0x188] sm:$0xff]  ;;  %v5458_v18 = vmul.f32 %v5433_v42, %v4465_v35 }
 0x6c2   : > { %v5206_v26 = vmax.f32 %v5181_v12, 0.0  ;;  %6212 = vadd.xlane.f32.xlu0 %v12459_v27  ;;  %v5119_v7 = vpop.xlane.xlu1 %5118  ;;  %v4638_v32 = vld [vmem:[#allocation2 + $0x7a8] sm:$0xff]  ;;  %v5030_v43 = vsel %vm588_vm2, %v4982_v61, 0.0  ;;  %v12796_v27 = vsel %vm5253_vm4, 1.0, %v13871_v45  ;;  %v5104_v12 = vmul.f32 %v5079_v19, %v4442_v48 }
 0x6c3   : > { %v5029_v56 = vadd.f32 %v5028_v63, %v5027_v46  ;;  %v5312_v10 = vmul.f32 %v12508_v53, %v5207_v0  ;;  %v5184_v55 = vadd.f32 0.6, %v5119_v7  ;;  %v5116_v47 = vpop.xlane.xlu0 %5115  ;;  %v6139_v53 = vsub.f32 %v12717_v13, %v4638_v32  ;;  %v4615_v0 = vld [vmem:[#allocation2 + $0x6f0] sm:$0xff]  ;;  %v12804_v63 = vld [vmem:[#allocation2 + $0x880] sm:$0xff] }
 0x6c4   : > { %v5311_v49 = vmul.f32 %v12519_v34, %v5206_v26  ;;  %v5183_v1 = vadd.f32 0.6, %v5116_v47  ;;  %v5335_v42 = vsel %vm588_vm2, %v5310_v9, 0.0  ;;  %v13964_v32 = vld [vmem:[#allocation33_spill] sm:$0xff] }
 0x6c5   : > { %v5031_v29 = vadd.f32 %v5030_v43, %v5029_v56  ;;  %v5209_v36 = vmax.f32 %v5184_v55, 0.0  ;;  %6215 = vadd.xlane.f32.xlu1 %v12462_v24  ;;  %v5338_v61 = vsel %vm588_vm2, %v5312_v10, 0.0  ;;  %vm5256_vm9 = vcmp.lt.s32.totalorder %v13964_v32, %v12446_v62  ;;  %v13965_v56 = vld [vmem:[#allocation32_spill] sm:$0xff] }
 0x6c6   : > { %v5336_v34 = vsel %vm588_vm2, %v5311_v49, 0.0  ;;  %v5208_v35 = vmax.f32 %v5183_v1, 0.0  ;;  %5868 = vadd.xlane.f32.xlu0 %v12465_v22  ;;  %v5125_v46 = vpop.xlane.xlu1 %5124  ;;  %vm5255_vm8 = vcmp.lt.s32.totalorder %v13965_v56, %v12446_v62  ;;  %v4513_v47 = vld [vmem:[#allocation2 + $0x3c0] sm:$0xff]  ;;  %v5791_v43 = vsub.f32 %v12804_v63, %v4615_v0 }
 0x6c7   : > { %v5032_v26 = vrot.slane %v5031_v29, 4  ;;  %v5337_v7 = vadd.f32 %v5336_v34, %v5335_v42  ;;  %v5314_v24 = vmul.f32 %v12532_v23, %v5209_v36  ;;  %v5186_v19 = vadd.f32 0.6, %v5125_v46  ;;  %v5122_v48 = vpop.xlane.xlu0 %5121 }
 0x6c8   : > { %v5313_v13 = vmul.f32 %v12538_v33, %v5208_v35  ;;  %v5185_v9 = vadd.f32 0.6, %v5122_v48  ;;  %v12818_v36 = vsel %vm4088_vm1, %v5458_v18, 0.0  ;;  %v6164_v0 = vmul.f32 %v6139_v53, %v4513_v47 }
 0x6c9   : > { %v5033_v22 = vadd.f32 %v5032_v26, %v5031_v29  ;;  %v5339_v10 = vadd.f32 %v5338_v61, %v5337_v7  ;;  %v5211_v55 = vmax.f32 %v5186_v19, 0.0  ;;  %5871 = vadd.xlane.f32.xlu1 %v12541_v6  ;;  %v5342_v23 = vsel %vm588_vm2, %v5314_v24, 0.0  ;;  %v4591_v24 = vld [vmem:[#allocation2 + $0x630] sm:$0xff] }
 0x6ca   : > { %v5340_v49 = vsel %vm588_vm2, %v5313_v13, 0.0  ;;  %v5210_v33 = vmax.f32 %v5185_v9, 0.0  ;;  %5516 = vadd.xlane.f32.xlu0 %v12567_v44  ;;  %v5131_v1 = vpop.xlane.xlu1 %5130  ;;  %v12826_v26 = vsel %vm5256_vm9, 1.0, %v13871_v45  ;;  %v12839_v9 = vsel %vm4088_vm1, %v5104_v12, 0.0 }
 0x6cb   : > { %v5034_v42 = vrot.slane %v5033_v22, 2  ;;  %v5341_v29 = vadd.f32 %v5340_v49, %v5339_v10  ;;  %v5316_v61 = vmul.f32 %v12552_v38, %v5211_v55  ;;  %v5188_v34 = vadd.f32 0.6, %v5131_v1  ;;  %v5128_v6 = vpop.xlane.xlu0 %5127  ;;  %v8089_v1 = vld [vmem:[#allocation2 + $0x950] sm:$0xff] }
 0x6cc   : > { %v5315_v35 = vmul.f32 %v12558_v31, %v5210_v33  ;;  %v5187_v46 = vadd.f32 0.6, %v5128_v6  ;;  %v12833_v38 = vsel %vm5255_vm8, 1.0, %v13871_v45  ;;  %v4490_v31 = vld [vmem:[#allocation2 + $0x308] sm:$0xff] }
 0x6cd   : > { %v5035_v44 = vadd.f32 %v5034_v42, %v5033_v22  ;;  %v5343_v7 = vadd.f32 %v5342_v23, %v5341_v29  ;;  %v5213_v18 = vmax.f32 %v5188_v34, 0.0  ;;  %5519 = vadd.xlane.f32.xlu1 %v12598_v2  ;;  %v5346_v53 = vsel %vm588_vm2, %v5316_v61, 0.0 }
 0x6ce   : > { %v5344_v19 = vsel %vm588_vm2, %v5315_v35, 0.0  ;;  %v5212_v48 = vmax.f32 %v5187_v46, 0.0  ;;  %6218 = vadd.xlane.f32.xlu0 %v12606_v60  ;;  %v5137_v13 = vpop.xlane.xlu1 %5136  ;;  %v5816_v33 = vmul.f32 %v5791_v43, %v4490_v31  ;;  %v5434_v42 = vsub.f32 %v8089_v1, %v4591_v24  ;;  %v13966_v60 = vld [vmem:[#allocation39_spill] sm:$0xff] }
 0x6cf   : > { %v5036_v2 = vrot.slane %v5035_v44, 1  ;;  %v5345_v22 = vadd.f32 %v5344_v19, %v5343_v7  ;;  %v5318_v10 = vmul.f32 %v12581_v51, %v5213_v18  ;;  %v5190_v55 = vadd.f32 0.6, %v5137_v13  ;;  %v5134_v47 = vpop.xlane.xlu0 %5133  ;;  %v4592_v43 = vld [vmem:[#allocation2 + $0x638] sm:$0xff]  ;;  %v13968_v13 = vld [vmem:[#allocation34_spill] sm:$0xff] }
 0x6d0   : > { %v5317_v23 = vmul.f32 %v12595_v5, %v5212_v48  ;;  %v5189_v49 = vadd.f32 0.6, %v5134_v47  ;;  %v5405_v12 = vrot.slane %v13966_v60, 6  ;;  %v12849_v5 = vsel %vm4088_vm1, %v6164_v0, 0.0  ;;  %v13967_v19 = vld [vmem:[#allocation40_spill] sm:$0xff] }
 0x6d1   : > { %v5037_v29 = vadd.f32 %v5036_v2, %v5035_v44  ;;  %v5347_v61 = vadd.f32 %v5346_v53, %v5345_v22  ;;  %v5215_v34 = vmax.f32 %v5190_v55, 0.0  ;;  %6221 = vadd.xlane.f32.xlu1 %v12660_v15  ;;  %v5350_v6 = vsel %vm588_vm2, %v5318_v10, 0.0 }
 0x6d2   : > { %v5348_v35 = vsel %vm588_vm2, %v5317_v23, 0.0  ;;  %v5214_v51 = vmax.f32 %v5189_v49, 0.0  ;;  %5874 = vadd.xlane.f32.xlu0 %v12663_v17  ;;  %v5143_v46 = vpop.xlane.xlu1 %5142  ;;  %v5408_v48 = vrot.slane %v13967_v19, 1  ;;  %vm5257_vm15 = vcmp.lt.s32.totalorder %v13968_v13, %v12446_v62  ;;  %v13969_v17 = vld [vmem:[#allocation67_spill] sm:$0xff]  ;;  %v13971_v23 = vld [vmem:[#allocation36_spill] sm:$0xff] }
 0x6d3   : > { %v5040_v44 = vmul.f32 %v12543_v40, %v5037_v29  ;;  %v5349_v7 = vadd.f32 %v5348_v35, %v5347_v61  ;;  %v5320_v18 = vmul.f32 %v12612_v30, %v5215_v34  ;;  %v5192_v15 = vadd.f32 0.6, %v5143_v46  ;;  %v5140_v31 = vpop.xlane.xlu0 %5139  ;;  %v4466_v40 = vld [vmem:[#allocation2 + $0x248] sm:$0xff]  ;;  %v4467_v34 = vld [vmem:[#allocation2 + $0x250] sm:$0xff] }
 0x6d4   : > { %v5319_v24 = vmul.f32 %v12623_v28, %v5214_v51  ;;  %v5191_v53 = vadd.f32 0.6, %v5140_v31  ;;  %v5435_v30 = vsub.f32 %v12780_v57, %v4592_v43  ;;  %vm5406_vm0 = vcmp.lt.s32.totalorder %v13971_v23, %v5405_v12  ;;  %v4639_v51 = vld [vmem:[#allocation2 + $0x7b0] sm:$0xff] }
 0x6d5   : > { %v12858_v2 = vmul.f32 %v13969_v17, %v5040_v44  ;;  %v5351_v0 = vadd.f32 %v5350_v6, %v5349_v7  ;;  %v5217_v22 = vmax.f32 %v5192_v15, 0.0  ;;  %5877 = vadd.xlane.f32.xlu1 %v12671_v54  ;;  %v5354_v10 = vsel %vm588_vm2, %v5320_v18, 0.0 }
 0x6d6   : > { %v5352_v28 = vsel %vm588_vm2, %v5319_v24, 0.0  ;;  %v5216_v55 = vmax.f32 %v5191_v53, 0.0  ;;  %5522 = vadd.xlane.f32.xlu0 %v12694_v59  ;;  %v5149_v47 = vpop.xlane.xlu1 %5148  ;;  %v12868_v54 = vsel %vm4088_vm1, %v5816_v33, 0.0  ;;  %v5459_v35 = vmul.f32 %v5434_v42, %v4466_v40  ;;  %v4640_v33 = vld [vmem:[#allocation2 + $0x7b8] sm:$0xff] }
 0x6d7   : > { %13970 = vst [vmem:[#allocation50_spill] sm:$0xff] %v12858_v2  ;;  %v5353_v49 = vadd.f32 %v5352_v28, %v5351_v0  ;;  %v5322_v1 = vmul.f32 %v12640_v20, %v5217_v22  ;;  %v5194_v29 = vadd.f32 0.6, %v5149_v47  ;;  %v5146_v61 = vpop.xlane.xlu0 %5145  ;;  %v12875_v59 = vsel %vm5257_vm15, 1.0, %v13871_v45  ;;  %v13973_v53 = vld [vmem:[#allocation43_spill] sm:$0xff]  ;;  %v13980_v47 = vld [vmem:[#allocation10_spill] sm:$0xff] }
 0x6d8   : > { %v5321_v57 = vmul.f32 %v12648_v21, %v5216_v55  ;;  %v5193_v6 = vadd.f32 0.6, %v5146_v61  ;;  %v5407_v20 = vsel %vm5406_vm0, %v13971_v23, %v5405_v12  ;;  %v13972_v44 = vrot.slane %v13971_v23, 2  ;;  %v4616_v40 = vld [vmem:[#allocation2 + $0x6f8] sm:$0xff] }
 0x6d9   : > { %v5355_v46 = vadd.f32 %v5354_v10, %v5353_v49  ;;  %v5219_v43 = vmax.f32 %v5194_v29, 0.0  ;;  %5525 = vadd.xlane.f32.xlu1 %v12738_v50  ;;  %v5358_v42 = vsel %vm588_vm2, %v5322_v1, 0.0  ;;  %v5460_v31 = vmul.f32 %v5435_v30, %v4467_v34  ;;  %v12887_v10 = vld [vmem:[#allocation2 + $0x888] sm:$0xff] }
 0x6da   : > { %v5761_v21 = vadd.s32 %v13972_v44, %v13966_v60  ;;  %v5356_v7 = vsel %vm588_vm2, %v5321_v57, 0.0  ;;  %v5218_v18 = vmax.f32 %v5193_v6, 0.0  ;;  %6224 = vadd.xlane.f32.xlu0 %v12747_v52  ;;  %v5155_v15 = vpop.xlane.xlu1 %5154  ;;  %v6140_v12 = vsub.f32 %v12725_v39, %v4639_v51  ;;  %v13974_v60 = vld [vmem:[#allocation42_spill] sm:$0xff]  ;;  %v13977_v51 = vld [vmem:[#allocation44_spill] sm:$0xff]  ;;  %v13978_v44 = vld [vmem:[#allocation45_spill] sm:$0xff] }
 0x6db   : > { %v5357_v24 = vadd.f32 %v5356_v7, %v5355_v46  ;;  %v5324_v0 = vmul.f32 %v13973_v53, %v5219_v43  ;;  %v5196_v50 = vadd.f32 0.6, %v5155_v15  ;;  %v5152_v22 = vpop.xlane.xlu0 %5151  ;;  %vm12892_vm6 = vcmp.lt.s32.totalorder %v5407_v20, %v5408_v48  ;;  %v4514_v57 = vld [vmem:[#allocation2 + $0x3c8] sm:$0xff] }
 0x6dc   : > { %v5323_v28 = vmul.f32 %v13974_v60, %v5218_v18  ;;  %v5195_v55 = vadd.f32 0.6, %v5152_v22  ;;  %v6141_v52 = vsub.f32 %v12804_v63, %v4640_v33  ;;  %v12899_v39 = vsel %vm4088_vm1, %v5459_v35, 0.0  ;;  %v4515_v33 = vld [vmem:[#allocation2 + $0x3d0] sm:$0xff] }
 0x6dd   : > { %v5359_v30 = vadd.f32 %v5358_v42, %v5357_v24  ;;  %v5221_v49 = vmax.f32 %v5196_v50, 0.0  ;;  %6227 = vadd.xlane.f32.xlu1 %v12759_v41  ;;  %vm5764_vm13 = vcmp.lt.s32.totalorder %v5761_v21, 200  ;;  %v5362_v1 = vsel %vm588_vm2, %v5324_v0, 0.0  ;;  %v13979_v0 = vld [vmem:[#allocation38_spill] sm:$0xff] }
 0x6de   : > { %v5360_v29 = vsel %vm588_vm2, %v5323_v28, 0.0  ;;  %v5220_v61 = vmax.f32 %v5195_v55, 0.0  ;;  %5880 = vadd.xlane.f32.xlu0 %v12767_v14  ;;  %v5161_v34 = vpop.xlane.xlu1 %5160  ;;  %v5792_v6 = vsub.f32 %v12887_v10, %v4616_v40  ;;  %v12910_v35 = vsel %vm12892_vm6, %v5407_v20, %v5408_v48  ;;  %v4491_v22 = vld [vmem:[#allocation2 + $0x310] sm:$0xff] }
 0x6df   : > { %v5361_v63 = vadd.f32 %v5360_v29, %v5359_v30  ;;  %v5326_v46 = vmul.f32 %v13977_v51, %v5221_v49  ;;  %v5198_v43 = vadd.f32 0.6, %v5161_v34  ;;  %v5158_v41 = vpop.xlane.xlu0 %5157  ;;  %v12914_v14 = vsel %vm4088_vm1, %v5460_v31, 0.0  ;;  %v4641_v51 = vld [vmem:[#allocation2 + $0x7c0] sm:$0xff] }
 0x6e0   : > { %v5325_v42 = vmul.f32 %v13978_v44, %v5220_v61  ;;  %v5197_v7 = vadd.f32 0.6, %v5158_v41  ;;  %v5765_v18 = vsel %vm5764_vm13, %v5761_v21, 200  ;;  %v6165_v53 = vmul.f32 %v6140_v12, %v4514_v57  ;;  %v4617_v44 = vld [vmem:[#allocation2 + $0x700] sm:$0xff] }
 0x6e1   : > { %v5363_v15 = vadd.f32 %v5362_v1, %v5361_v63  ;;  %v5223_v24 = vmax.f32 %v5198_v43, 0.0  ;;  %5883 = vadd.xlane.f32.xlu1 %v12787_v16  ;;  %vm5762_vm5 = vcmp.lt.s32.totalorder %v13971_v23, %v13979_v0  ;;  %v5366_v19 = vsel %vm588_vm2, %v5326_v46, 0.0 }
 0x6e2   : > { %v5364_v48 = vsel %vm588_vm2, %v5325_v42, 0.0  ;;  %v5222_v20 = vmax.f32 %v5197_v7, 0.0  ;;  %5528 = vadd.xlane.f32.xlu0 %v12818_v36  ;;  %v5167_v50 = vpop.xlane.xlu1 %5166  ;;  %v6166_v31 = vmul.f32 %v6141_v52, %v4515_v33  ;;  %v5766_v16 = vrot.slane %v5765_v18, 5  ;;  %v4667_v42 = vld [vmem:[#allocation2 + $0x890] sm:$0xff] }
 0x6e3   : > { %v5365_v40 = vadd.f32 %v5364_v48, %v5363_v15  ;;  %v5328_v21 = vmul.f32 %v12734_v37, %v5223_v24  ;;  %v5200_v60 = vadd.f32 0.6, %v5167_v50  ;;  %v5164_v28 = vpop.xlane.xlu0 %5163  ;;  %v13981_v30 = vsub.s32 2, %v13980_v47  ;;  %v4642_v24 = vld [vmem:[#allocation2 + $0x7c8] sm:$0xff] }
 0x6e4   : > { %v5327_v12 = vmul.f32 %v12755_v11, %v5222_v20  ;;  %v5199_v55 = vadd.f32 0.6, %v5164_v28  ;;  %v5763_v36 = vsel %vm5762_vm5, %v13971_v23, %v13979_v0  ;;  %v6232_v37 = vsel %vm4088_vm1, %v6165_v53, 0.0  ;;  %v4516_v20 = vld [vmem:[#allocation2 + $0x3d8] sm:$0xff] }
 0x6e5   : > { %v12928_v49 = vrot.slane %v12910_v35, %v13981_v30  ;;  %v5367_v52 = vadd.f32 %v5366_v19, %v5365_v40  ;;  %v5225_v1 = vmax.f32 %v5200_v60, 0.0  ;;  %5178 = vadd.xlane.f32.xlu1 %v12839_v9  ;;  %v5817_v29 = vmul.f32 %v5792_v6, %v4491_v22  ;;  %v4492_v28 = vld [vmem:[#allocation2 + $0x318] sm:$0xff] }
 0x6e6   : > { %v5370_v11 = vsel %vm588_vm2, %v5328_v21, 0.0  ;;  %v5368_v61 = vsel %vm588_vm2, %v5327_v12, 0.0  ;;  %v5224_v34 = vmax.f32 %v5199_v55, 0.0  ;;  %6230 = vadd.xlane.f32.xlu0 %v12849_v5  ;;  %v5173_v57 = vpop.xlane.xlu1 %5172  ;;  %v6235_v63 = vsel %vm4088_vm1, %v6166_v31, 0.0  ;;  %v13984_v5 = vld [vmem:[#allocation12_spill] sm:$0xff]  ;;  %v13986_v55 = vld [vmem:[#allocation14_spill] sm:$0xff] }
 0x6e7   : > { %v5369_v46 = vadd.f32 %v5368_v61, %v5367_v52  ;;  %v5330_v23 = vmul.f32 %v12775_v4, %v5225_v1  ;;  %v5202_v43 = vadd.f32 0.6, %v5173_v57  ;;  %v5170_v41 = vpop.xlane.xlu0 %5169  ;;  %vm12942_vm11 = vcmp.lt.s32.totalorder %v5763_v36, %v5766_v16  ;;  %v13985_v4 = vld [vmem:[#allocation11_spill] sm:$0xff] }
 0x6e8   : > { %v5329_v6 = vmul.f32 %v12796_v27, %v5224_v34  ;;  %v5201_v33 = vadd.f32 0.6, %v5170_v41  ;;  %vm5590_vm7 = vcmp.lt.s32.totalorder %v13980_v47, %v12928_v49  ;;  %vm5592_vm14 = vcmp.lt.s32.totalorder %v13984_v5, %v12928_v49 }
 0x6e9   : > { %v5371_v7 = vadd.f32 %v5370_v11, %v5369_v46  ;;  %v5227_v18 = vmax.f32 %v5202_v43, 0.0  ;;  %5886 = vadd.xlane.f32.xlu1 %v12868_v54  ;;  %vm5591_vm10 = vcmp.lt.s32.totalorder %v13985_v4, %v12928_v49  ;;  %v6142_v15 = vsub.f32 %v12887_v10, %v4641_v51 }
 0x6ea   : > { %v5374_v27 = vsel %vm588_vm2, %v5330_v23, 0.0  ;;  %v5372_v53 = vsel %vm588_vm2, %v5329_v6, 0.0  ;;  %v5226_v0 = vmax.f32 %v5201_v33, 0.0  ;;  %5531 = vadd.xlane.f32.xlu0 %v12899_v39  ;;  %v5463_v19 = vpop.xlane.xlu1 %5462  ;;  %v12960_v48 = vsel %vm12942_vm11, %v5763_v36, %v5766_v16  ;;  %v4517_v36 = vld [vmem:[#allocation2 + $0x3e0] sm:$0xff] }
 0x6eb   : > { %v5373_v54 = vadd.f32 %v5372_v53, %v5371_v7  ;;  %v5332_v50 = vmul.f32 %v12826_v26, %v5227_v18  ;;  %v5536_v31 = vadd.f32 0.6, %v5463_v19  ;;  %v5176_v22 = vpop.xlane.xlu0 %5175  ;;  %v5793_v10 = vsub.f32 %v4667_v42, %v4617_v44 }
 0x6ec   : > { %v5331_v40 = vmul.f32 %v12833_v38, %v5226_v0  ;;  %v5203_v21 = vadd.f32 0.6, %v5176_v22  ;;  %v5888_v60 = vsel %vm4088_vm1, %v5817_v29, 0.0  ;;  %v6143_v12 = vsub.f32 %v4667_v42, %v4642_v24 }
 0x6ed   : > { %v5375_v39 = vadd.f32 %v5374_v27, %v5373_v54  ;;  %v7137_v16 = vsel %vm5590_vm7, 1.0, %v13871_v45  ;;  %5534 = vadd.xlane.f32.xlu1 %v12914_v14  ;;  %v12972_v26 = vrot.slane %v12960_v48, %v13986_v55  ;;  %v6167_v30 = vmul.f32 %v6142_v15, %v4516_v20 }
 0x6ee   : > { %v5378_v38 = vsel %vm588_vm2, %v5332_v50, 0.0  ;;  %v5376_v52 = vsel %vm588_vm2, %v5331_v40, 0.0  ;;  %v5561_v1 = vmax.f32 %v5536_v31, 0.0  ;;  %v5228_v29 = vmax.f32 %v5203_v21, 0.0  ;;  %6233 = vadd.xlane.f32.xlu0 %v6232_v37  ;;  %v5469_v11 = vpop.xlane.xlu1 %5468 }
 0x6ef   : > { %v5377_v61 = vadd.f32 %v5376_v52, %v5375_v39  ;;  %v7139_v14 = vsel %vm5592_vm14, 1.0, %v13871_v45  ;;  %v5538_v34 = vadd.f32 0.6, %v5469_v11  ;;  %v5466_v57 = vpop.xlane.xlu0 %5465  ;;  %v5818_v51 = vmul.f32 %v5793_v10, %v4492_v28 }
 0x6f0   : > { %v5333_v46 = vmul.f32 %v12875_v59, %v5228_v29  ;;  %v7138_v23 = vsel %vm5591_vm10, 1.0, %v13871_v45  ;;  %v5537_v43 = vadd.f32 0.6, %v5466_v57  ;;  %v6168_v41 = vmul.f32 %v6143_v12, %v4517_v36 }
 0x6f1   : > { %v5379_v37 = vadd.f32 %v5378_v38, %v5377_v61  ;;  %v5563_v9 = vmax.f32 %v5538_v34, 0.0  ;;  %6236 = vadd.xlane.f32.xlu1 %v6235_v63  ;;  %vm5949_vm12 = vcmp.lt.s32.totalorder %v13985_v4, %v12972_v26  ;;  %v6238_v6 = vsel %vm4088_vm1, %v6167_v30, 0.0 }
 0x6f2   : > { %v5666_v33 = vmul.f32 %v7137_v16, %v5561_v1  ;;  %v5380_v44 = vsel %vm588_vm2, %v5333_v46, 0.0  ;;  %v5562_v42 = vmax.f32 %v5537_v43, 0.0  ;;  %5889 = vadd.xlane.f32.xlu0 %v5888_v60  ;;  %v5824_v59 = vpop.xlane.xlu1 %5823  ;;  %vm5948_vm3 = vcmp.lt.s32.totalorder %v13980_v47, %v12972_v26  ;;  %v13988_v47 = vld [vmem:[#allocation13_spill] sm:$0xff] }
 0x6f3   : > { %v12991_v7 = vadd.f32 %v5380_v44, %v5379_v37  ;;  %v5668_v18 = vmul.f32 %v7139_v14, %v5563_v9  ;;  %v5895_v15 = vadd.f32 0.6, %v5824_v59  ;;  %v5821_v24 = vpop.xlane.xlu0 %5820  ;;  %v5891_v63 = vsel %vm4088_vm1, %v5818_v51, 0.0  ;;  %v13989_v9 = vld [vmem:[#allocation15_spill] sm:$0xff]  ;;  %v13990_v59 = vld [vmem:[#allocation66_spill] sm:$0xff] }
 0x6f4   : > { %v5667_v27 = vmul.f32 %v7138_v23, %v5562_v42  ;;  %v7164_v4 = vsel %vm5949_vm12, 1.0, %v13871_v45  ;;  %v5894_v53 = vadd.f32 0.6, %v5821_v24  ;;  %v7163_v19 = vsel %vm5948_vm3, 1.0, %v13871_v45 }
 0x6f5   : > { %13987 = vst [vmem:[#allocation47_spill] sm:$0xff] %v12991_v7  ;;  %v5920_v0 = vmax.f32 %v5895_v15, 0.0  ;;  %6239 = vadd.xlane.f32.xlu1 %v6238_v6  ;;  %vm5950_vm4 = vcmp.lt.s32.totalorder %v13984_v5, %v12972_v26  ;;  %vm5593_vm9 = vcmp.lt.s32.totalorder %v13988_v47, %v12928_v49  ;;  %v5691_v20 = vsel %vm588_vm2, %v5666_v33, 0.0 }
 0x6f6   : > { %v5694_v54 = vsel %vm588_vm2, %v5668_v18, 0.0  ;;  %v5692_v50 = vsel %vm588_vm2, %v5667_v27, 0.0  ;;  %v5919_v31 = vmax.f32 %v5894_v53, 0.0  ;;  %5892 = vadd.xlane.f32.xlu0 %v5891_v63  ;;  %v5827_v22 = vpop.xlane.xlu1 %5826  ;;  %v6241_v28 = vsel %vm4088_vm1, %v6168_v41, 0.0 }
 0x6f7   : > { %v5693_v10 = vadd.f32 %v5692_v50, %v5691_v20  ;;  %v6025_v40 = vmul.f32 %v7164_v4, %v5920_v0  ;;  %v5896_v21 = vadd.f32 0.6, %v5827_v22  ;;  %v5472_v60 = vpop.xlane.xlu0 %5471  ;;  %v7165_v5 = vsel %vm5950_vm4, 1.0, %v13871_v45  ;;  %v13991_v0 = vld [vmem:[#allocation16_spill] sm:$0xff] }
 0x6f8   : > { %v6024_v12 = vmul.f32 %v7163_v19, %v5919_v31  ;;  %v5539_v39 = vadd.f32 0.6, %v5472_v60  ;;  %v7140_v30 = vsel %vm5593_vm9, 1.0, %v13871_v45  ;;  %vm5951_vm1 = vcmp.lt.s32.totalorder %v13988_v47, %v12972_v26 }
 0x6f9   : > { %v6050_v16 = vsel %vm588_vm2, %v6025_v40, 0.0  ;;  %v5921_v55 = vmax.f32 %v5896_v21, 0.0  ;;  %v5695_v36 = vadd.f32 %v5694_v54, %v5693_v10  ;;  %vm5594_vm8 = vcmp.lt.s32.totalorder %v13989_v9, %v12928_v49 }
 0x6fa   : > { %v6049_v38 = vsel %vm588_vm2, %v6024_v12, 0.0  ;;  %v5564_v52 = vmax.f32 %v5539_v39, 0.0  ;;  %6242 = vadd.xlane.f32.xlu0 %v6241_v28  ;;  %v6174_v1 = vpop.xlane.xlu1 %6173  ;;  %vm5393_vm15 = vcmp.gt.s32.totalorder %v13990_v59, 0  ;;  %v7166_v15 = vsel %vm5951_vm1, 1.0, %v13871_v45 }
 0x6fb   : > { %v6051_v29 = vadd.f32 %v6050_v16, %v6049_v38  ;;  %v6026_v11 = vmul.f32 %v7165_v5, %v5921_v55  ;;  %v6245_v61 = vadd.f32 0.6, %v6174_v1  ;;  %v6171_v14 = vpop.xlane.xlu0 %6170  ;;  %v7141_v53 = vsel %vm5594_vm8, 1.0, %v13871_v45 }
 0x6fc   : > { %v5669_v34 = vmul.f32 %v7140_v30, %v5564_v52  ;;  %v6244_v57 = vadd.f32 0.6, %v6171_v14  ;;  %vm5595_vm0 = vcmp.lt.s32.totalorder %v13991_v0, %v12928_v49  ;;  %vm5952_vm6 = vcmp.lt.s32.totalorder %v13989_v9, %v12972_v26  ;;  %v13993_v14 = vld [vmem:[#allocation17_spill] sm:$0xff] }
 0x6fd   : > { %v6052_v51 = vsel %vm588_vm2, %v6026_v11, 0.0  ;;  %v6270_v46 = vmax.f32 %v6245_v61, 0.0  ;;  %v7142_v40 = vsel %vm5595_vm0, 1.0, %v13871_v45  ;;  %v7167_v12 = vsel %vm5952_vm6, 1.0, %v13871_v45 }
 0x6fe   : > { %v6053_v23 = vadd.f32 %v6052_v51, %v6051_v29  ;;  %v5696_v43 = vsel %vm588_vm2, %v5669_v34, 0.0  ;;  %v6269_v41 = vmax.f32 %v6244_v57, 0.0  ;;  %v5830_v37 = vpop.xlane.xlu1 %5829  ;;  %vm5953_vm13 = vcmp.lt.s32.totalorder %v13991_v0, %v12972_v26 }
 0x6ff   : > { %v5697_v6 = vadd.f32 %v5696_v43, %v5695_v36  ;;  %v6295_v33 = vmul.f32 %v7164_v4, %v6270_v46  ;;  %v5897_v44 = vadd.f32 0.6, %v5830_v37  ;;  %v5475_v42 = vpop.xlane.xlu0 %5474  ;;  %vm5749_vm5 = vcmp.gt.s32.totalorder %v12910_v35, 0 }
 0x700   : > { %v6294_v18 = vmul.f32 %v7163_v19, %v6269_v41  ;;  %v5540_v24 = vadd.f32 0.6, %v5475_v42  ;;  %v13027_v19 = vsel %vm5393_vm15, 1.0, %v13871_v45  ;;  %vm5596_vm11 = vcmp.lt.s32.totalorder %v13993_v14, %v12928_v49 }
 0x701   : > { %v6320_v63 = vsel %vm588_vm2, %v6295_v33, 0.0  ;;  %v5922_v27 = vmax.f32 %v5897_v44, 0.0  ;;  %13992 = vst [vmem:[#allocation51_spill] sm:$0xff] %v13027_v19  ;;  %v5402_v39 = vrot.slane %v13027_v19, 1  ;;  %v13040_v34 = vsel %vm5749_vm5, 1.0, %v13871_v45 }
 0x702   : > { %v6319_v47 = vsel %vm588_vm2, %v6294_v18, 0.0  ;;  %v5565_v20 = vmax.f32 %v5540_v24, 0.0  ;;  %v5478_v4 = vpop.xlane.xlu1 %5477  ;;  %13994 = vst [vmem:[#allocation46_spill] sm:$0xff] %v13040_v34  ;;  %vm6107_vm7 = vcmp.gt.s32.totalorder %v12960_v48, 0  ;;  %v7168_v18 = vsel %vm5953_vm13, 1.0, %v13871_v45 }
 0x703   : > { %v6321_v54 = vadd.f32 %v6320_v63, %v6319_v47  ;;  %v6027_v50 = vmul.f32 %v7166_v15, %v5922_v27  ;;  %v5541_v31 = vadd.f32 0.6, %v5478_v4  ;;  %v6177_v22 = vpop.xlane.xlu0 %6176  ;;  %v5404_v46 = vadd.f32 %v13969_v17, %v5402_v39 }
 0x704   : > { %v5670_v10 = vmul.f32 %v7141_v53, %v5565_v20  ;;  %v6246_v21 = vadd.f32 0.6, %v6177_v22  ;;  %v13052_v24 = vsel %vm6107_vm7, 1.0, %v13871_v45  ;;  %v13996_v53 = vld [vmem:[#allocation18_spill] sm:$0xff]  ;;  %vm5954_vm10 = vcmp.lt.s32.totalorder %v13993_v14, %v12972_v26  ;;  %v13997_v14 = vld [vmem:[#allocation19_spill] sm:$0xff] }
 0x705   : > { %v6054_v60 = vsel %vm588_vm2, %v6027_v50, 0.0  ;;  %v5566_v28 = vmax.f32 %v5541_v31, 0.0  ;;  %13995 = vst [vmem:[#allocation37_spill] sm:$0xff] %v13052_v24  ;;  %vm5597_vm14 = vcmp.lt.s32.totalorder %v13996_v53, %v12928_v49  ;;  %vm5955_vm12 = vcmp.lt.s32.totalorder %v13996_v53, %v12972_v26 }
 0x706   : > { %v6055_v16 = vadd.f32 %v6054_v60, %v6053_v23  ;;  %v5698_v55 = vsel %vm588_vm2, %v5670_v10, 0.0  ;;  %v6271_v30 = vmax.f32 %v6246_v21, 0.0  ;;  %v6180_v36 = vpop.xlane.xlu1 %6179  ;;  %v7144_v60 = vsel %vm5597_vm14, 1.0, %v13871_v45 }
 0x707   : > { %v5699_v38 = vadd.f32 %v5698_v55, %v5697_v6  ;;  %v5671_v52 = vmul.f32 %v7142_v40, %v5566_v28  ;;  %v6247_v1 = vadd.f32 0.6, %v6180_v36  ;;  %v5833_v29 = vpop.xlane.xlu0 %5832  ;;  %v6116_v40 = vrot.slane %v13052_v24, 3 }
 0x708   : > { %v6296_v11 = vmul.f32 %v7165_v5, %v6271_v30  ;;  %v5898_v61 = vadd.f32 0.6, %v5833_v29  ;;  %v5758_v5 = vrot.slane %v13040_v34, 2  ;;  %vm5598_vm3 = vcmp.lt.s32.totalorder %v13997_v14, %v12928_v49 }
 0x709   : > { %v5700_v57 = vsel %vm588_vm2, %v5671_v52, 0.0  ;;  %v6272_v51 = vmax.f32 %v6247_v1, 0.0  ;;  %vm6386_vm9 = vcmask 0   ;;  %vm5956_vm1 = vcmp.lt.s32.totalorder %v13997_v14, %v12972_v26  ;;  %v14000_v14 = vld [vmem:[#allocation21_spill] sm:$0xff] }
 0x70a   : > { %v5701_v23 = vadd.f32 %v5700_v57, %v5699_v38  ;;  %v6322_v43 = vsel %vm588_vm2, %v6296_v11, 0.0  ;;  %v5923_v41 = vmax.f32 %v5898_v61, 0.0  ;;  %v5836_v37 = vpop.xlane.xlu1 %5835  ;;  %vm5600_vm8 = vcmp.lt.s32.totalorder %v14000_v14, %v12928_v49 }
 0x70b   : > { %v6323_v9 = vadd.f32 %v6322_v43, %v6321_v54  ;;  %v6297_v6 = vmul.f32 %v7166_v15, %v6272_v51  ;;  %v5899_v33 = vadd.f32 0.6, %v5836_v37  ;;  %v5481_v44 = vpop.xlane.xlu0 %5480  ;;  %v7143_v15 = vsel %vm5596_vm11, 1.0, %v13871_v45 }
 0x70c   : > { %v6028_v42 = vmul.f32 %v7167_v12, %v5923_v41  ;;  %v5542_v17 = vadd.f32 0.6, %v5481_v44  ;;  %v5760_v54 = vadd.f32 %v5758_v5, %v5404_v46  ;;  %v7169_v51 = vsel %vm5954_vm10, 1.0, %v13871_v45 }
 0x70d   : > { %v6324_v63 = vsel %vm588_vm2, %v6297_v6, 0.0  ;;  %v5924_v27 = vmax.f32 %v5899_v33, 0.0  ;;  %vm5958_vm6 = vcmp.lt.s32.totalorder %v14000_v14, %v12972_v26 }
 0x70e   : > { %v6325_v47 = vadd.f32 %v6324_v63, %v6323_v9  ;;  %v6056_v20 = vsel %vm588_vm2, %v6028_v42, 0.0  ;;  %v5567_v0 = vmax.f32 %v5542_v17, 0.0  ;;  %v5484_v4 = vpop.xlane.xlu1 %5483  ;;  %v6118_v61 = vadd.f32 %v6116_v40, %v5760_v54 }
 0x70f   : > { %v6057_v50 = vadd.f32 %v6056_v20, %v6055_v16  ;;  %v6029_v31 = vmul.f32 %v7168_v18, %v5924_v27  ;;  %v5543_v22 = vadd.f32 0.6, %v5484_v4  ;;  %v6183_v10 = vpop.xlane.xlu0 %6182  ;;  %v7170_v63 = vsel %vm5955_vm12, 1.0, %v13871_v45 }
 0x710   : > { %v5672_v21 = vmul.f32 %v7143_v15, %v5567_v0  ;;  %v6248_v28 = vadd.f32 0.6, %v6183_v10  ;;  %v13075_v42 = vadd.f32 %v6118_v61, %v6116_v40  ;;  %v7145_v27 = vsel %vm5598_vm3, 1.0, %v13871_v45  ;;  %v13999_v0 = vld [vmem:[#allocation20_spill] sm:$0xff] }
 0x711   : > { %v6058_v39 = vsel %vm588_vm2, %v6029_v31, 0.0  ;;  %v5568_v55 = vmax.f32 %v5543_v22, 0.0  ;;  %vm5599_vm4 = vcmp.lt.s32.totalorder %v13999_v0, %v12928_v49  ;;  %vm5957_vm15 = vcmp.lt.s32.totalorder %v13999_v0, %v12972_v26  ;;  %v14003_v0 = vld [vmem:[#allocation24_spill] sm:$0xff] }
 0x712   : > { %v6059_v30 = vadd.f32 %v6058_v39, %v6057_v50  ;;  %v5702_v36 = vsel %vm588_vm2, %v5672_v21, 0.0  ;;  %v6273_v38 = vmax.f32 %v6248_v28, 0.0  ;;  %v6186_v16 = vpop.xlane.xlu1 %6185  ;;  %13998 = vst [vmem:[#allocation49_spill] sm:$0xff] %v13075_v42  ;;  %v8029_v4 = vtrunc.f32 %v13075_v42 }
 0x713   : > { %v5703_v52 = vadd.f32 %v5702_v36, %v5701_v23  ;;  %v5673_v1 = vmul.f32 %v7144_v60, %v5568_v55  ;;  %v6249_v29 = vadd.f32 0.6, %v6186_v16  ;;  %v5839_v11 = vpop.xlane.xlu0 %5838  ;;  %v7146_v60 = vsel %vm5599_vm4, 1.0, %v13871_v45 }
 0x714   : > { %v6298_v57 = vmul.f32 %v7167_v12, %v6273_v38  ;;  %v5900_v46 = vadd.f32 0.6, %v5839_v11  ;;  %v8030_v36 = vcvt.f32.s32 %v8029_v4  ;;  %vm5603_vm11 = vcmp.lt.s32.totalorder %v14003_v0, %v12928_v49 }
 0x715   : > { %v5704_v43 = vsel %vm588_vm2, %v5673_v1, 0.0  ;;  %v6274_v41 = vmax.f32 %v6249_v29, 0.0  ;;  %vm5961_vm14 = vcmp.lt.s32.totalorder %v14003_v0, %v12972_v26 }
 0x716   : > { %v5705_v37 = vadd.f32 %v5704_v43, %v5703_v52  ;;  %v6326_v23 = vsel %vm588_vm2, %v6298_v57, 0.0  ;;  %v5925_v5 = vmax.f32 %v5900_v46, 0.0  ;;  %v5842_v9 = vpop.xlane.xlu1 %5841  ;;  %6389 = vst.msk [vmem:[#allocation6] sm:$0x1] %vm6386_vm9, %v8030_v36  ;;  %v14002_v36 = vld [vmem:[#allocation23_spill] sm:$0xff] }
 0x717   : > { %v6327_v6 = vadd.f32 %v6326_v23, %v6325_v47  ;;  %v6299_v33 = vmul.f32 %v7168_v18, %v6274_v41  ;;  %v5901_v12 = vadd.f32 0.6, %v5842_v9  ;;  %v5487_v44 = vpop.xlane.xlu0 %5486  ;;  %v13092_v23 = vsel %vm5956_vm1, 1.0, %v13871_v45 }
 0x718   : > { %v6030_v17 = vmul.f32 %v7169_v51, %v5925_v5  ;;  %v5544_v15 = vadd.f32 0.6, %v5487_v44  ;;  %vm5602_vm5 = vcmp.lt.s32.totalorder %v14002_v36, %v12928_v49  ;;  %vm5960_vm7 = vcmp.lt.s32.totalorder %v14002_v36, %v12972_v26 }
 0x719   : > { %v6328_v53 = vsel %vm588_vm2, %v6299_v33, 0.0  ;;  %v5926_v20 = vmax.f32 %v5901_v12, 0.0 }
 0x71a   : > { %v6329_v47 = vadd.f32 %v6328_v53, %v6327_v6  ;;  %v6060_v18 = vsel %vm588_vm2, %v6030_v17, 0.0  ;;  %v5569_v54 = vmax.f32 %v5544_v15, 0.0  ;;  %v5490_v50 = vpop.xlane.xlu1 %5489  ;;  %v7147_v15 = vsel %vm5600_vm8, 1.0, %v13871_v45 }
 0x71b   : > { %v6061_v31 = vadd.f32 %v6060_v18, %v6059_v30  ;;  %v6031_v22 = vmul.f32 %v7170_v63, %v5926_v20  ;;  %v5545_v10 = vadd.f32 0.6, %v5490_v50  ;;  %v6189_v40 = vpop.xlane.xlu0 %6188  ;;  %vm5607_vm8 = vcmp.lt.s32.totalorder %v13959_v58, %v12928_v49 }
 0x71c   : > { %v5674_v21 = vmul.f32 %v7145_v27, %v5569_v54  ;;  %v6250_v28 = vadd.f32 0.6, %v6189_v40 }
 0x71d   : > { %v6062_v39 = vsel %vm588_vm2, %v6031_v22, 0.0  ;;  %v5570_v55 = vmax.f32 %v5545_v10, 0.0 }
 0x71e   : > { %v6063_v38 = vadd.f32 %v6062_v39, %v6061_v31  ;;  %v5706_v16 = vsel %vm588_vm2, %v5674_v21, 0.0  ;;  %v6275_v52 = vmax.f32 %v6250_v28, 0.0  ;;  %v6192_v1 = vpop.xlane.xlu1 %6191 }
 0x71f   : > { %v5707_v30 = vadd.f32 %v5706_v16, %v5705_v37  ;;  %v5675_v29 = vmul.f32 %v7146_v60, %v5570_v55  ;;  %v6251_v11 = vadd.f32 0.6, %v6192_v1  ;;  %v5845_v61 = vpop.xlane.xlu0 %5844  ;;  %v14001_v55 = vld [vmem:[#allocation22_spill] sm:$0xff]  ;;  %v13137_v16 = vsel %vm5957_vm15, 1.0, %v13871_v45 }
 0x720   : > { %v6300_v57 = vmul.f32 %v7169_v51, %v6275_v52  ;;  %v5902_v46 = vadd.f32 0.6, %v5845_v61  ;;  %vm5601_vm0 = vcmp.lt.s32.totalorder %v14001_v55, %v12928_v49  ;;  %vm5959_vm13 = vcmp.lt.s32.totalorder %v14001_v55, %v12972_v26  ;;  %v14004_v61 = vld [vmem:[#allocation25_spill] sm:$0xff] }
 0x721   : > { %v5708_v43 = vsel %vm588_vm2, %v5675_v29, 0.0  ;;  %v6276_v41 = vmax.f32 %v6251_v11, 0.0  ;;  %v13144_v52 = vsel %vm5601_vm0, 1.0, %v13871_v45  ;;  %v13147_v1 = vsel %vm5958_vm6, 1.0, %v13871_v45 }
 0x722   : > { %v5709_v5 = vadd.f32 %v5708_v43, %v5707_v30  ;;  %v6330_v9 = vsel %vm588_vm2, %v6300_v57, 0.0  ;;  %v5927_v6 = vmax.f32 %v5902_v46, 0.0  ;;  %v13095_v33 = vpop.xlane.xlu1 %5847  ;;  %v13150_v30 = vsel %vm5959_vm13, 1.0, %v13871_v45  ;;  %v14005_v46 = vld [vmem:[#allocation26_spill] sm:$0xff] }
 0x723   : > { %v6331_v37 = vadd.f32 %v6330_v9, %v6329_v47  ;;  %v6301_v12 = vmul.f32 %v7170_v63, %v6276_v41  ;;  %v5493_v44 = vpop.xlane.xlu0 %5492  ;;  %v13153_v29 = vsel %vm5602_vm5, 1.0, %v13871_v45  ;;  %vm5604_vm10 = vcmp.lt.s32.totalorder %v14004_v61, %v12928_v49 }
 0x724   : > { %v6032_v51 = vmul.f32 %v13092_v23, %v5927_v6  ;;  %v5546_v17 = vadd.f32 0.6, %v5493_v44  ;;  %vm5605_vm12 = vcmp.lt.s32.totalorder %v14005_v46, %v12928_v49  ;;  %vm5962_vm3 = vcmp.lt.s32.totalorder %v14004_v61, %v12972_v26 }
 0x725   : > { %v6332_v27 = vsel %vm588_vm2, %v6301_v12, 0.0  ;;  %v13168_v43 = vsel %vm5603_vm11, 1.0, %v13871_v45  ;;  %v13171_v41 = vsel %vm5960_vm7, 1.0, %v13871_v45  ;;  %vm5963_vm4 = vcmp.lt.s32.totalorder %v14005_v46, %v12972_v26 }
 0x726   : > { %v13102_v53 = vadd.f32 %v6332_v27, %v6331_v37  ;;  %v6064_v20 = vsel %vm588_vm2, %v6032_v51, 0.0  ;;  %v5571_v4 = vmax.f32 %v5546_v17, 0.0  ;;  %v13105_v18 = vpop.xlane.xlu1 %5495  ;;  %vm5965_vm0 = vcmp.lt.s32.totalorder %v13959_v58, %v12972_v26 }
 0x727   : > { %v13107_v54 = vadd.f32 %v6064_v20, %v6063_v38  ;;  %v6195_v50 = vpop.xlane.xlu0 %6194  ;;  %vm5608_vm6 = vcmp.lt.s32.totalorder %v13956_v8, %v12928_v49  ;;  %v13186_v9 = vsel %vm5961_vm14, 1.0, %v13871_v45  ;;  %v13189_v6 = vsel %vm5604_vm10, 1.0, %v13871_v45 }
 0x728   : > { %v5676_v47 = vmul.f32 %v7147_v15, %v5571_v4  ;;  %v13192_v14 = vsel %vm5605_vm12, 1.0, %v13871_v45  ;;  %v13197_v12 = vsel %vm5962_vm3, 1.0, %v13871_v45  ;;  %v13202_v58 = vsel %vm5963_vm4, 1.0, %v13871_v45 }
 0x729   : > { %vm5609_vm13 = vcmp.lt.s32.totalorder %v13963_v25, %v12928_v49  ;;  %vm5966_vm5 = vcmp.lt.s32.totalorder %v13956_v8, %v12972_v26  ;;  %v13212_v17 = vsel %vm5607_vm8, 1.0, %v13871_v45  ;;  %v13218_v15 = vsel %vm5965_vm0, 1.0, %v13871_v45 }
 0x72a   : > { %v5710_v63 = vsel %vm588_vm2, %v5676_v47, 0.0  ;;  %v13110_v31 = vpop.xlane.xlu1 %6197  ;;  %v13221_v20 = vsel %vm5608_vm6, 1.0, %v13871_v45  ;;  %vm5967_vm11 = vcmp.lt.s32.totalorder %v13963_v25, %v12972_v26  ;;  %vm5610_vm7 = vcmp.lt.s32.totalorder %v13961_v3, %v12928_v49 }
 0x72b   : > { %v13112_v22 = vadd.f32 %v5710_v63, %v5709_v5  ;;  %v5851_v10 = vpop.xlane.xlu0 %5850  ;;  %v14006_v5 = vld [vmem:[#allocation27_spill] sm:$0xff]  ;;  %vm5611_vm14 = vcmp.lt.s32.totalorder %v13965_v56, %v12928_v49  ;;  %v5309_v8 = vcvt.s32.f32 %v13990_v59  ;;  %v13233_v47 = vsel %vm5609_vm13, 1.0, %v13871_v45 }
 0x72c   : > { %vm5606_vm1 = vcmp.lt.s32.totalorder %v14006_v5, %v12928_v49  ;;  %vm5964_vm15 = vcmp.lt.s32.totalorder %v14006_v5, %v12972_v26  ;;  %v13236_v63 = vsel %vm5966_vm5, 1.0, %v13871_v45  ;;  %vm5968_vm10 = vcmp.lt.s32.totalorder %v13961_v3, %v12972_v26 }
 0x72d   : > { %v13205_v51 = vsel %vm5606_vm1, 1.0, %v13871_v45  ;;  %v13215_v27 = vsel %vm5964_vm15, 1.0, %v13871_v45  ;;  %vm5969_vm12 = vcmp.lt.s32.totalorder %v13965_v56, %v12972_v26  ;;  %v5903_v25 = vadd.f32 0.6, %v13095_v33  ;;  %v14008_v33 = vld [vmem:[#allocation35_spill] sm:$0xff] }
 0x72e   : > { %v13114_v40 = vpop.xlane.xlu1 %5853  ;;  %v5547_v55 = vadd.f32 0.6, %v13105_v18  ;;  %v6252_v36 = vadd.f32 0.6, %v6195_v50  ;;  %vm5612_vm3 = vcmp.lt.s32.totalorder %v13964_v32, %v12928_v49  ;;  %v5904_v0 = vadd.f32 0.6, %v5851_v10 }
 0x72f   : > { %v13116_v21 = vpop.xlane.xlu0 %5498  ;;  %v13249_v61 = vsel %vm5967_vm11, 1.0, %v13871_v45  ;;  %v13252_v46 = vsel %vm5610_vm7, 1.0, %v13871_v45  ;;  %v13255_v3 = vsel %vm5611_vm14, 1.0, %v13871_v45  ;;  %v13258_v56 = vsel %vm5968_vm10, 1.0, %v13871_v45 }
 0x730   : > { %14007 = vst [vmem:[#allocation56_spill] sm:$0xff] %v13258_v56  ;;  %vm5258_vm4 = vcmp.lt.s32.totalorder %v14008_v33, %v12446_v62  ;;  %v5390_v18 = vmax.f32 %v5309_v8, 1.0  ;;  %v5665_v50 = vcvt.s32.f32 %v12910_v35  ;;  %v13266_v10 = vsel %vm5969_vm12, 1.0, %v13871_v45 }
 0x731   : > { %14009 = vst [vmem:[#allocation48_spill] sm:$0xff] %v13266_v10  ;;  %v13269_v24 = vsel %vm5612_vm3, 1.0, %v13871_v45  ;;  %vm5970_vm1 = vcmp.lt.s32.totalorder %v13964_v32, %v12972_v26  ;;  %vm5613_vm8 = vcmp.lt.s32.totalorder %v13968_v13, %v12928_v49  ;;  %v5928_v34 = vmax.f32 %v5903_v25, 0.0 }
 0x732   : > { %v13118_v60 = vpop.xlane.xlu1 %5501  ;;  %v5572_v42 = vmax.f32 %v5547_v55, 0.0  ;;  %v6277_v2 = vmax.f32 %v6252_v36, 0.0  ;;  %vm5614_vm15 = vcmp.lt.s32.totalorder %v14008_v33, %v12928_v49  ;;  %v6253_v35 = vadd.f32 0.6, %v13110_v31 }
 0x733   : > { %v13120_v28 = vpop.xlane.xlu0 %6200  ;;  %v5929_v19 = vmax.f32 %v5904_v0, 0.0  ;;  %v5905_v10 = vadd.f32 0.6, %v13114_v40  ;;  %v13285_v32 = vsel %vm5258_vm4, 1.0, %v13871_v45  ;;  %v5548_v25 = vadd.f32 0.6, %v13116_v21 }
 0x734   : > { %8072 = vrcp.f32 %v5390_v18  ;;  %v13289_v55 = vsel %vm5970_vm1, 1.0, %v13871_v45  ;;  %v5746_v36 = vmax.f32 %v5665_v50, 1.0  ;;  %v6254_v7 = vadd.f32 0.6, %v13120_v28 }
 0x735   : > { %14010 = vst [vmem:[#allocation57_spill] sm:$0xff] %v13289_v55  ;;  %v13298_v31 = vsel %vm5613_vm8, 1.0, %v13871_v45  ;;  %v13301_v62 = vsel %vm5614_vm15, 1.0, %v13871_v45  ;;  %vm5971_vm0 = vcmp.lt.s32.totalorder %v13968_v13, %v12972_v26  ;;  %v6033_v40 = vmul.f32 %v13137_v16, %v5928_v34 }
 0x736   : > { %v13124_v39 = vpop.xlane.xlu1 %6203  ;;  %14011 = vst [vmem:[#allocation53_spill] sm:$0xff] %v13298_v31  ;;  %14012 = vst [vmem:[#allocation58_spill] sm:$0xff] %v13301_v62  ;;  %v5677_v21 = vmul.f32 %v13144_v52, %v5572_v42  ;;  %v6302_v28 = vmul.f32 %v13092_v23, %v6277_v2  ;;  %vm5972_vm6 = vcmp.lt.s32.totalorder %v14008_v33, %v12972_v26  ;;  %v6278_v18 = vmax.f32 %v6253_v35, 0.0 }
 0x737   : > { %v13134_v38 = vpop.xlane.xlu0 %5856  ;;  %v6034_v49 = vmul.f32 %v13147_v1, %v5929_v19  ;;  %v5930_v50 = vmax.f32 %v5905_v10, 0.0  ;;  %v5549_v55 = vadd.f32 0.6, %v13118_v60  ;;  %v5573_v62 = vmax.f32 %v5548_v25, 0.0 }
 0x738   : > { %v6255_v31 = vadd.f32 0.6, %v13124_v39  ;;  %8074 = vrcp.f32 %v5746_v36  ;;  %v13314_v13 = vsel %vm5971_vm0, 1.0, %v13871_v45  ;;  %v6279_v34 = vmax.f32 %v6254_v7, 0.0 }
 0x739   : > { %v5906_v2 = vadd.f32 0.6, %v13134_v38  ;;  %v13320_v26 = vsel %vm5972_vm6, 1.0, %v13871_v45  ;;  %v6066_v23 = vsel %vm588_vm2, %v6033_v40, 0.0  ;;  %v5712_v60 = vsel %vm588_vm2, %v5677_v21, 0.0 }
 0x73a   : > { %v13155_v11 = vpop.xlane.xlu1 %5859  ;;  %v6334_v39 = vsel %vm588_vm2, %v6302_v28, 0.0  ;;  %v6303_v7 = vmul.f32 %v13137_v16, %v6278_v18  ;;  %v6068_v38 = vsel %vm588_vm2, %v6034_v49, 0.0  ;;  %v6035_v10 = vmul.f32 %v13150_v30, %v5930_v50 }
 0x73b   : > { %v13161_v57 = vpop.xlane.xlu0 %5504  ;;  %v5574_v45 = vmax.f32 %v5549_v55, 0.0  ;;  %v5678_v35 = vmul.f32 %v13153_v29, %v5573_v62  ;;  %v6280_v25 = vmax.f32 %v6255_v31, 0.0  ;;  %v5907_v36 = vadd.f32 0.6, %v13155_v11 }
 0x73c   : > { %v5550_v52 = vadd.f32 0.6, %v13161_v57  ;;  %v6067_v21 = vadd.f32 %v6066_v23, %v13107_v54  ;;  %v6304_v57 = vmul.f32 %v13147_v1, %v6279_v34  ;;  %v5931_v28 = vmax.f32 %v5906_v2, 0.0 }
 0x73d   : > { %v5713_v18 = vadd.f32 %v5712_v60, %v13112_v22  ;;  %v6335_v55 = vadd.f32 %v6334_v39, %v13102_v53  ;;  %v6336_v11 = vsel %vm588_vm2, %v6303_v7, 0.0  ;;  %v6070_v54 = vsel %vm588_vm2, %v6035_v10, 0.0 }
 0x73e   : > { %v13194_v37 = vpop.xlane.xlu1 %5507  ;;  %v5575_v49 = vmax.f32 %v5550_v52, 0.0  ;;  %v5679_v1 = vmul.f32 %v13168_v43, %v5574_v45  ;;  %v5714_v62 = vsel %vm588_vm2, %v5678_v35, 0.0  ;;  %v5932_v50 = vmax.f32 %v5907_v36, 0.0 }
 0x73f   : > { %v13199_v44 = vpop.xlane.xlu0 %6206  ;;  %v5551_v19 = vadd.f32 0.6, %v13194_v37  ;;  %v6305_v37 = vmul.f32 %v13150_v30, %v6280_v25  ;;  %v6338_v53 = vsel %vm588_vm2, %v6304_v57, 0.0  ;;  %v6337_v39 = vadd.f32 %v6336_v11, %v6335_v55 }
 0x740   : > { %v6256_v40 = vadd.f32 0.6, %v13199_v44  ;;  %v6069_v44 = vadd.f32 %v6068_v38, %v6067_v21  ;;  %v5680_v52 = vmul.f32 %v13189_v6, %v5575_v49  ;;  %v5715_v10 = vadd.f32 %v5714_v62, %v5713_v18 }
 0x741   : > { %v13348_v22 = vpop.eup %8072  ;;  %v5576_v2 = vmax.f32 %v5551_v19, 0.0  ;;  %v5716_v45 = vsel %vm588_vm2, %v5679_v1, 0.0  ;;  %v6339_v25 = vadd.f32 %v6338_v53, %v6337_v39  ;;  %v6340_v36 = vsel %vm588_vm2, %v6305_v37, 0.0 }
 0x742   : > { %v13230_v4 = vpop.xlane.xlu1 %6209  ;;  %v6281_v34 = vmax.f32 %v6256_v40, 0.0  ;;  %v6071_v30 = vadd.f32 %v6070_v54, %v6069_v44  ;;  %v6037_v19 = vmul.f32 %v13186_v9, %v5932_v50  ;;  %v5718_v18 = vsel %vm588_vm2, %v5680_v52, 0.0 }
 0x743   : > { %v13244_v59 = vpop.xlane.xlu0 %5862  ;;  %v6257_v29 = vadd.f32 0.6, %v13230_v4  ;;  %v6036_v4 = vmul.f32 %v13171_v41, %v5931_v28  ;;  %v5681_v21 = vmul.f32 %v13192_v14, %v5576_v2  ;;  %v5717_v11 = vadd.f32 %v5716_v45, %v5715_v10 }
 0x744   : > { %v5908_v23 = vadd.f32 0.6, %v13244_v59  ;;  %v6306_v59 = vmul.f32 %v13171_v41, %v6281_v34  ;;  %v6341_v41 = vadd.f32 %v6340_v36, %v6339_v25  ;;  %v6074_v14 = vsel %vm588_vm2, %v6037_v19, 0.0 }
 0x745   : > { %v6282_v43 = vmax.f32 %v6257_v29, 0.0  ;;  %v13359_v40 = vpop.eup %8074  ;;  %v6072_v6 = vsel %vm588_vm2, %v6036_v4, 0.0  ;;  %v5719_v37 = vadd.f32 %v5718_v18, %v5717_v11  ;;  %v5720_v50 = vsel %vm588_vm2, %v5681_v21, 0.0 }
 0x746   : > { %v13263_v5 = vpop.xlane.xlu1 %5865  ;;  %v6073_v1 = vadd.f32 %v6072_v6, %v6071_v30  ;;  %v6342_v62 = vsel %vm588_vm2, %v6306_v59, 0.0 }
 0x747   : > { %v13275_v8 = vpop.xlane.xlu0 %5510  ;;  %v5909_v57 = vadd.f32 0.6, %v13263_v5  ;;  %v6343_v39 = vadd.f32 %v6342_v62, %v6341_v41 }
 0x748   : > { %v5552_v7 = vadd.f32 0.6, %v13275_v8  ;;  %v5933_v8 = vmax.f32 %v5908_v23, 0.0 }
 0x749   : > { %v5934_v34 = vmax.f32 %v5909_v57, 0.0 }
 0x74a   : > { %v13292_v56 = vpop.xlane.xlu1 %5513  ;;  %v5577_v55 = vmax.f32 %v5552_v7, 0.0  ;;  %v6075_v7 = vadd.f32 %v6074_v14, %v6073_v1 }
 0x74b   : > { %v6213_v0 = vpop.xlane.xlu0 %6212  ;;  %v5553_v49 = vadd.f32 0.6, %v13292_v56  ;;  %v6039_v19 = vmul.f32 %v13202_v58, %v5934_v34 }
 0x74c   : > { %v6258_v35 = vadd.f32 0.6, %v6213_v0  ;;  %v6307_v0 = vmul.f32 %v13186_v9, %v6282_v43  ;;  %v6038_v9 = vmul.f32 %v13197_v12, %v5933_v8  ;;  %v5682_v4 = vmul.f32 %v13205_v51, %v5577_v55 }
 0x74d   : > { %v5578_v2 = vmax.f32 %v5553_v49, 0.0  ;;  %v6078_v11 = vsel %vm588_vm2, %v6039_v19, 0.0 }
 0x74e   : > { %v13317_v42 = vpop.xlane.xlu1 %6215  ;;  %v6283_v44 = vmax.f32 %v6258_v35, 0.0  ;;  %v6344_v53 = vsel %vm588_vm2, %v6307_v0, 0.0  ;;  %v5721_v35 = vadd.f32 %v5720_v50, %v5719_v37  ;;  %v6076_v36 = vsel %vm588_vm2, %v6038_v9, 0.0 }
 0x74f   : > { %v13327_v33 = vpop.xlane.xlu0 %5868  ;;  %v6259_v54 = vadd.f32 0.6, %v13317_v42  ;;  %v6345_v25 = vadd.f32 %v6344_v53, %v6343_v39  ;;  %v5683_v59 = vmul.f32 %v13212_v17, %v5578_v2  ;;  %v6077_v49 = vadd.f32 %v6076_v36, %v6075_v7 }
 0x750   : > { %v5910_v5 = vadd.f32 0.6, %v13327_v33  ;;  %v6308_v52 = vmul.f32 %v13197_v12, %v6283_v44 }
 0x751   : > { %v6284_v43 = vmax.f32 %v6259_v54, 0.0  ;;  %v6079_v53 = vadd.f32 %v6078_v11, %v6077_v49 }
 0x752   : > { %v13338_v16 = vpop.xlane.xlu1 %5871  ;;  %v5935_v30 = vmax.f32 %v5910_v5, 0.0 }
 0x753   : > { %v5517_v31 = vpop.xlane.xlu0 %5516  ;;  %v5911_v33 = vadd.f32 0.6, %v13338_v16  ;;  %v6346_v16 = vsel %vm588_vm2, %v6308_v52, 0.0  ;;  %v6309_v8 = vmul.f32 %v13202_v58, %v6284_v43 }
 0x754   : > { %v5554_v42 = vadd.f32 0.6, %v5517_v31  ;;  %v5722_v31 = vsel %vm588_vm2, %v5682_v4, 0.0  ;;  %v6040_v57 = vmul.f32 %v13215_v27, %v5935_v30  ;;  %v6347_v62 = vadd.f32 %v6346_v16, %v6345_v25 }
 0x755   : > { %v5723_v54 = vadd.f32 %v5722_v31, %v5721_v35 }
 0x756   : > { %v5520_v60 = vpop.xlane.xlu1 %5519  ;;  %v5579_v6 = vmax.f32 %v5554_v42, 0.0  ;;  %v6080_v50 = vsel %vm588_vm2, %v6040_v57, 0.0 }
 0x757   : > { %v6219_v38 = vpop.xlane.xlu0 %6218  ;;  %v5555_v10 = vadd.f32 0.6, %v5520_v60  ;;  %v5936_v60 = vmax.f32 %v5911_v33, 0.0  ;;  %v6081_v7 = vadd.f32 %v6080_v50, %v6079_v53  ;;  %v14013_v50 = vld [vmem:[#allocation56_spill] sm:$0xff] }
 0x758   : > { %v6260_v45 = vadd.f32 0.6, %v6219_v38  ;;  %v5684_v1 = vmul.f32 %v13221_v20, %v5579_v6 }
 0x759   : > { %v5580_v18 = vmax.f32 %v5555_v10, 0.0  ;;  %v6041_v5 = vmul.f32 %v13218_v15, %v5936_v60 }
 0x75a   : > { %v6222_v28 = vpop.xlane.xlu1 %6221  ;;  %v6285_v0 = vmax.f32 %v6260_v45, 0.0  ;;  %v5726_v52 = vsel %vm588_vm2, %v5684_v1, 0.0 }
 0x75b   : > { %v5875_v29 = vpop.xlane.xlu0 %5874  ;;  %v6261_v38 = vadd.f32 0.6, %v6222_v28  ;;  %v6348_v28 = vsel %vm588_vm2, %v6309_v8, 0.0  ;;  %v5685_v9 = vmul.f32 %v13233_v47, %v5580_v18  ;;  %v6082_v30 = vsel %vm588_vm2, %v6041_v5, 0.0 }
 0x75c   : > { %v5912_v12 = vadd.f32 0.6, %v5875_v29  ;;  %v5724_v29 = vsel %vm588_vm2, %v5683_v59, 0.0  ;;  %v6310_v34 = vmul.f32 %v13215_v27, %v6285_v0  ;;  %v6349_v39 = vadd.f32 %v6348_v28, %v6347_v62 }
 0x75d   : > { %v6286_v37 = vmax.f32 %v6261_v38, 0.0  ;;  %v5728_v27 = vsel %vm588_vm2, %v5685_v9, 0.0  ;;  %v6083_v6 = vadd.f32 %v6082_v30, %v6081_v7  ;;  %v14015_v7 = vld [vmem:[#allocation53_spill] sm:$0xff] }
 0x75e   : > { %v5878_v56 = vpop.xlane.xlu1 %5877  ;;  %v5937_v14 = vmax.f32 %v5912_v12, 0.0  ;;  %v6350_v45 = vsel %vm588_vm2, %v6310_v34, 0.0 }
 0x75f   : > { %v5523_v23 = vpop.xlane.xlu0 %5522  ;;  %v5913_v41 = vadd.f32 0.6, %v5878_v56  ;;  %v6311_v47 = vmul.f32 %v13218_v15, %v6286_v37  ;;  %v6351_v60 = vadd.f32 %v6350_v45, %v6349_v39  ;;  %v14016_v45 = vld [vmem:[#allocation48_spill] sm:$0xff] }
 0x760   : > { %v5556_v55 = vadd.f32 0.6, %v5523_v23  ;;  %v5725_v23 = vadd.f32 %v5724_v29, %v5723_v54  ;;  %v6042_v43 = vmul.f32 %v13236_v63, %v5937_v14 }
 0x761   : > { %v5938_v4 = vmax.f32 %v5913_v41, 0.0  ;;  %v6352_v38 = vsel %vm588_vm2, %v6311_v47, 0.0 }
 0x762   : > { %v5526_v51 = vpop.xlane.xlu1 %5525  ;;  %v5581_v56 = vmax.f32 %v5556_v55, 0.0  ;;  %v5727_v36 = vadd.f32 %v5726_v52, %v5725_v23  ;;  %v6084_v12 = vsel %vm588_vm2, %v6042_v43, 0.0 }
 0x763   : > { %v6225_v21 = vpop.xlane.xlu0 %6224  ;;  %v5557_v44 = vadd.f32 0.6, %v5526_v51  ;;  %v6043_v19 = vmul.f32 %v13249_v61, %v5938_v4  ;;  %v6085_v49 = vadd.f32 %v6084_v12, %v6083_v6  ;;  %v14014_v4 = vld [vmem:[#allocation47_spill] sm:$0xff]  ;;  %v14017_v12 = vld [vmem:[#allocation57_spill] sm:$0xff] }
 0x764   : > { %v6262_v42 = vadd.f32 0.6, %v6225_v21  ;;  %v5686_v35 = vmul.f32 %v13252_v46, %v5581_v56  ;;  %v5729_v8 = vadd.f32 %v5728_v27, %v5727_v36 }
 0x765   : > { %v5582_v2 = vmax.f32 %v5557_v44, 0.0 }
 0x766   : > { %v6228_v17 = vpop.xlane.xlu1 %6227  ;;  %v6287_v31 = vmax.f32 %v6262_v42, 0.0  ;;  %v5730_v46 = vsel %vm588_vm2, %v5686_v35, 0.0 }
 0x767   : > { %v5881_v58 = vpop.xlane.xlu0 %5880  ;;  %v5687_v51 = vmul.f32 %v13255_v3, %v5582_v2  ;;  %v6263_v57 = vadd.f32 0.6, %v6228_v17  ;;  %v6086_v3 = vsel %vm588_vm2, %v6043_v19, 0.0  ;;  %v5731_v62 = vadd.f32 %v5730_v46, %v5729_v8 }
 0x768   : > { %v5914_v25 = vadd.f32 0.6, %v5881_v58  ;;  %v6312_v41 = vmul.f32 %v13236_v63, %v6287_v31  ;;  %v6353_v58 = vadd.f32 %v6352_v38, %v6351_v60  ;;  %v6087_v37 = vadd.f32 %v6086_v3, %v6085_v49 }
 0x769   : > { %v5732_v11 = vsel %vm588_vm2, %v5687_v51, 0.0  ;;  %v6288_v28 = vmax.f32 %v6263_v57, 0.0 }
 0x76a   : > { %v5884_v20 = vpop.xlane.xlu1 %5883  ;;  %v5939_v18 = vmax.f32 %v5914_v25, 0.0  ;;  %v5733_v53 = vadd.f32 %v5732_v11, %v5731_v62  ;;  %v6354_v63 = vsel %vm588_vm2, %v6312_v41, 0.0 }
 0x76b   : > { %v5529_v33 = vpop.xlane.xlu0 %5528  ;;  %v5915_v0 = vadd.f32 0.6, %v5884_v20  ;;  %v6313_v43 = vmul.f32 %v13249_v61, %v6288_v28 }
 0x76c   : > { %v5558_v10 = vadd.f32 0.6, %v5529_v33  ;;  %v6044_v9 = vmul.f32 %v14013_v50, %v5939_v18 }
 0x76d   : > { %v5940_v34 = vmax.f32 %v5915_v0, 0.0  ;;  %v6356_v60 = vsel %vm588_vm2, %v6313_v43, 0.0 }
 0x76e   : > { %v5179_v59 = vpop.xlane.xlu1 %5178  ;;  %v5583_v21 = vmax.f32 %v5558_v10, 0.0  ;;  %v6355_v10 = vadd.f32 %v6354_v63, %v6353_v58  ;;  %v6088_v27 = vsel %vm588_vm2, %v6044_v9, 0.0 }
 0x76f   : > { %v5204_v15 = vadd.f32 0.6, %v5179_v59  ;;  %v6231_v16 = vpop.xlane.xlu0 %6230  ;;  %v6045_v35 = vmul.f32 %v14016_v45, %v5940_v34  ;;  %v6089_v18 = vadd.f32 %v6088_v27, %v6087_v37 }
 0x770   : > { %v5688_v54 = vmul.f32 %v13269_v24, %v5583_v21  ;;  %v6264_v1 = vadd.f32 0.6, %v6231_v16  ;;  %v14018_v21 = vld [vmem:[#allocation58_spill] sm:$0xff] }
 0x771   : > { %v5229_v55 = vmax.f32 %v5204_v15, 0.0  ;;  %v6090_v0 = vsel %vm588_vm2, %v6045_v35, 0.0 }
 0x772   : > { %v5887_v44 = vpop.xlane.xlu1 %5886  ;;  %v5734_v42 = vsel %vm588_vm2, %v5688_v54, 0.0  ;;  %v6289_v20 = vmax.f32 %v6264_v1, 0.0  ;;  %v6091_v9 = vadd.f32 %v6090_v0, %v6089_v18  ;;  %v14023_v18 = vld [vmem:[#allocation46_spill] sm:$0xff] }
 0x773   : > { %v5334_v29 = vmul.f32 %v13285_v32, %v5229_v55  ;;  %v5916_v14 = vadd.f32 0.6, %v5887_v44  ;;  %v5532_v17 = vpop.xlane.xlu0 %5531  ;;  %v5735_v36 = vadd.f32 %v5734_v42, %v5733_v53 }
 0x774   : > { %v5559_v5 = vadd.f32 0.6, %v5532_v17  ;;  %v6314_v6 = vmul.f32 %v14013_v50, %v6289_v20  ;;  %v6357_v50 = vadd.f32 %v6356_v60, %v6355_v10  ;;  %v14020_v10 = vld [vmem:[#allocation51_spill] sm:$0xff] }
 0x775   : > { %v5382_v56 = vsel %vm588_vm2, %v5334_v29, 0.0  ;;  %v5941_v23 = vmax.f32 %v5916_v14, 0.0 }
 0x776   : > { %v5383_v24 = vadd.f32 %v5382_v56, %v14014_v4  ;;  %v5584_v2 = vmax.f32 %v5559_v5, 0.0  ;;  %v5535_v32 = vpop.xlane.xlu1 %5534  ;;  %v6358_v29 = vsel %vm588_vm2, %v6314_v6, 0.0  ;;  %v14019_v56 = vcvt.s32.f32 %v12960_v48  ;;  %v14021_v6 = vld [vmem:[#allocation50_spill] sm:$0xff] }
 0x777   : > { %v5560_v39 = vadd.f32 0.6, %v5535_v32  ;;  %v6234_v52 = vpop.xlane.xlu0 %6233  ;;  %v6046_v61 = vmul.f32 %v14017_v12, %v5941_v23  ;;  %v6359_v32 = vadd.f32 %v6358_v29, %v6357_v50 }
 0x778   : > { %v5384_v33 = vrot.slane %v5383_v24, 4  ;;  %v5689_v30 = vmul.f32 %v14015_v7, %v5584_v2  ;;  %v6265_v47 = vadd.f32 0.6, %v6234_v52  ;;  %v6104_v53 = vmax.f32 %v14019_v56, 1.0 }
 0x779   : > { %v5585_v25 = vmax.f32 %v5560_v39, 0.0  ;;  %v6092_v1 = vsel %vm588_vm2, %v6046_v61, 0.0 }
 0x77a   : > { %v5385_v19 = vadd.f32 %v5384_v33, %v5383_v24  ;;  %v5736_v51 = vsel %vm588_vm2, %v5689_v30, 0.0  ;;  %v6290_v31 = vmax.f32 %v6265_v47, 0.0  ;;  %v6237_v59 = vpop.xlane.xlu1 %6236  ;;  %v6093_v42 = vadd.f32 %v6092_v1, %v6091_v9 }
 0x77b   : > { %v5690_v15 = vmul.f32 %v14018_v21, %v5585_v25  ;;  %v6266_v16 = vadd.f32 0.6, %v6237_v59  ;;  %v5890_v8 = vpop.xlane.xlu0 %5889  ;;  %v5737_v57 = vadd.f32 %v5736_v51, %v5735_v36  ;;  %8076 = vrcp.f32 %v6104_v53 }
 0x77c   : > { %v5386_v38 = vrot.slane %v5385_v19, 2  ;;  %v5917_v46 = vadd.f32 0.6, %v5890_v8  ;;  %v6315_v41 = vmul.f32 %v14016_v45, %v6290_v31 }
 0x77d   : > { %v5738_v55 = vsel %vm588_vm2, %v5690_v15, 0.0  ;;  %v6291_v49 = vmax.f32 %v6266_v16, 0.0 }
 0x77e   : > { %v5387_v3 = vadd.f32 %v5386_v38, %v5385_v19  ;;  %v5739_v11 = vadd.f32 %v5738_v55, %v5737_v57  ;;  %v5942_v44 = vmax.f32 %v5917_v46, 0.0  ;;  %v6240_v54 = vpop.xlane.xlu1 %6239  ;;  %v6360_v24 = vsel %vm588_vm2, %v6315_v41, 0.0  ;;  %v14022_v38 = vld [vmem:[#allocation49_spill] sm:$0xff] }
 0x77f   : > { %v6316_v14 = vmul.f32 %v14017_v12, %v6291_v49  ;;  %v6267_v17 = vadd.f32 0.6, %v6240_v54  ;;  %v5893_v58 = vpop.xlane.xlu0 %5892  ;;  %v6361_v48 = vadd.f32 %v6360_v24, %v6359_v32  ;;  %v6382_v57 = vmax.f32 %v14022_v38, 1.0 }
 0x780   : > { %v5388_v62 = vrot.slane %v5387_v3, 1  ;;  %v5740_v28 = vrot.slane %v5739_v11, 4  ;;  %v6047_v5 = vmul.f32 %v13314_v13, %v5942_v44  ;;  %v5918_v37 = vadd.f32 0.6, %v5893_v58  ;;  %v14024_v58 = vld [vmem:[#allocation37_spill] sm:$0xff] }
 0x781   : > { %v6292_v34 = vmax.f32 %v6267_v17, 0.0  ;;  %v6362_v33 = vsel %vm588_vm2, %v6316_v14, 0.0  ;;  %8078 = vrcp.f32 %v6382_v57 }
 0x782   : > { %v5389_v63 = vadd.f32 %v5388_v62, %v5387_v3  ;;  %v5741_v4 = vadd.f32 %v5740_v28, %v5739_v11  ;;  %v6094_v2 = vsel %vm588_vm2, %v6047_v5, 0.0  ;;  %v5943_v23 = vmax.f32 %v5918_v37, 0.0 }
 0x783   : > { %v6317_v20 = vmul.f32 %v13314_v13, %v6292_v34  ;;  %v6243_v39 = vpop.xlane.xlu0 %6242  ;;  %v6095_v30 = vadd.f32 %v6094_v2, %v6093_v42  ;;  %v6363_v13 = vadd.f32 %v6362_v33, %v6361_v48 }
 0x784   : > { %v5392_v52 = vmul.f32 %v13348_v22, %v5389_v63  ;;  %v5742_v43 = vrot.slane %v5741_v4, 2  ;;  %v6268_v7 = vadd.f32 0.6, %v6243_v39  ;;  %v6048_v47 = vmul.f32 %v13320_v26, %v5943_v23 }
 0x785   : > { %v6364_v35 = vsel %vm588_vm2, %v6317_v20, 0.0 }
 0x786   : > { %v5396_v27 = vmul.f32 %v14020_v10, %v5392_v52  ;;  %v5743_v45 = vadd.f32 %v5742_v43, %v5741_v4  ;;  %v6293_v25 = vmax.f32 %v6268_v7, 0.0  ;;  %v6096_v36 = vsel %vm588_vm2, %v6048_v47, 0.0 }
 0x787   : > { %v6097_v51 = vadd.f32 %v6096_v36, %v6095_v30  ;;  %v6365_v59 = vadd.f32 %v6364_v35, %v6363_v13 }
 0x788   : > { %v5398_v19 = vrot.slane %v5396_v27, 1  ;;  %v5744_v22 = vrot.slane %v5743_v45, 1  ;;  %v6318_v31 = vmul.f32 %v13320_v26, %v6293_v25  ;;  %v8077_v41 = vpop.eup %8076 }
 0x789   : > { %v6098_v21 = vrot.slane %v6097_v51, 4 }
 0x78a   : > { %v5400_v12 = vadd.f32 %v5398_v19, %v14021_v6  ;;  %v5745_v61 = vadd.f32 %v5744_v22, %v5743_v45  ;;  %v6366_v15 = vsel %vm588_vm2, %v6318_v31, 0.0  ;;  %vm6381_vm2 = vcmp.gt.f32.partialorder %v14022_v38, 0.0 }
 0x78b   : > { %v6367_v16 = vadd.f32 %v6366_v15, %v6365_v59  ;;  %v6099_v60 = vadd.f32 %v6098_v21, %v6097_v51 }
 0x78c   : > { %v5748_v8 = vmul.f32 %v13359_v40, %v5745_v61 }
 0x78d   : > { %v6368_v46 = vrot.slane %v6367_v16, 4  ;;  %v6100_v55 = vrot.slane %v6099_v60, 2 }
 0x78e   : > { %v5752_v0 = vmul.f32 %v14023_v18, %v5748_v8  ;;  %v8079_v34 = vpop.eup %8078 }
 0x78f   : > { %v6369_v49 = vadd.f32 %v6368_v46, %v6367_v16  ;;  %v6101_v26 = vadd.f32 %v6100_v55, %v6099_v60 }
 0x790   : > { %v5754_v3 = vrot.slane %v5752_v0, 2 }
 0x791   : > { %v6370_v11 = vrot.slane %v6369_v49, 2  ;;  %v6102_v54 = vrot.slane %v6101_v26, 1 }
 0x792   : > { %v5756_v44 = vadd.f32 %v5754_v3, %v5400_v12 }
 0x793   : > { %v6371_v29 = vadd.f32 %v6370_v11, %v6369_v49  ;;  %v6103_v1 = vadd.f32 %v6102_v54, %v6101_v26 }
 0x795   : > { %v6372_v14 = vrot.slane %v6371_v29, 1  ;;  %v6106_v17 = vmul.f32 %v8077_v41, %v6103_v1 }
 0x797   : > { %v6373_v40 = vadd.f32 %v6372_v14, %v6371_v29  ;;  %v6110_v62 = vmul.f32 %v14024_v58, %v6106_v17 }
 0x799   : > { %v6374_v28 = vmul.f32 %v8077_v41, %v6373_v40  ;;  %v6112_v5 = vrot.slane %v6110_v62, 3 }
 0x79b   : > { %v6375_v37 = vmul.f32 %v14024_v58, %v6374_v28  ;;  %v6114_v50 = vadd.f32 %v6112_v5, %v5756_v44 }
 0x79d   : > { %v6377_v9 = vrot.slane %v6375_v37, 3 }
 0x79f   : > { %v6379_v56 = vadd.f32 %v6377_v9, %v6114_v50 }
 0x7a1   : > { %v6384_v53 = vmul.f32 %v8079_v34, %v6379_v56 }
 0x7a3   : > { %v6385_v63 = vsel %vm6381_vm2, %v6384_v53, 0.0 }
 0x7a4   : > { %6387 = vst.msk [vmem:[#allocation4] sm:$0x1] %vm6386_vm9, %v6385_v63 }
 0x7a5 PF: > { %p8039_p7 = scmp.eq.s32.totalorder %s8196_s13, 3  ;;  %s8168_s5 = smov [#allocation4]  }
 0x7a6   : > { %s6397_s6 = sshll.u32 %s8168_s5, 4  ;;  %s8169_s7 = smov [#allocation6]   ;;  %s6398_s6 = int_to_ptr.vmem [resolvable:$true] %s6397_s6 }
 0x7a7   : > { %s6408_s8 = sshll.u32 %s8169_s7, 4  ;;  %s8090_s9 = scalar_lea.vmem %s6398_s6, 16  ;;  %s6409_s8 = int_to_ptr.vmem [resolvable:$true] %s6408_s8 }
 0x7a8   : > { %p8091_p8 = scmp.ne.s32.totalorder %s6398_s6, %s8090_s9  ;;  %s8096_s10 = scalar_lea.vmem %s6398_s6, 32 }
 0x7a9   : > { %p8097_p11 = scmp.lt.s32.totalorder %s6398_s6, %s6398_s6  ;;  %p8098_p12 = scmp.lt.s32.totalorder %s8096_s10, %s8090_s9 }
 0x7aa   : > { %p8092_p9 = pnand %p8091_p8, %p8039_p7 }
 0x7ab   : > { %p8099_p13 = por %p8098_p12, %p8097_p11 }
 0x7ac   : > { %p8093_p10 = pneg %p8092_p9 }
 0x7ae   : > { %p8100_p0 = pnand %p8099_p13, %p8093_p10 }
 0x7b0   : > { %8103 = shalt.err (!%p8100_p0)
}
 0x7b1   : > { %8032 = dma.vmem_to_hbm [thread:$0]  (%p8039_p7), %s6398_s6, 16, %s13479_s2, [#allocation5]  }
 0x7b2   : > { %s8114_s15 = scalar_lea.vmem %s6409_s8, 16  ;;  %s8120_s16 = scalar_lea.vmem %s6409_s8, 32 }
 0x7b3   : > { %p8115_p1 = scmp.ne.s32.totalorder %s6409_s8, %s8114_s15  ;;  %p8121_p4 = scmp.lt.s32.totalorder %s6409_s8, %s6409_s8 }
 0x7b4   : > { %p8122_p5 = scmp.lt.s32.totalorder %s8120_s16, %s8114_s15 }
 0x7b5   : > { %p8116_p2 = pnand %p8115_p1, %p8039_p7 }
 0x7b6   : > { %p8123_p6 = por %p8122_p5, %p8121_p4 }
 0x7b7   : > { %p8117_p3 = pneg %p8116_p2 }
 0x7b9   : > { %p8124_p8 = pnand %p8123_p6, %p8117_p3 }
 0x7bb   : > { %8127 = shalt.err (!%p8124_p8)
}
 0x7bc   : > { %8034 = dma.vmem_to_hbm [thread:$0]  (%p8039_p7), %s6409_s8, 16, %s13480_s3, [#allocation7]  }
 0x7bd   : > { %8143 = dma.done.wait (%p8039_p7), [#allocation5], 16  }
 0x7be   : > { %8145 = vsyncadd (%p8039_p7), [#allocation5], 4294967280 }
 0x7bf   : > { %8147 = dma.done.wait (%p8039_p7), [#allocation7], 16  }
 0x7c0   : > { %8149 = vsyncadd (%p8039_p7), [#allocation7], 4294967280 }
 0x7c1 PF: > { %s16_s12 = sadd.s32 1, %s8152_s12  }
 0x7c2   : > { %p13_p9 = scmp.ge.s32.totalorder %s16_s12, 6  }
 0x7c4   :  { %15 = sbr.rel (!%p13_p9) target bundleno = 2 (0x2), region = 74 }
 0x7c9   :  { %6425 = vsyncpa [#allocation5], 1 }
 0x7ca   :  { %6427 = vsyncpa [#allocation5 + $0x1], 1 }
 0x7cb   :  { %6428 = vsyncpa [#allocation7], 1 }

</bundles_post_ra>
